<compile_context>
chip_gen: v6e
topology: v6e:2x2x1
jax: 0.10.0
libtpu: 0.0.40
codegen_flags: <defaults>
</compile_context>

<pallas_src>
import math
import jax
import jax.numpy as jnp
from jax import lax
from jax.experimental import pallas as pl
from jax.experimental.pallas import tpu as pltpu

D_IN = 768
D_HID = 3072
HID_CHUNK = 512                     # 6 chunks of the 3072-wide hidden dim
_INV_SQRT2 = 1.0 / math.sqrt(2.0)


def _gelu_exact(x):
    # torch.nn.GELU() default: 0.5 * x * (1 + erf(x / sqrt(2)))
    return 0.5 * x * (1.0 + lax.erf(x * _INV_SQRT2))


def mlp_kernel(x_ref, w1_ref, b1_ref, w2_ref, b2_ref, o_ref):
    # x_ref : (tm, 768)   f32    w1_ref: (768, 3072) bf16   b1_ref: (1, 3072) f32
    # w2_ref: (3072, 768) bf16   b2_ref: (1, 768)    f32    o_ref : (tm, 768) f32
    tm = x_ref.shape[0]
    x = x_ref[...].astype(jnp.bfloat16)

    acc = jnp.zeros((tm, D_IN), jnp.float32)
    # Chunk the hidden dim so the MXU work of chunk i overlaps the erf/VALU
    # GELU of chunk i-1; f32 accumulation throughout.
    for c in range(D_HID // HID_CHUNK):
        c0 = c * HID_CHUNK
        h = jnp.dot(x, w1_ref[:, c0:c0 + HID_CHUNK],
                    preferred_element_type=jnp.float32)
        h = _gelu_exact(h + b1_ref[:, c0:c0 + HID_CHUNK])
        acc = acc + jnp.dot(h.astype(jnp.bfloat16),
                            w2_ref[c0:c0 + HID_CHUNK, :],
                            preferred_element_type=jnp.float32)

    y = _gelu_exact(acc + b2_ref[...])
    # TODO(synk): Dropout(0.2) is identity here (eval-mode semantics); training
    # mode would draw a keep-mask via pltpu.prng_seed / pltpu.prng_random_bits.
    o_ref[...] = y.astype(o_ref.dtype)


def _cdiv(a, b):
    return (a + b - 1) // b


def _round_up(n, m):
    return ((n + m - 1) // m) * m


def gpt_neo_mlp(x, w1, b1, w2, b2, *, tm=512):
    """x: [..., 768] -> [..., 768].

    w1: [768, 3072], w2: [3072, 768] (ideally pre-cast to bf16 once at load
    time; f32 is accepted as a fallback), b1: [1, 3072], b2: [1, 768] f32.
    Matmuls run on the MXU in bf16 with f32 accumulation.
    """
    assert x.shape[-1] == D_IN
    orig_shape = x.shape
    xm = x.reshape(-1, D_IN)
    M = xm.shape[0]

    # Weights should already be bf16 (one-time cast hoisted out of this call);
    # only cast here as a fallback so arbitrary-dtype params still work.
    if w1.dtype != jnp.bfloat16:
        w1 = w1.astype(jnp.bfloat16)
    if w2.dtype != jnp.bfloat16:
        w2 = w2.astype(jnp.bfloat16)
    b1 = b1.astype(jnp.float32).reshape(1, D_HID)
    b2 = b2.astype(jnp.float32).reshape(1, D_IN)

    # Row tile: multiple of 8 (sublane granularity), no larger than needed.
    # When the whole problem would fit in a single grid step, split it in two
    # so the "parallel" axis can shard across both v7x TensorCores.
    tm_eff = min(tm, _round_up(M, 8))
    if M > 8 and _cdiv(M, tm_eff) < 2:
        tm_eff = _round_up(_cdiv(M, 2), 8)
    grid_m = _cdiv(M, tm_eff)   # partial final block handled by Pallas (no pad copy)

    out = pl.pallas_call(
        mlp_kernel,
        out_shape=jax.ShapeDtypeStruct((M, D_IN), x.dtype),
        grid_spec=pltpu.PrefetchScalarGridSpec(
            num_scalar_prefetch=0,
            grid=(grid_m,),
            in_specs=[
                pl.BlockSpec((tm_eff, D_IN), lambda i: (i, 0)),   # streamed x rows
                pl.BlockSpec((D_IN, D_HID), lambda i: (0, 0)),    # resident W1 (bf16)
                pl.BlockSpec((1, D_HID), lambda i: (0, 0)),       # resident b1
                pl.BlockSpec((D_HID, D_IN), lambda i: (0, 0)),    # resident W2 (bf16)
                pl.BlockSpec((1, D_IN), lambda i: (0, 0)),        # resident b2
            ],
            out_specs=pl.BlockSpec((tm_eff, D_IN), lambda i: (i, 0)),
        ),
        compiler_params=pltpu.CompilerParams(
            dimension_semantics=("parallel",),
            vmem_limit_bytes=48 << 20,   # fits v7x's 64 MiB per-TC VMEM
        ),
    )(xm, w1, b1, w2, b2)

    return out.reshape(orig_shape)


def _init_params(key):
    # Deterministic init mimicking nn.Linear's default (uniform +-1/sqrt(fan_in)).
    k1, k2, k3, k4 = jax.random.split(key, 4)
    bound1 = 1.0 / math.sqrt(D_IN)
    bound2 = 1.0 / math.sqrt(D_HID)
    w1 = jax.random.uniform(k1, (D_IN, D_HID), jnp.float32, -bound1, bound1)
    b1 = jax.random.uniform(k2, (1, D_HID), jnp.float32, -bound1, bound1)
    w2 = jax.random.uniform(k3, (D_HID, D_IN), jnp.float32, -bound2, bound2)
    b2 = jax.random.uniform(k4, (1, D_IN), jnp.float32, -bound2, bound2)
    return w1, b1, w2, b2


if __name__ == "__main__":
    key = jax.random.PRNGKey(0)
    kx, kx2, kp = jax.random.split(key, 3)
    w1_f32, b1, w2_f32, b2 = _init_params(kp)

    # One-time ("load time") weight cast; the kernel wrapper does not re-cast.
    w1 = jax.block_until_ready(w1_f32.astype(jnp.bfloat16))
    w2 = jax.block_until_ready(w2_f32.astype(jnp.bfloat16))

    def reference(x):
        # Plain-JAX reference using the same bf16-matmul / f32-accumulate recipe.
        xb = x.reshape(-1, D_IN)
        h = jnp.dot(xb.astype(jnp.bfloat16), w1,
                    preferred_element_type=jnp.float32) + b1
        h = _gelu_exact(h)
        y = jnp.dot(h.astype(jnp.bfloat16), w2,
                    preferred_element_type=jnp.float32) + b2
        y = _gelu_exact(y)
        return y.reshape(x.shape)

    # Small shape consistent with the module: [batch, seq, 768].
    # M=16 -> exercises the ">=2 grid steps" split (two 8-row tiles).
    x = jax.random.normal(kx, (2, 8, D_IN), jnp.float32)
    out = jax.block_until_ready(gpt_neo_mlp(x, w1, b1, w2, b2))
    assert out.shape == x.shape
    assert jnp.allclose(out, reference(x), atol=1e-2, rtol=1e-2)

    # Second shape: multi-step grid with a partial final row block (M=400, tm=128).
    x2 = jax.random.normal(kx2, (4, 100, D_IN), jnp.float32)
    out2 = jax.block_until_ready(gpt_neo_mlp(x2, w1, b1, w2, b2, tm=128))
    assert out2.shape == x2.shape
    assert jnp.allclose(out2, reference(x2), atol=1e-2, rtol=1e-2)

    print("KERNEL_OK")
</pallas_src>

<mosaic_0001>
module attributes {stable_mosaic.version = 11 : i64} {
  func.func @mlp_kernel(%arg0: i32, %arg1: memref<8x768xf32, #tpu.memory_space<vmem>>, %arg2: memref<768x3072xbf16, #tpu.memory_space<vmem>>, %arg3: memref<1x3072xf32, #tpu.memory_space<vmem>>, %arg4: memref<3072x768xbf16, #tpu.memory_space<vmem>>, %arg5: memref<1x768xf32, #tpu.memory_space<vmem>>, %arg6: memref<8x768xf32, #tpu.memory_space<vmem>>) attributes {dimension_semantics = [#tpu.dimension_semantics<parallel>], iteration_bounds = array<i64: 2>, scalar_prefetch = 0 : i64, scratch_operands = 0 : i64, tpu.core_type = #tpu.core_type<tc>, window_params = [{transform_indices = @transform_0, window_bounds = array<i64: 8, 768>}, {pipeline_mode = #tpu.pipeline_mode<synchronous>, transform_indices = @transform_1, window_bounds = array<i64: 768, 3072>}, {pipeline_mode = #tpu.pipeline_mode<synchronous>, transform_indices = @transform_2, window_bounds = array<i64: 1, 3072>}, {pipeline_mode = #tpu.pipeline_mode<synchronous>, transform_indices = @transform_3, window_bounds = array<i64: 3072, 768>}, {pipeline_mode = #tpu.pipeline_mode<synchronous>, transform_indices = @transform_4, window_bounds = array<i64: 1, 768>}, {transform_indices = @transform_5, window_bounds = array<i64: 8, 768>}]} {
    %c0 = arith.constant 0 : index
    %c0_0 = arith.constant 0 : index
    %0 = vector.load %arg1[%c0, %c0_0] : memref<8x768xf32, #tpu.memory_space<vmem>>, vector<8x768xf32>
    %1 = arith.truncf %0 : vector<8x768xf32> to vector<8x768xbf16>
    %cst = arith.constant 0.000000e+00 : f32
    %2 = vector.broadcast %cst : f32 to vector<8x768xf32>
    %c0_1 = arith.constant 0 : index
    %c0_2 = arith.constant 0 : index
    %3 = vector.load %arg2[%c0_1, %c0_2] : memref<768x3072xbf16, #tpu.memory_space<vmem>>, vector<768x512xbf16>
    %cst_3 = arith.constant dense<0.000000e+00> : vector<8x512xf32>
    %4 = tpu.matmul %1, %3, %cst_3 {dimension_numbers = #tpu.dot_dimension_numbers<[1], [0], [0], [1], [0, 0, 1, 1], [], []>} : vector<8x768xbf16>, vector<768x512xbf16>, vector<8x512xf32> -> vector<8x512xf32>
    %c0_4 = arith.constant 0 : index
    %c0_5 = arith.constant 0 : index
    %5 = vector.load %arg3[%c0_4, %c0_5] : memref<1x3072xf32, #tpu.memory_space<vmem>>, vector<1x512xf32>
    %6 = vector.broadcast %5 : vector<1x512xf32> to vector<8x512xf32>
    %7 = arith.addf %4, %6 : vector<8x512xf32>
    %cst_6 = arith.constant 5.000000e-01 : f32
    %8 = vector.broadcast %cst_6 : f32 to vector<8x512xf32>
    %9 = arith.mulf %8, %7 : vector<8x512xf32>
    %cst_7 = arith.constant 0.707106769 : f32
    %10 = vector.broadcast %cst_7 : f32 to vector<8x512xf32>
    %11 = arith.mulf %7, %10 : vector<8x512xf32>
    %12 = math.erf %11 : vector<8x512xf32>
    %cst_8 = arith.constant 1.000000e+00 : f32
    %13 = vector.broadcast %cst_8 : f32 to vector<8x512xf32>
    %14 = arith.addf %13, %12 : vector<8x512xf32>
    %15 = arith.mulf %9, %14 : vector<8x512xf32>
    %16 = arith.truncf %15 : vector<8x512xf32> to vector<8x512xbf16>
    %c0_9 = arith.constant 0 : index
    %c0_10 = arith.constant 0 : index
    %17 = vector.load %arg4[%c0_9, %c0_10] : memref<3072x768xbf16, #tpu.memory_space<vmem>>, vector<512x768xbf16>
    %cst_11 = arith.constant dense<0.000000e+00> : vector<8x768xf32>
    %18 = tpu.matmul %16, %17, %cst_11 {dimension_numbers = #tpu.dot_dimension_numbers<[1], [0], [0], [1], [0, 0, 1, 1], [], []>} : vector<8x512xbf16>, vector<512x768xbf16>, vector<8x768xf32> -> vector<8x768xf32>
    %19 = arith.addf %2, %18 : vector<8x768xf32>
    %c0_12 = arith.constant 0 : index
    %c512 = arith.constant 512 : index
    %20 = vector.load %arg2[%c0_12, %c512] : memref<768x3072xbf16, #tpu.memory_space<vmem>>, vector<768x512xbf16>
    %cst_13 = arith.constant dense<0.000000e+00> : vector<8x512xf32>
    %21 = tpu.matmul %1, %20, %cst_13 {dimension_numbers = #tpu.dot_dimension_numbers<[1], [0], [0], [1], [0, 0, 1, 1], [], []>} : vector<8x768xbf16>, vector<768x512xbf16>, vector<8x512xf32> -> vector<8x512xf32>
    %c0_14 = arith.constant 0 : index
    %c512_15 = arith.constant 512 : index
    %22 = vector.load %arg3[%c0_14, %c512_15] : memref<1x3072xf32, #tpu.memory_space<vmem>>, vector<1x512xf32>
    %23 = vector.broadcast %22 : vector<1x512xf32> to vector<8x512xf32>
    %24 = arith.addf %21, %23 : vector<8x512xf32>
    %cst_16 = arith.constant 5.000000e-01 : f32
    %25 = vector.broadcast %cst_16 : f32 to vector<8x512xf32>
    %26 = arith.mulf %25, %24 : vector<8x512xf32>
    %cst_17 = arith.constant 0.707106769 : f32
    %27 = vector.broadcast %cst_17 : f32 to vector<8x512xf32>
    %28 = arith.mulf %24, %27 : vector<8x512xf32>
    %29 = math.erf %28 : vector<8x512xf32>
    %cst_18 = arith.constant 1.000000e+00 : f32
    %30 = vector.broadcast %cst_18 : f32 to vector<8x512xf32>
    %31 = arith.addf %30, %29 : vector<8x512xf32>
    %32 = arith.mulf %26, %31 : vector<8x512xf32>
    %33 = arith.truncf %32 : vector<8x512xf32> to vector<8x512xbf16>
    %c512_19 = arith.constant 512 : index
    %c0_20 = arith.constant 0 : index
    %34 = vector.load %arg4[%c512_19, %c0_20] : memref<3072x768xbf16, #tpu.memory_space<vmem>>, vector<512x768xbf16>
    %cst_21 = arith.constant dense<0.000000e+00> : vector<8x768xf32>
    %35 = tpu.matmul %33, %34, %cst_21 {dimension_numbers = #tpu.dot_dimension_numbers<[1], [0], [0], [1], [0, 0, 1, 1], [], []>} : vector<8x512xbf16>, vector<512x768xbf16>, vector<8x768xf32> -> vector<8x768xf32>
    %36 = arith.addf %19, %35 : vector<8x768xf32>
    %c0_22 = arith.constant 0 : index
    %c1024 = arith.constant 1024 : index
    %37 = vector.load %arg2[%c0_22, %c1024] : memref<768x3072xbf16, #tpu.memory_space<vmem>>, vector<768x512xbf16>
    %cst_23 = arith.constant dense<0.000000e+00> : vector<8x512xf32>
    %38 = tpu.matmul %1, %37, %cst_23 {dimension_numbers = #tpu.dot_dimension_numbers<[1], [0], [0], [1], [0, 0, 1, 1], [], []>} : vector<8x768xbf16>, vector<768x512xbf16>, vector<8x512xf32> -> vector<8x512xf32>
    %c0_24 = arith.constant 0 : index
    %c1024_25 = arith.constant 1024 : index
    %39 = vector.load %arg3[%c0_24, %c1024_25] : memref<1x3072xf32, #tpu.memory_space<vmem>>, vector<1x512xf32>
    %40 = vector.broadcast %39 : vector<1x512xf32> to vector<8x512xf32>
    %41 = arith.addf %38, %40 : vector<8x512xf32>
    %cst_26 = arith.constant 5.000000e-01 : f32
    %42 = vector.broadcast %cst_26 : f32 to vector<8x512xf32>
    %43 = arith.mulf %42, %41 : vector<8x512xf32>
    %cst_27 = arith.constant 0.707106769 : f32
    %44 = vector.broadcast %cst_27 : f32 to vector<8x512xf32>
    %45 = arith.mulf %41, %44 : vector<8x512xf32>
    %46 = math.erf %45 : vector<8x512xf32>
    %cst_28 = arith.constant 1.000000e+00 : f32
    %47 = vector.broadcast %cst_28 : f32 to vector<8x512xf32>
    %48 = arith.addf %47, %46 : vector<8x512xf32>
    %49 = arith.mulf %43, %48 : vector<8x512xf32>
    %50 = arith.truncf %49 : vector<8x512xf32> to vector<8x512xbf16>
    %c1024_29 = arith.constant 1024 : index
    %c0_30 = arith.constant 0 : index
    %51 = vector.load %arg4[%c1024_29, %c0_30] : memref<3072x768xbf16, #tpu.memory_space<vmem>>, vector<512x768xbf16>
    %cst_31 = arith.constant dense<0.000000e+00> : vector<8x768xf32>
    %52 = tpu.matmul %50, %51, %cst_31 {dimension_numbers = #tpu.dot_dimension_numbers<[1], [0], [0], [1], [0, 0, 1, 1], [], []>} : vector<8x512xbf16>, vector<512x768xbf16>, vector<8x768xf32> -> vector<8x768xf32>
    %53 = arith.addf %36, %52 : vector<8x768xf32>
    %c0_32 = arith.constant 0 : index
    %c1536 = arith.constant 1536 : index
    %54 = vector.load %arg2[%c0_32, %c1536] : memref<768x3072xbf16, #tpu.memory_space<vmem>>, vector<768x512xbf16>
    %cst_33 = arith.constant dense<0.000000e+00> : vector<8x512xf32>
    %55 = tpu.matmul %1, %54, %cst_33 {dimension_numbers = #tpu.dot_dimension_numbers<[1], [0], [0], [1], [0, 0, 1, 1], [], []>} : vector<8x768xbf16>, vector<768x512xbf16>, vector<8x512xf32> -> vector<8x512xf32>
    %c0_34 = arith.constant 0 : index
    %c1536_35 = arith.constant 1536 : index
    %56 = vector.load %arg3[%c0_34, %c1536_35] : memref<1x3072xf32, #tpu.memory_space<vmem>>, vector<1x512xf32>
    %57 = vector.broadcast %56 : vector<1x512xf32> to vector<8x512xf32>
    %58 = arith.addf %55, %57 : vector<8x512xf32>
    %cst_36 = arith.constant 5.000000e-01 : f32
    %59 = vector.broadcast %cst_36 : f32 to vector<8x512xf32>
    %60 = arith.mulf %59, %58 : vector<8x512xf32>
    %cst_37 = arith.constant 0.707106769 : f32
    %61 = vector.broadcast %cst_37 : f32 to vector<8x512xf32>
    %62 = arith.mulf %58, %61 : vector<8x512xf32>
    %63 = math.erf %62 : vector<8x512xf32>
    %cst_38 = arith.constant 1.000000e+00 : f32
    %64 = vector.broadcast %cst_38 : f32 to vector<8x512xf32>
    %65 = arith.addf %64, %63 : vector<8x512xf32>
    %66 = arith.mulf %60, %65 : vector<8x512xf32>
    %67 = arith.truncf %66 : vector<8x512xf32> to vector<8x512xbf16>
    %c1536_39 = arith.constant 1536 : index
    %c0_40 = arith.constant 0 : index
    %68 = vector.load %arg4[%c1536_39, %c0_40] : memref<3072x768xbf16, #tpu.memory_space<vmem>>, vector<512x768xbf16>
    %cst_41 = arith.constant dense<0.000000e+00> : vector<8x768xf32>
    %69 = tpu.matmul %67, %68, %cst_41 {dimension_numbers = #tpu.dot_dimension_numbers<[1], [0], [0], [1], [0, 0, 1, 1], [], []>} : vector<8x512xbf16>, vector<512x768xbf16>, vector<8x768xf32> -> vector<8x768xf32>
    %70 = arith.addf %53, %69 : vector<8x768xf32>
    %c0_42 = arith.constant 0 : index
    %c2048 = arith.constant 2048 : index
    %71 = vector.load %arg2[%c0_42, %c2048] : memref<768x3072xbf16, #tpu.memory_space<vmem>>, vector<768x512xbf16>
    %cst_43 = arith.constant dense<0.000000e+00> : vector<8x512xf32>
    %72 = tpu.matmul %1, %71, %cst_43 {dimension_numbers = #tpu.dot_dimension_numbers<[1], [0], [0], [1], [0, 0, 1, 1], [], []>} : vector<8x768xbf16>, vector<768x512xbf16>, vector<8x512xf32> -> vector<8x512xf32>
    %c0_44 = arith.constant 0 : index
    %c2048_45 = arith.constant 2048 : index
    %73 = vector.load %arg3[%c0_44, %c2048_45] : memref<1x3072xf32, #tpu.memory_space<vmem>>, vector<1x512xf32>
    %74 = vector.broadcast %73 : vector<1x512xf32> to vector<8x512xf32>
    %75 = arith.addf %72, %74 : vector<8x512xf32>
    %cst_46 = arith.constant 5.000000e-01 : f32
    %76 = vector.broadcast %cst_46 : f32 to vector<8x512xf32>
    %77 = arith.mulf %76, %75 : vector<8x512xf32>
    %cst_47 = arith.constant 0.707106769 : f32
    %78 = vector.broadcast %cst_47 : f32 to vector<8x512xf32>
    %79 = arith.mulf %75, %78 : vector<8x512xf32>
    %80 = math.erf %79 : vector<8x512xf32>
    %cst_48 = arith.constant 1.000000e+00 : f32
    %81 = vector.broadcast %cst_48 : f32 to vector<8x512xf32>
    %82 = arith.addf %81, %80 : vector<8x512xf32>
    %83 = arith.mulf %77, %82 : vector<8x512xf32>
    %84 = arith.truncf %83 : vector<8x512xf32> to vector<8x512xbf16>
    %c2048_49 = arith.constant 2048 : index
    %c0_50 = arith.constant 0 : index
    %85 = vector.load %arg4[%c2048_49, %c0_50] : memref<3072x768xbf16, #tpu.memory_space<vmem>>, vector<512x768xbf16>
    %cst_51 = arith.constant dense<0.000000e+00> : vector<8x768xf32>
    %86 = tpu.matmul %84, %85, %cst_51 {dimension_numbers = #tpu.dot_dimension_numbers<[1], [0], [0], [1], [0, 0, 1, 1], [], []>} : vector<8x512xbf16>, vector<512x768xbf16>, vector<8x768xf32> -> vector<8x768xf32>
    %87 = arith.addf %70, %86 : vector<8x768xf32>
    %c0_52 = arith.constant 0 : index
    %c2560 = arith.constant 2560 : index
    %88 = vector.load %arg2[%c0_52, %c2560] : memref<768x3072xbf16, #tpu.memory_space<vmem>>, vector<768x512xbf16>
    %cst_53 = arith.constant dense<0.000000e+00> : vector<8x512xf32>
    %89 = tpu.matmul %1, %88, %cst_53 {dimension_numbers = #tpu.dot_dimension_numbers<[1], [0], [0], [1], [0, 0, 1, 1], [], []>} : vector<8x768xbf16>, vector<768x512xbf16>, vector<8x512xf32> -> vector<8x512xf32>
    %c0_54 = arith.constant 0 : index
    %c2560_55 = arith.constant 2560 : index
    %90 = vector.load %arg3[%c0_54, %c2560_55] : memref<1x3072xf32, #tpu.memory_space<vmem>>, vector<1x512xf32>
    %91 = vector.broadcast %90 : vector<1x512xf32> to vector<8x512xf32>
    %92 = arith.addf %89, %91 : vector<8x512xf32>
    %cst_56 = arith.constant 5.000000e-01 : f32
    %93 = vector.broadcast %cst_56 : f32 to vector<8x512xf32>
    %94 = arith.mulf %93, %92 : vector<8x512xf32>
    %cst_57 = arith.constant 0.707106769 : f32
    %95 = vector.broadcast %cst_57 : f32 to vector<8x512xf32>
    %96 = arith.mulf %92, %95 : vector<8x512xf32>
    %97 = math.erf %96 : vector<8x512xf32>
    %cst_58 = arith.constant 1.000000e+00 : f32
    %98 = vector.broadcast %cst_58 : f32 to vector<8x512xf32>
    %99 = arith.addf %98, %97 : vector<8x512xf32>
    %100 = arith.mulf %94, %99 : vector<8x512xf32>
    %101 = arith.truncf %100 : vector<8x512xf32> to vector<8x512xbf16>
    %c2560_59 = arith.constant 2560 : index
    %c0_60 = arith.constant 0 : index
    %102 = vector.load %arg4[%c2560_59, %c0_60] : memref<3072x768xbf16, #tpu.memory_space<vmem>>, vector<512x768xbf16>
    %cst_61 = arith.constant dense<0.000000e+00> : vector<8x768xf32>
    %103 = tpu.matmul %101, %102, %cst_61 {dimension_numbers = #tpu.dot_dimension_numbers<[1], [0], [0], [1], [0, 0, 1, 1], [], []>} : vector<8x512xbf16>, vector<512x768xbf16>, vector<8x768xf32> -> vector<8x768xf32>
    %104 = arith.addf %87, %103 : vector<8x768xf32>
    %c0_62 = arith.constant 0 : index
    %c0_63 = arith.constant 0 : index
    %105 = vector.load %arg5[%c0_62, %c0_63] : memref<1x768xf32, #tpu.memory_space<vmem>>, vector<1x768xf32>
    %106 = vector.broadcast %105 : vector<1x768xf32> to vector<8x768xf32>
    %107 = arith.addf %104, %106 : vector<8x768xf32>
    %cst_64 = arith.constant 5.000000e-01 : f32
    %108 = vector.broadcast %cst_64 : f32 to vector<8x768xf32>
    %109 = arith.mulf %108, %107 : vector<8x768xf32>
    %cst_65 = arith.constant 0.707106769 : f32
    %110 = vector.broadcast %cst_65 : f32 to vector<8x768xf32>
    %111 = arith.mulf %107, %110 : vector<8x768xf32>
    %112 = math.erf %111 : vector<8x768xf32>
    %cst_66 = arith.constant 1.000000e+00 : f32
    %113 = vector.broadcast %cst_66 : f32 to vector<8x768xf32>
    %114 = arith.addf %113, %112 : vector<8x768xf32>
    %115 = arith.mulf %109, %114 : vector<8x768xf32>
    %c0_67 = arith.constant 0 : index
    %c0_68 = arith.constant 0 : index
    %116 = vector.load %arg6[%c0_67, %c0_68] : memref<8x768xf32, #tpu.memory_space<vmem>>, vector<8x768xf32>
    tpu.vector_store %arg6[%c0_67, %c0_68], %115 {strides = array<i32>} : memref<8x768xf32, #tpu.memory_space<vmem>>, vector<8x768xf32>,
    return
  }
  func.func @transform_0(%arg0: i32) -> (i32, i32) {
    %c0_i32 = arith.constant 0 : i32
    %c0_i32_0 = arith.constant 0 : i32
    return %arg0, %c0_i32 : i32, i32
  }
  func.func @transform_1(%arg0: i32) -> (i32, i32) {
    %c0_i32 = arith.constant 0 : i32
    %c0_i32_0 = arith.constant 0 : i32
    %c0_i32_1 = arith.constant 0 : i32
    return %c0_i32, %c0_i32_0 : i32, i32
  }
  func.func @transform_2(%arg0: i32) -> (i32, i32) {
    %c0_i32 = arith.constant 0 : i32
    %c0_i32_0 = arith.constant 0 : i32
    %c0_i32_1 = arith.constant 0 : i32
    return %c0_i32, %c0_i32_0 : i32, i32
  }
  func.func @transform_3(%arg0: i32) -> (i32, i32) {
    %c0_i32 = arith.constant 0 : i32
    %c0_i32_0 = arith.constant 0 : i32
    %c0_i32_1 = arith.constant 0 : i32
    return %c0_i32, %c0_i32_0 : i32, i32
  }
  func.func @transform_4(%arg0: i32) -> (i32, i32) {
    %c0_i32 = arith.constant 0 : i32
    %c0_i32_0 = arith.constant 0 : i32
    %c0_i32_1 = arith.constant 0 : i32
    return %c0_i32, %c0_i32_0 : i32, i32
  }
  func.func @transform_5(%arg0: i32) -> (i32, i32) {
    %c0_i32 = arith.constant 0 : i32
    %c0_i32_0 = arith.constant 0 : i32
    return %arg0, %c0_i32 : i32, i32
  }
}

</mosaic_0001>

<bundles_post_ra>
// kernel: tpu_custom_call.1
= control target key start
LH: loop header
LB: loop body
LE: loop exit
PB: predicated region body
PF: predicated region fallthrough
CT: control target
= control target key end

     0   :  { %10 = vsyncpa [#allocation3], 0  ;;  %s22816_s0 = inlined_call_operand.hbm [shape: f32[16,768], index: 0, kind: input, shape index: {}]   ;;  %s22817_s1 = inlined_call_operand.hbm [shape: bf16[768,3072], index: 1, kind: input, shape index: {}]   ;;  %s22818_s2 = inlined_call_operand.hbm [shape: f32[1,3072], index: 2, kind: input, shape index: {}]   ;;  %s22819_s3 = inlined_call_operand.hbm [shape: bf16[3072,768], index: 3, kind: input, shape index: {}]   ;;  %s22820_s4 = inlined_call_operand.hbm [shape: f32[1,768], index: 4, kind: input, shape index: {}]   ;;  %s22821_s5 = inlined_call_operand.hbm [shape: f32[16,768], index: 5, kind: output, shape index: {}]  }
   0x1   :  { %12 = vsyncpa [#allocation3 + $0x1], 0 }
   0x2   :  { %13 = vsyncpa [#allocation6], 0 }
   0x3   :  { %14 = vsyncpa [#allocation9], 0 }
   0x4   :  { %15 = vsyncpa [#allocation4], 0 }
   0x5   :  { %17 = vsyncpa [#allocation4 + $0x1], 0  ;;  %s22030_s18 = smov 0   ;;  %s22032_s19 = smov 0  }
   0x6   :  { %s22034_s20 = smov 0   ;;  %s22036_s21 = smov 0  }
   0x7 LB: > { %s21990_s22 = smov [#allocation5]   ;;  %s22051_s24 = sadd.s32 4294967295, %s21988_s21   ;;  %s21988_s21 = sphi %s22036_s21, %s22844_s21   ;;  %s21984_s20 = sphi %s22034_s20, %s22843_s20   ;;  %s21980_s19 = sphi %s22032_s19, %s22842_s19   ;;  %s21976_s18 = sphi %s22030_s18, %s22841_s18  }
   0x8   : > { %s176_s23 = sshll.u32 %s21990_s22, 4  ;;  %p17581_p0 = scmp.ge.s32.totalorder %s21988_s21, 1  ;;  %s177_s23 = int_to_ptr.vmem [resolvable:$true] %s176_s23 }
   0x9   : > { %p22822_p1 = scmp.eq.s32.totalorder %s22051_s24, 0  ;;  %p164_p2 = scmp.lt.s32.totalorder %s21988_s21, 3 }
   0xa   : > { %s21991_s26 = smov [#allocation8]   ;;  %s21992_s29 = smov [#allocation7]  }
   0xb   : > { %p22056_p3 = pnand %p17581_p0, %p164_p2  ;;  %s200_s27 = sshll.u32 %s21991_s26, 4  ;;  %s22069_s27 = int_to_ptr.vmem [resolvable:$true] %s200_s27 }
   0xc   : > { %s22071_s30 = sshll.u32 %s21992_s29, 4  ;;  %s21795_s6 = scalar_lea.vmem %s177_s23, 147456  ;;  %s191_s30 = int_to_ptr.vmem [resolvable:$true] %s22071_s30 }
   0xd   : > { %s22826_s25 = scalar_select %p22056_p3, 1, 0 }
   0xe   : > { %p19924_p5 = pneg %p22056_p3  ;;  %p21796_p8 = scmp.ne.s32.totalorder %s177_s23, %s21795_s6 }
   0xf   : > { %p21803_p11 = scmp.lt.s32.totalorder %s177_s23, %s177_s23  ;;  %p21804_p12 = scmp.lt.s32.totalorder %s21795_s6, %s21795_s6 }
  0x10   : > { %p22065_p6 = pnand %p19924_p5, %p22822_p1 }
  0x11   : > { %p21805_p13 = por %p21804_p12, %p21803_p11 }
  0x12   : > { %p21786_p7 = pneg %p22065_p6 }
  0x14   : > { %p21798_p9 = pnand %p21796_p8, %p21786_p7 }
  0x16   : > { %p21799_p10 = pneg %p21798_p9 }
  0x18   : > { %p21806_p0 = pnand %p21805_p13, %p21799_p10 }
  0x1a   : > { %21809 = shalt.err (!%p21806_p0)
}
  0x1b   : > { %s21993_s7 = smov 1536   ;;  %s21994_s8 = smov 96  }
  0x1c   : > { %19927 = dma.hbm_to_vmem [thread:$0]  (!%p22065_p6), %s22817_s1, 147456, %s177_s23, [#allocation6], %s21993_s7, %s21993_s7, %s21994_s8  }
  0x1d   : > { %s21821_s11 = scalar_lea.vmem %s22069_s27, 147456  ;;  %p21829_p9 = scmp.lt.s32.totalorder %s22069_s27, %s22069_s27 }
  0x1e   : > { %p21822_p2 = scmp.ne.s32.totalorder %s22069_s27, %s21821_s11  ;;  %p21830_p10 = scmp.lt.s32.totalorder %s21821_s11, %s21821_s11 }
  0x20   : > { %p21824_p5 = pnand %p21822_p2, %p21786_p7  ;;  %p21831_p11 = por %p21830_p10, %p21829_p9 }
  0x22   : > { %p21825_p8 = pneg %p21824_p5 }
  0x24   : > { %p21832_p12 = pnand %p21831_p11, %p21825_p8 }
  0x26   : > { %21835 = shalt.err (!%p21832_p12)
}
  0x27   : > { %s21995_s12 = smov 384   ;;  %s21996_s13 = smov 24  }
  0x28   : > { %19933 = dma.hbm_to_vmem [thread:$0]  (!%p22065_p6), %s22819_s3, 147456, %s22069_s27, [#allocation9], %s21995_s12, %s21995_s12, %s21996_s13  }
  0x29   : > { %s21847_s16 = scalar_lea.vmem %s191_s30, 384  ;;  %p21855_p5 = scmp.lt.s32.totalorder %s191_s30, %s191_s30 }
  0x2a   : > { %p21848_p13 = scmp.ne.s32.totalorder %s191_s30, %s21847_s16  ;;  %p21856_p8 = scmp.lt.s32.totalorder %s21847_s16, %s21847_s16 }
  0x2c   : > { %p21850_p0 = pnand %p21848_p13, %p21786_p7  ;;  %p21857_p9 = por %p21856_p8, %p21855_p5 }
  0x2e   : > { %p21851_p2 = pneg %p21850_p0 }
  0x30   : > { %p21858_p10 = pnand %p21857_p9, %p21851_p2 }
  0x32   : > { %21861 = shalt.err (!%p21858_p10)
}
  0x33   : > { %19930 = dma.hbm_to_vmem [thread:$0]  (!%p22065_p6), %s22818_s2, 384, %s191_s30, [#allocation6]  }
  0x34   : > { %s21997_s23 = smov [#allocation10]  }
  0x35   : > { %s214_s26 = sshll.u32 %s21997_s23, 4  ;;  %s215_s26 = int_to_ptr.vmem [resolvable:$true] %s214_s26 }
  0x36   : > { %s21873_s27 = scalar_lea.vmem %s215_s26, 96  ;;  %p21881_p0 = scmp.lt.s32.totalorder %s215_s26, %s215_s26 }
  0x37   : > { %p21874_p11 = scmp.ne.s32.totalorder %s215_s26, %s21873_s27  ;;  %p21882_p5 = scmp.lt.s32.totalorder %s21873_s27, %s21873_s27 }
  0x39   : > { %p21876_p12 = pnand %p21874_p11, %p21786_p7  ;;  %p21883_p2 = por %p21882_p5, %p21881_p0 }
  0x3b   : > { %p21877_p13 = pneg %p21876_p12 }
  0x3d   : > { %p21884_p8 = pnand %p21883_p2, %p21877_p13 }
  0x3f   : > { %21887 = shalt.err (!%p21884_p8)
}
  0x40   : > { %19936 = dma.hbm_to_vmem [thread:$0]  (!%p22065_p6), %s22820_s4, 96, %s215_s26, [#allocation9]  }
  0x41   : > { %s17580_s30 = sadd.s32 4294967294, %s21988_s21   ;;  %s22115_s28 = sadd.s32 1, %s21988_s21  }
  0x42   : > { %s27_s7 = ssub.s32 %s21988_s21, %s22115_s28  ;;  %s30_s8 = sadd.s32 1, %s21984_s20 }
  0x43   : > { %p28_p7 = scmp.eq.s32.totalorder %s27_s7, 0  ;;  %p37_p9 = scmp.ne.s32.totalorder %s21984_s20, %s21980_s19 }
  0x44   : > { %p38_p10 = scmp.eq.s32.totalorder %s21988_s21, 0  ;;  %p43_p11 = scmp.ne.s32.totalorder %s21980_s19, %s21976_s18 }
  0x45   : > { %s22126_s9 = scalar_select %p28_p7, %s21984_s20, %s30_s8  }
  0x46   : > { %p39_p12 = por %p38_p10, %p37_p9  ;;  %p22130_p13 = por %p22822_p1, %p43_p11 }
  0x47   : > { %p151_p6 = scmp.eq.s32.totalorder %s22051_s24, 1  ;;  %p157_p0 = scmp.eq.s32.totalorder %s17580_s30, 1 }
  0x48   : > { %s22828_s10 = scalar_select %p22130_p13, 1, 0 }
  0x49   : > { %p19949_p5 = scmp.lt.s32.totalorder %s21988_s21, 2  ;;  %s225_s11 = sand.u32 1, %s21984_s20  }
  0x4a   : > { %p22137_p2 = por %p151_p6, %p37_p9  ;;  %p22141_p8 = por %p157_p0, %p43_p11 }
  0x4b   : > { %s19900_s14 = smul.u32 48, %s225_s11  ;;  %p22146_p7 = pnand %p19949_p5, %p39_p12 }
  0x4c   : > { %s22829_s12 = scalar_select %p22137_p2, 1, 0 }
  0x4d   : > { %s22830_s13 = scalar_select %p22141_p8, 1, 0 }
  0x4e   : > { %s19901_s15 = smul.u32 768, %s21988_s21  ;;  %s229_s26 = scalar_lea.vmem [#allocation2], %s19900_s14 }
  0x4f   : > { %s237_s27 = sshll.u32 %s229_s26, 4  ;;  %s226_s29 = scalar_lea.sflag [#allocation3], %s225_s11  ;;  %s238_s27 = int_to_ptr.vmem [resolvable:$true] %s237_s27 }
  0x50   : > { %s22153_s23 = scalar_lea.hbm %s22816_s0, %s19901_s15  ;;  %p21890_p10 = pneg %p22146_p7 }
  0x51   : > { %s21888_s6 = scalar_lea.hbm %s22153_s23, 768  ;;  %s21893_s8 = scalar_lea.hbm %s22816_s0, 1536 }
  0x52   : > { %p21889_p9 = scmp.ne.s32.totalorder %s22153_s23, %s21888_s6  ;;  %p21894_p6 = scmp.lt.s32.totalorder %s22153_s23, %s22816_s0 }
  0x53   : > { %p21895_p0 = scmp.lt.s32.totalorder %s21893_s8, %s21888_s6 }
  0x54   : > { %p21891_p11 = pnand %p21890_p10, %p21889_p9 }
  0x55   : > { %p21896_p5 = por %p21895_p0, %p21894_p6 }
  0x56   : > { %p21892_p12 = pneg %p21891_p11 }
  0x58   : > { %p21897_p4 = pnand %p21896_p5, %p21892_p12 }
  0x5a   : > { %21900 = shalt.err (!%p21897_p4)
}
  0x5b   : > { %s21901_s14 = scalar_lea.vmem %s238_s27, 768  ;;  %s21998_s11 = smov [#allocation2]  }
  0x5c   : > { %p21902_p1 = scmp.ne.s32.totalorder %s238_s27, %s21901_s14  ;;  %s21906_s22 = sshll.u32 %s21998_s11, 4  ;;  %s21907_s22 = int_to_ptr.vmem [resolvable:$false] %s21906_s22 }
  0x5d   : > { %s21908_s26 = scalar_lea.vmem %s21907_s22, 1536  ;;  %p21909_p9 = scmp.lt.s32.totalorder %s238_s27, %s21907_s22 }
  0x5e   : > { %p21904_p8 = pnand %p21902_p1, %p21890_p10  ;;  %p21910_p11 = scmp.lt.s32.totalorder %s21908_s26, %s21901_s14 }
  0x60   : > { %p21905_p2 = pneg %p21904_p8  ;;  %p21911_p13 = por %p21910_p11, %p21909_p9 }
  0x62   : > { %p21912_p3 = pnand %p21911_p13, %p21905_p2 }
  0x64   : > { %21915 = shalt.err (!%p21912_p3)
}
  0x65   : > { %19940 = dma.hbm_to_vmem [thread:$0]  (!%p22146_p7), %s22153_s23, 768, %s238_s27, %s226_s29  }
  0x66   : > { %p22832_p12 = scmp.ne.s32.totalorder %s22826_s25, 0 }
  0x67   : > { %s22172_s6 = sand.u32 (!%p22832_p12), 1, %s21980_s19   ;;  %p22833_p1 = scmp.ne.s32.totalorder (!%p22832_p12), %s22828_s10, 0 }
  0x68   : > { %246 = sbr.rel (%p22832_p12) target bundleno = 3442 (0xd72), region = 40  ;;  %s249_s7 = scalar_lea.sflag (!%p22832_p12), [#allocation3], %s22172_s6 }
  0x69   : > { %s19902_s30 = smul.u32 (!%p22832_p12), 48, %s22172_s6 }
  0x6b   : > { %s22178_s8 = scalar_lea.vmem (!%p22832_p12), [#allocation2], %s19902_s30 }
  0x6d   : > { %21959 = dma.done.wait (%p22833_p1), %s249_s7, 768  }
  0x6e   : > { %21961 = vsyncadd (%p22833_p1), %s249_s7, 4294966528  ;;  %p22834_p3 = scmp.eq.s32.totalorder %s22051_s24, 0 }
  0x70   : > { %21963 = dma.done.wait (%p22834_p3), [#allocation6], 147840   ;;  %p22835_p4 = pmov %p22834_p3 }
  0x71   : > { %p22836_p13 = pmov %p22834_p3 }
  0x72   : > { %21965 = vsyncadd (%p22835_p4), [#allocation6], 4294819456 }
  0x73   : > { %21967 = dma.done.wait (%p22836_p13), [#allocation9], 147552   ;;  %p22837_p2 = pmov %p22834_p3 }
  0x74   : > { %v335_v0 = vld [vmem:[#allocation5 + $0x540] sm:$0xff]  ;;  %v296_v53 = vld [vmem:[%s22178_s8 + $0x8] sm:$0xff]  ;;  %v298_v54 = vld [vmem:[%s22178_s8 + $0x18] sm:$0xff]  ;;  %s22760_s25 = scalar_lea.vmem [#allocation11], %s19902_s30  ;;  %s19903_s10 = smul.u32 768, %s22051_s24 }
  0x75   : > { %21969 = vsyncadd (%p22837_p2), [#allocation9], 4294819744  ;;  %v337_v1 = vld [vmem:[#allocation5 + $0x5a0] sm:$0xff]  ;;  %v22194_v58 = vpack.c.bf16 %v296_v53, %v296_v53  ;;  %v22196_v59 = vpack.c.bf16 %v298_v54, %v298_v54  ;;  %s17472_s16 = sshll.u32 %s22760_s25, 4  ;;  %s17458_s17 = scalar_lea.sflag [#allocation4], %s22172_s6  ;;  %s17473_s16 = int_to_ptr.vmem [resolvable:$true] %s17472_s16 }
  0x76   : > { %v399_v2 = vld [vmem:[#allocation5 + $0x1140] sm:$0xff]  ;;  %v17622_v3 = vcombine.high %v335_v0, %v337_v1  ;;  %v17621_v5 = vcombine.low %v335_v0, %v337_v1  ;;  %s17470_s29 = scalar_lea.hbm %s22821_s5, %s19903_s10  ;;  %s21916_s15 = scalar_lea.vmem %s17473_s16, 768 }
  0x77   : > { %v401_v4 = vld [vmem:[#allocation5 + $0x11a0] sm:$0xff]  ;;  %1513 = vmatprep.mubr.bf16.mxu0 %v22194_v58  ;;  %1554 = vmatprep.mubr.bf16.mxu1 %v22196_v59  ;;  %p21917_p8 = scmp.ne.s32.totalorder %s17473_s16, %s21916_s15  ;;  %p22838_p7 = scmp.ne.s32.totalorder %s22829_s12, 0 }
  0x78   : > { %v331_v6 = vld [vmem:[#allocation5 + $0x480] sm:$0xff]  ;;  %v17686_v8 = vcombine.high %v399_v2, %v401_v4  ;;  %v17685_v9 = vcombine.low %v399_v2, %v401_v4  ;;  %1481 = vmatprep.subr.bf16.mxu0 %v17622_v3  ;;  %s21999_s24 = smov [#allocation11]  }
  0x79   : > { %v333_v7 = vld [vmem:[#allocation5 + $0x4e0] sm:$0xff]  ;;  %1482 = vmatpush1.bf16.msra.mxu0 %v17621_v5  ;;  %p21918_p10 = pnand %p21917_p8, %p22838_p7  ;;  %s21920_s14 = sshll.u32 %s21999_s24, 4  ;;  %s21921_s14 = int_to_ptr.vmem [resolvable:$false] %s21920_s14 }
  0x7a   : > { %v17618_v10 = vcombine.high %v331_v6, %v333_v7  ;;  %v395_v11 = vld [vmem:[#allocation5 + $0x1080] sm:$0xff]  ;;  %1522 = vmatprep.subr.bf16.mxu1 %v17686_v8  ;;  %v17617_v18 = vcombine.low %v331_v6, %v333_v7  ;;  %s21922_s11 = scalar_lea.vmem %s21921_s14, 1536  ;;  %p21923_p0 = scmp.lt.s32.totalorder %s17473_s16, %s21921_s14 }
  0x7b   : > { %v397_v12 = vld [vmem:[#allocation5 + $0x10e0] sm:$0xff]  ;;  %1523 = vmatpush1.bf16.msra.mxu1 %v17685_v9  ;;  %p21919_p6 = pneg %p21918_p10  ;;  %p21924_p5 = scmp.lt.s32.totalorder %s21922_s11, %s21916_s15 }
  0x7c   : > { %v327_v13 = vld [vmem:[#allocation5 + $0x3c0] sm:$0xff]  ;;  %v17682_v14 = vcombine.high %v395_v11, %v397_v12  ;;  %1483 = vmatprep.subr.bf16.mxu0 %v17618_v10  ;;  %v17681_v19 = vcombine.low %v395_v11, %v397_v12 }
  0x7d   : > { %v329_v15 = vld [vmem:[#allocation5 + $0x420] sm:$0xff]  ;;  %1484 = vmatpush1.bf16.msra.mxu0 %v17617_v18  ;;  %p21925_p9 = por %p21924_p5, %p21923_p0 }
  0x7e   : > { %v391_v16 = vld [vmem:[#allocation5 + $0xfc0] sm:$0xff]  ;;  %v17614_v20 = vcombine.high %v327_v13, %v329_v15  ;;  %1524 = vmatprep.subr.bf16.mxu1 %v17682_v14  ;;  %v17613_v26 = vcombine.low %v327_v13, %v329_v15 }
  0x7f   : > { %v393_v17 = vld [vmem:[#allocation5 + $0x1020] sm:$0xff]  ;;  %1525 = vmatpush1.bf16.msra.mxu1 %v17681_v19  ;;  %p21926_p11 = pnand %p21925_p9, %p21919_p6 }
  0x80   : > { %v17678_v21 = vcombine.high %v391_v16, %v393_v17  ;;  %v323_v22 = vld [vmem:[#allocation5 + $0x300] sm:$0xff]  ;;  %1485 = vmatprep.subr.bf16.mxu0 %v17614_v20  ;;  %v17677_v27 = vcombine.low %v391_v16, %v393_v17 }
  0x81   : > { %v325_v23 = vld [vmem:[#allocation5 + $0x360] sm:$0xff]  ;;  %1486 = vmatpush1.bf16.msra.mxu0 %v17613_v26 }
  0x82   : > { %v387_v24 = vld [vmem:[#allocation5 + $0xf00] sm:$0xff]  ;;  %v17610_v28 = vcombine.high %v323_v22, %v325_v23  ;;  %1526 = vmatprep.subr.bf16.mxu1 %v17678_v21  ;;  %v17609_v34 = vcombine.low %v323_v22, %v325_v23 }
  0x83   : > { %v389_v25 = vld [vmem:[#allocation5 + $0xf60] sm:$0xff]  ;;  %1527 = vmatpush1.bf16.msra.mxu1 %v17677_v27 }
  0x84   : > { %v17674_v29 = vcombine.high %v387_v24, %v389_v25  ;;  %v319_v30 = vld [vmem:[#allocation5 + $0x240] sm:$0xff]  ;;  %1487 = vmatprep.subr.bf16.mxu0 %v17610_v28  ;;  %v17673_v35 = vcombine.low %v387_v24, %v389_v25 }
  0x85   : > { %v321_v31 = vld [vmem:[#allocation5 + $0x2a0] sm:$0xff]  ;;  %1488 = vmatpush1.bf16.msra.mxu0 %v17609_v34 }
  0x86   : > { %v383_v32 = vld [vmem:[#allocation5 + $0xe40] sm:$0xff]  ;;  %v17606_v36 = vcombine.high %v319_v30, %v321_v31  ;;  %1528 = vmatprep.subr.bf16.mxu1 %v17674_v29  ;;  %v17605_v42 = vcombine.low %v319_v30, %v321_v31 }
  0x87   : > { %v385_v33 = vld [vmem:[#allocation5 + $0xea0] sm:$0xff]  ;;  %1529 = vmatpush1.bf16.msra.mxu1 %v17673_v35 }
  0x88   : > { %v17670_v37 = vcombine.high %v383_v32, %v385_v33  ;;  %v315_v38 = vld [vmem:[#allocation5 + $0x180] sm:$0xff]  ;;  %1489 = vmatprep.subr.bf16.mxu0 %v17606_v36  ;;  %v17669_v43 = vcombine.low %v383_v32, %v385_v33 }
  0x89   : > { %v317_v39 = vld [vmem:[#allocation5 + $0x1e0] sm:$0xff]  ;;  %1490 = vmatpush1.bf16.msra.mxu0 %v17605_v42 }
  0x8a   : > { %v379_v40 = vld [vmem:[#allocation5 + $0xd80] sm:$0xff]  ;;  %v17602_v44 = vcombine.high %v315_v38, %v317_v39  ;;  %1530 = vmatprep.subr.bf16.mxu1 %v17670_v37  ;;  %v17601_v50 = vcombine.low %v315_v38, %v317_v39 }
  0x8b   : > { %v381_v41 = vld [vmem:[#allocation5 + $0xde0] sm:$0xff]  ;;  %1531 = vmatpush1.bf16.msra.mxu1 %v17669_v43 }
  0x8c   : > { %v17666_v45 = vcombine.high %v379_v40, %v381_v41  ;;  %v311_v46 = vld [vmem:[#allocation5 + $0xc0] sm:$0xff]  ;;  %1491 = vmatprep.subr.bf16.mxu0 %v17602_v44  ;;  %v17665_v51 = vcombine.low %v379_v40, %v381_v41 }
  0x8d   : > { %v313_v47 = vld [vmem:[#allocation5 + $0x120] sm:$0xff]  ;;  %1492 = vmatpush1.bf16.msra.mxu0 %v17601_v50 }
  0x8e   : > { %v375_v48 = vld [vmem:[#allocation5 + $0xcc0] sm:$0xff]  ;;  %v17598_v52 = vcombine.high %v311_v46, %v313_v47  ;;  %1532 = vmatprep.subr.bf16.mxu1 %v17666_v45  ;;  %v17597_v62 = vcombine.low %v311_v46, %v313_v47 }
  0x8f   : > { %v377_v49 = vld [vmem:[#allocation5 + $0xd20] sm:$0xff]  ;;  %1533 = vmatpush1.bf16.msra.mxu1 %v17665_v51 }
  0x90   : > { %v17662_v55 = vcombine.high %v375_v48, %v377_v49  ;;  %v307_v56 = vld [vmem:[#allocation5] sm:$0xff]  ;;  %1493 = vmatprep.subr.bf16.mxu0 %v17598_v52  ;;  %v17661_v63 = vcombine.low %v375_v48, %v377_v49 }
  0x91   : > { %v309_v57 = vld [vmem:[#allocation5 + $0x60] sm:$0xff]  ;;  %1494 = vmatpush1.bf16.msra.mxu0 %v17597_v62 }
  0x92   : > { %v371_v60 = vld [vmem:[#allocation5 + $0xc00] sm:$0xff]  ;;  %v17594_v0 = vcombine.high %v307_v56, %v309_v57  ;;  %1534 = vmatprep.subr.bf16.mxu1 %v17662_v55  ;;  %v17593_v6 = vcombine.low %v307_v56, %v309_v57 }
  0x93   : > { %v373_v61 = vld [vmem:[#allocation5 + $0xc60] sm:$0xff]  ;;  %1535 = vmatpush1.bf16.msra.mxu1 %v17661_v63 }
  0x94   : > { %v17658_v1 = vcombine.high %v371_v60, %v373_v61  ;;  %v367_v2 = vld [vmem:[#allocation5 + $0xb40] sm:$0xff]  ;;  %1495 = vmatprep.subr.bf16.mxu0 %v17594_v0  ;;  %v17657_v7 = vcombine.low %v371_v60, %v373_v61 }
  0x95   : > { %v369_v3 = vld [vmem:[#allocation5 + $0xba0] sm:$0xff]  ;;  %1496 = vmatpush1.bf16.msra.mxu0 %v17593_v6  ;;  %v336_v6 = vld [vmem:[#allocation5 + $0x548] sm:$0xff] }
  0x96   : > { %v431_v4 = vld [vmem:[#allocation5 + $0x1740] sm:$0xff]  ;;  %v17654_v8 = vcombine.high %v367_v2, %v369_v3  ;;  %1536 = vmatprep.subr.bf16.mxu1 %v17658_v1  ;;  %v17653_v14 = vcombine.low %v367_v2, %v369_v3 }
  0x97   : > { %v433_v5 = vld [vmem:[#allocation5 + $0x17a0] sm:$0xff]  ;;  %1537 = vmatpush1.bf16.msra.mxu1 %v17657_v7  ;;  %v338_v7 = vld [vmem:[#allocation5 + $0x5a8] sm:$0xff] }
  0x98   : > { %v17718_v9 = vcombine.high %v431_v4, %v433_v5  ;;  %v363_v10 = vld [vmem:[#allocation5 + $0xa80] sm:$0xff]  ;;  %1497 = vmatprep.subr.bf16.mxu0 %v17654_v8  ;;  %v17717_v15 = vcombine.low %v431_v4, %v433_v5 }
  0x99   : > { %v365_v11 = vld [vmem:[#allocation5 + $0xae0] sm:$0xff]  ;;  %1498 = vmatpush2.bf16.msra.mxu0 %v17653_v14 }
  0x9a   : > { %v427_v12 = vld [vmem:[#allocation5 + $0x1680] sm:$0xff]  ;;  %v17650_v16 = vcombine.high %v363_v10, %v365_v11  ;;  %1538 = vmatprep.subr.bf16.mxu1 %v17718_v9  ;;  %v17649_v22 = vcombine.low %v363_v10, %v365_v11 }
  0x9b   : > { %v429_v13 = vld [vmem:[#allocation5 + $0x16e0] sm:$0xff]  ;;  %1539 = vmatpush2.bf16.msra.mxu1 %v17717_v15 }
  0x9c   : > { %v17714_v17 = vcombine.high %v427_v12, %v429_v13  ;;  %v359_v18 = vld [vmem:[#allocation5 + $0x9c0] sm:$0xff]  ;;  %1499 = vmatprep.subr.bf16.mxu0 %v17650_v16  ;;  %v17713_v23 = vcombine.low %v427_v12, %v429_v13  ;;  %v17624_v13 = vcombine.high %v336_v6, %v338_v7 }
  0x9d   : > { %v361_v19 = vld [vmem:[#allocation5 + $0xa20] sm:$0xff]  ;;  %1500 = vmatpush2.bf16.msra.mxu0 %v17649_v22  ;;  %v17623_v22 = vcombine.low %v336_v6, %v338_v7  ;;  %v310_v7 = vld [vmem:[#allocation5 + $0x68] sm:$0xff] }
  0x9e   : > { %v423_v20 = vld [vmem:[#allocation5 + $0x15c0] sm:$0xff]  ;;  %v17646_v24 = vcombine.high %v359_v18, %v361_v19  ;;  %1540 = vmatprep.subr.bf16.mxu1 %v17714_v17  ;;  %v17645_v30 = vcombine.low %v359_v18, %v361_v19  ;;  %v332_v17 = vld [vmem:[#allocation5 + $0x488] sm:$0xff] }
  0x9f   : > { %v425_v21 = vld [vmem:[#allocation5 + $0x1620] sm:$0xff]  ;;  %1541 = vmatpush2.bf16.msra.mxu1 %v17713_v23  ;;  %v334_v18 = vld [vmem:[#allocation5 + $0x4e8] sm:$0xff] }
  0xa0   : > { %v17710_v25 = vcombine.high %v423_v20, %v425_v21  ;;  %v355_v26 = vld [vmem:[#allocation5 + $0x900] sm:$0xff]  ;;  %1501 = vmatprep.subr.bf16.mxu0 %v17646_v24  ;;  %v17709_v31 = vcombine.low %v423_v20, %v425_v21  ;;  %v300_v19 = vld [vmem:[%s22178_s8 + $0x28] sm:$0xff]  ;;  %v17620_v24 = vcombine.high %v332_v17, %v334_v18 }
  0xa1   : > { %v357_v27 = vld [vmem:[#allocation5 + $0x960] sm:$0xff]  ;;  %1502 = vmatpush2.bf16.msra.mxu0 %v17645_v30 }
  0xa2   : > { %v419_v28 = vld [vmem:[#allocation5 + $0x1500] sm:$0xff]  ;;  %v17642_v32 = vcombine.high %v355_v26, %v357_v27  ;;  %1542 = vmatprep.subr.bf16.mxu1 %v17710_v25  ;;  %v17641_v38 = vcombine.low %v355_v26, %v357_v27  ;;  %v328_v27 = vld [vmem:[#allocation5 + $0x3c8] sm:$0xff] }
  0xa3   : > { %v421_v29 = vld [vmem:[#allocation5 + $0x1560] sm:$0xff]  ;;  %1543 = vmatpush2.bf16.msra.mxu1 %v17709_v31  ;;  %v17619_v31 = vcombine.low %v332_v17, %v334_v18 }
  0xa4   : > { %v17706_v33 = vcombine.high %v419_v28, %v421_v29  ;;  %v351_v34 = vld [vmem:[#allocation5 + $0x840] sm:$0xff]  ;;  %1503 = vmatprep.subr.bf16.mxu0 %v17642_v32  ;;  %v17705_v39 = vcombine.low %v419_v28, %v421_v29  ;;  %v22207_v28 = vpack.c.bf16 %v300_v19, %v300_v19  ;;  %v330_v29 = vld [vmem:[#allocation5 + $0x428] sm:$0xff] }
  0xa5   : > { %v353_v35 = vld [vmem:[#allocation5 + $0x8a0] sm:$0xff]  ;;  %1504 = vmatpush2.bf16.msra.mxu0 %v17641_v38 }
  0xa6   : > { %v415_v36 = vld [vmem:[#allocation5 + $0x1440] sm:$0xff]  ;;  %v17638_v40 = vcombine.high %v351_v34, %v353_v35  ;;  %1544 = vmatprep.subr.bf16.mxu1 %v17706_v33  ;;  %v17637_v46 = vcombine.low %v351_v34, %v353_v35  ;;  %v324_v35 = vld [vmem:[#allocation5 + $0x308] sm:$0xff] }
  0xa7   : > { %v417_v37 = vld [vmem:[#allocation5 + $0x14a0] sm:$0xff]  ;;  %1545 = vmatpush2.bf16.msra.mxu1 %v17705_v39  ;;  %v17615_v39 = vcombine.low %v328_v27, %v330_v29 }
  0xa8   : > { %v17702_v41 = vcombine.high %v415_v36, %v417_v37  ;;  %v347_v42 = vld [vmem:[#allocation5 + $0x780] sm:$0xff]  ;;  %1505 = vmatprep.subr.bf16.mxu0 %v17638_v40  ;;  %v17701_v47 = vcombine.low %v415_v36, %v417_v37  ;;  %v17616_v36 = vcombine.high %v328_v27, %v330_v29  ;;  %v326_v37 = vld [vmem:[#allocation5 + $0x368] sm:$0xff] }
  0xa9   : > { %v349_v43 = vld [vmem:[#allocation5 + $0x7e0] sm:$0xff]  ;;  %1506 = vmatpush2.bf16.msra.mxu0 %v17637_v46 }
  0xaa   : > { %v411_v44 = vld [vmem:[#allocation5 + $0x1380] sm:$0xff]  ;;  %v17634_v48 = vcombine.high %v347_v42, %v349_v43  ;;  %1546 = vmatprep.subr.bf16.mxu1 %v17702_v41  ;;  %v17633_v54 = vcombine.low %v347_v42, %v349_v43  ;;  %v320_v43 = vld [vmem:[#allocation5 + $0x248] sm:$0xff] }
  0xab   : > { %v413_v45 = vld [vmem:[#allocation5 + $0x13e0] sm:$0xff]  ;;  %1547 = vmatpush2.bf16.msra.mxu1 %v17701_v47  ;;  %v17611_v47 = vcombine.low %v324_v35, %v326_v37 }
  0xac   : > { %v17698_v49 = vcombine.high %v411_v44, %v413_v45  ;;  %v343_v50 = vld [vmem:[#allocation5 + $0x6c0] sm:$0xff]  ;;  %1507 = vmatprep.subr.bf16.mxu0 %v17634_v48  ;;  %v17697_v55 = vcombine.low %v411_v44, %v413_v45  ;;  %v17612_v44 = vcombine.high %v324_v35, %v326_v37  ;;  %v322_v45 = vld [vmem:[#allocation5 + $0x2a8] sm:$0xff] }
  0xad   : > { %v345_v51 = vld [vmem:[#allocation5 + $0x720] sm:$0xff]  ;;  %1508 = vmatpush2.bf16.msra.mxu0 %v17633_v54 }
  0xae   : > { %v407_v52 = vld [vmem:[#allocation5 + $0x12c0] sm:$0xff]  ;;  %v17630_v56 = vcombine.high %v343_v50, %v345_v51  ;;  %1548 = vmatprep.subr.bf16.mxu1 %v17698_v49  ;;  %v17629_v0 = vcombine.low %v343_v50, %v345_v51  ;;  %v316_v51 = vld [vmem:[#allocation5 + $0x188] sm:$0xff] }
  0xaf   : > { %v409_v53 = vld [vmem:[#allocation5 + $0x1320] sm:$0xff]  ;;  %1549 = vmatpush2.bf16.msra.mxu1 %v17697_v55  ;;  %v17607_v55 = vcombine.low %v320_v43, %v322_v45 }
  0xb0   : > { %v17694_v57 = vcombine.high %v407_v52, %v409_v53  ;;  %v339_v60 = vld [vmem:[#allocation5 + $0x600] sm:$0xff]  ;;  %1509 = vmatprep.subr.bf16.mxu0 %v17630_v56  ;;  %v17693_v1 = vcombine.low %v407_v52, %v409_v53  ;;  %v17608_v52 = vcombine.high %v320_v43, %v322_v45  ;;  %v318_v53 = vld [vmem:[#allocation5 + $0x1e8] sm:$0xff] }
  0xb1   : > { %v341_v61 = vld [vmem:[#allocation5 + $0x660] sm:$0xff]  ;;  %1510 = vmatpush2.bf16.msra.mxu0 %v17629_v0 }
  0xb2   : > { %v403_v62 = vld [vmem:[#allocation5 + $0x1200] sm:$0xff]  ;;  %v17626_v2 = vcombine.high %v339_v60, %v341_v61  ;;  %1550 = vmatprep.subr.bf16.mxu1 %v17694_v57  ;;  %v17625_v8 = vcombine.low %v339_v60, %v341_v61  ;;  %v312_v61 = vld [vmem:[#allocation5 + $0xc8] sm:$0xff] }
  0xb3   : > { %v405_v63 = vld [vmem:[#allocation5 + $0x1260] sm:$0xff]  ;;  %1551 = vmatpush2.bf16.msra.mxu1 %v17693_v1  ;;  %v17603_v1 = vcombine.low %v316_v51, %v318_v53 }
  0xb4   : > { %v17690_v3 = vcombine.high %v403_v62, %v405_v63  ;;  %v463_v4 = vld [vmem:[#allocation5 + $0x1d40] sm:$0xff]  ;;  %1511 = vmatprep.subr.bf16.mxu0 %v17626_v2  ;;  %v17689_v10 = vcombine.low %v403_v62, %v405_v63  ;;  %v17604_v62 = vcombine.high %v316_v51, %v318_v53  ;;  %v314_v63 = vld [vmem:[#allocation5 + $0x128] sm:$0xff] }
  0xb5   : > { %v465_v5 = vld [vmem:[#allocation5 + $0x1da0] sm:$0xff]  ;;  %1512 = vmatpush2.bf16.msra.mxu0 %v17625_v8  ;;  %v17600_v6 = vcombine.high %v312_v61, %v314_v63 }
  0xb6   : > { %v295_v9 = vld [vmem:[%s22178_s8] sm:$0xff]  ;;  %v297_v11 = vld [vmem:[%s22178_s8 + $0x10] sm:$0xff]  ;;  %v17750_v12 = vcombine.high %v463_v4, %v465_v5  ;;  %1552 = vmatprep.subr.bf16.mxu1 %v17690_v3  ;;  %v17749_v21 = vcombine.low %v463_v4, %v465_v5  ;;  %v308_v5 = vld [vmem:[#allocation5 + $0x8] sm:$0xff] }
  0xb7   : > { %v459_v14 = vld [vmem:[#allocation5 + $0x1c80] sm:$0xff]  ;;  %v22202_v16 = vpack.c.bf16 %v295_v9, %v295_v9  ;;  %v22205_v20 = vpack.c.bf16 %v297_v11, %v297_v11  ;;  %1553 = vmatpush2.bf16.msra.mxu1 %v17689_v10  ;;  %v17599_v9 = vcombine.low %v312_v61, %v314_v63  ;;  %v17595_v18 = vcombine.low %v308_v5, %v310_v7 }
  0xb8   : > { %v461_v15 = vld [vmem:[#allocation5 + $0x1ce0] sm:$0xff]  ;;  %1563 = vmatprep.subr.bf16.mxu0 %v17750_v12  ;;  %1604 = vmatprep.subr.bf16.mxu1 %v17624_v13  ;;  %v368_v13 = vld [vmem:[#allocation5 + $0xb48] sm:$0xff] }
  0xb9   : > { %v17746_v23 = vcombine.high %v459_v14, %v461_v15  ;;  %v455_v25 = vld [vmem:[#allocation5 + $0x1bc0] sm:$0xff]  ;;  %1514 = vmatmul.mubr.bf16.vlgmr.msra.gmra.mxu0 %v22202_v16  ;;  %v17745_v30 = vcombine.low %v459_v14, %v461_v15  ;;  %v17596_v14 = vcombine.high %v308_v5, %v310_v7  ;;  %v370_v15 = vld [vmem:[#allocation5 + $0xba8] sm:$0xff] }
  0xba   : > { %v457_v26 = vld [vmem:[#allocation5 + $0x1c20] sm:$0xff]  ;;  %1555 = vmatmul.mubr.bf16.vlgmr.msra.gmra.mxu1 %v22205_v20  ;;  %1564 = vmatpush1.bf16.msra.mxu0 %v17749_v21  ;;  %v17655_v27 = vcombine.low %v368_v13, %v370_v15 }
  0xbb   : > { %1605 = vmatpush1.bf16.msra.mxu1 %v17623_v22  ;;  %1565 = vmatprep.subr.bf16.mxu0 %v17746_v23  ;;  %v17742_v32 = vcombine.high %v455_v25, %v457_v26  ;;  %v451_v33 = vld [vmem:[#allocation5 + $0x1b00] sm:$0xff]  ;;  %v17741_v38 = vcombine.low %v455_v25, %v457_v26  ;;  %v364_v23 = vld [vmem:[#allocation5 + $0xa88] sm:$0xff] }
  0xbc   : > { %v453_v34 = vld [vmem:[#allocation5 + $0x1b60] sm:$0xff]  ;;  %1606 = vmatprep.subr.bf16.mxu1 %v17620_v24  ;;  %1595 = vmatprep.mubr.bf16.mxu0 %v22207_v28  ;;  %v17656_v24 = vcombine.high %v368_v13, %v370_v15  ;;  %v366_v25 = vld [vmem:[#allocation5 + $0xae8] sm:$0xff] }
  0xbd   : > { %1636 = vmatprep.mubr.bf16.mxu1 %v22194_v58  ;;  %v17738_v40 = vcombine.high %v451_v33, %v453_v34  ;;  %v447_v41 = vld [vmem:[#allocation5 + $0x1a40] sm:$0xff]  ;;  %v17737_v46 = vcombine.low %v451_v33, %v453_v34  ;;  %v17652_v33 = vcombine.high %v364_v23, %v366_v25  ;;  %v362_v34 = vld [vmem:[#allocation5 + $0xa28] sm:$0xff] }
  0xbe   : > { %1566 = vmatpush1.bf16.msra.mxu0 %v17745_v30  ;;  %v449_v42 = vld [vmem:[#allocation5 + $0x1aa0] sm:$0xff] }
  0xbf   : > { %1607 = vmatpush1.bf16.msra.mxu1 %v17619_v31  ;;  %1567 = vmatprep.subr.bf16.mxu0 %v17742_v32  ;;  %v17734_v48 = vcombine.high %v447_v41, %v449_v42  ;;  %v443_v49 = vld [vmem:[#allocation5 + $0x1980] sm:$0xff]  ;;  %v17733_v54 = vcombine.low %v447_v41, %v449_v42  ;;  %v360_v32 = vld [vmem:[#allocation5 + $0x9c8] sm:$0xff] }
  0xc0   : > { %1608 = vmatprep.subr.bf16.mxu1 %v17616_v36  ;;  %v445_v50 = vld [vmem:[#allocation5 + $0x19e0] sm:$0xff]  ;;  %v17651_v36 = vcombine.low %v364_v23, %v366_v25  ;;  %v17648_v41 = vcombine.high %v360_v32, %v362_v34  ;;  %v358_v42 = vld [vmem:[#allocation5 + $0x968] sm:$0xff] }
  0xc1   : > { %v17730_v56 = vcombine.high %v443_v49, %v445_v50  ;;  %v439_v57 = vld [vmem:[#allocation5 + $0x18c0] sm:$0xff]  ;;  %v17729_v0 = vcombine.low %v443_v49, %v445_v50  ;;  %v354_v50 = vld [vmem:[#allocation5 + $0x8a8] sm:$0xff] }
  0xc2   : > { %1568 = vmatpush1.bf16.msra.mxu0 %v17741_v38  ;;  %v441_v60 = vld [vmem:[#allocation5 + $0x1920] sm:$0xff]  ;;  %v466_v23 = vld [vmem:[#allocation5 + $0x1da8] sm:$0xff] }
  0xc3   : > { %1609 = vmatpush1.bf16.msra.mxu1 %v17615_v39  ;;  %1569 = vmatprep.subr.bf16.mxu0 %v17738_v40  ;;  %v17726_v2 = vcombine.high %v439_v57, %v441_v60  ;;  %v435_v3 = vld [vmem:[#allocation5 + $0x1800] sm:$0xff]  ;;  %v17725_v8 = vcombine.low %v439_v57, %v441_v60  ;;  %v356_v40 = vld [vmem:[#allocation5 + $0x908] sm:$0xff] }
  0xc4   : > { %1610 = vmatprep.subr.bf16.mxu1 %v17612_v44  ;;  %v437_v4 = vld [vmem:[#allocation5 + $0x1860] sm:$0xff]  ;;  %v17647_v44 = vcombine.low %v360_v32, %v362_v34  ;;  %v17644_v49 = vcombine.high %v356_v40, %v358_v42  ;;  %v350_v60 = vld [vmem:[#allocation5 + $0x7e8] sm:$0xff] }
  0xc5   : > { %v17722_v10 = vcombine.high %v435_v3, %v437_v4  ;;  %v495_v11 = vld [vmem:[#allocation5 + $0x2340] sm:$0xff]  ;;  %v17721_v17 = vcombine.low %v435_v3, %v437_v4  ;;  %v346_v4 = vld [vmem:[#allocation5 + $0x728] sm:$0xff] }
  0xc6   : > { %1570 = vmatpush1.bf16.msra.mxu0 %v17737_v46  ;;  %v497_v12 = vld [vmem:[#allocation5 + $0x23a0] sm:$0xff]  ;;  %v462_v32 = vld [vmem:[#allocation5 + $0x1ce8] sm:$0xff] }
  0xc7   : > { %1611 = vmatpush1.bf16.msra.mxu1 %v17611_v47  ;;  %1571 = vmatprep.subr.bf16.mxu0 %v17734_v48  ;;  %v17782_v19 = vcombine.high %v495_v11, %v497_v12  ;;  %v491_v21 = vld [vmem:[#allocation5 + $0x2280] sm:$0xff]  ;;  %v17781_v26 = vcombine.low %v495_v11, %v497_v12  ;;  %v352_v48 = vld [vmem:[#allocation5 + $0x848] sm:$0xff] }
  0xc8   : > { %1612 = vmatprep.subr.bf16.mxu1 %v17608_v52  ;;  %v493_v22 = vld [vmem:[#allocation5 + $0x22e0] sm:$0xff]  ;;  %v17643_v52 = vcombine.low %v356_v40, %v358_v42  ;;  %v17640_v57 = vcombine.high %v352_v48, %v354_v50  ;;  %v342_v12 = vld [vmem:[#allocation5 + $0x668] sm:$0xff] }
  0xc9   : > { %v17778_v29 = vcombine.high %v491_v21, %v493_v22  ;;  %v487_v30 = vld [vmem:[#allocation5 + $0x21c0] sm:$0xff]  ;;  %v17777_v35 = vcombine.low %v491_v21, %v493_v22  ;;  %v456_v40 = vld [vmem:[#allocation5 + $0x1bc8] sm:$0xff] }
  0xca   : > { %1572 = vmatpush1.bf16.msra.mxu0 %v17733_v54  ;;  %v489_v31 = vld [vmem:[#allocation5 + $0x2220] sm:$0xff] }
  0xcb   : > { %1613 = vmatpush1.bf16.msra.mxu1 %v17607_v55  ;;  %1573 = vmatprep.subr.bf16.mxu0 %v17730_v56  ;;  %v17774_v37 = vcombine.high %v487_v30, %v489_v31  ;;  %v483_v38 = vld [vmem:[#allocation5 + $0x2100] sm:$0xff]  ;;  %v17773_v43 = vcombine.low %v487_v30, %v489_v31  ;;  %v348_v56 = vld [vmem:[#allocation5 + $0x788] sm:$0xff] }
  0xcc   : > { %1614 = vmatprep.subr.bf16.mxu1 %v17604_v62  ;;  %v485_v39 = vld [vmem:[#allocation5 + $0x2160] sm:$0xff]  ;;  %v17639_v62 = vcombine.low %v352_v48, %v354_v50  ;;  %v17636_v3 = vcombine.high %v348_v56, %v350_v60  ;;  %v460_v30 = vld [vmem:[#allocation5 + $0x1c88] sm:$0xff] }
  0xcd   : > { %v17770_v45 = vcombine.high %v483_v38, %v485_v39  ;;  %v479_v46 = vld [vmem:[#allocation5 + $0x2040] sm:$0xff]  ;;  %v17769_v51 = vcombine.low %v483_v38, %v485_v39  ;;  %v394_v38 = vld [vmem:[#allocation5 + $0x1028] sm:$0xff]  ;;  %v17748_v39 = vcombine.high %v460_v30, %v462_v32 }
  0xce   : > { %1574 = vmatpush1.bf16.msra.mxu0 %v17729_v0  ;;  %v481_v47 = vld [vmem:[#allocation5 + $0x20a0] sm:$0xff] }
  0xcf   : > { %1615 = vmatpush1.bf16.msra.mxu1 %v17603_v1  ;;  %1575 = vmatprep.subr.bf16.mxu0 %v17726_v2  ;;  %v17766_v53 = vcombine.high %v479_v46, %v481_v47  ;;  %v475_v54 = vld [vmem:[#allocation5 + $0x1f80] sm:$0xff]  ;;  %v17765_v61 = vcombine.low %v479_v46, %v481_v47  ;;  %v344_v2 = vld [vmem:[#allocation5 + $0x6c8] sm:$0xff] }
  0xd0   : > { %1616 = vmatprep.subr.bf16.mxu1 %v17600_v6  ;;  %v477_v55 = vld [vmem:[#allocation5 + $0x1fe0] sm:$0xff]  ;;  %v17635_v6 = vcombine.low %v348_v56, %v350_v60  ;;  %v17632_v11 = vcombine.high %v344_v2, %v346_v4  ;;  %v390_v46 = vld [vmem:[#allocation5 + $0xf68] sm:$0xff] }
  0xd1   : > { %v17762_v63 = vcombine.high %v475_v54, %v477_v55  ;;  %v471_v0 = vld [vmem:[#allocation5 + $0x1ec0] sm:$0xff]  ;;  %v17761_v5 = vcombine.low %v475_v54, %v477_v55  ;;  %v452_v47 = vld [vmem:[#allocation5 + $0x1b08] sm:$0xff] }
  0xd2   : > { %1576 = vmatpush1.bf16.msra.mxu0 %v17725_v8  ;;  %v473_v1 = vld [vmem:[#allocation5 + $0x1f20] sm:$0xff]  ;;  %v386_v54 = vld [vmem:[#allocation5 + $0xea8] sm:$0xff] }
  0xd3   : > { %1617 = vmatpush1.bf16.msra.mxu1 %v17599_v9  ;;  %1577 = vmatprep.subr.bf16.mxu0 %v17722_v10  ;;  %v17758_v7 = vcombine.high %v471_v0, %v473_v1  ;;  %v467_v8 = vld [vmem:[#allocation5 + $0x1e00] sm:$0xff]  ;;  %v340_v10 = vld [vmem:[#allocation5 + $0x608] sm:$0xff]  ;;  %v17757_v13 = vcombine.low %v471_v0, %v473_v1 }
  0xd4   : > { %1618 = vmatprep.subr.bf16.mxu1 %v17596_v14  ;;  %v469_v9 = vld [vmem:[#allocation5 + $0x1e60] sm:$0xff]  ;;  %v17631_v14 = vcombine.low %v344_v2, %v346_v4  ;;  %v17628_v21 = vcombine.high %v340_v10, %v342_v12  ;;  %v17627_v25 = vcombine.low %v340_v10, %v342_v12  ;;  %v448_v55 = vld [vmem:[#allocation5 + $0x1a48] sm:$0xff] }
  0xd5   : > { %v17754_v15 = vcombine.high %v467_v8, %v469_v9  ;;  %v299_v22 = vld [vmem:[%s22178_s8 + $0x20] sm:$0xff]  ;;  %v382_v0 = vld [vmem:[#allocation5 + $0xde8] sm:$0xff] }
  0xd6   : > { %1578 = vmatpush1.bf16.msra.mxu0 %v17721_v17  ;;  %v400_v17 = vld [vmem:[#allocation5 + $0x1148] sm:$0xff] }
  0xd7   : > { %1619 = vmatpush1.bf16.msra.mxu1 %v17595_v18  ;;  %1579 = vmatprep.subr.bf16.mxu0 %v17782_v19  ;;  %v402_v18 = vld [vmem:[#allocation5 + $0x11a8] sm:$0xff] }
  0xd8   : > { %1620 = vmatprep.subr.bf16.mxu1 %v17656_v24  ;;  %v464_v19 = vld [vmem:[#allocation5 + $0x1d48] sm:$0xff]  ;;  %v17753_v24 = vcombine.low %v467_v8, %v469_v9  ;;  %v17687_v34 = vcombine.low %v400_v17, %v402_v18 }
  0xd9   : > { %v17752_v31 = vcombine.high %v464_v19, %v466_v23  ;;  %v444_v1 = vld [vmem:[#allocation5 + $0x1988] sm:$0xff] }
  0xda   : > { %1580 = vmatpush2.bf16.msra.mxu0 %v17781_v26  ;;  %v17688_v26 = vcombine.high %v400_v17, %v402_v18  ;;  %v378_v8 = vld [vmem:[#allocation5 + $0xd28] sm:$0xff] }
  0xdb   : > { %1621 = vmatpush2.bf16.msra.mxu1 %v17655_v27  ;;  %1581 = vmatprep.subr.bf16.mxu0 %v17778_v29  ;;  %v396_v27 = vld [vmem:[#allocation5 + $0x1088] sm:$0xff] }
  0xdc   : > { %1622 = vmatprep.subr.bf16.mxu1 %v17652_v33  ;;  %v398_v29 = vld [vmem:[#allocation5 + $0x10e8] sm:$0xff]  ;;  %v22214_v33 = vpack.c.bf16 %v299_v22, %v299_v22 }
  0xdd   : > { %v17683_v42 = vcombine.low %v396_v27, %v398_v29  ;;  %v440_v9 = vld [vmem:[#allocation5 + $0x18c8] sm:$0xff] }
  0xde   : > { %1582 = vmatpush2.bf16.msra.mxu0 %v17777_v35  ;;  %v17751_v35 = vcombine.low %v464_v19, %v466_v23  ;;  %v374_v17 = vld [vmem:[#allocation5 + $0xc68] sm:$0xff] }
  0xdf   : > { %1623 = vmatpush2.bf16.msra.mxu1 %v17651_v36  ;;  %1583 = vmatprep.subr.bf16.mxu0 %v17774_v37  ;;  %v17684_v36 = vcombine.high %v396_v27, %v398_v29  ;;  %v392_v37 = vld [vmem:[#allocation5 + $0xfc8] sm:$0xff] }
  0xe0   : > { %1624 = vmatprep.subr.bf16.mxu1 %v17648_v41  ;;  %v458_v41 = vld [vmem:[#allocation5 + $0x1c28] sm:$0xff]  ;;  %v17679_v50 = vcombine.low %v392_v37, %v394_v38 }
  0xe1   : > { %v17744_v48 = vcombine.high %v456_v40, %v458_v41  ;;  %v436_v18 = vld [vmem:[#allocation5 + $0x1808] sm:$0xff] }
  0xe2   : > { %1584 = vmatpush2.bf16.msra.mxu0 %v17773_v43  ;;  %v17747_v43 = vcombine.low %v460_v30, %v462_v32  ;;  %v496_v27 = vld [vmem:[#allocation5 + $0x2348] sm:$0xff] }
  0xe3   : > { %1625 = vmatpush2.bf16.msra.mxu1 %v17647_v44  ;;  %1585 = vmatprep.subr.bf16.mxu0 %v17770_v45  ;;  %v17680_v44 = vcombine.high %v392_v37, %v394_v38  ;;  %v388_v45 = vld [vmem:[#allocation5 + $0xf08] sm:$0xff] }
  0xe4   : > { %1626 = vmatprep.subr.bf16.mxu1 %v17644_v49  ;;  %v454_v49 = vld [vmem:[#allocation5 + $0x1b68] sm:$0xff]  ;;  %v17675_v60 = vcombine.low %v388_v45, %v390_v46 }
  0xe5   : > { %v17740_v56 = vcombine.high %v452_v47, %v454_v49  ;;  %v498_v30 = vld [vmem:[#allocation5 + $0x23a8] sm:$0xff] }
  0xe6   : > { %1586 = vmatpush2.bf16.msra.mxu0 %v17769_v51  ;;  %v17743_v51 = vcombine.low %v456_v40, %v458_v41  ;;  %v492_v37 = vld [vmem:[#allocation5 + $0x2288] sm:$0xff]  ;;  %v17784_v38 = vcombine.high %v496_v27, %v498_v30  ;;  %v17783_v41 = vcombine.low %v496_v27, %v498_v30 }
  0xe7   : > { %1627 = vmatpush2.bf16.msra.mxu1 %v17643_v52  ;;  %1587 = vmatprep.subr.bf16.mxu0 %v17766_v53  ;;  %v17676_v52 = vcombine.high %v388_v45, %v390_v46  ;;  %v384_v53 = vld [vmem:[#allocation5 + $0xe48] sm:$0xff] }
  0xe8   : > { %1628 = vmatprep.subr.bf16.mxu1 %v17640_v57  ;;  %v450_v57 = vld [vmem:[#allocation5 + $0x1aa8] sm:$0xff]  ;;  %v17671_v4 = vcombine.low %v384_v53, %v386_v54 }
  0xe9   : > { %v17736_v2 = vcombine.high %v448_v55, %v450_v57  ;;  %v488_v45 = vld [vmem:[#allocation5 + $0x21c8] sm:$0xff] }
  0xea   : > { %1588 = vmatpush2.bf16.msra.mxu0 %v17765_v61  ;;  %v17739_v61 = vcombine.low %v452_v47, %v454_v49  ;;  %v490_v47 = vld [vmem:[#allocation5 + $0x2228] sm:$0xff] }
  0xeb   : > { %1629 = vmatpush2.bf16.msra.mxu1 %v17639_v62  ;;  %1589 = vmatprep.subr.bf16.mxu0 %v17762_v63  ;;  %v17672_v62 = vcombine.high %v384_v53, %v386_v54  ;;  %v380_v63 = vld [vmem:[#allocation5 + $0xd88] sm:$0xff]  ;;  %v17776_v54 = vcombine.high %v488_v45, %v490_v47 }
  0xec   : > { %1630 = vmatprep.subr.bf16.mxu1 %v17636_v3  ;;  %v446_v3 = vld [vmem:[#allocation5 + $0x19e8] sm:$0xff]  ;;  %v17667_v12 = vcombine.low %v380_v63, %v382_v0 }
  0xed   : > { %v17732_v10 = vcombine.high %v444_v1, %v446_v3  ;;  %v484_v53 = vld [vmem:[#allocation5 + $0x2108] sm:$0xff] }
  0xee   : > { %1590 = vmatpush2.bf16.msra.mxu0 %v17761_v5  ;;  %v17735_v5 = vcombine.low %v448_v55, %v450_v57  ;;  %v486_v55 = vld [vmem:[#allocation5 + $0x2168] sm:$0xff]  ;;  %v17775_v57 = vcombine.low %v488_v45, %v490_v47  ;;  %v2033_v45 = vld [vmem:[#allocation5 + $0x10f0] sm:$0xff] }
  0xef   : > { %1631 = vmatpush2.bf16.msra.mxu1 %v17635_v6  ;;  %1591 = vmatprep.subr.bf16.mxu0 %v17758_v7  ;;  %v17668_v6 = vcombine.high %v380_v63, %v382_v0  ;;  %v376_v7 = vld [vmem:[#allocation5 + $0xcc8] sm:$0xff]  ;;  %v17772_v0 = vcombine.high %v484_v53, %v486_v55 }
  0xf0   : > { %1632 = vmatprep.subr.bf16.mxu1 %v17632_v11  ;;  %v442_v11 = vld [vmem:[#allocation5 + $0x1928] sm:$0xff]  ;;  %v17663_v22 = vcombine.low %v376_v7, %v378_v8 }
  0xf1   : > { %v17728_v19 = vcombine.high %v440_v9, %v442_v11  ;;  %v17727_v23 = vcombine.low %v440_v9, %v442_v11  ;;  %v480_v63 = vld [vmem:[#allocation5 + $0x2048] sm:$0xff] }
  0xf2   : > { %1592 = vmatpush2.bf16.msra.mxu0 %v17757_v13  ;;  %v17731_v13 = vcombine.low %v444_v1, %v446_v3  ;;  %v482_v1 = vld [vmem:[#allocation5 + $0x20a8] sm:$0xff]  ;;  %v17771_v3 = vcombine.low %v484_v53, %v486_v55  ;;  %v2029_v53 = vld [vmem:[#allocation5 + $0x1030] sm:$0xff] }
  0xf3   : > { %1633 = vmatpush2.bf16.msra.mxu1 %v17631_v14  ;;  %1593 = vmatprep.subr.bf16.mxu0 %v17754_v15  ;;  %v17664_v14 = vcombine.high %v376_v7, %v378_v8  ;;  %v372_v15 = vld [vmem:[#allocation5 + $0xc08] sm:$0xff]  ;;  %v17768_v8 = vcombine.high %v480_v63, %v482_v1  ;;  %v17767_v11 = vcombine.low %v480_v63, %v482_v1  ;;  %v2025_v63 = vld [vmem:[#allocation5 + $0xf70] sm:$0xff] }
  0xf4   : > { %1634 = vmatprep.subr.bf16.mxu1 %v17628_v21  ;;  %v438_v21 = vld [vmem:[#allocation5 + $0x1868] sm:$0xff] }
  0xf5   : > { %v17724_v29 = vcombine.high %v436_v18, %v438_v21  ;;  %v17723_v32 = vcombine.low %v436_v18, %v438_v21  ;;  %v476_v7 = vld [vmem:[#allocation5 + $0x1f88] sm:$0xff] }
  0xf6   : > { %1594 = vmatpush2.bf16.msra.mxu0 %v17753_v24  ;;  %v17660_v24 = vcombine.high %v372_v15, %v374_v17  ;;  %v478_v9 = vld [vmem:[#allocation5 + $0x1fe8] sm:$0xff] }
  0xf7   : > { %1635 = vmatpush2.bf16.msra.mxu1 %v17627_v25  ;;  %1645 = vmatprep.subr.bf16.mxu0 %v17688_v26  ;;  %v432_v25 = vld [vmem:[#allocation5 + $0x1748] sm:$0xff]  ;;  %v17763_v21 = vcombine.low %v476_v7, %v478_v9 }
  0xf8   : > { %1686 = vmatprep.subr.bf16.mxu1 %v17752_v31  ;;  %v434_v26 = vld [vmem:[#allocation5 + $0x17a8] sm:$0xff]  ;;  %v17659_v31 = vcombine.low %v372_v15, %v374_v17  ;;  %v17764_v17 = vcombine.high %v476_v7, %v478_v9  ;;  %v2021_v7 = vld [vmem:[#allocation5 + $0xeb0] sm:$0xff] }
  0xf9   : > { %1596 = vmatmul.mubr.bf16.vlgmr.msra.gmra.mxu0 %v22214_v33  ;;  %v17719_v40 = vcombine.low %v432_v25, %v434_v26  ;;  %v472_v15 = vld [vmem:[#allocation5 + $0x1ec8] sm:$0xff] }
  0xfa   : > { %1637 = vmatmul.mubr.bf16.vlgmr.msra.gmra.mxu1 %v22202_v16  ;;  %1646 = vmatpush1.bf16.msra.mxu0 %v17687_v34  ;;  %v17720_v34 = vcombine.high %v432_v25, %v434_v26  ;;  %v474_v18 = vld [vmem:[#allocation5 + $0x1f28] sm:$0xff] }
  0xfb   : > { %1687 = vmatpush1.bf16.msra.mxu1 %v17751_v35  ;;  %1647 = vmatprep.subr.bf16.mxu0 %v17684_v36  ;;  %v428_v35 = vld [vmem:[#allocation5 + $0x1688] sm:$0xff]  ;;  %v17760_v26 = vcombine.high %v472_v15, %v474_v18  ;;  %v17759_v30 = vcombine.low %v472_v15, %v474_v18  ;;  %v2017_v15 = vld [vmem:[#allocation5 + $0xdf0] sm:$0xff] }
  0xfc   : > { %1688 = vmatprep.subr.bf16.mxu1 %v17748_v39  ;;  %1677 = vmatprep.mubr.bf16.mxu0 %v22196_v59  ;;  %v430_v36 = vld [vmem:[#allocation5 + $0x16e8] sm:$0xff] }
  0xfd   : > { %1718 = vmatprep.mubr.bf16.mxu1 %v22207_v28  ;;  %v494_v39 = vld [vmem:[#allocation5 + $0x22e8] sm:$0xff] }
  0xfe   : > { %1648 = vmatpush1.bf16.msra.mxu0 %v17683_v42  ;;  %v17716_v42 = vcombine.high %v428_v35, %v430_v36  ;;  %v17780_v46 = vcombine.high %v492_v37, %v494_v39  ;;  %v17779_v49 = vcombine.low %v492_v37, %v494_v39  ;;  %v468_v25 = vld [vmem:[#allocation5 + $0x1e08] sm:$0xff]  ;;  %v2037_v37 = vld [vmem:[#allocation5 + $0x11b0] sm:$0xff] }
  0xff   : > { %1689 = vmatpush1.bf16.msra.mxu1 %v17747_v43  ;;  %1649 = vmatprep.subr.bf16.mxu0 %v17680_v44  ;;  %v424_v43 = vld [vmem:[#allocation5 + $0x15c8] sm:$0xff] }
 0x100   : > { %1690 = vmatprep.subr.bf16.mxu1 %v17744_v48  ;;  %v426_v44 = vld [vmem:[#allocation5 + $0x1628] sm:$0xff]  ;;  %v17715_v48 = vcombine.low %v428_v35, %v430_v36  ;;  %v2035_v35 = vld [vmem:[#allocation5 + $0x1150] sm:$0xff] }
 0x101   : > { %v470_v27 = vld [vmem:[#allocation5 + $0x1e68] sm:$0xff]  ;;  %v17877_v47 = vcombine.low %v2035_v35, %v2037_v37 }
 0x102   : > { %1650 = vmatpush1.bf16.msra.mxu0 %v17679_v50  ;;  %v17712_v50 = vcombine.high %v424_v43, %v426_v44  ;;  %v17756_v36 = vcombine.high %v468_v25, %v470_v27  ;;  %v17755_v39 = vcombine.low %v468_v25, %v470_v27  ;;  %v2013_v25 = vld [vmem:[#allocation5 + $0xd30] sm:$0xff] }
 0x103   : > { %1691 = vmatpush1.bf16.msra.mxu1 %v17743_v51  ;;  %1651 = vmatprep.subr.bf16.mxu0 %v17676_v52  ;;  %v420_v51 = vld [vmem:[#allocation5 + $0x1508] sm:$0xff] }
 0x104   : > { %1692 = vmatprep.subr.bf16.mxu1 %v17740_v56  ;;  %v422_v52 = vld [vmem:[#allocation5 + $0x1568] sm:$0xff]  ;;  %v17711_v56 = vcombine.low %v424_v43, %v426_v44  ;;  %v2031_v43 = vld [vmem:[#allocation5 + $0x1090] sm:$0xff]  ;;  %v17878_v44 = vcombine.high %v2035_v35, %v2037_v37 }
 0x105   : > { %v17873_v55 = vcombine.low %v2031_v43, %v2033_v45  ;;  %v2009_v35 = vld [vmem:[#allocation5 + $0xc70] sm:$0xff] }
 0x106   : > { %1652 = vmatpush1.bf16.msra.mxu0 %v17675_v60  ;;  %v17708_v60 = vcombine.high %v420_v51, %v422_v52 }
 0x107   : > { %1693 = vmatpush1.bf16.msra.mxu1 %v17739_v61  ;;  %1653 = vmatprep.subr.bf16.mxu0 %v17672_v62  ;;  %v416_v61 = vld [vmem:[#allocation5 + $0x1448] sm:$0xff] }
 0x108   : > { %1694 = vmatprep.subr.bf16.mxu1 %v17736_v2  ;;  %v418_v62 = vld [vmem:[#allocation5 + $0x14a8] sm:$0xff]  ;;  %v17707_v2 = vcombine.low %v420_v51, %v422_v52  ;;  %v2027_v51 = vld [vmem:[#allocation5 + $0xfd0] sm:$0xff]  ;;  %v17874_v52 = vcombine.high %v2031_v43, %v2033_v45 }
 0x109   : > { %v17869_v1 = vcombine.low %v2027_v51, %v2029_v53  ;;  %v2069_v43 = vld [vmem:[#allocation5 + $0x17b0] sm:$0xff] }
 0x10a   : > { %1654 = vmatpush1.bf16.msra.mxu0 %v17671_v4  ;;  %v17704_v4 = vcombine.high %v416_v61, %v418_v62 }
 0x10b   : > { %1695 = vmatpush1.bf16.msra.mxu1 %v17735_v5  ;;  %1655 = vmatprep.subr.bf16.mxu0 %v17668_v6  ;;  %v412_v5 = vld [vmem:[#allocation5 + $0x1388] sm:$0xff] }
 0x10c   : > { %1696 = vmatprep.subr.bf16.mxu1 %v17732_v10  ;;  %v414_v6 = vld [vmem:[#allocation5 + $0x13e8] sm:$0xff]  ;;  %v17703_v10 = vcombine.low %v416_v61, %v418_v62  ;;  %v2023_v61 = vld [vmem:[#allocation5 + $0xf10] sm:$0xff]  ;;  %v17870_v62 = vcombine.high %v2027_v51, %v2029_v53 }
 0x10d   : > { %v17865_v9 = vcombine.low %v2023_v61, %v2025_v63  ;;  %v2065_v51 = vld [vmem:[#allocation5 + $0x16f0] sm:$0xff] }
 0x10e   : > { %1656 = vmatpush1.bf16.msra.mxu0 %v17667_v12  ;;  %v17700_v12 = vcombine.high %v412_v5, %v414_v6 }
 0x10f   : > { %1697 = vmatpush1.bf16.msra.mxu1 %v17731_v13  ;;  %1657 = vmatprep.subr.bf16.mxu0 %v17664_v14  ;;  %v408_v13 = vld [vmem:[#allocation5 + $0x12c8] sm:$0xff] }
 0x110   : > { %1698 = vmatprep.subr.bf16.mxu1 %v17728_v19  ;;  %v410_v14 = vld [vmem:[#allocation5 + $0x1328] sm:$0xff]  ;;  %v17699_v19 = vcombine.low %v412_v5, %v414_v6  ;;  %v2019_v5 = vld [vmem:[#allocation5 + $0xe50] sm:$0xff]  ;;  %v17866_v6 = vcombine.high %v2023_v61, %v2025_v63 }
 0x111   : > { %v17861_v18 = vcombine.low %v2019_v5, %v2021_v7  ;;  %v2061_v61 = vld [vmem:[#allocation5 + $0x1630] sm:$0xff] }
 0x112   : > { %1658 = vmatpush1.bf16.msra.mxu0 %v17663_v22  ;;  %v17696_v22 = vcombine.high %v408_v13, %v410_v14 }
 0x113   : > { %1699 = vmatpush1.bf16.msra.mxu1 %v17727_v23  ;;  %1659 = vmatprep.subr.bf16.mxu0 %v17660_v24  ;;  %v404_v23 = vld [vmem:[#allocation5 + $0x1208] sm:$0xff] }
 0x114   : > { %1700 = vmatprep.subr.bf16.mxu1 %v17724_v29  ;;  %v406_v24 = vld [vmem:[#allocation5 + $0x1268] sm:$0xff]  ;;  %v17695_v29 = vcombine.low %v408_v13, %v410_v14  ;;  %v2015_v13 = vld [vmem:[#allocation5 + $0xd90] sm:$0xff]  ;;  %v17862_v14 = vcombine.high %v2019_v5, %v2021_v7 }
 0x115   : > { %v17857_v27 = vcombine.low %v2015_v13, %v2017_v15  ;;  %v2057_v5 = vld [vmem:[#allocation5 + $0x1570] sm:$0xff] }
 0x116   : > { %1660 = vmatpush1.bf16.msra.mxu0 %v17659_v31  ;;  %v17692_v31 = vcombine.high %v404_v23, %v406_v24 }
 0x117   : > { %1701 = vmatpush1.bf16.msra.mxu1 %v17723_v32  ;;  %1661 = vmatprep.subr.bf16.mxu0 %v17720_v34  ;;  %v1971_v32 = vld [vmem:[#allocation5 + $0x550] sm:$0xff] }
 0x118   : > { %1702 = vmatprep.subr.bf16.mxu1 %v17784_v38  ;;  %v1973_v34 = vld [vmem:[#allocation5 + $0x5b0] sm:$0xff]  ;;  %v17691_v38 = vcombine.low %v404_v23, %v406_v24  ;;  %v17858_v24 = vcombine.high %v2015_v13, %v2017_v15 }
 0x119   : > { %v2011_v23 = vld [vmem:[#allocation5 + $0xcd0] sm:$0xff] }
 0x11a   : > { %1662 = vmatpush2.bf16.msra.mxu0 %v17719_v40  ;;  %v17814_v40 = vcombine.high %v1971_v32, %v1973_v34  ;;  %v17853_v37 = vcombine.low %v2011_v23, %v2013_v25  ;;  %v2053_v13 = vld [vmem:[#allocation5 + $0x14b0] sm:$0xff] }
 0x11b   : > { %1703 = vmatpush2.bf16.msra.mxu1 %v17783_v41  ;;  %1663 = vmatprep.subr.bf16.mxu0 %v17716_v42  ;;  %v1967_v41 = vld [vmem:[#allocation5 + $0x490] sm:$0xff] }
 0x11c   : > { %1704 = vmatprep.subr.bf16.mxu1 %v17780_v46  ;;  %v1969_v42 = vld [vmem:[#allocation5 + $0x4f0] sm:$0xff]  ;;  %v17813_v46 = vcombine.low %v1971_v32, %v1973_v34  ;;  %v17854_v34 = vcombine.high %v2011_v23, %v2013_v25 }
 0x11d   : > { %v2007_v32 = vld [vmem:[#allocation5 + $0xc10] sm:$0xff] }
 0x11e   : > { %1664 = vmatpush2.bf16.msra.mxu0 %v17715_v48  ;;  %v17810_v48 = vcombine.high %v1967_v41, %v1969_v42  ;;  %v17849_v45 = vcombine.low %v2007_v32, %v2009_v35  ;;  %v2049_v23 = vld [vmem:[#allocation5 + $0x13f0] sm:$0xff] }
 0x11f   : > { %1705 = vmatpush2.bf16.msra.mxu1 %v17779_v49  ;;  %1665 = vmatprep.subr.bf16.mxu0 %v17712_v50  ;;  %v1963_v49 = vld [vmem:[#allocation5 + $0x3d0] sm:$0xff] }
 0x120   : > { %1706 = vmatprep.subr.bf16.mxu1 %v17776_v54  ;;  %v1965_v50 = vld [vmem:[#allocation5 + $0x430] sm:$0xff]  ;;  %v17809_v54 = vcombine.low %v1967_v41, %v1969_v42  ;;  %v17850_v42 = vcombine.high %v2007_v32, %v2009_v35  ;;  %v501_v35 = vlaneseq }
 0x121   : > { %v2067_v41 = vld [vmem:[#allocation5 + $0x1750] sm:$0xff] }
 0x122   : > { %1666 = vmatpush2.bf16.msra.mxu0 %v17711_v56  ;;  %v17806_v56 = vcombine.high %v1963_v49, %v1965_v50  ;;  %v17909_v53 = vcombine.low %v2067_v41, %v2069_v43  ;;  %v2045_v32 = vld [vmem:[#allocation5 + $0x1330] sm:$0xff] }
 0x123   : > { %1707 = vmatpush2.bf16.msra.mxu1 %v17775_v57  ;;  %1667 = vmatprep.subr.bf16.mxu0 %v17708_v60  ;;  %v1959_v57 = vld [vmem:[#allocation5 + $0x310] sm:$0xff] }
 0x124   : > { %1708 = vmatprep.subr.bf16.mxu1 %v17772_v0  ;;  %v1961_v60 = vld [vmem:[#allocation5 + $0x370] sm:$0xff]  ;;  %v17805_v0 = vcombine.low %v1963_v49, %v1965_v50  ;;  %v17910_v50 = vcombine.high %v2067_v41, %v2069_v43 }
 0x125   : > { %v2063_v49 = vld [vmem:[#allocation5 + $0x1690] sm:$0xff] }
 0x126   : > { %1668 = vmatpush2.bf16.msra.mxu0 %v17707_v2  ;;  %v17802_v2 = vcombine.high %v1959_v57, %v1961_v60  ;;  %v17905_v63 = vcombine.low %v2063_v49, %v2065_v51 }
 0x127   : > { %1709 = vmatpush2.bf16.msra.mxu1 %v17771_v3  ;;  %1669 = vmatprep.subr.bf16.mxu0 %v17704_v4  ;;  %v1955_v3 = vld [vmem:[#allocation5 + $0x250] sm:$0xff] }
 0x128   : > { %1710 = vmatprep.subr.bf16.mxu1 %v17768_v8  ;;  %v1957_v4 = vld [vmem:[#allocation5 + $0x2b0] sm:$0xff]  ;;  %v17801_v8 = vcombine.low %v1959_v57, %v1961_v60  ;;  %v17906_v60 = vcombine.high %v2063_v49, %v2065_v51  ;;  %v1972_v49 = vld [vmem:[#allocation5 + $0x558] sm:$0xff] }
 0x129   : > { %v2059_v57 = vld [vmem:[#allocation5 + $0x15d0] sm:$0xff]  ;;  %v1974_v51 = vld [vmem:[#allocation5 + $0x5b8] sm:$0xff] }
 0x12a   : > { %1670 = vmatpush2.bf16.msra.mxu0 %v17703_v10  ;;  %v17798_v10 = vcombine.high %v1955_v3, %v1957_v4  ;;  %v17901_v7 = vcombine.low %v2059_v57, %v2061_v61 }
 0x12b   : > { %1711 = vmatpush2.bf16.msra.mxu1 %v17767_v11  ;;  %1671 = vmatprep.subr.bf16.mxu0 %v17700_v12  ;;  %v1951_v11 = vld [vmem:[#allocation5 + $0x190] sm:$0xff] }
 0x12c   : > { %1712 = vmatprep.subr.bf16.mxu1 %v17764_v17  ;;  %v1953_v12 = vld [vmem:[#allocation5 + $0x1f0] sm:$0xff]  ;;  %v17797_v17 = vcombine.low %v1955_v3, %v1957_v4  ;;  %v17902_v4 = vcombine.high %v2059_v57, %v2061_v61  ;;  %v1968_v61 = vld [vmem:[#allocation5 + $0x498] sm:$0xff] }
 0x12d   : > { %v2055_v3 = vld [vmem:[#allocation5 + $0x1510] sm:$0xff] }
 0x12e   : > { %1672 = vmatpush2.bf16.msra.mxu0 %v17699_v19  ;;  %v17794_v19 = vcombine.high %v1951_v11, %v1953_v12  ;;  %v17897_v15 = vcombine.low %v2055_v3, %v2057_v5  ;;  %v2095_v57 = vld [vmem:[#allocation5 + $0x1c90] sm:$0xff] }
 0x12f   : > { %1713 = vmatpush2.bf16.msra.mxu1 %v17763_v21  ;;  %1673 = vmatprep.subr.bf16.mxu0 %v17696_v22  ;;  %v1947_v21 = vld [vmem:[#allocation5 + $0xd0] sm:$0xff] }
 0x130   : > { %1714 = vmatprep.subr.bf16.mxu1 %v17760_v26  ;;  %v1949_v22 = vld [vmem:[#allocation5 + $0x130] sm:$0xff]  ;;  %v17793_v26 = vcombine.low %v1951_v11, %v1953_v12  ;;  %v17898_v12 = vcombine.high %v2055_v3, %v2057_v5  ;;  %v17815_v5 = vcombine.low %v1972_v49, %v1974_v51 }
 0x131   : > { %v2051_v11 = vld [vmem:[#allocation5 + $0x1450] sm:$0xff] }
 0x132   : > { %1674 = vmatpush2.bf16.msra.mxu0 %v17695_v29  ;;  %v17790_v29 = vcombine.high %v1947_v21, %v1949_v22  ;;  %v17893_v25 = vcombine.low %v2051_v11, %v2053_v13  ;;  %v2091_v3 = vld [vmem:[#allocation5 + $0x1bd0] sm:$0xff] }
 0x133   : > { %1715 = vmatpush2.bf16.msra.mxu1 %v17759_v30  ;;  %1675 = vmatprep.subr.bf16.mxu0 %v17692_v31  ;;  %v1943_v30 = vld [vmem:[#allocation5 + $0x10] sm:$0xff] }
 0x134   : > { %1716 = vmatprep.subr.bf16.mxu1 %v17756_v36  ;;  %v1945_v31 = vld [vmem:[#allocation5 + $0x70] sm:$0xff]  ;;  %v17789_v36 = vcombine.low %v1947_v21, %v1949_v22  ;;  %v17894_v22 = vcombine.high %v2051_v11, %v2053_v13 }
 0x135   : > { %v2047_v21 = vld [vmem:[#allocation5 + $0x1390] sm:$0xff] }
 0x136   : > { %1676 = vmatpush2.bf16.msra.mxu0 %v17691_v38  ;;  %v17786_v38 = vcombine.high %v1943_v30, %v1945_v31 }
 0x137   : > { %1717 = vmatpush2.bf16.msra.mxu1 %v17755_v39  ;;  %3117 = vmatprep.subr.bf16.mxu0 %v17814_v40  ;;  %v2003_v39 = vld [vmem:[#allocation5 + $0xb50] sm:$0xff] }
 0x138   : > { %3158 = vmatprep.subr.bf16.mxu1 %v17878_v44  ;;  %v2005_v40 = vld [vmem:[#allocation5 + $0xbb0] sm:$0xff]  ;;  %v17785_v44 = vcombine.low %v1943_v30, %v1945_v31  ;;  %v17890_v31 = vcombine.high %v2047_v21, %v2049_v23 }
 0x139   : > { %1678 = vmatmul.mubr.bf16.vlgmr.msra.gmra.mxu0 %v22205_v20  ;;  %v2043_v30 = vld [vmem:[#allocation5 + $0x12d0] sm:$0xff] }
 0x13a   : > { %1719 = vmatmul.mubr.bf16.vlgmr.msra.gmra.mxu1 %v22214_v33  ;;  %3118 = vmatpush1.bf16.msra.mxu0 %v17813_v46  ;;  %v17846_v46 = vcombine.high %v2003_v39, %v2005_v40  ;;  %v17886_v41 = vcombine.high %v2043_v30, %v2045_v32 }
 0x13b   : > { %3159 = vmatpush1.bf16.msra.mxu1 %v17877_v47  ;;  %3119 = vmatprep.subr.bf16.mxu0 %v17810_v48  ;;  %v1999_v47 = vld [vmem:[#allocation5 + $0xa90] sm:$0xff] }
 0x13c   : > { %3160 = vmatprep.subr.bf16.mxu1 %v17874_v52  ;;  %3149 = vmatprep.mubr.bf16.mxu0 %v22194_v58  ;;  %v2001_v48 = vld [vmem:[#allocation5 + $0xaf0] sm:$0xff]  ;;  %v17845_v52 = vcombine.low %v2003_v39, %v2005_v40 }
 0x13d   : > { %3190 = vmatprep.mubr.bf16.mxu1 %v22196_v59  ;;  %v1977_v39 = vld [vmem:[#allocation5 + $0x670] sm:$0xff] }
 0x13e   : > { %3120 = vmatpush1.bf16.msra.mxu0 %v17809_v54  ;;  %v17842_v54 = vcombine.high %v1999_v47, %v2001_v48  ;;  %v2039_v40 = vld [vmem:[#allocation5 + $0x1210] sm:$0xff] }
 0x13f   : > { %3161 = vmatpush1.bf16.msra.mxu1 %v17873_v55  ;;  %3121 = vmatprep.subr.bf16.mxu0 %v17806_v56  ;;  %v1995_v55 = vld [vmem:[#allocation5 + $0x9d0] sm:$0xff] }
 0x140   : > { %3162 = vmatprep.subr.bf16.mxu1 %v17870_v62  ;;  %v1997_v56 = vld [vmem:[#allocation5 + $0xa30] sm:$0xff]  ;;  %v17841_v62 = vcombine.low %v1999_v47, %v2001_v48 }
 0x141   : > { %v2099_v47 = vld [vmem:[#allocation5 + $0x1d50] sm:$0xff] }
 0x142   : > { %3122 = vmatpush1.bf16.msra.mxu0 %v17805_v0  ;;  %v17838_v0 = vcombine.high %v1995_v55, %v1997_v56  ;;  %v2101_v48 = vld [vmem:[#allocation5 + $0x1db0] sm:$0xff] }
 0x143   : > { %3163 = vmatpush1.bf16.msra.mxu1 %v17869_v1  ;;  %3123 = vmatprep.subr.bf16.mxu0 %v17802_v2  ;;  %v1991_v1 = vld [vmem:[#allocation5 + $0x910] sm:$0xff] }
 0x144   : > { %3164 = vmatprep.subr.bf16.mxu1 %v17866_v6  ;;  %v1993_v2 = vld [vmem:[#allocation5 + $0x970] sm:$0xff]  ;;  %v17837_v6 = vcombine.low %v1995_v55, %v1997_v56  ;;  %v17942_v56 = vcombine.high %v2099_v47, %v2101_v48 }
 0x146   : > { %3124 = vmatpush1.bf16.msra.mxu0 %v17801_v8  ;;  %v17834_v8 = vcombine.high %v1991_v1, %v1993_v2 }
 0x147   : > { %3165 = vmatpush1.bf16.msra.mxu1 %v17865_v9  ;;  %3125 = vmatprep.subr.bf16.mxu0 %v17798_v10  ;;  %v1987_v9 = vld [vmem:[#allocation5 + $0x850] sm:$0xff] }
 0x148   : > { %3166 = vmatprep.subr.bf16.mxu1 %v17862_v14  ;;  %v1989_v10 = vld [vmem:[#allocation5 + $0x8b0] sm:$0xff]  ;;  %v17833_v14 = vcombine.low %v1991_v1, %v1993_v2  ;;  %v17941_v2 = vcombine.low %v2099_v47, %v2101_v48 }
 0x14a   : > { %3126 = vmatpush1.bf16.msra.mxu0 %v17797_v17  ;;  %v17830_v17 = vcombine.high %v1987_v9, %v1989_v10 }
 0x14b   : > { %3167 = vmatpush1.bf16.msra.mxu1 %v17861_v18  ;;  %3127 = vmatprep.subr.bf16.mxu0 %v17794_v19  ;;  %v1983_v18 = vld [vmem:[#allocation5 + $0x790] sm:$0xff] }
 0x14c   : > { %3168 = vmatprep.subr.bf16.mxu1 %v17858_v24  ;;  %v1985_v19 = vld [vmem:[#allocation5 + $0x7f0] sm:$0xff]  ;;  %v17829_v24 = vcombine.low %v1987_v9, %v1989_v10 }
 0x14e   : > { %3128 = vmatpush1.bf16.msra.mxu0 %v17793_v26  ;;  %v17826_v26 = vcombine.high %v1983_v18, %v1985_v19 }
 0x14f   : > { %3169 = vmatpush1.bf16.msra.mxu1 %v17857_v27  ;;  %3129 = vmatprep.subr.bf16.mxu0 %v17790_v29  ;;  %v1979_v27 = vld [vmem:[#allocation5 + $0x6d0] sm:$0xff] }
 0x150   : > { %3170 = vmatprep.subr.bf16.mxu1 %v17854_v34  ;;  %v1981_v29 = vld [vmem:[#allocation5 + $0x730] sm:$0xff]  ;;  %v17825_v34 = vcombine.low %v1983_v18, %v1985_v19 }
 0x151   : > { %v17821_v43 = vcombine.low %v1979_v27, %v1981_v29 }
 0x152   : > { %3130 = vmatpush1.bf16.msra.mxu0 %v17789_v36  ;;  %v17889_v36 = vcombine.low %v2047_v21, %v2049_v23  ;;  %v1962_v23 = vld [vmem:[#allocation5 + $0x378] sm:$0xff] }
 0x153   : > { %3171 = vmatpush1.bf16.msra.mxu1 %v17853_v37  ;;  %3131 = vmatprep.subr.bf16.mxu0 %v17786_v38  ;;  %v17822_v37 = vcombine.high %v1979_v27, %v1981_v29  ;;  %v1975_v38 = vld [vmem:[#allocation5 + $0x610] sm:$0xff] }
 0x154   : > { %3172 = vmatprep.subr.bf16.mxu1 %v17850_v42  ;;  %v2041_v42 = vld [vmem:[#allocation5 + $0x1270] sm:$0xff] }
 0x155   : > { %v17881_v55 = vcombine.low %v2039_v40, %v2041_v42 }
 0x156   : > { %3132 = vmatpush1.bf16.msra.mxu0 %v17785_v44  ;;  %v22224_v44 = vshrl.u32 %v501_v35, 7  ;;  %v2085_v35 = vld [vmem:[#allocation5 + $0x1ab0] sm:$0xff] }
 0x157   : > { %3173 = vmatpush1.bf16.msra.mxu1 %v17849_v45  ;;  %3133 = vmatprep.subr.bf16.mxu0 %v17846_v46  ;;  %v17885_v45 = vcombine.low %v2043_v30, %v2045_v32  ;;  %v17818_v46 = vcombine.high %v1975_v38, %v1977_v39 }
 0x158   : > { %3174 = vmatprep.subr.bf16.mxu1 %v17910_v50  ;;  %v17882_v50 = vcombine.high %v2039_v40, %v2041_v42  ;;  %v1958_v40 = vld [vmem:[#allocation5 + $0x2b8] sm:$0xff] }
 0x15a   : > { %3134 = vmatpush2.bf16.msra.mxu0 %v17845_v52  ;;  %v499_v52 = vld [vmem:[#allocation7] sm:$0xf] }
 0x15b   : > { %3175 = vmatpush2.bf16.msra.mxu1 %v17909_v53  ;;  %3135 = vmatprep.subr.bf16.mxu0 %v17842_v54  ;;  %v17817_v53 = vcombine.low %v1975_v38, %v1977_v39  ;;  %v22227_v54 = vsub.s32 0, %v22224_v44  ;;  %v1956_v39 = vld [vmem:[#allocation5 + $0x258] sm:$0xff] }
 0x15c   : > { %3176 = vmatprep.subr.bf16.mxu1 %v17906_v60  ;;  %v2097_v60 = vld [vmem:[#allocation5 + $0x1cf0] sm:$0xff] }
 0x15d   : > { %v504_v1 = vrot.slane %v499_v52, %v22227_v54 }
 0x15e   : > { %3136 = vmatpush2.bf16.msra.mxu0 %v17841_v62  ;;  %v17816_v62 = vcombine.high %v1972_v49, %v1974_v51  ;;  %v1952_v49 = vld [vmem:[#allocation5 + $0x198] sm:$0xff]  ;;  %v17800_v51 = vcombine.high %v1956_v39, %v1958_v40 }
 0x15f   : > { %3177 = vmatpush2.bf16.msra.mxu1 %v17905_v63  ;;  %3137 = vmatprep.subr.bf16.mxu0 %v17838_v0  ;;  %v22230_v63 = vsub.s32 1, %v22224_v44  ;;  %v1970_v0 = vld [vmem:[#allocation5 + $0x4f8] sm:$0xff] }
 0x160   : > { %3178 = vmatprep.subr.bf16.mxu1 %v17902_v4  ;;  %v2093_v4 = vld [vmem:[#allocation5 + $0x1c30] sm:$0xff]  ;;  %v17812_v10 = vcombine.high %v1968_v61, %v1970_v0  ;;  %v17811_v19 = vcombine.low %v1968_v61, %v1970_v0  ;;  %v1950_v61 = vld [vmem:[#allocation5 + $0x138] sm:$0xff] }
 0x161   : > { %v508_v9 = vrot.slane %v499_v52, %v22230_v63  ;;  %v17934_v21 = vcombine.high %v2091_v3, %v2093_v4  ;;  %v17933_v32 = vcombine.low %v2091_v3, %v2093_v4 }
 0x162   : > { %3138 = vmatpush2.bf16.msra.mxu0 %v17837_v6  ;;  %v17938_v6 = vcombine.high %v2095_v57, %v2097_v60 }
 0x163   : > { %3179 = vmatpush2.bf16.msra.mxu1 %v17901_v7  ;;  %3139 = vmatprep.subr.bf16.mxu0 %v17834_v8  ;;  %v1964_v7 = vld [vmem:[#allocation5 + $0x3d8] sm:$0xff] }
 0x164   : > { %3180 = vmatprep.subr.bf16.mxu1 %v17898_v12  ;;  %v1966_v8 = vld [vmem:[#allocation5 + $0x438] sm:$0xff] }
 0x165   : > { %v17808_v27 = vcombine.high %v1964_v7, %v1966_v8 }
 0x166   : > { %3140 = vmatpush2.bf16.msra.mxu0 %v17833_v14  ;;  %v17937_v14 = vcombine.low %v2095_v57, %v2097_v60  ;;  %v1948_v60 = vld [vmem:[#allocation5 + $0xd8] sm:$0xff] }
 0x167   : > { %3181 = vmatpush2.bf16.msra.mxu1 %v17897_v15  ;;  %3141 = vmatprep.subr.bf16.mxu0 %v17830_v17  ;;  %v2087_v15 = vld [vmem:[#allocation5 + $0x1b10] sm:$0xff] }
 0x168   : > { %3182 = vmatprep.subr.bf16.mxu1 %v17894_v22  ;;  %v2089_v17 = vld [vmem:[#allocation5 + $0x1b70] sm:$0xff]  ;;  %v1960_v22 = vld [vmem:[#allocation5 + $0x318] sm:$0xff] }
 0x169   : > { %v17930_v38 = vcombine.high %v2087_v15, %v2089_v17  ;;  %v17804_v42 = vcombine.high %v1960_v22, %v1962_v23  ;;  %v17803_v47 = vcombine.low %v1960_v22, %v1962_v23  ;;  %v2000_v23 = vld [vmem:[#allocation5 + $0xa98] sm:$0xff] }
 0x16a   : > { %3142 = vmatpush2.bf16.msra.mxu0 %v17829_v24 }
 0x16b   : > { %3183 = vmatpush2.bf16.msra.mxu1 %v17893_v25  ;;  %3143 = vmatprep.subr.bf16.mxu0 %v17826_v26 }
 0x16c   : > { %3184 = vmatprep.subr.bf16.mxu1 %v17890_v31 }
 0x16e   : > { %3144 = vmatpush2.bf16.msra.mxu0 %v17825_v34  ;;  %v2083_v34 = vld [vmem:[#allocation5 + $0x1a50] sm:$0xff] }
 0x16f   : > { %3185 = vmatpush2.bf16.msra.mxu1 %v17889_v36  ;;  %3145 = vmatprep.subr.bf16.mxu0 %v17822_v37  ;;  %v17807_v37 = vcombine.low %v1964_v7, %v1966_v8  ;;  %v17926_v48 = vcombine.high %v2083_v34, %v2085_v35  ;;  %v17925_v52 = vcombine.low %v2083_v34, %v2085_v35  ;;  %v1996_v35 = vld [vmem:[#allocation5 + $0x9d8] sm:$0xff] }
 0x170   : > { %3186 = vmatprep.subr.bf16.mxu1 %v17886_v41  ;;  %v17792_v7 = vcombine.high %v1948_v60, %v1950_v61 }
 0x172   : > { %3146 = vmatpush2.bf16.msra.mxu0 %v17821_v43  ;;  %v17929_v43 = vcombine.low %v2087_v15, %v2089_v17 }
 0x173   : > { %3187 = vmatpush2.bf16.msra.mxu1 %v17885_v45  ;;  %3147 = vmatprep.subr.bf16.mxu0 %v17818_v46  ;;  %v2079_v45 = vld [vmem:[#allocation5 + $0x1990] sm:$0xff] }
 0x174   : > { %3188 = vmatprep.subr.bf16.mxu1 %v17882_v50  ;;  %v2081_v46 = vld [vmem:[#allocation5 + $0x19f0] sm:$0xff]  ;;  %v1954_v50 = vld [vmem:[#allocation5 + $0x1f8] sm:$0xff] }
 0x175   : > { %v17922_v57 = vcombine.high %v2079_v45, %v2081_v46  ;;  %v17921_v0 = vcombine.low %v2079_v45, %v2081_v46  ;;  %v17795_v3 = vcombine.low %v1952_v49, %v1954_v50  ;;  %v1994_v45 = vld [vmem:[#allocation5 + $0x978] sm:$0xff] }
 0x176   : > { %3148 = vmatpush2.bf16.msra.mxu0 %v17817_v53  ;;  %v2075_v53 = vld [vmem:[#allocation5 + $0x18d0] sm:$0xff] }
 0x177   : > { %3189 = vmatpush2.bf16.msra.mxu1 %v17881_v55  ;;  %3199 = vmatprep.subr.bf16.mxu0 %v17942_v56  ;;  %v2077_v55 = vld [vmem:[#allocation5 + $0x1930] sm:$0xff]  ;;  %v17799_v56 = vcombine.low %v1956_v39, %v1958_v40 }
 0x178   : > { %3240 = vmatprep.subr.bf16.mxu1 %v17816_v62  ;;  %v17796_v62 = vcombine.high %v1952_v49, %v1954_v50  ;;  %v17918_v4 = vcombine.high %v2075_v53, %v2077_v55  ;;  %v17917_v8 = vcombine.low %v2075_v53, %v2077_v55  ;;  %v2119_v39 = vld [vmem:[#allocation5 + $0x2110] sm:$0xff]  ;;  %v1990_v53 = vld [vmem:[#allocation5 + $0x8b8] sm:$0xff] }
 0x179   : > { %v1515_v11 = vpop.f32.mrf.mxu0  ;;  %3150 = vmatmul.mubr.bf16.vlgmr.msra.gmra.mxu0 %v22202_v16  ;;  %v2121_v40 = vld [vmem:[#allocation5 + $0x2170] sm:$0xff] }
 0x17a   : > { %v1516_v12 = vadd.f32 %v1515_v11, %v504_v1  ;;  %v1556_v13 = vpop.f32.mrf.mxu1  ;;  %3191 = vmatmul.mubr.bf16.vlgmr.msra.gmra.mxu1 %v22205_v20  ;;  %3200 = vmatpush1.bf16.msra.mxu0 %v17941_v2  ;;  %v2071_v1 = vld [vmem:[#allocation5 + $0x1810] sm:$0xff]  ;;  %v17791_v11 = vcombine.low %v1948_v60, %v1950_v61 }
 0x17b   : > { %3241 = vmatpush1.bf16.msra.mxu1 %v17815_v5  ;;  %v1517_v18 = vpop.f32.mrf.mxu0  ;;  %3201 = vmatprep.subr.bf16.mxu0 %v17938_v6  ;;  %v2073_v2 = vld [vmem:[#allocation5 + $0x1870] sm:$0xff]  ;;  %v1944_v5 = vld [vmem:[#allocation5 + $0x18] sm:$0xff] }
 0x17c   : > { %v22236_v24 = vadd.f32 %v1556_v13, %v1516_v12  ;;  %v1518_v25 = vadd.f32 %v1517_v18, %v508_v9  ;;  %v1558_v26 = vpop.f32.mrf.mxu1  ;;  %3242 = vmatprep.subr.bf16.mxu1 %v17812_v10  ;;  %3231 = vmatprep.mubr.bf16.mxu0 %v22207_v28  ;;  %v1946_v6 = vld [vmem:[#allocation5 + $0x78] sm:$0xff]  ;;  %v2131_v9 = vld [vmem:[#allocation5 + $0x2350] sm:$0xff]  ;;  %v17914_v12 = vcombine.high %v2071_v1, %v2073_v2 }
 0x17d   : > { %v1519_v29 = vpop.f32.mrf.mxu0  ;;  %3272 = vmatprep.mubr.bf16.mxu1 %v22194_v58  ;;  %v2133_v10 = vld [vmem:[#allocation5 + $0x23b0] sm:$0xff]  ;;  %v2004_v13 = vld [vmem:[#allocation5 + $0xb58] sm:$0xff]  ;;  %v17788_v15 = vcombine.high %v1944_v5, %v1946_v6  ;;  %v17913_v17 = vcombine.low %v2071_v1, %v2073_v2 }
 0x17e   : > { %v22240_v30 = vadd.f32 %v1558_v26, %v1518_v25  ;;  %v1560_v31 = vpop.f32.mrf.mxu1  ;;  %3202 = vmatpush1.bf16.msra.mxu0 %v17937_v14  ;;  %v2006_v14 = vld [vmem:[#allocation5 + $0xbb8] sm:$0xff]  ;;  %v2127_v18 = vld [vmem:[#allocation5 + $0x2290] sm:$0xff]  ;;  %v17974_v22 = vcombine.high %v2131_v9, %v2133_v10 }
 0x17f   : > { %3243 = vmatpush1.bf16.msra.mxu1 %v17811_v19  ;;  %v1520_v36 = vpop.f32.mrf.mxu0  ;;  %3203 = vmatprep.subr.bf16.mxu0 %v17934_v21  ;;  %v2129_v19 = vld [vmem:[#allocation5 + $0x22f0] sm:$0xff]  ;;  %v17787_v21 = vcombine.low %v1944_v5, %v1946_v6  ;;  %v2002_v25 = vld [vmem:[#allocation5 + $0xaf8] sm:$0xff]  ;;  %v17848_v26 = vcombine.high %v2004_v13, %v2006_v14 }
 0x180   : > { %v1561_v41 = vpop.f32.mrf.mxu1  ;;  %3244 = vmatprep.subr.bf16.mxu1 %v17808_v27  ;;  %v17973_v27 = vcombine.low %v2131_v9, %v2133_v10  ;;  %v2123_v29 = vld [vmem:[#allocation5 + $0x21d0] sm:$0xff]  ;;  %v17970_v34 = vcombine.high %v2127_v18, %v2129_v19  ;;  %v1998_v36 = vld [vmem:[#allocation5 + $0xa38] sm:$0xff] }
 0x181   : > { %v2125_v31 = vld [vmem:[#allocation5 + $0x2230] sm:$0xff]  ;;  %v17843_v41 = vcombine.low %v2000_v23, %v2002_v25  ;;  %v17840_v46 = vcombine.high %v1996_v35, %v1998_v36  ;;  %v17839_v50 = vcombine.low %v1996_v35, %v1998_v36  ;;  %v1986_v1 = vld [vmem:[#allocation5 + $0x7f8] sm:$0xff] }
 0x182   : > { %3204 = vmatpush1.bf16.msra.mxu0 %v17933_v32  ;;  %v17847_v32 = vcombine.low %v2004_v13, %v2006_v14  ;;  %v2117_v49 = vld [vmem:[#allocation5 + $0x20b0] sm:$0xff]  ;;  %v1982_v9 = vld [vmem:[#allocation5 + $0x738] sm:$0xff] }
 0x183   : > { %3245 = vmatpush1.bf16.msra.mxu1 %v17807_v37  ;;  %3205 = vmatprep.subr.bf16.mxu0 %v17930_v38  ;;  %v17844_v37 = vcombine.high %v2000_v23, %v2002_v25  ;;  %v17969_v38 = vcombine.low %v2127_v18, %v2129_v19  ;;  %v2113_v60 = vld [vmem:[#allocation5 + $0x1ff0] sm:$0xff]  ;;  %v1978_v18 = vld [vmem:[#allocation5 + $0x678] sm:$0xff] }
 0x184   : > { %3246 = vmatprep.subr.bf16.mxu1 %v17804_v42  ;;  %v17966_v42 = vcombine.high %v2123_v29, %v2125_v31  ;;  %v2109_v5 = vld [vmem:[#allocation5 + $0x1f30] sm:$0xff]  ;;  %v2038_v23 = vld [vmem:[#allocation5 + $0x11b8] sm:$0xff] }
 0x185   : > { %v2105_v13 = vld [vmem:[#allocation5 + $0x1e70] sm:$0xff]  ;;  %v2034_v35 = vld [vmem:[#allocation5 + $0x10f8] sm:$0xff] }
 0x186   : > { %3206 = vmatpush1.bf16.msra.mxu0 %v17929_v43  ;;  %v1992_v43 = vld [vmem:[#allocation5 + $0x918] sm:$0xff] }
 0x187   : > { %3247 = vmatpush1.bf16.msra.mxu1 %v17803_v47  ;;  %3207 = vmatprep.subr.bf16.mxu0 %v17926_v48  ;;  %v17965_v47 = vcombine.low %v2123_v29, %v2125_v31  ;;  %v2115_v48 = vld [vmem:[#allocation5 + $0x2050] sm:$0xff]  ;;  %v17836_v55 = vcombine.high %v1992_v43, %v1994_v45  ;;  %v17835_v61 = vcombine.low %v1992_v43, %v1994_v45  ;;  %v2102_v29 = vld [vmem:[#allocation5 + $0x1db8] sm:$0xff] }
 0x188   : > { %3248 = vmatprep.subr.bf16.mxu1 %v17800_v51  ;;  %v17962_v51 = vcombine.high %v2119_v39, %v2121_v40  ;;  %v2030_v43 = vld [vmem:[#allocation5 + $0x1038] sm:$0xff] }
 0x18a   : > { %3208 = vmatpush1.bf16.msra.mxu0 %v17925_v52  ;;  %v1988_v52 = vld [vmem:[#allocation5 + $0x858] sm:$0xff] }
 0x18b   : > { %3249 = vmatpush1.bf16.msra.mxu1 %v17799_v56  ;;  %3209 = vmatprep.subr.bf16.mxu0 %v17922_v57  ;;  %v17961_v56 = vcombine.low %v2119_v39, %v2121_v40  ;;  %v2111_v57 = vld [vmem:[#allocation5 + $0x1f90] sm:$0xff]  ;;  %v17832_v2 = vcombine.high %v1988_v52, %v1990_v53  ;;  %v17831_v6 = vcombine.low %v1988_v52, %v1990_v53  ;;  %v2098_v39 = vld [vmem:[#allocation5 + $0x1cf8] sm:$0xff] }
 0x18c   : > { %3250 = vmatprep.subr.bf16.mxu1 %v17796_v62  ;;  %v17958_v62 = vcombine.high %v2115_v48, %v2117_v49 }
 0x18e   : > { %3210 = vmatpush1.bf16.msra.mxu0 %v17921_v0  ;;  %v1984_v0 = vld [vmem:[#allocation5 + $0x798] sm:$0xff] }
 0x18f   : > { %3251 = vmatpush1.bf16.msra.mxu1 %v17795_v3  ;;  %3211 = vmatprep.subr.bf16.mxu0 %v17918_v4  ;;  %v17957_v3 = vcombine.low %v2115_v48, %v2117_v49  ;;  %v2107_v4 = vld [vmem:[#allocation5 + $0x1ed0] sm:$0xff]  ;;  %v17828_v10 = vcombine.high %v1984_v0, %v1986_v1  ;;  %v17827_v14 = vcombine.low %v1984_v0, %v1986_v1  ;;  %v2094_v48 = vld [vmem:[#allocation5 + $0x1c38] sm:$0xff] }
 0x190   : > { %3252 = vmatprep.subr.bf16.mxu1 %v17792_v7  ;;  %v17954_v7 = vcombine.high %v2111_v57, %v2113_v60  ;;  %v2090_v0 = vld [vmem:[#allocation5 + $0x1b78] sm:$0xff] }
 0x192   : > { %3212 = vmatpush1.bf16.msra.mxu0 %v17917_v8  ;;  %v1980_v8 = vld [vmem:[#allocation5 + $0x6d8] sm:$0xff] }
 0x193   : > { %3253 = vmatpush1.bf16.msra.mxu1 %v17791_v11  ;;  %3213 = vmatprep.subr.bf16.mxu0 %v17914_v12  ;;  %v17953_v11 = vcombine.low %v2111_v57, %v2113_v60  ;;  %v2103_v12 = vld [vmem:[#allocation5 + $0x1e10] sm:$0xff]  ;;  %v17824_v19 = vcombine.high %v1980_v8, %v1982_v9  ;;  %v17823_v25 = vcombine.low %v1980_v8, %v1982_v9 }
 0x194   : > { %3254 = vmatprep.subr.bf16.mxu1 %v17788_v15  ;;  %v17950_v15 = vcombine.high %v2107_v4, %v2109_v5 }
 0x196   : > { %3214 = vmatpush1.bf16.msra.mxu0 %v17913_v17  ;;  %v1976_v17 = vld [vmem:[#allocation5 + $0x618] sm:$0xff] }
 0x197   : > { %3255 = vmatpush1.bf16.msra.mxu1 %v17787_v21  ;;  %3215 = vmatprep.subr.bf16.mxu0 %v17974_v22  ;;  %v17949_v21 = vcombine.low %v2107_v4, %v2109_v5  ;;  %v2036_v22 = vld [vmem:[#allocation5 + $0x1158] sm:$0xff]  ;;  %v17820_v31 = vcombine.high %v1976_v17, %v1978_v18  ;;  %v17819_v36 = vcombine.low %v1976_v17, %v1978_v18 }
 0x198   : > { %3256 = vmatprep.subr.bf16.mxu1 %v17848_v26  ;;  %v17946_v26 = vcombine.high %v2103_v12, %v2105_v13 }
 0x19a   : > { %3216 = vmatpush2.bf16.msra.mxu0 %v17973_v27  ;;  %v2100_v27 = vld [vmem:[#allocation5 + $0x1d58] sm:$0xff] }
 0x19b   : > { %3257 = vmatpush2.bf16.msra.mxu1 %v17847_v32  ;;  %3217 = vmatprep.subr.bf16.mxu0 %v17970_v34  ;;  %v17945_v32 = vcombine.low %v2103_v12, %v2105_v13  ;;  %v2032_v34 = vld [vmem:[#allocation5 + $0x1098] sm:$0xff]  ;;  %v17944_v40 = vcombine.high %v2100_v27, %v2102_v29  ;;  %v17943_v45 = vcombine.low %v2100_v27, %v2102_v29 }
 0x19c   : > { %3258 = vmatprep.subr.bf16.mxu1 %v17844_v37  ;;  %v17880_v37 = vcombine.high %v2036_v22, %v2038_v23  ;;  %v17875_v53 = vcombine.low %v2032_v34, %v2034_v35  ;;  %v2084_v12 = vld [vmem:[#allocation5 + $0x1a58] sm:$0xff] }
 0x19d   : > { %v2086_v13 = vld [vmem:[#allocation5 + $0x1ab8] sm:$0xff] }
 0x19e   : > { %3218 = vmatpush2.bf16.msra.mxu0 %v17969_v38  ;;  %v2096_v38 = vld [vmem:[#allocation5 + $0x1c98] sm:$0xff]  ;;  %v17928_v18 = vcombine.high %v2084_v12, %v2086_v13  ;;  %v17927_v29 = vcombine.low %v2084_v12, %v2086_v13 }
 0x19f   : > { %3259 = vmatpush2.bf16.msra.mxu1 %v17843_v41  ;;  %3219 = vmatprep.subr.bf16.mxu0 %v17966_v42  ;;  %v17879_v41 = vcombine.low %v2036_v22, %v2038_v23  ;;  %v2028_v42 = vld [vmem:[#allocation5 + $0xfd8] sm:$0xff]  ;;  %v17940_v49 = vcombine.high %v2096_v38, %v2098_v39  ;;  %v17939_v60 = vcombine.low %v2096_v38, %v2098_v39 }
 0x1a0   : > { %3260 = vmatprep.subr.bf16.mxu1 %v17840_v46  ;;  %v17876_v46 = vcombine.high %v2032_v34, %v2034_v35  ;;  %v17871_v5 = vcombine.low %v2028_v42, %v2030_v43  ;;  %v2080_v22 = vld [vmem:[#allocation5 + $0x1998] sm:$0xff] }
 0x1a1   : > { %v2082_v23 = vld [vmem:[#allocation5 + $0x19f8] sm:$0xff] }
 0x1a2   : > { %3220 = vmatpush2.bf16.msra.mxu0 %v17965_v47  ;;  %v2092_v47 = vld [vmem:[#allocation5 + $0x1bd8] sm:$0xff]  ;;  %v17924_v35 = vcombine.high %v2080_v22, %v2082_v23  ;;  %v17923_v39 = vcombine.low %v2080_v22, %v2082_v23 }
 0x1a3   : > { %3261 = vmatpush2.bf16.msra.mxu1 %v17839_v50  ;;  %3221 = vmatprep.subr.bf16.mxu0 %v17962_v51  ;;  %v2014_v27 = vld [vmem:[#allocation5 + $0xd38] sm:$0xff] }
 0x1a4   : > { %3262 = vmatprep.subr.bf16.mxu1 %v17836_v55  ;;  %v2024_v55 = vld [vmem:[#allocation5 + $0xf18] sm:$0xff] }
 0x1a5   : > { %v2078_v34 = vld [vmem:[#allocation5 + $0x1938] sm:$0xff] }
 0x1a6   : > { %3222 = vmatpush2.bf16.msra.mxu0 %v17961_v56  ;;  %v2026_v56 = vld [vmem:[#allocation5 + $0xf78] sm:$0xff] }
 0x1a7   : > { %3263 = vmatpush2.bf16.msra.mxu1 %v17835_v61  ;;  %3223 = vmatprep.subr.bf16.mxu0 %v17958_v62  ;;  %v17872_v61 = vcombine.high %v2028_v42, %v2030_v43  ;;  %v2088_v62 = vld [vmem:[#allocation5 + $0x1b18] sm:$0xff]  ;;  %v17868_v8 = vcombine.high %v2024_v55, %v2026_v56 }
 0x1a8   : > { %3264 = vmatprep.subr.bf16.mxu1 %v17832_v2  ;;  %v17936_v2 = vcombine.high %v2092_v47, %v2094_v48  ;;  %v2010_v38 = vld [vmem:[#allocation5 + $0xc78] sm:$0xff] }
 0x1a9   : > { %v2074_v42 = vld [vmem:[#allocation5 + $0x1878] sm:$0xff] }
 0x1aa   : > { %3224 = vmatpush2.bf16.msra.mxu0 %v17957_v3  ;;  %v2056_v12 = vld [vmem:[#allocation5 + $0x1518] sm:$0xff] }
 0x1ab   : > { %3265 = vmatpush2.bf16.msra.mxu1 %v17831_v6  ;;  %3225 = vmatprep.subr.bf16.mxu0 %v17954_v7  ;;  %v17935_v7 = vcombine.low %v2092_v47, %v2094_v48  ;;  %v2070_v47 = vld [vmem:[#allocation5 + $0x17b8] sm:$0xff] }
 0x1ac   : > { %3266 = vmatprep.subr.bf16.mxu1 %v17828_v10  ;;  %v2020_v10 = vld [vmem:[#allocation5 + $0xe58] sm:$0xff] }
 0x1ad   : > { %v2058_v13 = vld [vmem:[#allocation5 + $0x1578] sm:$0xff] }
 0x1ae   : > { %3226 = vmatpush2.bf16.msra.mxu0 %v17953_v11  ;;  %v2022_v11 = vld [vmem:[#allocation5 + $0xeb8] sm:$0xff] }
 0x1af   : > { %3267 = vmatpush2.bf16.msra.mxu1 %v17827_v14  ;;  %3227 = vmatprep.subr.bf16.mxu0 %v17950_v15  ;;  %v17867_v14 = vcombine.low %v2024_v55, %v2026_v56  ;;  %v17931_v15 = vcombine.low %v2088_v62, %v2090_v0  ;;  %v17864_v17 = vcombine.high %v2020_v10, %v2022_v11  ;;  %v2052_v22 = vld [vmem:[#allocation5 + $0x1458] sm:$0xff] }
 0x1b0   : > { %3268 = vmatprep.subr.bf16.mxu1 %v17824_v19  ;;  %v2016_v19 = vld [vmem:[#allocation5 + $0xd98] sm:$0xff] }
 0x1b1   : > { %v2054_v23 = vld [vmem:[#allocation5 + $0x14b8] sm:$0xff] }
 0x1b2   : > { %3228 = vmatpush2.bf16.msra.mxu0 %v17949_v21  ;;  %v2018_v21 = vld [vmem:[#allocation5 + $0xdf8] sm:$0xff] }
 0x1b3   : > { %3269 = vmatpush2.bf16.msra.mxu1 %v17823_v25  ;;  %3229 = vmatprep.subr.bf16.mxu0 %v17946_v26  ;;  %v17863_v25 = vcombine.low %v2020_v10, %v2022_v11  ;;  %v2012_v26 = vld [vmem:[#allocation5 + $0xcd8] sm:$0xff] }
 0x1b4   : > { %3270 = vmatprep.subr.bf16.mxu1 %v17820_v31  ;;  %v17860_v31 = vcombine.high %v2016_v19, %v2018_v21 }
 0x1b6   : > { %3230 = vmatpush2.bf16.msra.mxu0 %v17945_v32  ;;  %v2076_v32 = vld [vmem:[#allocation5 + $0x18d8] sm:$0xff] }
 0x1b7   : > { %3271 = vmatpush2.bf16.msra.mxu1 %v17819_v36  ;;  %3281 = vmatprep.subr.bf16.mxu0 %v17880_v37  ;;  %v17859_v36 = vcombine.low %v2016_v19, %v2018_v21  ;;  %v2008_v37 = vld [vmem:[#allocation5 + $0xc18] sm:$0xff]  ;;  %v17920_v43 = vcombine.high %v2076_v32, %v2078_v34  ;;  %v17919_v48 = vcombine.low %v2076_v32, %v2078_v34 }
 0x1b8   : > { %3322 = vmatprep.subr.bf16.mxu1 %v17944_v40  ;;  %v17856_v40 = vcombine.high %v2012_v26, %v2014_v27  ;;  %v17851_v56 = vcombine.low %v2008_v37, %v2010_v38  ;;  %v17899_v32 = vcombine.low %v2056_v12, %v2058_v13  ;;  %v2048_v34 = vld [vmem:[#allocation5 + $0x1398] sm:$0xff] }
 0x1b9   : > { %v1597_v50 = vpop.f32.mrf.mxu0  ;;  %3232 = vmatmul.mubr.bf16.vlgmr.msra.gmra.mxu0 %v22214_v33 }
 0x1ba   : > { %v22244_v51 = vadd.f32 %v1597_v50, %v22236_v24  ;;  %v22246_v52 = vpop.f32.mrf.mxu1  ;;  %3273 = vmatmul.mubr.bf16.vlgmr.msra.gmra.mxu1 %v22202_v16  ;;  %3282 = vmatpush1.bf16.msra.mxu0 %v17879_v41  ;;  %v2072_v41 = vld [vmem:[#allocation5 + $0x1818] sm:$0xff] }
 0x1bb   : > { %3323 = vmatpush1.bf16.msra.mxu1 %v17943_v45  ;;  %v1599_v57 = vpop.f32.mrf.mxu0  ;;  %3283 = vmatprep.subr.bf16.mxu0 %v17876_v46  ;;  %v17855_v45 = vcombine.low %v2012_v26, %v2014_v27  ;;  %v2068_v46 = vld [vmem:[#allocation5 + $0x1758] sm:$0xff]  ;;  %v17916_v55 = vcombine.high %v2072_v41, %v2074_v42  ;;  %v17900_v26 = vcombine.high %v2056_v12, %v2058_v13 }
 0x1bc   : > { %v22250_v1 = vadd.f32 %v1599_v57, %v22240_v30  ;;  %v22252_v24 = vpop.f32.mrf.mxu1  ;;  %3324 = vmatprep.subr.bf16.mxu1 %v17940_v49  ;;  %3313 = vmatprep.mubr.bf16.mxu0 %v22196_v59  ;;  %v17932_v30 = vcombine.high %v2088_v62, %v2090_v0  ;;  %v17852_v49 = vcombine.high %v2008_v37, %v2010_v38  ;;  %v2132_v50 = vld [vmem:[#allocation5 + $0x2358] sm:$0xff] }
 0x1bd   : > { %v1601_v3 = vpop.f32.mrf.mxu0  ;;  %3354 = vmatprep.mubr.bf16.mxu1 %v22207_v28  ;;  %v2064_v57 = vld [vmem:[#allocation5 + $0x1698] sm:$0xff]  ;;  %v17912_v62 = vcombine.high %v2068_v46, %v2070_v47  ;;  %v17896_v37 = vcombine.high %v2052_v22, %v2054_v23 }
 0x1be   : > { %v1642_v4 = vpop.f32.mrf.mxu1  ;;  %3284 = vmatpush1.bf16.msra.mxu0 %v17875_v53  ;;  %v2134_v53 = vld [vmem:[#allocation5 + $0x23b8] sm:$0xff] }
 0x1bf   : > { %3325 = vmatpush1.bf16.msra.mxu1 %v17939_v60  ;;  %v1602_v6 = vpop.f32.mrf.mxu0  ;;  %3285 = vmatprep.subr.bf16.mxu0 %v17872_v61  ;;  %v2066_v60 = vld [vmem:[#allocation5 + $0x16f8] sm:$0xff]  ;;  %v17915_v61 = vcombine.low %v2072_v41, %v2074_v42  ;;  %v17976_v3 = vcombine.high %v2132_v50, %v2134_v53  ;;  %v17911_v4 = vcombine.low %v2068_v46, %v2070_v47 }
 0x1c0   : > { %v1643_v9 = vpop.f32.mrf.mxu1  ;;  %3326 = vmatprep.subr.bf16.mxu1 %v17936_v2  ;;  %v2128_v0 = vld [vmem:[#allocation5 + $0x2298] sm:$0xff]  ;;  %v17907_v11 = vcombine.low %v2064_v57, %v2066_v60  ;;  %v17895_v41 = vcombine.low %v2052_v22, %v2054_v23  ;;  %v20003_v23 = vld [vmem:[#allocation8 + $0x6f4] ss:$24 sps:$4 sm:$0xff]  }
 0x1c1   : > { %v2130_v2 = vld [vmem:[#allocation5 + $0x22f8] sm:$0xff] }
 0x1c2   : > { %3286 = vmatpush1.bf16.msra.mxu0 %v17871_v5  ;;  %v2060_v5 = vld [vmem:[#allocation5 + $0x15d8] sm:$0xff]  ;;  %v17972_v10 = vcombine.high %v2128_v0, %v2130_v2 }
 0x1c3   : > { %3327 = vmatpush1.bf16.msra.mxu1 %v17935_v7  ;;  %3287 = vmatprep.subr.bf16.mxu0 %v17868_v8  ;;  %v2062_v6 = vld [vmem:[#allocation5 + $0x1638] sm:$0xff]  ;;  %v17975_v7 = vcombine.low %v2132_v50, %v2134_v53  ;;  %v17908_v8 = vcombine.high %v2064_v57, %v2066_v60 }
 0x1c4   : > { %3328 = vmatprep.subr.bf16.mxu1 %v17932_v30  ;;  %v2124_v9 = vld [vmem:[#allocation5 + $0x21d8] sm:$0xff]  ;;  %v17903_v21 = vcombine.low %v2060_v5, %v2062_v6 }
 0x1c5   : > { %v2126_v30 = vld [vmem:[#allocation5 + $0x2238] sm:$0xff] }
 0x1c6   : > { %3288 = vmatpush1.bf16.msra.mxu0 %v17867_v14  ;;  %v17971_v14 = vcombine.low %v2128_v0, %v2130_v2  ;;  %v17968_v19 = vcombine.high %v2124_v9, %v2126_v30  ;;  %v2116_v27 = vld [vmem:[#allocation5 + $0x2058] sm:$0xff] }
 0x1c7   : > { %3329 = vmatpush1.bf16.msra.mxu1 %v17931_v15  ;;  %3289 = vmatprep.subr.bf16.mxu0 %v17864_v17  ;;  %v17904_v15 = vcombine.high %v2060_v5, %v2062_v6  ;;  %v2120_v17 = vld [vmem:[#allocation5 + $0x2118] sm:$0xff]  ;;  %v19997_v6 = vld [vmem:[#allocation8 + $0x754] ss:$24 sps:$4 sm:$0xff]  }
 0x1c8   : > { %3330 = vmatprep.subr.bf16.mxu1 %v17928_v18  ;;  %v2122_v18 = vld [vmem:[#allocation5 + $0x2178] sm:$0xff] }
 0x1c9   : > { %v2112_v38 = vld [vmem:[#allocation5 + $0x1f98] sm:$0xff] }
 0x1ca   : > { %3290 = vmatpush1.bf16.msra.mxu0 %v17863_v25  ;;  %v17967_v25 = vcombine.low %v2124_v9, %v2126_v30  ;;  %v2044_v42 = vld [vmem:[#allocation5 + $0x12d8] sm:$0xff]  ;;  %v21783_v30 = vld [vmem:[#allocation7] sm:$0xf] }
 0x1cb   : > { %3331 = vmatpush1.bf16.msra.mxu1 %v17927_v29  ;;  %3291 = vmatprep.subr.bf16.mxu0 %v17860_v31  ;;  %v2118_v29 = vld [vmem:[#allocation5 + $0x20b8] sm:$0xff]  ;;  %v17964_v31 = vcombine.high %v2120_v17, %v2122_v18 }
 0x1cc   : > { %3332 = vmatprep.subr.bf16.mxu1 %v17924_v35  ;;  %v2050_v35 = vld [vmem:[#allocation5 + $0x13f8] sm:$0xff] }
 0x1cd   : > { %v17892_v46 = vcombine.high %v2048_v34, %v2050_v35  ;;  %v2108_v47 = vld [vmem:[#allocation5 + $0x1ed8] sm:$0xff]  ;;  %v17891_v50 = vcombine.low %v2048_v34, %v2050_v35 }
 0x1ce   : > { %3292 = vmatpush1.bf16.msra.mxu0 %v17859_v36  ;;  %v17963_v36 = vcombine.low %v2120_v17, %v2122_v18  ;;  %v2040_v53 = vld [vmem:[#allocation5 + $0x1218] sm:$0xff] }
 0x1cf   : > { %3333 = vmatpush1.bf16.msra.mxu1 %v17923_v39  ;;  %3293 = vmatprep.subr.bf16.mxu0 %v17856_v40  ;;  %v2114_v39 = vld [vmem:[#allocation5 + $0x1ff8] sm:$0xff]  ;;  %v17960_v40 = vcombine.high %v2116_v27, %v2118_v29 }
 0x1d0   : > { %3334 = vmatprep.subr.bf16.mxu1 %v17920_v43  ;;  %v2046_v43 = vld [vmem:[#allocation5 + $0x1338] sm:$0xff] }
 0x1d1   : > { %v17888_v57 = vcombine.high %v2044_v42, %v2046_v43  ;;  %v2104_v60 = vld [vmem:[#allocation5 + $0x1e18] sm:$0xff]  ;;  %v17887_v0 = vcombine.low %v2044_v42, %v2046_v43  ;;  %v20013_v42 = vld [vmem:[#allocation8 + $0x630] ss:$24 sps:$4 sm:$0xff]  }
 0x1d2   : > { %3294 = vmatpush1.bf16.msra.mxu0 %v17855_v45  ;;  %v17959_v45 = vcombine.low %v2116_v27, %v2118_v29  ;;  %v20000_v12 = vld [vmem:[#allocation8 + $0x724] ss:$24 sps:$4 sm:$0xff]   ;;  %v20001_v29 = vld [vmem:[#allocation8 + $0x6f0] ss:$24 sps:$4 sm:$0xff]  }
 0x1d3   : > { %3335 = vmatpush1.bf16.msra.mxu1 %v17919_v48  ;;  %3295 = vmatprep.subr.bf16.mxu0 %v17852_v49  ;;  %v2110_v48 = vld [vmem:[#allocation5 + $0x1f38] sm:$0xff]  ;;  %v17956_v49 = vcombine.high %v2112_v38, %v2114_v39 }
 0x1d4   : > { %3336 = vmatprep.subr.bf16.mxu1 %v17916_v55  ;;  %v2042_v55 = vld [vmem:[#allocation5 + $0x1278] sm:$0xff]  ;;  %v17951_v2 = vcombine.low %v2108_v47, %v2110_v48 }
 0x1d5   : > { %v20018_v43 = vld [vmem:[#allocation8 + $0x604] ss:$24 sps:$4 sm:$0xff]  }
 0x1d6   : > { %3296 = vmatpush1.bf16.msra.mxu0 %v17851_v56  ;;  %v17955_v56 = vcombine.low %v2112_v38, %v2114_v39  ;;  %v20007_v38 = vld [vmem:[#allocation8 + $0x690] ss:$24 sps:$4 sm:$0xff]   ;;  %v20012_v39 = vld [vmem:[#allocation8 + $0x664] ss:$24 sps:$4 sm:$0xff]  }
 0x1d7   : > { %3337 = vmatpush1.bf16.msra.mxu1 %v17915_v61  ;;  %3297 = vmatprep.subr.bf16.mxu0 %v17912_v62  ;;  %v2106_v61 = vld [vmem:[#allocation5 + $0x1e78] sm:$0xff]  ;;  %v17952_v62 = vcombine.high %v2108_v47, %v2110_v48  ;;  %v20048_v47 = vld [vmem:[#allocation8 + $0xa54] ss:$24 sps:$4 sm:$0xff]   ;;  %v20019_v48 = vld [vmem:[#allocation8 + $0x8d0] ss:$24 sps:$4 sm:$0xff]  }
 0x1d8   : > { %3338 = vmatprep.subr.bf16.mxu1 %v17976_v3  ;;  %v17884_v3 = vcombine.high %v2040_v53, %v2042_v55  ;;  %v17948_v5 = vcombine.high %v2104_v60, %v2106_v61  ;;  %v17947_v9 = vcombine.low %v2104_v60, %v2106_v61  ;;  %v20060_v60 = vld [vmem:[#allocation8 + $0x9f4] ss:$24 sps:$4 sm:$0xff]   ;;  %v20025_v61 = vld [vmem:[#allocation8 + $0x870] ss:$24 sps:$4 sm:$0xff]  }
 0x1da   : > { %3298 = vmatpush2.bf16.msra.mxu0 %v17911_v4  ;;  %v22257_v4 = vsub.s32 2, %v22224_v44 }
 0x1db   : > { %3339 = vmatpush2.bf16.msra.mxu1 %v17975_v7  ;;  %3299 = vmatprep.subr.bf16.mxu0 %v17908_v8  ;;  %v22260_v7 = vsub.s32 3, %v22224_v44  ;;  %v17883_v8 = vcombine.low %v2040_v53, %v2042_v55  ;;  %v20054_v53 = vld [vmem:[#allocation8 + $0xa24] ss:$24 sps:$4 sm:$0xff]   ;;  %v20022_v55 = vld [vmem:[#allocation8 + $0x8a0] ss:$24 sps:$4 sm:$0xff]  }
 0x1dc   : > { %3340 = vmatprep.subr.bf16.mxu1 %v17972_v10  ;;  %v512_v10 = vrot.slane %v21783_v30, %v22257_v4 }
 0x1dd   : > { %v516_v13 = vrot.slane %v21783_v30, %v22260_v7  ;;  %v20036_v30 = vld [vmem:[#allocation8 + $0x7e4] ss:$24 sps:$4 sm:$0xff]  }
 0x1de   : > { %3300 = vmatpush2.bf16.msra.mxu0 %v17907_v11  ;;  %v19995_v11 = vld [vmem:[#allocation8 + $0x750] ss:$24 sps:$4 sm:$0xff]  }
 0x1df   : > { %3341 = vmatpush2.bf16.msra.mxu1 %v17971_v14  ;;  %3301 = vmatprep.subr.bf16.mxu0 %v17904_v15  ;;  %v1639_v14 = vadd.f32 %v22246_v52, %v512_v10  ;;  %v19998_v15 = vld [vmem:[#allocation8 + $0x720] ss:$24 sps:$4 sm:$0xff]   ;;  %v1641_v18 = vadd.f32 %v22252_v24, %v516_v13  ;;  %v20006_v24 = vld [vmem:[#allocation8 + $0x6c4] ss:$24 sps:$4 sm:$0xff]   ;;  %v20070_v10 = vld [vmem:[#allocation8 + $0x990] ss:$24 sps:$4 sm:$0xff]  }
 0x1e0   : > { %3342 = vmatprep.subr.bf16.mxu1 %v17968_v19  ;;  %v20039_v13 = vld [vmem:[#allocation8 + $0x7b4] ss:$24 sps:$4 sm:$0xff]  }
 0x1e2   : > { %3302 = vmatpush2.bf16.msra.mxu0 %v17903_v21 }
 0x1e3   : > { %3343 = vmatpush2.bf16.msra.mxu1 %v17967_v25  ;;  %3303 = vmatprep.subr.bf16.mxu0 %v17900_v26 }
 0x1e4   : > { %3344 = vmatprep.subr.bf16.mxu1 %v17964_v31 }
 0x1e6   : > { %3304 = vmatpush2.bf16.msra.mxu0 %v17899_v32 }
 0x1e7   : > { %3345 = vmatpush2.bf16.msra.mxu1 %v17963_v36  ;;  %3305 = vmatprep.subr.bf16.mxu0 %v17896_v37  ;;  %v20004_v36 = vld [vmem:[#allocation8 + $0x6c0] ss:$24 sps:$4 sm:$0xff]   ;;  %v20009_v37 = vld [vmem:[#allocation8 + $0x694] ss:$24 sps:$4 sm:$0xff]  }
 0x1e8   : > { %3346 = vmatprep.subr.bf16.mxu1 %v17960_v40  ;;  %v20010_v40 = vld [vmem:[#allocation8 + $0x660] ss:$24 sps:$4 sm:$0xff]  }
 0x1ea   : > { %3306 = vmatpush2.bf16.msra.mxu0 %v17895_v41  ;;  %v20015_v41 = vld [vmem:[#allocation8 + $0x634] ss:$24 sps:$4 sm:$0xff]  }
 0x1eb   : > { %3347 = vmatpush2.bf16.msra.mxu1 %v17959_v45  ;;  %3307 = vmatprep.subr.bf16.mxu0 %v17892_v46  ;;  %v20016_v45 = vld [vmem:[#allocation8 + $0x600] ss:$24 sps:$4 sm:$0xff]   ;;  %v20021_v46 = vld [vmem:[#allocation8 + $0x8d4] ss:$24 sps:$4 sm:$0xff]  }
 0x1ec   : > { %3348 = vmatprep.subr.bf16.mxu1 %v17956_v49  ;;  %v20024_v49 = vld [vmem:[#allocation8 + $0x8a4] ss:$24 sps:$4 sm:$0xff]  }
 0x1ee   : > { %3308 = vmatpush2.bf16.msra.mxu0 %v17891_v50  ;;  %v20046_v50 = vld [vmem:[#allocation8 + $0xa50] ss:$24 sps:$4 sm:$0xff]  }
 0x1ef   : > { %3349 = vmatpush2.bf16.msra.mxu1 %v17955_v56  ;;  %3309 = vmatprep.subr.bf16.mxu0 %v17888_v57  ;;  %v20027_v56 = vld [vmem:[#allocation8 + $0x874] ss:$24 sps:$4 sm:$0xff]   ;;  %v20052_v57 = vld [vmem:[#allocation8 + $0xa20] ss:$24 sps:$4 sm:$0xff]  }
 0x1f0   : > { %3350 = vmatprep.subr.bf16.mxu1 %v17952_v62  ;;  %v20030_v62 = vld [vmem:[#allocation8 + $0x844] ss:$24 sps:$4 sm:$0xff]  }
 0x1f2   : > { %3310 = vmatpush2.bf16.msra.mxu0 %v17887_v0  ;;  %v20058_v0 = vld [vmem:[#allocation8 + $0x9f0] ss:$24 sps:$4 sm:$0xff]  }
 0x1f3   : > { %3351 = vmatpush2.bf16.msra.mxu1 %v17951_v2  ;;  %3311 = vmatprep.subr.bf16.mxu0 %v17884_v3  ;;  %v20066_v2 = vld [vmem:[#allocation8 + $0x9c4] ss:$24 sps:$4 sm:$0xff]   ;;  %v20028_v3 = vld [vmem:[#allocation8 + $0x840] ss:$24 sps:$4 sm:$0xff]  }
 0x1f4   : > { %3352 = vmatprep.subr.bf16.mxu1 %v17948_v5  ;;  %v20033_v5 = vld [vmem:[#allocation8 + $0x814] ss:$24 sps:$4 sm:$0xff]  }
 0x1f6   : > { %3312 = vmatpush2.bf16.msra.mxu0 %v17883_v8  ;;  %v20072_v8 = vld [vmem:[#allocation8 + $0x994] ss:$24 sps:$4 sm:$0xff]  }
 0x1f7   : > { %3353 = vmatpush2.bf16.msra.mxu1 %v17947_v9  ;;  %4539 = vmatprep.subr.bf16.mxu0 %v19997_v6  ;;  %v20064_v6 = vld [vmem:[#allocation8 + $0x9c0] ss:$24 sps:$4 sm:$0xff]   ;;  %v20031_v9 = vld [vmem:[#allocation8 + $0x810] ss:$24 sps:$4 sm:$0xff]  }
 0x1f8   : > { %4580 = vmatprep.subr.bf16.mxu1 %v20048_v47  ;;  %v20118_v47 = vld [vmem:[#allocation8 + $0xb10] ss:$24 sps:$4 sm:$0xff]  }
 0x1f9   : > { %v1679_v17 = vpop.f32.mrf.mxu0  ;;  %3314 = vmatmul.mubr.bf16.vlgmr.msra.gmra.mxu0 %v22205_v20 }
 0x1fa   : > { %v1680_v19 = vadd.f32 %v1679_v17, %v1639_v14  ;;  %v1720_v21 = vpop.f32.mrf.mxu1  ;;  %3355 = vmatmul.mubr.bf16.vlgmr.msra.gmra.mxu1 %v22214_v33  ;;  %4540 = vmatpush1.bf16.msra.mxu0 %v19995_v11  ;;  %v20078_v11 = vld [vmem:[#allocation8 + $0x964] ss:$24 sps:$4 sm:$0xff]   ;;  %v20076_v14 = vld [vmem:[#allocation8 + $0x960] ss:$24 sps:$4 sm:$0xff]   ;;  %v20037_v17 = vld [vmem:[#allocation8 + $0x7b0] ss:$24 sps:$4 sm:$0xff]  }
 0x1fb   : > { %v1681_v22 = vpop.f32.mrf.mxu0  ;;  %4541 = vmatprep.subr.bf16.mxu0 %v20000_v12  ;;  %4581 = vmatpush1.bf16.msra.mxu1 %v20046_v50  ;;  %v20034_v12 = vld [vmem:[#allocation8 + $0x7e0] ss:$24 sps:$4 sm:$0xff]   ;;  %v20132_v50 = vld [vmem:[#allocation8 + $0xab4] ss:$24 sps:$4 sm:$0xff]  }
 0x1fc   : > { %v22268_v25 = vadd.f32 %v1720_v21, %v1680_v19  ;;  %v1682_v26 = vadd.f32 %v1681_v22, %v1641_v18  ;;  %v1722_v27 = vpop.f32.mrf.mxu1  ;;  %4582 = vmatprep.subr.bf16.mxu1 %v20054_v53  ;;  %v20042_v18 = vld [vmem:[#allocation8 + $0x784] ss:$24 sps:$4 sm:$0xff]   ;;  %v20082_v19 = vld [vmem:[#allocation8 + $0x930] ss:$24 sps:$4 sm:$0xff]   ;;  %v20040_v22 = vld [vmem:[#allocation8 + $0x780] ss:$24 sps:$4 sm:$0xff]  }
 0x1fd   : > { %v1683_v52 = vpop.f32.mrf.mxu0  ;;  %v20090_v21 = vld [vmem:[#allocation8 + $0x904] ss:$24 sps:$4 sm:$0xff]   ;;  %v20130_v53 = vld [vmem:[#allocation8 + $0xab0] ss:$24 sps:$4 sm:$0xff]  }
 0x1fe   : > { %v22270_v31 = vadd.f32 %v1722_v27, %v1682_v26  ;;  %v1724_v32 = vpop.f32.mrf.mxu1  ;;  %4542 = vmatpush1.bf16.msra.mxu0 %v19998_v15  ;;  %v20084_v15 = vld [vmem:[#allocation8 + $0x934] ss:$24 sps:$4 sm:$0xff]   ;;  %v20088_v26 = vld [vmem:[#allocation8 + $0x900] ss:$24 sps:$4 sm:$0xff]  }
 0x1ff   : > { %v1684_v34 = vpop.f32.mrf.mxu0  ;;  %4543 = vmatprep.subr.bf16.mxu0 %v20003_v23  ;;  %4583 = vmatpush1.bf16.msra.mxu1 %v20052_v57  ;;  %v20045_v23 = vld [vmem:[#allocation8 + $0x75c] ss:$24 sps:$4 sm:$0xff]  }
 0x200   : > { %v1725_v35 = vpop.f32.mrf.mxu1  ;;  %4584 = vmatprep.subr.bf16.mxu1 %v20060_v60  ;;  %v20096_v27 = vld [vmem:[#allocation8 + $0xbd4] ss:$24 sps:$4 sm:$0xff]   ;;  %v20102_v32 = vld [vmem:[#allocation8 + $0xba4] ss:$24 sps:$4 sm:$0xff]  }
 0x201   : > { %v20144_v57 = vld [vmem:[#allocation8 + $0xa5c] ss:$24 sps:$4 sm:$0xff]   ;;  %v22272_v60 = vld [vmem:[#allocation7 + $0x4] sm:$0xf] }
 0x202   : > { %4544 = vmatpush1.bf16.msra.mxu0 %v20001_v29  ;;  %v20094_v29 = vld [vmem:[#allocation8 + $0xbd0] ss:$24 sps:$4 sm:$0xff]  }
 0x203   : > { %4545 = vmatprep.subr.bf16.mxu0 %v20006_v24  ;;  %4585 = vmatpush1.bf16.msra.mxu1 %v20058_v0  ;;  %v20100_v24 = vld [vmem:[#allocation8 + $0xba0] ss:$24 sps:$4 sm:$0xff]  }
 0x204   : > { %4586 = vmatprep.subr.bf16.mxu1 %v20066_v2 }
 0x206   : > { %4546 = vmatpush1.bf16.msra.mxu0 %v20004_v36 }
 0x207   : > { %4547 = vmatprep.subr.bf16.mxu0 %v20009_v37  ;;  %4587 = vmatpush1.bf16.msra.mxu1 %v20064_v6 }
 0x208   : > { %4588 = vmatprep.subr.bf16.mxu1 %v20072_v8 }
 0x20a   : > { %4548 = vmatpush1.bf16.msra.mxu0 %v20007_v38  ;;  %v20108_v38 = vld [vmem:[#allocation8 + $0xb74] ss:$24 sps:$4 sm:$0xff]  }
 0x20b   : > { %4549 = vmatprep.subr.bf16.mxu0 %v20012_v39  ;;  %4589 = vmatpush1.bf16.msra.mxu1 %v20070_v10 }
 0x20c   : > { %4590 = vmatprep.subr.bf16.mxu1 %v20078_v11 }
 0x20e   : > { %4550 = vmatpush1.bf16.msra.mxu0 %v20010_v40  ;;  %v20106_v40 = vld [vmem:[#allocation8 + $0xb70] ss:$24 sps:$4 sm:$0xff]  }
 0x20f   : > { %4551 = vmatprep.subr.bf16.mxu0 %v20015_v41  ;;  %4591 = vmatpush1.bf16.msra.mxu1 %v20076_v14 }
 0x210   : > { %4592 = vmatprep.subr.bf16.mxu1 %v20084_v15 }
 0x212   : > { %4552 = vmatpush1.bf16.msra.mxu0 %v20013_v42 }
 0x213   : > { %4553 = vmatprep.subr.bf16.mxu0 %v20018_v43  ;;  %4593 = vmatpush1.bf16.msra.mxu1 %v20082_v19  ;;  %v20114_v43 = vld [vmem:[#allocation8 + $0xb44] ss:$24 sps:$4 sm:$0xff]  }
 0x214   : > { %4594 = vmatprep.subr.bf16.mxu1 %v20090_v21 }
 0x216   : > { %4554 = vmatpush1.bf16.msra.mxu0 %v20016_v45  ;;  %v20112_v45 = vld [vmem:[#allocation8 + $0xb40] ss:$24 sps:$4 sm:$0xff]  }
 0x217   : > { %4555 = vmatprep.subr.bf16.mxu0 %v20021_v46  ;;  %4595 = vmatpush1.bf16.msra.mxu1 %v20088_v26  ;;  %v20120_v46 = vld [vmem:[#allocation8 + $0xb14] ss:$24 sps:$4 sm:$0xff]  }
 0x218   : > { %4596 = vmatprep.subr.bf16.mxu1 %v20096_v27 }
 0x21a   : > { %4556 = vmatpush2.bf16.msra.mxu0 %v20019_v48  ;;  %v20126_v48 = vld [vmem:[#allocation8 + $0xae4] ss:$24 sps:$4 sm:$0xff]  }
 0x21b   : > { %4557 = vmatprep.subr.bf16.mxu0 %v20024_v49  ;;  %4597 = vmatpush2.bf16.msra.mxu1 %v20094_v29  ;;  %v20124_v49 = vld [vmem:[#allocation8 + $0xae0] ss:$24 sps:$4 sm:$0xff]  }
 0x21c   : > { %4598 = vmatprep.subr.bf16.mxu1 %v20102_v32 }
 0x21e   : > { %4558 = vmatpush2.bf16.msra.mxu0 %v20022_v55  ;;  %v20138_v55 = vld [vmem:[#allocation8 + $0xa84] ss:$24 sps:$4 sm:$0xff]  }
 0x21f   : > { %4559 = vmatprep.subr.bf16.mxu0 %v20027_v56  ;;  %4599 = vmatpush2.bf16.msra.mxu1 %v20100_v24  ;;  %v20136_v56 = vld [vmem:[#allocation8 + $0xa80] ss:$24 sps:$4 sm:$0xff]   ;;  %v20051_v24 = vld [vmem:[#allocation8 + $0x72c] ss:$24 sps:$4 sm:$0xff]  }
 0x220   : > { %4600 = vmatprep.subr.bf16.mxu1 %v20108_v38  ;;  %v20055_v38 = vld [vmem:[#allocation8 + $0x6f8] ss:$24 sps:$4 sm:$0xff]  }
 0x222   : > { %4560 = vmatpush2.bf16.msra.mxu0 %v20025_v61  ;;  %v2140_v61 = vrot.slane %v22272_v60, %v22227_v54 }
 0x223   : > { %4561 = vmatprep.subr.bf16.mxu0 %v20030_v62  ;;  %4601 = vmatpush2.bf16.msra.mxu1 %v20106_v40  ;;  %v2144_v62 = vrot.slane %v22272_v60, %v22230_v63  ;;  %v20061_v40 = vld [vmem:[#allocation8 + $0x6c8] ss:$24 sps:$4 sm:$0xff]  }
 0x224   : > { %4602 = vmatprep.subr.bf16.mxu1 %v20114_v43  ;;  %v20075_v43 = vld [vmem:[#allocation8 + $0x66c] ss:$24 sps:$4 sm:$0xff]  }
 0x226   : > { %4562 = vmatpush2.bf16.msra.mxu0 %v20028_v3 }
 0x227   : > { %4563 = vmatprep.subr.bf16.mxu0 %v20033_v5  ;;  %4603 = vmatpush2.bf16.msra.mxu1 %v20112_v45  ;;  %v20073_v45 = vld [vmem:[#allocation8 + $0x668] ss:$24 sps:$4 sm:$0xff]  }
 0x228   : > { %4604 = vmatprep.subr.bf16.mxu1 %v20120_v46  ;;  %v20081_v46 = vld [vmem:[#allocation8 + $0x63c] ss:$24 sps:$4 sm:$0xff]  }
 0x22a   : > { %4564 = vmatpush2.bf16.msra.mxu0 %v20031_v9 }
 0x22b   : > { %4565 = vmatprep.subr.bf16.mxu0 %v20036_v30  ;;  %4605 = vmatpush2.bf16.msra.mxu1 %v20118_v47  ;;  %v20079_v47 = vld [vmem:[#allocation8 + $0x638] ss:$24 sps:$4 sm:$0xff]  }
 0x22c   : > { %4606 = vmatprep.subr.bf16.mxu1 %v20126_v48  ;;  %v20087_v48 = vld [vmem:[#allocation8 + $0x60c] ss:$24 sps:$4 sm:$0xff]  }
 0x22e   : > { %4566 = vmatpush2.bf16.msra.mxu0 %v20034_v12 }
 0x22f   : > { %4567 = vmatprep.subr.bf16.mxu0 %v20039_v13  ;;  %4607 = vmatpush2.bf16.msra.mxu1 %v20124_v49  ;;  %v20085_v49 = vld [vmem:[#allocation8 + $0x608] ss:$24 sps:$4 sm:$0xff]  }
 0x230   : > { %4608 = vmatprep.subr.bf16.mxu1 %v20132_v50  ;;  %v20093_v50 = vld [vmem:[#allocation8 + $0x8dc] ss:$24 sps:$4 sm:$0xff]  }
 0x232   : > { %4568 = vmatpush2.bf16.msra.mxu0 %v20037_v17 }
 0x233   : > { %4569 = vmatprep.subr.bf16.mxu0 %v20042_v18  ;;  %4609 = vmatpush2.bf16.msra.mxu1 %v20130_v53  ;;  %v20091_v53 = vld [vmem:[#allocation8 + $0x8d8] ss:$24 sps:$4 sm:$0xff]  }
 0x234   : > { %4610 = vmatprep.subr.bf16.mxu1 %v20138_v55  ;;  %v20099_v55 = vld [vmem:[#allocation8 + $0x8ac] ss:$24 sps:$4 sm:$0xff]  }
 0x236   : > { %4570 = vmatpush2.bf16.msra.mxu0 %v20040_v22 }
 0x237   : > { %4621 = vmatprep.subr.bf16.mxu0 %v20045_v23  ;;  %4611 = vmatpush2.bf16.msra.mxu1 %v20136_v56  ;;  %v2148_v56 = vrot.slane %v22272_v60, %v22257_v4 }
 0x238   : > { %4662 = vmatprep.subr.bf16.mxu1 %v20144_v57  ;;  %v2152_v57 = vrot.slane %v22272_v60, %v22260_v7 }
 0x239   : > { %v3151_v52 = vpop.f32.mrf.mxu0 }
 0x23a   : > { %v3192_v34 = vpop.f32.mrf.mxu1  ;;  %v3152_v0 = vadd.f32 %v3151_v52, %v2140_v61  ;;  %v20097_v61 = vld [vmem:[#allocation8 + $0x8a8] ss:$24 sps:$4 sm:$0xff]  }
 0x23b   : > { %v3153_v35 = vpop.f32.mrf.mxu0 }
 0x23c   : > { %v3194_v36 = vpop.f32.mrf.mxu1  ;;  %v3154_v2 = vadd.f32 %v3153_v35, %v2144_v62  ;;  %v3193_v3 = vadd.f32 %v3192_v34, %v3152_v0  ;;  %v20043_v34 = vld [vmem:[#allocation8 + $0x758] ss:$24 sps:$4 sm:$0xff]   ;;  %v20105_v62 = vld [vmem:[#allocation8 + $0x87c] ss:$24 sps:$4 sm:$0xff]  }
 0x23d   : > { %v3155_v37 = vpop.f32.mrf.mxu0 }
 0x23e   : > { %v3196_v39 = vpop.f32.mrf.mxu1  ;;  %v3195_v6 = vadd.f32 %v3194_v36, %v3154_v2  ;;  %v20049_v36 = vld [vmem:[#allocation8 + $0x728] ss:$24 sps:$4 sm:$0xff]   ;;  %v20057_v37 = vld [vmem:[#allocation8 + $0x6fc] ss:$24 sps:$4 sm:$0xff]  }
 0x23f   : > { %v3156_v41 = vpop.f32.mrf.mxu0  ;;  %v20063_v39 = vld [vmem:[#allocation8 + $0x6cc] ss:$24 sps:$4 sm:$0xff]  }
 0x240   : > { %v3197_v42 = vpop.f32.mrf.mxu1  ;;  %v20069_v41 = vld [vmem:[#allocation8 + $0x69c] ss:$24 sps:$4 sm:$0xff]  }
 0x241   : > { %v20067_v42 = vld [vmem:[#allocation8 + $0x698] ss:$24 sps:$4 sm:$0xff]  }
 0x279   : > { %v3233_v5 = vpop.f32.mrf.mxu0 }
 0x27a   : > { %v3234_v8 = vadd.f32 %v3233_v5, %v3193_v3  ;;  %v22278_v9 = vpop.f32.mrf.mxu1 }
 0x27b   : > { %v3235_v30 = vpop.f32.mrf.mxu0  ;;  %v3275_v0 = vadd.f32 %v22278_v9, %v2148_v56  ;;  %v20153_v56 = vld [vmem:[#allocation8 + $0x704] ss:$24 sps:$4 sm:$0xff]  }
 0x27c   : > { %v3367_v10 = vmul.f32 0.70710677, %v3234_v8  ;;  %v3236_v11 = vadd.f32 %v3235_v30, %v3195_v6  ;;  %v22280_v12 = vpop.f32.mrf.mxu1  ;;  %v3363_v23 = vmul.f32 0.5, %v3234_v8  ;;  %v20103_v8 = vld [vmem:[#allocation8 + $0x878] ss:$24 sps:$4 sm:$0xff]  }
 0x27d   : > { %v3237_v13 = vpop.f32.mrf.mxu0  ;;  %v3277_v3 = vadd.f32 %v22280_v12, %v2152_v57  ;;  %v20111_v30 = vld [vmem:[#allocation8 + $0x84c] ss:$24 sps:$4 sm:$0xff]   ;;  %v20148_v57 = vld [vmem:[#allocation8 + $0xa28] ss:$24 sps:$4 sm:$0xff]  }
 0x27e   : > { %21723 = verf.f32 %v3367_v10  ;;  %v3368_v14 = vmul.f32 0.70710677, %v3236_v11  ;;  %v3278_v15 = vpop.f32.mrf.mxu1  ;;  %v3364_v26 = vmul.f32 0.5, %v3236_v11 }
 0x27f   : > { %v3238_v17 = vpop.f32.mrf.mxu0 }
 0x280   : > { %21725 = verf.f32 %v3368_v14  ;;  %v3279_v18 = vpop.f32.mrf.mxu1 }
 0x28b   : > { %v21724_v19 = vpop.eup %21723 }
 0x28c   : > { %v3375_v21 = vadd.f32 1.0, %v21724_v19  ;;  %v20109_v19 = vld [vmem:[#allocation8 + $0x848] ss:$24 sps:$4 sm:$0xff]  }
 0x28d   : > { %v21726_v22 = vpop.eup %21725 }
 0x28e   : > { %v3376_v27 = vadd.f32 1.0, %v21726_v22  ;;  %v3379_v29 = vmul.f32 %v3375_v21, %v3363_v23  ;;  %v20117_v21 = vld [vmem:[#allocation8 + $0x81c] ss:$24 sps:$4 sm:$0xff]   ;;  %v20115_v23 = vld [vmem:[#allocation8 + $0x818] ss:$24 sps:$4 sm:$0xff]  }
 0x290   : > { %v3380_v52 = vmul.f32 %v3376_v27, %v3364_v26  ;;  %v22284_v35 = vpack.c.bf16 %v3379_v29, %v3379_v29  ;;  %v20123_v26 = vld [vmem:[#allocation8 + $0x7ec] ss:$24 sps:$4 sm:$0xff]   ;;  %v20121_v27 = vld [vmem:[#allocation8 + $0x7e8] ss:$24 sps:$4 sm:$0xff]   ;;  %v20129_v29 = vld [vmem:[#allocation8 + $0x7bc] ss:$24 sps:$4 sm:$0xff]  }
 0x292   : > { %v22282_v32 = vpack.c.bf16 %v3380_v52, %v3380_v52  ;;  %v20127_v52 = vld [vmem:[#allocation8 + $0x7b8] ss:$24 sps:$4 sm:$0xff]  }
 0x294   : > { %4571 = vmatprep.mubr.bf16.mxu0 %v22282_v32 }
 0x295   : > { %4572 = vmatmul.mubr.bf16.vlgmr.msra.gmra.mxu0 %v22284_v35 }
 0x296   : > { %4622 = vmatpush1.bf16.msra.mxu0 %v20043_v34  ;;  %4653 = vmatprep.mubr.bf16.mxu0 %v22282_v32  ;;  %v20135_v34 = vld [vmem:[#allocation8 + $0x78c] ss:$24 sps:$4 sm:$0xff]  }
 0x297   : > { %4623 = vmatprep.subr.bf16.mxu0 %v20051_v24 }
 0x29a   : > { %4624 = vmatpush1.bf16.msra.mxu0 %v20049_v36 }
 0x29b   : > { %4625 = vmatprep.subr.bf16.mxu0 %v20057_v37  ;;  %v20133_v37 = vld [vmem:[#allocation8 + $0x788] ss:$24 sps:$4 sm:$0xff]  }
 0x29e   : > { %4626 = vmatpush1.bf16.msra.mxu0 %v20055_v38 }
 0x29f   : > { %4627 = vmatprep.subr.bf16.mxu0 %v20063_v39  ;;  %v20141_v39 = vld [vmem:[#allocation8 + $0x764] ss:$24 sps:$4 sm:$0xff]  }
 0x2a2   : > { %4628 = vmatpush1.bf16.msra.mxu0 %v20061_v40 }
 0x2a3   : > { %4629 = vmatprep.subr.bf16.mxu0 %v20069_v41 }
 0x2a6   : > { %4630 = vmatpush1.bf16.msra.mxu0 %v20067_v42 }
 0x2a7   : > { %4631 = vmatprep.subr.bf16.mxu0 %v20075_v43 }
 0x2aa   : > { %4632 = vmatpush1.bf16.msra.mxu0 %v20073_v45  ;;  %v20139_v45 = vld [vmem:[#allocation8 + $0x760] ss:$24 sps:$4 sm:$0xff]  }
 0x2ab   : > { %4633 = vmatprep.subr.bf16.mxu0 %v20081_v46 }
 0x2ae   : > { %4634 = vmatpush1.bf16.msra.mxu0 %v20079_v47  ;;  %v20147_v47 = vld [vmem:[#allocation8 + $0x734] ss:$24 sps:$4 sm:$0xff]  }
 0x2af   : > { %4635 = vmatprep.subr.bf16.mxu0 %v20087_v48 }
 0x2b2   : > { %4636 = vmatpush1.bf16.msra.mxu0 %v20085_v49  ;;  %v20142_v49 = vld [vmem:[#allocation8 + $0xa58] ss:$24 sps:$4 sm:$0xff]  }
 0x2b3   : > { %4637 = vmatprep.subr.bf16.mxu0 %v20093_v50 }
 0x2b6   : > { %4638 = vmatpush2.bf16.msra.mxu0 %v20091_v53  ;;  %v20145_v53 = vld [vmem:[#allocation8 + $0x730] ss:$24 sps:$4 sm:$0xff]  }
 0x2b7   : > { %4639 = vmatprep.subr.bf16.mxu0 %v20099_v55  ;;  %v20150_v55 = vld [vmem:[#allocation8 + $0xa2c] ss:$24 sps:$4 sm:$0xff]  }
 0x2b9   : > { %v3315_v2 = vpop.f32.mrf.mxu0 }
 0x2ba   : > { %v3316_v5 = vadd.f32 %v3315_v2, %v3275_v0  ;;  %v3356_v6 = vpop.f32.mrf.mxu1  ;;  %4640 = vmatpush2.bf16.msra.mxu0 %v20097_v61  ;;  %v20151_v61 = vld [vmem:[#allocation8 + $0x700] ss:$24 sps:$4 sm:$0xff]   ;;  %v20159_v0 = vld [vmem:[#allocation8 + $0x6d4] ss:$24 sps:$4 sm:$0xff]   ;;  %v20157_v2 = vld [vmem:[#allocation8 + $0x6d0] ss:$24 sps:$4 sm:$0xff]  }
 0x2bb   : > { %v3317_v10 = vpop.f32.mrf.mxu0  ;;  %4641 = vmatprep.subr.bf16.mxu0 %v20105_v62  ;;  %v20156_v62 = vld [vmem:[#allocation8 + $0x9fc] ss:$24 sps:$4 sm:$0xff]  }
 0x2bc   : > { %v3357_v11 = vadd.f32 %v3356_v6, %v3316_v5  ;;  %v3318_v13 = vadd.f32 %v3317_v10, %v3277_v3  ;;  %v3358_v14 = vpop.f32.mrf.mxu1  ;;  %v20162_v3 = vld [vmem:[#allocation8 + $0x9cc] ss:$24 sps:$4 sm:$0xff]   ;;  %v20160_v6 = vld [vmem:[#allocation8 + $0x9c8] ss:$24 sps:$4 sm:$0xff]  }
 0x2bd   : > { %v3319_v60 = vpop.f32.mrf.mxu0  ;;  %v20165_v5 = vld [vmem:[#allocation8 + $0x6a4] ss:$24 sps:$4 sm:$0xff]   ;;  %v20171_v10 = vld [vmem:[#allocation8 + $0x674] ss:$24 sps:$4 sm:$0xff]  }
 0x2be   : > { %v3369_v15 = vmul.f32 0.70710677, %v3357_v11  ;;  %v3359_v17 = vadd.f32 %v3358_v14, %v3318_v13  ;;  %v3360_v18 = vpop.f32.mrf.mxu1  ;;  %4642 = vmatpush2.bf16.msra.mxu0 %v20103_v8  ;;  %v3365_v40 = vmul.f32 0.5, %v3357_v11  ;;  %v20163_v8 = vld [vmem:[#allocation8 + $0x6a0] ss:$24 sps:$4 sm:$0xff]  }
 0x2bf   : > { %v3320_v9 = vpop.f32.mrf.mxu0  ;;  %4643 = vmatprep.subr.bf16.mxu0 %v20111_v30  ;;  %v20168_v30 = vld [vmem:[#allocation8 + $0x99c] ss:$24 sps:$4 sm:$0xff]   ;;  %v20166_v11 = vld [vmem:[#allocation8 + $0x998] ss:$24 sps:$4 sm:$0xff]   ;;  %v20174_v14 = vld [vmem:[#allocation8 + $0x96c] ss:$24 sps:$4 sm:$0xff]  }
 0x2c0   : > { %21727 = verf.f32 %v3369_v15  ;;  %v3370_v12 = vmul.f32 0.70710677, %v3359_v17  ;;  %v3361_v22 = vpop.f32.mrf.mxu1  ;;  %v3366_v41 = vmul.f32 0.5, %v3359_v17  ;;  %v20169_v13 = vld [vmem:[#allocation8 + $0x670] ss:$24 sps:$4 sm:$0xff]  }
 0x2c1   : > { %v20177_v60 = vld [vmem:[#allocation8 + $0x644] ss:$24 sps:$4 sm:$0xff]   ;;  %v20172_v15 = vld [vmem:[#allocation8 + $0x968] ss:$24 sps:$4 sm:$0xff]   ;;  %v20178_v9 = vld [vmem:[#allocation8 + $0x938] ss:$24 sps:$4 sm:$0xff]  }
 0x2c2   : > { %21729 = verf.f32 %v3370_v12  ;;  %4644 = vmatpush2.bf16.msra.mxu0 %v20109_v19  ;;  %v20175_v17 = vld [vmem:[#allocation8 + $0x640] ss:$24 sps:$4 sm:$0xff]   ;;  %v20180_v18 = vld [vmem:[#allocation8 + $0x93c] ss:$24 sps:$4 sm:$0xff]   ;;  %v20186_v12 = vld [vmem:[#allocation8 + $0x90c] ss:$24 sps:$4 sm:$0xff]  }
 0x2c3   : > { %4645 = vmatprep.subr.bf16.mxu0 %v20117_v21  ;;  %v20183_v19 = vld [vmem:[#allocation8 + $0x614] ss:$24 sps:$4 sm:$0xff]   ;;  %v20181_v21 = vld [vmem:[#allocation8 + $0x610] ss:$24 sps:$4 sm:$0xff]   ;;  %v20189_v22 = vld [vmem:[#allocation8 + $0x8e4] ss:$24 sps:$4 sm:$0xff]  }
 0x2c6   : > { %4646 = vmatpush2.bf16.msra.mxu0 %v20115_v23  ;;  %v20184_v23 = vld [vmem:[#allocation8 + $0x908] ss:$24 sps:$4 sm:$0xff]  }
 0x2c7   : > { %4647 = vmatprep.subr.bf16.mxu0 %v20123_v26  ;;  %v20187_v26 = vld [vmem:[#allocation8 + $0x8e0] ss:$24 sps:$4 sm:$0xff]  }
 0x2ca   : > { %4648 = vmatpush2.bf16.msra.mxu0 %v20121_v27  ;;  %v20192_v27 = vld [vmem:[#allocation8 + $0xbdc] ss:$24 sps:$4 sm:$0xff]  }
 0x2cb   : > { %4649 = vmatprep.subr.bf16.mxu0 %v20129_v29  ;;  %v20195_v29 = vld [vmem:[#allocation8 + $0x8b4] ss:$24 sps:$4 sm:$0xff]  }
 0x2cd   : > { %v21728_v24 = vpop.eup %21727 }
 0x2ce   : > { %v3377_v36 = vadd.f32 1.0, %v21728_v24  ;;  %4650 = vmatpush2.bf16.msra.mxu0 %v20127_v52  ;;  %v20190_v52 = vld [vmem:[#allocation8 + $0xbd8] ss:$24 sps:$4 sm:$0xff]   ;;  %v20198_v24 = vld [vmem:[#allocation8 + $0xbac] ss:$24 sps:$4 sm:$0xff]  }
 0x2cf   : > { %v21730_v38 = vpop.eup %21729  ;;  %4651 = vmatprep.subr.bf16.mxu0 %v20135_v34  ;;  %v20193_v34 = vld [vmem:[#allocation8 + $0x8b0] ss:$24 sps:$4 sm:$0xff]  }
 0x2d0   : > { %v3378_v42 = vadd.f32 1.0, %v21730_v38  ;;  %v3381_v43 = vmul.f32 %v3377_v36, %v3365_v40  ;;  %v20201_v36 = vld [vmem:[#allocation8 + $0x884] ss:$24 sps:$4 sm:$0xff]   ;;  %v20196_v38 = vld [vmem:[#allocation8 + $0xba8] ss:$24 sps:$4 sm:$0xff]  }
 0x2d1   : > { %v20204_v40 = vld [vmem:[#allocation8 + $0xb7c] ss:$24 sps:$4 sm:$0xff]  }
 0x2d2   : > { %4652 = vmatpush2.bf16.msra.mxu0 %v20133_v37  ;;  %v3382_v46 = vmul.f32 %v3378_v42, %v3366_v41  ;;  %v22298_v50 = vpack.c.bf16 %v3381_v43, %v3381_v43  ;;  %v1732_v37 = vmul.f32 0.70710677, %v22250_v1  ;;  %v20207_v41 = vld [vmem:[#allocation8 + $0x854] ss:$24 sps:$4 sm:$0xff]   ;;  %v20202_v42 = vld [vmem:[#allocation8 + $0xb78] ss:$24 sps:$4 sm:$0xff]  }
 0x2d3   : > { %4703 = vmatprep.subr.bf16.mxu0 %v20141_v39  ;;  %v20199_v39 = vld [vmem:[#allocation8 + $0x880] ss:$24 sps:$4 sm:$0xff]   ;;  %v20205_v43 = vld [vmem:[#allocation8 + $0x850] ss:$24 sps:$4 sm:$0xff]  }
 0x2d4   : > { %v22295_v48 = vpack.c.bf16 %v3382_v46, %v3382_v46  ;;  %21731 = verf.f32 %v1732_v37  ;;  %v20213_v46 = vld [vmem:[#allocation8 + $0x824] ss:$24 sps:$4 sm:$0xff]  }
 0x2d5   : > { %4654 = vmatmul.mubr.bf16.vlgmr.msra.gmra.mxu0 %v22284_v35  ;;  %v20267_v37 = vld [vmem:[#allocation8 + $0x64] ss:$24 sps:$4 sm:$0xff]  }
 0x2d6   : > { %4704 = vmatpush1.bf16.msra.mxu0 %v20139_v45  ;;  %4735 = vmatprep.mubr.bf16.mxu0 %v22282_v32  ;;  %v20154_v32 = vld [vmem:[#allocation8 + $0x9f8] ss:$24 sps:$4 sm:$0xff]   ;;  %v20210_v45 = vld [vmem:[#allocation8 + $0xb4c] ss:$24 sps:$4 sm:$0xff]  }
 0x2d7   : > { %4612 = vmatprep.mubr.bf16.mxu1 %v22295_v48  ;;  %4705 = vmatprep.subr.bf16.mxu0 %v20147_v47  ;;  %v20208_v47 = vld [vmem:[#allocation8 + $0xb48] ss:$24 sps:$4 sm:$0xff]  }
 0x2d8   : > { %4613 = vmatmul.mubr.bf16.vlgmr.msra.gmra.mxu1 %v22298_v50 }
 0x2d9   : > { %4663 = vmatpush1.bf16.msra.mxu1 %v20142_v49  ;;  %4694 = vmatprep.mubr.bf16.mxu1 %v22295_v48  ;;  %v20211_v49 = vld [vmem:[#allocation8 + $0x820] ss:$24 sps:$4 sm:$0xff]  }
 0x2da   : > { %4706 = vmatpush1.bf16.msra.mxu0 %v20145_v53  ;;  %4664 = vmatprep.subr.bf16.mxu1 %v20150_v55  ;;  %v20216_v53 = vld [vmem:[#allocation8 + $0xb1c] ss:$24 sps:$4 sm:$0xff]  }
 0x2db   : > { %4707 = vmatprep.subr.bf16.mxu0 %v20153_v56  ;;  %v20219_v55 = vld [vmem:[#allocation8 + $0x7f4] ss:$24 sps:$4 sm:$0xff]   ;;  %v20214_v56 = vld [vmem:[#allocation8 + $0xb18] ss:$24 sps:$4 sm:$0xff]  }
 0x2dd   : > { %4665 = vmatpush1.bf16.msra.mxu1 %v20148_v57  ;;  %v20217_v57 = vld [vmem:[#allocation8 + $0x7f0] ss:$24 sps:$4 sm:$0xff]  }
 0x2de   : > { %4708 = vmatpush1.bf16.msra.mxu0 %v20151_v61  ;;  %4666 = vmatprep.subr.bf16.mxu1 %v20156_v62  ;;  %v20222_v61 = vld [vmem:[#allocation8 + $0xaec] ss:$24 sps:$4 sm:$0xff]  }
 0x2df   : > { %4709 = vmatprep.subr.bf16.mxu0 %v20159_v0  ;;  %v20225_v62 = vld [vmem:[#allocation8 + $0x7c4] ss:$24 sps:$4 sm:$0xff]  }
 0x2e1   : > { %4667 = vmatpush1.bf16.msra.mxu1 %v20154_v32  ;;  %v21732_v0 = vpop.eup %21731  ;;  %v20220_v32 = vld [vmem:[#allocation8 + $0xae8] ss:$24 sps:$4 sm:$0xff]  }
 0x2e2   : > { %4710 = vmatpush1.bf16.msra.mxu0 %v20157_v2  ;;  %4668 = vmatprep.subr.bf16.mxu1 %v20162_v3  ;;  %v20223_v2 = vld [vmem:[#allocation8 + $0x7c0] ss:$24 sps:$4 sm:$0xff]   ;;  %v20228_v3 = vld [vmem:[#allocation8 + $0xabc] ss:$24 sps:$4 sm:$0xff]  }
 0x2e3   : > { %4711 = vmatprep.subr.bf16.mxu0 %v20165_v5  ;;  %v20231_v5 = vld [vmem:[#allocation8 + $0x794] ss:$24 sps:$4 sm:$0xff]  }
 0x2e5   : > { %4669 = vmatpush1.bf16.msra.mxu1 %v20160_v6  ;;  %v1740_v6 = vadd.f32 1.0, %v21732_v0  ;;  %v20286_v0 = vld [vmem:[#allocation8 + $0xbe0] ss:$24 sps:$4 sm:$0xff]  }
 0x2e6   : > { %4712 = vmatpush1.bf16.msra.mxu0 %v20163_v8  ;;  %4670 = vmatprep.subr.bf16.mxu1 %v20168_v30  ;;  %v20226_v8 = vld [vmem:[#allocation8 + $0xab8] ss:$24 sps:$4 sm:$0xff]   ;;  %v1728_v30 = vmul.f32 0.5, %v22250_v1 }
 0x2e7   : > { %4713 = vmatprep.subr.bf16.mxu0 %v20171_v10  ;;  %v20229_v10 = vld [vmem:[#allocation8 + $0x790] ss:$24 sps:$4 sm:$0xff]   ;;  %v20238_v1 = vld [vmem:[#allocation8 + $0xa60] ss:$24 sps:$4 sm:$0xff]  }
 0x2e9   : > { %4671 = vmatpush1.bf16.msra.mxu1 %v20166_v11  ;;  %v20234_v11 = vld [vmem:[#allocation8 + $0xa8c] ss:$24 sps:$4 sm:$0xff]  }
 0x2ea   : > { %4714 = vmatpush1.bf16.msra.mxu0 %v20169_v13  ;;  %4672 = vmatprep.subr.bf16.mxu1 %v20174_v14  ;;  %v20237_v13 = vld [vmem:[#allocation8 + $0x154] ss:$24 sps:$4 sm:$0xff]   ;;  %v1744_v14 = vmul.f32 %v1740_v6, %v1728_v30  ;;  %v20292_v6 = vld [vmem:[#allocation8 + $0xbb0] ss:$24 sps:$4 sm:$0xff]   ;;  %v20300_v30 = vld [vmem:[#allocation8 + $0xb84] ss:$24 sps:$4 sm:$0xff]  }
 0x2eb   : > { %4715 = vmatprep.subr.bf16.mxu0 %v20177_v60  ;;  %v20232_v60 = vld [vmem:[#allocation8 + $0xa88] ss:$24 sps:$4 sm:$0xff]  }
 0x2ed   : > { %4673 = vmatpush1.bf16.msra.mxu1 %v20172_v15  ;;  %v20235_v15 = vld [vmem:[#allocation8 + $0x150] ss:$24 sps:$4 sm:$0xff]  }
 0x2ee   : > { %4716 = vmatpush1.bf16.msra.mxu0 %v20175_v17  ;;  %4674 = vmatprep.subr.bf16.mxu1 %v20180_v18  ;;  %v20240_v17 = vld [vmem:[#allocation8 + $0xa64] ss:$24 sps:$4 sm:$0xff]  }
 0x2ef   : > { %4717 = vmatprep.subr.bf16.mxu0 %v20183_v19  ;;  %v20243_v18 = vld [vmem:[#allocation8 + $0x124] ss:$24 sps:$4 sm:$0xff]   ;;  %v22306_v19 = vpack.c.bf16 %v1744_v14, %v1744_v14  ;;  %v20301_v14 = vld [vmem:[#allocation8 + $0x240] ss:$24 sps:$4 sm:$0xff]  }
 0x2f1   : > { %4675 = vmatpush1.bf16.msra.mxu1 %v20178_v9  ;;  %v20241_v9 = vld [vmem:[#allocation8 + $0x120] ss:$24 sps:$4 sm:$0xff]  }
 0x2f2   : > { %4718 = vmatpush1.bf16.msra.mxu0 %v20181_v21  ;;  %4676 = vmatprep.subr.bf16.mxu1 %v20186_v12  ;;  %v20246_v21 = vld [vmem:[#allocation8 + $0xa34] ss:$24 sps:$4 sm:$0xff]  }
 0x2f3   : > { %4719 = vmatprep.subr.bf16.mxu0 %v20189_v22  ;;  %v20249_v12 = vld [vmem:[#allocation8 + $0xf4] ss:$24 sps:$4 sm:$0xff]   ;;  %v20244_v22 = vld [vmem:[#allocation8 + $0xa30] ss:$24 sps:$4 sm:$0xff]  }
 0x2f5   : > { %4677 = vmatpush1.bf16.msra.mxu1 %v20184_v23  ;;  %v20247_v23 = vld [vmem:[#allocation8 + $0xf0] ss:$24 sps:$4 sm:$0xff]  }
 0x2f6   : > { %4720 = vmatpush2.bf16.msra.mxu0 %v20187_v26  ;;  %4678 = vmatprep.subr.bf16.mxu1 %v20192_v27  ;;  %v20252_v26 = vld [vmem:[#allocation8 + $0xa04] ss:$24 sps:$4 sm:$0xff]   ;;  %v20250_v27 = vld [vmem:[#allocation8 + $0xa00] ss:$24 sps:$4 sm:$0xff]  }
 0x2f7   : > { %4721 = vmatprep.subr.bf16.mxu0 %v20195_v29  ;;  %v20253_v29 = vld [vmem:[#allocation8 + $0xc0] ss:$24 sps:$4 sm:$0xff]  }
 0x2f9   : > { %4679 = vmatpush2.bf16.msra.mxu1 %v20190_v52  ;;  %v20258_v52 = vld [vmem:[#allocation8 + $0x9d4] ss:$24 sps:$4 sm:$0xff]  }
 0x2fa   : > { %4722 = vmatpush2.bf16.msra.mxu0 %v20193_v34  ;;  %4680 = vmatprep.subr.bf16.mxu1 %v20198_v24  ;;  %v20261_v34 = vld [vmem:[#allocation8 + $0x94] ss:$24 sps:$4 sm:$0xff]   ;;  %v20256_v24 = vld [vmem:[#allocation8 + $0x9d0] ss:$24 sps:$4 sm:$0xff]  }
 0x2fb   : > { %4723 = vmatprep.subr.bf16.mxu0 %v20201_v36  ;;  %v20264_v36 = vld [vmem:[#allocation8 + $0x9a4] ss:$24 sps:$4 sm:$0xff]  }
 0x2fd   : > { %4681 = vmatpush2.bf16.msra.mxu1 %v20196_v38  ;;  %v20262_v38 = vld [vmem:[#allocation8 + $0x9a0] ss:$24 sps:$4 sm:$0xff]  }
 0x2fe   : > { %4724 = vmatpush2.bf16.msra.mxu0 %v20199_v39  ;;  %4682 = vmatprep.subr.bf16.mxu1 %v20204_v40  ;;  %v20265_v39 = vld [vmem:[#allocation8 + $0x60] ss:$24 sps:$4 sm:$0xff]   ;;  %v20270_v40 = vld [vmem:[#allocation8 + $0x974] ss:$24 sps:$4 sm:$0xff]  }
 0x2ff   : > { %4725 = vmatprep.subr.bf16.mxu0 %v20207_v41  ;;  %v20273_v41 = vld [vmem:[#allocation8 + $0x34] ss:$24 sps:$4 sm:$0xff]  }
 0x301   : > { %4683 = vmatpush2.bf16.msra.mxu1 %v20202_v42  ;;  %v20268_v42 = vld [vmem:[#allocation8 + $0x970] ss:$24 sps:$4 sm:$0xff]  }
 0x302   : > { %4726 = vmatpush2.bf16.msra.mxu0 %v20205_v43  ;;  %4684 = vmatprep.subr.bf16.mxu1 %v20210_v45  ;;  %v20271_v43 = vld [vmem:[#allocation8 + $0x30] ss:$24 sps:$4 sm:$0xff]   ;;  %v20276_v45 = vld [vmem:[#allocation8 + $0x944] ss:$24 sps:$4 sm:$0xff]  }
 0x303   : > { %4727 = vmatprep.subr.bf16.mxu0 %v20213_v46  ;;  %v20279_v46 = vld [vmem:[#allocation8 + $0x4] ss:$24 sps:$4 sm:$0xff]  }
 0x305   : > { %4685 = vmatpush2.bf16.msra.mxu1 %v20208_v47  ;;  %v20274_v47 = vld [vmem:[#allocation8 + $0x940] ss:$24 sps:$4 sm:$0xff]  }
 0x306   : > { %4728 = vmatpush2.bf16.msra.mxu0 %v20211_v49  ;;  %4686 = vmatprep.subr.bf16.mxu1 %v20216_v53  ;;  %v20277_v49 = vld [vmem:[#allocation8] ss:$24 sps:$4 sm:$0xff]   ;;  %v20282_v53 = vld [vmem:[#allocation8 + $0x914] ss:$24 sps:$4 sm:$0xff]  }
 0x307   : > { %4729 = vmatprep.subr.bf16.mxu0 %v20219_v55  ;;  %v20285_v55 = vld [vmem:[#allocation8 + $0x2d4] ss:$24 sps:$4 sm:$0xff]  }
 0x309   : > { %4687 = vmatpush2.bf16.msra.mxu1 %v20214_v56  ;;  %v20280_v56 = vld [vmem:[#allocation8 + $0x910] ss:$24 sps:$4 sm:$0xff]  }
 0x30a   : > { %4730 = vmatpush2.bf16.msra.mxu0 %v20217_v57  ;;  %4688 = vmatprep.subr.bf16.mxu1 %v20222_v61  ;;  %v20283_v57 = vld [vmem:[#allocation8 + $0x2d0] ss:$24 sps:$4 sm:$0xff]   ;;  %v20288_v61 = vld [vmem:[#allocation8 + $0xbe4] ss:$24 sps:$4 sm:$0xff]  }
 0x30b   : > { %4731 = vmatprep.subr.bf16.mxu0 %v20225_v62  ;;  %v20291_v62 = vld [vmem:[#allocation8 + $0x2a4] ss:$24 sps:$4 sm:$0xff]  }
 0x30d   : > { %4689 = vmatpush2.bf16.msra.mxu1 %v20220_v32  ;;  %v20289_v32 = vld [vmem:[#allocation8 + $0x2a0] ss:$24 sps:$4 sm:$0xff]  }
 0x30e   : > { %4732 = vmatpush2.bf16.msra.mxu0 %v20223_v2  ;;  %4690 = vmatprep.subr.bf16.mxu1 %v20228_v3  ;;  %v20294_v2 = vld [vmem:[#allocation8 + $0xbb4] ss:$24 sps:$4 sm:$0xff]   ;;  %v1731_v3 = vmul.f32 0.70710677, %v22244_v51 }
 0x30f   : > { %4733 = vmatprep.subr.bf16.mxu0 %v20231_v5  ;;  %v20297_v5 = vld [vmem:[#allocation8 + $0x274] ss:$24 sps:$4 sm:$0xff]  }
 0x310   : > { %21733 = verf.f32 %v1731_v3  ;;  %v20348_v3 = vld [vmem:[#allocation8 + $0x3f4] ss:$24 sps:$4 sm:$0xff]  }
 0x311   : > { %4691 = vmatpush2.bf16.msra.mxu1 %v20226_v8  ;;  %v20295_v8 = vld [vmem:[#allocation8 + $0x270] ss:$24 sps:$4 sm:$0xff]  }
 0x312   : > { %4734 = vmatpush2.bf16.msra.mxu0 %v20229_v10  ;;  %4692 = vmatprep.subr.bf16.mxu1 %v20234_v11  ;;  %v1734_v10 = vmul.f32 0.70710677, %v22270_v31  ;;  %v20303_v11 = vld [vmem:[#allocation8 + $0x244] ss:$24 sps:$4 sm:$0xff]  }
 0x313   : > { %5745 = vmatprep.subr.bf16.mxu0 %v20237_v13  ;;  %v20298_v13 = vld [vmem:[#allocation8 + $0xb80] ss:$24 sps:$4 sm:$0xff]  }
 0x314   : > { %21735 = verf.f32 %v1734_v10  ;;  %v20354_v10 = vld [vmem:[#allocation8 + $0x3c4] ss:$24 sps:$4 sm:$0xff]  }
 0x315   : > { %4693 = vmatpush2.bf16.msra.mxu1 %v20232_v60  ;;  %4736 = vmatmul.mubr.bf16.vlgmr.msra.gmra.mxu0 %v22284_v35  ;;  %v20255_v35 = vld [vmem:[#allocation8 + $0xc4] ss:$24 sps:$4 sm:$0xff]   ;;  %v20306_v60 = vld [vmem:[#allocation8 + $0xb54] ss:$24 sps:$4 sm:$0xff]  }
 0x316   : > { %5746 = vmatpush1.bf16.msra.mxu0 %v20235_v15  ;;  %5777 = vmatprep.mubr.bf16.mxu0 %v22306_v19  ;;  %v20309_v15 = vld [vmem:[#allocation8 + $0x214] ss:$24 sps:$4 sm:$0xff]  }
 0x317   : > { %4744 = vmatprep.subr.bf16.mxu1 %v20240_v17  ;;  %5747 = vmatprep.subr.bf16.mxu0 %v20243_v18  ;;  %v20304_v17 = vld [vmem:[#allocation8 + $0xb50] ss:$24 sps:$4 sm:$0xff]  }
 0x318   : > { %4695 = vmatmul.mubr.bf16.vlgmr.msra.gmra.mxu1 %v22298_v50  ;;  %v20307_v18 = vld [vmem:[#allocation8 + $0x210] ss:$24 sps:$4 sm:$0xff]  }
 0x319   : > { %4745 = vmatpush1.bf16.msra.mxu1 %v20238_v1  ;;  %4776 = vmatprep.mubr.bf16.mxu1 %v22295_v48  ;;  %v20259_v48 = vld [vmem:[#allocation8 + $0x90] ss:$24 sps:$4 sm:$0xff]   ;;  %v20312_v1 = vld [vmem:[#allocation8 + $0xb24] ss:$24 sps:$4 sm:$0xff]  }
 0x31a   : > { %5748 = vmatpush1.bf16.msra.mxu0 %v20241_v9  ;;  %4746 = vmatprep.subr.bf16.mxu1 %v20246_v21  ;;  %v20315_v9 = vld [vmem:[#allocation8 + $0x1e4] ss:$24 sps:$4 sm:$0xff]   ;;  %v20310_v21 = vld [vmem:[#allocation8 + $0xb20] ss:$24 sps:$4 sm:$0xff]  }
 0x31b   : > { %5749 = vmatprep.subr.bf16.mxu0 %v20249_v12  ;;  %v20313_v12 = vld [vmem:[#allocation8 + $0x1e0] ss:$24 sps:$4 sm:$0xff]  }
 0x31d   : > { %4747 = vmatpush1.bf16.msra.mxu1 %v20244_v22  ;;  %v20318_v22 = vld [vmem:[#allocation8 + $0xaf4] ss:$24 sps:$4 sm:$0xff]  }
 0x31e   : > { %5750 = vmatpush1.bf16.msra.mxu0 %v20247_v23  ;;  %4748 = vmatprep.subr.bf16.mxu1 %v20252_v26  ;;  %v20321_v23 = vld [vmem:[#allocation8 + $0x1b4] ss:$24 sps:$4 sm:$0xff]   ;;  %v21734_v26 = vpop.eup %21733 }
 0x31f   : > { %5751 = vmatprep.subr.bf16.mxu0 %v20255_v35  ;;  %v20316_v35 = vld [vmem:[#allocation8 + $0xaf0] ss:$24 sps:$4 sm:$0xff]  }
 0x321   : > { %4749 = vmatpush1.bf16.msra.mxu1 %v20250_v27  ;;  %v20319_v27 = vld [vmem:[#allocation8 + $0x1b0] ss:$24 sps:$4 sm:$0xff]  }
 0x322   : > { %5752 = vmatpush1.bf16.msra.mxu0 %v20253_v29  ;;  %4750 = vmatprep.subr.bf16.mxu1 %v20258_v52  ;;  %v20324_v29 = vld [vmem:[#allocation8 + $0xac4] ss:$24 sps:$4 sm:$0xff]   ;;  %v1739_v52 = vadd.f32 1.0, %v21734_v26  ;;  %v20373_v26 = vld [vmem:[#allocation8 + $0x8] ss:$24 sps:$4 sm:$0xff]  }
 0x323   : > { %5753 = vmatprep.subr.bf16.mxu0 %v20261_v34  ;;  %v20327_v34 = vld [vmem:[#allocation8 + $0x184] ss:$24 sps:$4 sm:$0xff]  }
 0x325   : > { %4751 = vmatpush1.bf16.msra.mxu1 %v20256_v24  ;;  %v21736_v24 = vpop.eup %21735 }
 0x326   : > { %5754 = vmatpush1.bf16.msra.mxu0 %v20259_v48  ;;  %4752 = vmatprep.subr.bf16.mxu1 %v20264_v36  ;;  %v1727_v48 = vmul.f32 0.5, %v22244_v51  ;;  %v20322_v36 = vld [vmem:[#allocation8 + $0xac0] ss:$24 sps:$4 sm:$0xff]   ;;  %v20336_v51 = vld [vmem:[#allocation8 + $0x454] ss:$24 sps:$4 sm:$0xff]  }
 0x327   : > { %5755 = vmatprep.subr.bf16.mxu0 %v20267_v37  ;;  %v20325_v37 = vld [vmem:[#allocation8 + $0x180] ss:$24 sps:$4 sm:$0xff]  }
 0x329   : > { %4753 = vmatpush1.bf16.msra.mxu1 %v20262_v38  ;;  %v20330_v38 = vld [vmem:[#allocation8 + $0xa94] ss:$24 sps:$4 sm:$0xff]  }
 0x32a   : > { %5756 = vmatpush1.bf16.msra.mxu0 %v20265_v39  ;;  %4754 = vmatprep.subr.bf16.mxu1 %v20270_v40  ;;  %v1743_v39 = vmul.f32 %v1739_v52, %v1727_v48  ;;  %v20333_v40 = vld [vmem:[#allocation8 + $0x15c] ss:$24 sps:$4 sm:$0xff]   ;;  %v20379_v52 = vld [vmem:[#allocation8 + $0x2d8] ss:$24 sps:$4 sm:$0xff]  }
 0x32b   : > { %5757 = vmatprep.subr.bf16.mxu0 %v20273_v41  ;;  %v1742_v41 = vadd.f32 1.0, %v21736_v24  ;;  %v20387_v24 = vld [vmem:[#allocation8 + $0x2ac] ss:$24 sps:$4 sm:$0xff]   ;;  %v20382_v48 = vld [vmem:[#allocation8 + $0x5d0] ss:$24 sps:$4 sm:$0xff]  }
 0x32d   : > { %4755 = vmatpush1.bf16.msra.mxu1 %v20268_v42  ;;  %v1730_v42 = vmul.f32 0.5, %v22270_v31  ;;  %v20337_v31 = vld [vmem:[#allocation8 + $0x128] ss:$24 sps:$4 sm:$0xff]  }
 0x32e   : > { %5758 = vmatpush1.bf16.msra.mxu0 %v20271_v43  ;;  %4756 = vmatprep.subr.bf16.mxu1 %v20276_v45  ;;  %v20328_v43 = vld [vmem:[#allocation8 + $0xa90] ss:$24 sps:$4 sm:$0xff]  }
 0x32f   : > { %5759 = vmatprep.subr.bf16.mxu0 %v20279_v46  ;;  %v20331_v45 = vld [vmem:[#allocation8 + $0x158] ss:$24 sps:$4 sm:$0xff]   ;;  %v22316_v46 = vpack.c.bf16 %v1743_v39, %v1743_v39 }
 0x330   : > { %v20388_v39 = vld [vmem:[#allocation8 + $0x5a0] ss:$24 sps:$4 sm:$0xff]  }
 0x331   : > { %4757 = vmatpush1.bf16.msra.mxu1 %v20274_v47  ;;  %v1746_v47 = vmul.f32 %v1742_v41, %v1730_v42  ;;  %v20391_v41 = vld [vmem:[#allocation8 + $0x278] ss:$24 sps:$4 sm:$0xff]   ;;  %v20396_v42 = vld [vmem:[#allocation8 + $0x574] ss:$24 sps:$4 sm:$0xff]  }
 0x332   : > { %5760 = vmatpush1.bf16.msra.mxu0 %v20277_v49  ;;  %4758 = vmatprep.subr.bf16.mxu1 %v20282_v53  ;;  %v20339_v49 = vld [vmem:[#allocation8 + $0x12c] ss:$24 sps:$4 sm:$0xff]  }
 0x333   : > { %5761 = vmatprep.subr.bf16.mxu0 %v20285_v55  ;;  %v20334_v55 = vld [vmem:[#allocation8 + $0x450] ss:$24 sps:$4 sm:$0xff]  }
 0x335   : > { %4759 = vmatpush1.bf16.msra.mxu1 %v20280_v56  ;;  %v20342_v56 = vld [vmem:[#allocation8 + $0x424] ss:$24 sps:$4 sm:$0xff]  }
 0x336   : > { %5762 = vmatpush2.bf16.msra.mxu0 %v20283_v57  ;;  %4760 = vmatprep.subr.bf16.mxu1 %v20288_v61  ;;  %v22324_v61 = vpack.c.bf16 %v1746_v47, %v1746_v47  ;;  %v20402_v47 = vld [vmem:[#allocation8 + $0x544] ss:$24 sps:$4 sm:$0xff]  }
 0x337   : > { %5763 = vmatprep.subr.bf16.mxu0 %v20291_v62  ;;  %v20345_v62 = vld [vmem:[#allocation8 + $0xfc] ss:$24 sps:$4 sm:$0xff]  }
 0x339   : > { %4761 = vmatpush2.bf16.msra.mxu1 %v20286_v0 }
 0x33a   : > { %5764 = vmatpush2.bf16.msra.mxu0 %v20289_v32  ;;  %4762 = vmatprep.subr.bf16.mxu1 %v20294_v2  ;;  %v20340_v32 = vld [vmem:[#allocation8 + $0x420] ss:$24 sps:$4 sm:$0xff]  }
 0x33b   : > { %5765 = vmatprep.subr.bf16.mxu0 %v20297_v5  ;;  %v20343_v2 = vld [vmem:[#allocation8 + $0xf8] ss:$24 sps:$4 sm:$0xff]  }
 0x33d   : > { %4763 = vmatpush2.bf16.msra.mxu1 %v20292_v6  ;;  %v20351_v6 = vld [vmem:[#allocation8 + $0xcc] ss:$24 sps:$4 sm:$0xff]  }
 0x33e   : > { %5766 = vmatpush2.bf16.msra.mxu0 %v20295_v8  ;;  %4764 = vmatprep.subr.bf16.mxu1 %v20300_v30  ;;  %v20346_v8 = vld [vmem:[#allocation8 + $0x3f0] ss:$24 sps:$4 sm:$0xff]  }
 0x33f   : > { %5767 = vmatprep.subr.bf16.mxu0 %v20303_v11  ;;  %v20349_v30 = vld [vmem:[#allocation8 + $0xc8] ss:$24 sps:$4 sm:$0xff]  }
 0x340   : > { %v20352_v11 = vld [vmem:[#allocation8 + $0x3c0] ss:$24 sps:$4 sm:$0xff]  }
 0x341   : > { %4765 = vmatpush2.bf16.msra.mxu1 %v20298_v13  ;;  %v20355_v13 = vld [vmem:[#allocation8 + $0x98] ss:$24 sps:$4 sm:$0xff]  }
 0x342   : > { %5768 = vmatpush2.bf16.msra.mxu0 %v20301_v14  ;;  %4766 = vmatprep.subr.bf16.mxu1 %v20306_v60  ;;  %v20360_v14 = vld [vmem:[#allocation8 + $0x394] ss:$24 sps:$4 sm:$0xff]  }
 0x343   : > { %5769 = vmatprep.subr.bf16.mxu0 %v20309_v15  ;;  %v20363_v60 = vld [vmem:[#allocation8 + $0x6c] ss:$24 sps:$4 sm:$0xff]   ;;  %v20358_v15 = vld [vmem:[#allocation8 + $0x390] ss:$24 sps:$4 sm:$0xff]  }
 0x345   : > { %4767 = vmatpush2.bf16.msra.mxu1 %v20304_v17  ;;  %v20361_v17 = vld [vmem:[#allocation8 + $0x68] ss:$24 sps:$4 sm:$0xff]  }
 0x346   : > { %5770 = vmatpush2.bf16.msra.mxu0 %v20307_v18  ;;  %4768 = vmatprep.subr.bf16.mxu1 %v20312_v1  ;;  %v20366_v18 = vld [vmem:[#allocation8 + $0x364] ss:$24 sps:$4 sm:$0xff]  }
 0x347   : > { %5771 = vmatprep.subr.bf16.mxu0 %v20315_v9  ;;  %v20369_v1 = vld [vmem:[#allocation8 + $0x3c] ss:$24 sps:$4 sm:$0xff]   ;;  %v20364_v9 = vld [vmem:[#allocation8 + $0x360] ss:$24 sps:$4 sm:$0xff]  }
 0x349   : > { %4769 = vmatpush2.bf16.msra.mxu1 %v20310_v21  ;;  %v20367_v21 = vld [vmem:[#allocation8 + $0x38] ss:$24 sps:$4 sm:$0xff]  }
 0x34a   : > { %5772 = vmatpush2.bf16.msra.mxu0 %v20313_v12  ;;  %4770 = vmatprep.subr.bf16.mxu1 %v20318_v22  ;;  %v20372_v12 = vld [vmem:[#allocation8 + $0x334] ss:$24 sps:$4 sm:$0xff]  }
 0x34b   : > { %5773 = vmatprep.subr.bf16.mxu0 %v20321_v23  ;;  %v20375_v22 = vld [vmem:[#allocation8 + $0xc] ss:$24 sps:$4 sm:$0xff]   ;;  %v20370_v23 = vld [vmem:[#allocation8 + $0x330] ss:$24 sps:$4 sm:$0xff]  }
 0x34d   : > { %4771 = vmatpush2.bf16.msra.mxu1 %v20316_v35  ;;  %v20378_v35 = vld [vmem:[#allocation8 + $0x304] ss:$24 sps:$4 sm:$0xff]  }
 0x34e   : > { %5774 = vmatpush2.bf16.msra.mxu0 %v20319_v27  ;;  %4772 = vmatprep.subr.bf16.mxu1 %v20324_v29  ;;  %v20381_v27 = vld [vmem:[#allocation8 + $0x2dc] ss:$24 sps:$4 sm:$0xff]   ;;  %v20376_v29 = vld [vmem:[#allocation8 + $0x300] ss:$24 sps:$4 sm:$0xff]  }
 0x34f   : > { %5775 = vmatprep.subr.bf16.mxu0 %v20327_v34  ;;  %v20384_v34 = vld [vmem:[#allocation8 + $0x5d4] ss:$24 sps:$4 sm:$0xff]  }
 0x351   : > { %4773 = vmatpush2.bf16.msra.mxu1 %v20322_v36  ;;  %v20385_v36 = vld [vmem:[#allocation8 + $0x2a8] ss:$24 sps:$4 sm:$0xff]  }
 0x352   : > { %5776 = vmatpush2.bf16.msra.mxu0 %v20325_v37  ;;  %4774 = vmatprep.subr.bf16.mxu1 %v20330_v38  ;;  %v20390_v37 = vld [vmem:[#allocation8 + $0x5a4] ss:$24 sps:$4 sm:$0xff]  }
 0x353   : > { %5827 = vmatprep.subr.bf16.mxu0 %v20333_v40  ;;  %v20393_v38 = vld [vmem:[#allocation8 + $0x27c] ss:$24 sps:$4 sm:$0xff]   ;;  %v1733_v40 = vmul.f32 0.70710677, %v22268_v25 }
 0x355   : > { %4775 = vmatpush2.bf16.msra.mxu1 %v20328_v43  ;;  %5778 = vmatmul.mubr.bf16.vlgmr.msra.gmra.mxu0 %v22316_v46  ;;  %v22319_v53 = vpop.f32.mrf.mxu0  ;;  %v20399_v43 = vld [vmem:[#allocation8 + $0x24c] ss:$24 sps:$4 sm:$0xff]   ;;  %21737 = verf.f32 %v1733_v40 }
 0x356   : > { %5828 = vmatpush1.bf16.msra.mxu0 %v20331_v45  ;;  %5859 = vmatprep.mubr.bf16.mxu0 %v22306_v19  ;;  %v20394_v45 = vld [vmem:[#allocation8 + $0x570] ss:$24 sps:$4 sm:$0xff]  }
 0x357   : > { %5786 = vmatprep.subr.bf16.mxu1 %v20336_v51  ;;  %v22322_v57 = vpop.f32.mrf.mxu0  ;;  %5829 = vmatprep.subr.bf16.mxu0 %v20339_v49  ;;  %v20397_v51 = vld [vmem:[#allocation8 + $0x248] ss:$24 sps:$4 sm:$0xff]   ;;  %v20405_v49 = vld [vmem:[#allocation8 + $0x21c] ss:$24 sps:$4 sm:$0xff]  }
 0x358   : > { %4777 = vmatmul.mubr.bf16.vlgmr.msra.gmra.mxu1 %v22298_v50  ;;  %v20357_v50 = vld [vmem:[#allocation8 + $0x9c] ss:$24 sps:$4 sm:$0xff]  }
 0x359   : > { %5787 = vmatpush1.bf16.msra.mxu1 %v20334_v55  ;;  %5818 = vmatprep.mubr.bf16.mxu1 %v22324_v61  ;;  %v4577_v0 = vpop.f32.mrf.mxu0  ;;  %v20400_v55 = vld [vmem:[#allocation8 + $0x540] ss:$24 sps:$4 sm:$0xff]  }
 0x35a   : > { %5830 = vmatpush1.bf16.msra.mxu0 %v20337_v31  ;;  %5788 = vmatprep.subr.bf16.mxu1 %v20342_v56  ;;  %v20403_v31 = vld [vmem:[#allocation8 + $0x218] ss:$24 sps:$4 sm:$0xff]   ;;  %v20408_v56 = vld [vmem:[#allocation8 + $0x514] ss:$24 sps:$4 sm:$0xff]  }
 0x35b   : > { %v4578_v5 = vpop.f32.mrf.mxu0  ;;  %5831 = vmatprep.subr.bf16.mxu0 %v20345_v62  ;;  %v20411_v62 = vld [vmem:[#allocation8 + $0x1ec] ss:$24 sps:$4 sm:$0xff]   ;;  %v20406_v0 = vld [vmem:[#allocation8 + $0x510] ss:$24 sps:$4 sm:$0xff]  }
 0x35c   : > { %v20412_v5 = vld [vmem:[#allocation8 + $0x4e0] ss:$24 sps:$4 sm:$0xff]  }
 0x35d   : > { %5789 = vmatpush1.bf16.msra.mxu1 %v20340_v32  ;;  %v20409_v32 = vld [vmem:[#allocation8 + $0x1e8] ss:$24 sps:$4 sm:$0xff]  }
 0x35e   : > { %5832 = vmatpush1.bf16.msra.mxu0 %v20343_v2  ;;  %5790 = vmatprep.subr.bf16.mxu1 %v20348_v3  ;;  %v20414_v2 = vld [vmem:[#allocation8 + $0x4e4] ss:$24 sps:$4 sm:$0xff]  }
 0x35f   : > { %5833 = vmatprep.subr.bf16.mxu0 %v20351_v6  ;;  %v20417_v3 = vld [vmem:[#allocation8 + $0x1bc] ss:$24 sps:$4 sm:$0xff]   ;;  %v20415_v6 = vld [vmem:[#allocation8 + $0x1b8] ss:$24 sps:$4 sm:$0xff]  }
 0x361   : > { %5791 = vmatpush1.bf16.msra.mxu1 %v20346_v8  ;;  %v20420_v8 = vld [vmem:[#allocation8 + $0x4b4] ss:$24 sps:$4 sm:$0xff]  }
 0x362   : > { %5834 = vmatpush1.bf16.msra.mxu0 %v20349_v30  ;;  %5792 = vmatprep.subr.bf16.mxu1 %v20354_v10  ;;  %v21738_v30 = vpop.eup %21737  ;;  %v20423_v10 = vld [vmem:[#allocation8 + $0x18c] ss:$24 sps:$4 sm:$0xff]  }
 0x363   : > { %5835 = vmatprep.subr.bf16.mxu0 %v20357_v50  ;;  %v20418_v50 = vld [vmem:[#allocation8 + $0x4b0] ss:$24 sps:$4 sm:$0xff]  }
 0x365   : > { %5793 = vmatpush1.bf16.msra.mxu1 %v20352_v11  ;;  %v1741_v11 = vadd.f32 1.0, %v21738_v30  ;;  %v20477_v30 = vld [vmem:[#allocation8 + $0x2e4] ss:$24 sps:$4 sm:$0xff]  }
 0x366   : > { %5836 = vmatpush1.bf16.msra.mxu0 %v20355_v13  ;;  %5794 = vmatprep.subr.bf16.mxu1 %v20360_v14  ;;  %v20421_v13 = vld [vmem:[#allocation8 + $0x188] ss:$24 sps:$4 sm:$0xff]   ;;  %v20426_v14 = vld [vmem:[#allocation8 + $0x484] ss:$24 sps:$4 sm:$0xff]  }
 0x367   : > { %5837 = vmatprep.subr.bf16.mxu0 %v20363_v60  ;;  %v20429_v60 = vld [vmem:[#allocation8 + $0x164] ss:$24 sps:$4 sm:$0xff]  }
 0x369   : > { %5795 = vmatpush1.bf16.msra.mxu1 %v20358_v15  ;;  %v1729_v15 = vmul.f32 0.5, %v22268_v25  ;;  %v20433_v25 = vld [vmem:[#allocation8 + $0x130] ss:$24 sps:$4 sm:$0xff]  }
 0x36a   : > { %5838 = vmatpush1.bf16.msra.mxu0 %v20361_v17  ;;  %5796 = vmatprep.subr.bf16.mxu1 %v20366_v18  ;;  %v20424_v17 = vld [vmem:[#allocation8 + $0x480] ss:$24 sps:$4 sm:$0xff]  }
 0x36b   : > { %5839 = vmatprep.subr.bf16.mxu0 %v20369_v1  ;;  %v1745_v18 = vmul.f32 %v1741_v11, %v1729_v15  ;;  %v20427_v1 = vld [vmem:[#allocation8 + $0x160] ss:$24 sps:$4 sm:$0xff]   ;;  %v20480_v11 = vld [vmem:[#allocation8 + $0x5dc] ss:$24 sps:$4 sm:$0xff]   ;;  %v20486_v15 = vld [vmem:[#allocation8 + $0x5ac] ss:$24 sps:$4 sm:$0xff]  }
 0x36d   : > { %5797 = vmatpush1.bf16.msra.mxu1 %v20364_v9  ;;  %v20432_v9 = vld [vmem:[#allocation8 + $0x45c] ss:$24 sps:$4 sm:$0xff]  }
 0x36e   : > { %5840 = vmatpush1.bf16.msra.mxu0 %v20367_v21  ;;  %5798 = vmatprep.subr.bf16.mxu1 %v20372_v12  ;;  %v20435_v21 = vld [vmem:[#allocation8 + $0x134] ss:$24 sps:$4 sm:$0xff]  }
 0x36f   : > { %5841 = vmatprep.subr.bf16.mxu0 %v20375_v22  ;;  %v20430_v22 = vld [vmem:[#allocation8 + $0x458] ss:$24 sps:$4 sm:$0xff]  }
 0x371   : > { %5799 = vmatpush1.bf16.msra.mxu1 %v20370_v23  ;;  %v22333_v23 = vpack.c.bf16 %v1745_v18, %v1745_v18  ;;  %v20484_v18 = vld [vmem:[#allocation8 + $0x5a8] ss:$24 sps:$4 sm:$0xff]  }
 0x372   : > { %5842 = vmatpush1.bf16.msra.mxu0 %v20373_v26  ;;  %5800 = vmatprep.subr.bf16.mxu1 %v20378_v35  ;;  %v20438_v26 = vld [vmem:[#allocation8 + $0x42c] ss:$24 sps:$4 sm:$0xff]  }
 0x373   : > { %5843 = vmatprep.subr.bf16.mxu0 %v20381_v27  ;;  %v20441_v27 = vld [vmem:[#allocation8 + $0x104] ss:$24 sps:$4 sm:$0xff]  }
 0x375   : > { %5801 = vmatpush1.bf16.msra.mxu1 %v20376_v29 }
 0x376   : > { %5844 = vmatpush2.bf16.msra.mxu0 %v20379_v52  ;;  %5802 = vmatprep.subr.bf16.mxu1 %v20384_v34  ;;  %v20436_v34 = vld [vmem:[#allocation8 + $0x428] ss:$24 sps:$4 sm:$0xff]  }
 0x377   : > { %5845 = vmatprep.subr.bf16.mxu0 %v20387_v24 }
 0x379   : > { %5803 = vmatpush2.bf16.msra.mxu1 %v20382_v48  ;;  %v20444_v48 = vld [vmem:[#allocation8 + $0x3fc] ss:$24 sps:$4 sm:$0xff]  }
 0x37a   : > { %5846 = vmatpush2.bf16.msra.mxu0 %v20385_v36  ;;  %5804 = vmatprep.subr.bf16.mxu1 %v20390_v37  ;;  %v20447_v37 = vld [vmem:[#allocation8 + $0xd4] ss:$24 sps:$4 sm:$0xff]  }
 0x37b   : > { %5847 = vmatprep.subr.bf16.mxu0 %v20393_v38 }
 0x37d   : > { %5805 = vmatpush2.bf16.msra.mxu1 %v20388_v39  ;;  %v20442_v39 = vld [vmem:[#allocation8 + $0x3f8] ss:$24 sps:$4 sm:$0xff]  }
 0x37e   : > { %5848 = vmatpush2.bf16.msra.mxu0 %v20391_v41  ;;  %5806 = vmatprep.subr.bf16.mxu1 %v20396_v42  ;;  %v20445_v41 = vld [vmem:[#allocation8 + $0xd0] ss:$24 sps:$4 sm:$0xff]   ;;  %v20450_v42 = vld [vmem:[#allocation8 + $0x3cc] ss:$24 sps:$4 sm:$0xff]  }
 0x37f   : > { %5849 = vmatprep.subr.bf16.mxu0 %v20399_v43  ;;  %v20453_v43 = vld [vmem:[#allocation8 + $0xa4] ss:$24 sps:$4 sm:$0xff]  }
 0x381   : > { %5807 = vmatpush2.bf16.msra.mxu1 %v20394_v45  ;;  %v20448_v45 = vld [vmem:[#allocation8 + $0x3c8] ss:$24 sps:$4 sm:$0xff]  }
 0x382   : > { %5850 = vmatpush2.bf16.msra.mxu0 %v20397_v51  ;;  %5808 = vmatprep.subr.bf16.mxu1 %v20402_v47  ;;  %v20451_v51 = vld [vmem:[#allocation8 + $0xa0] ss:$24 sps:$4 sm:$0xff]   ;;  %v20456_v47 = vld [vmem:[#allocation8 + $0x39c] ss:$24 sps:$4 sm:$0xff]  }
 0x383   : > { %5851 = vmatprep.subr.bf16.mxu0 %v20405_v49  ;;  %v20459_v49 = vld [vmem:[#allocation8 + $0x74] ss:$24 sps:$4 sm:$0xff]  }
 0x385   : > { %5809 = vmatpush2.bf16.msra.mxu1 %v20400_v55  ;;  %v20454_v55 = vld [vmem:[#allocation8 + $0x398] ss:$24 sps:$4 sm:$0xff]  }
 0x386   : > { %5852 = vmatpush2.bf16.msra.mxu0 %v20403_v31  ;;  %5810 = vmatprep.subr.bf16.mxu1 %v20408_v56  ;;  %v20457_v31 = vld [vmem:[#allocation8 + $0x70] ss:$24 sps:$4 sm:$0xff]   ;;  %v20462_v56 = vld [vmem:[#allocation8 + $0x36c] ss:$24 sps:$4 sm:$0xff]  }
 0x387   : > { %5853 = vmatprep.subr.bf16.mxu0 %v20411_v62  ;;  %v20465_v62 = vld [vmem:[#allocation8 + $0x44] ss:$24 sps:$4 sm:$0xff]  }
 0x389   : > { %5811 = vmatpush2.bf16.msra.mxu1 %v20406_v0  ;;  %v20460_v0 = vld [vmem:[#allocation8 + $0x368] ss:$24 sps:$4 sm:$0xff]  }
 0x38a   : > { %5854 = vmatpush2.bf16.msra.mxu0 %v20409_v32  ;;  %5812 = vmatprep.subr.bf16.mxu1 %v20414_v2  ;;  %v20463_v32 = vld [vmem:[#allocation8 + $0x40] ss:$24 sps:$4 sm:$0xff]   ;;  %v20468_v2 = vld [vmem:[#allocation8 + $0x33c] ss:$24 sps:$4 sm:$0xff]  }
 0x38b   : > { %5855 = vmatprep.subr.bf16.mxu0 %v20417_v3  ;;  %v20471_v3 = vld [vmem:[#allocation8 + $0x14] ss:$24 sps:$4 sm:$0xff]  }
 0x38d   : > { %5813 = vmatpush2.bf16.msra.mxu1 %v20412_v5  ;;  %v20466_v5 = vld [vmem:[#allocation8 + $0x338] ss:$24 sps:$4 sm:$0xff]  }
 0x38e   : > { %5856 = vmatpush2.bf16.msra.mxu0 %v20415_v6  ;;  %5814 = vmatprep.subr.bf16.mxu1 %v20420_v8  ;;  %v20469_v6 = vld [vmem:[#allocation8 + $0x10] ss:$24 sps:$4 sm:$0xff]   ;;  %v20474_v8 = vld [vmem:[#allocation8 + $0x30c] ss:$24 sps:$4 sm:$0xff]  }
 0x38f   : > { %5857 = vmatprep.subr.bf16.mxu0 %v20423_v10  ;;  %v20472_v10 = vld [vmem:[#allocation8 + $0x308] ss:$24 sps:$4 sm:$0xff]  }
 0x391   : > { %5815 = vmatpush2.bf16.msra.mxu1 %v20418_v50  ;;  %v20475_v50 = vld [vmem:[#allocation8 + $0x2e0] ss:$24 sps:$4 sm:$0xff]  }
 0x392   : > { %5858 = vmatpush2.bf16.msra.mxu0 %v20421_v13  ;;  %5816 = vmatprep.subr.bf16.mxu1 %v20426_v14  ;;  %v20483_v13 = vld [vmem:[#allocation8 + $0x2b4] ss:$24 sps:$4 sm:$0xff]   ;;  %v20478_v14 = vld [vmem:[#allocation8 + $0x5d8] ss:$24 sps:$4 sm:$0xff]  }
 0x393   : > { %5909 = vmatprep.subr.bf16.mxu0 %v20429_v60  ;;  %v20481_v60 = vld [vmem:[#allocation8 + $0x2b0] ss:$24 sps:$4 sm:$0xff]  }
 0x395   : > { %5817 = vmatpush2.bf16.msra.mxu1 %v20424_v17  ;;  %v22330_v12 = vpop.f32.mrf.mxu0  ;;  %5860 = vmatmul.mubr.bf16.vlgmr.msra.gmra.mxu0 %v22316_v46  ;;  %v20489_v17 = vld [vmem:[#allocation8 + $0x284] ss:$24 sps:$4 sm:$0xff]  }
 0x396   : > { %5910 = vmatpush1.bf16.msra.mxu0 %v20427_v1  ;;  %5941 = vmatprep.mubr.bf16.mxu0 %v22306_v19  ;;  %v20439_v19 = vld [vmem:[#allocation8 + $0x100] ss:$24 sps:$4 sm:$0xff]  }
 0x397   : > { %v22336_v35 = vpop.f32.mrf.mxu0  ;;  %5868 = vmatprep.subr.bf16.mxu1 %v20432_v9  ;;  %5911 = vmatprep.subr.bf16.mxu0 %v20435_v21  ;;  %v20487_v1 = vld [vmem:[#allocation8 + $0x280] ss:$24 sps:$4 sm:$0xff]   ;;  %v20492_v9 = vld [vmem:[#allocation8 + $0x57c] ss:$24 sps:$4 sm:$0xff]  }
 0x398   : > { %5819 = vmatmul.mubr.bf16.vlgmr.msra.gmra.mxu1 %v22333_v23  ;;  %v22339_v29 = vpop.f32.mrf.mxu1  ;;  %v20495_v21 = vld [vmem:[#allocation8 + $0x254] ss:$24 sps:$4 sm:$0xff]  }
 0x399   : > { %5869 = vmatpush1.bf16.msra.mxu1 %v20430_v22  ;;  %5900 = vmatprep.mubr.bf16.mxu1 %v22324_v61  ;;  %v4659_v52 = vpop.f32.mrf.mxu0  ;;  %v20490_v22 = vld [vmem:[#allocation8 + $0x578] ss:$24 sps:$4 sm:$0xff]  }
 0x39a   : > { %v22342_v24 = vpop.f32.mrf.mxu1  ;;  %5912 = vmatpush1.bf16.msra.mxu0 %v20433_v25  ;;  %5870 = vmatprep.subr.bf16.mxu1 %v20438_v26  ;;  %v20493_v25 = vld [vmem:[#allocation8 + $0x250] ss:$24 sps:$4 sm:$0xff]   ;;  %v20498_v26 = vld [vmem:[#allocation8 + $0x54c] ss:$24 sps:$4 sm:$0xff]  }
 0x39b   : > { %v4660_v36 = vpop.f32.mrf.mxu0  ;;  %5913 = vmatprep.subr.bf16.mxu0 %v20441_v27  ;;  %v20501_v27 = vld [vmem:[#allocation8 + $0x224] ss:$24 sps:$4 sm:$0xff]   ;;  %v20496_v52 = vld [vmem:[#allocation8 + $0x548] ss:$24 sps:$4 sm:$0xff]  }
 0x39c   : > { %v4618_v38 = vpop.f32.mrf.mxu1  ;;  %v20502_v36 = vld [vmem:[#allocation8 + $0x518] ss:$24 sps:$4 sm:$0xff]  }
 0x39d   : > { %5871 = vmatpush1.bf16.msra.mxu1 %v20436_v34  ;;  %v20499_v34 = vld [vmem:[#allocation8 + $0x220] ss:$24 sps:$4 sm:$0xff]   ;;  %v20510_v38 = vld [vmem:[#allocation8 + $0x4ec] ss:$24 sps:$4 sm:$0xff]  }
 0x39e   : > { %v4619_v40 = vpop.f32.mrf.mxu1  ;;  %5914 = vmatpush1.bf16.msra.mxu0 %v20439_v19  ;;  %5872 = vmatprep.subr.bf16.mxu1 %v20444_v48  ;;  %v20504_v19 = vld [vmem:[#allocation8 + $0x51c] ss:$24 sps:$4 sm:$0xff]  }
 0x39f   : > { %5915 = vmatprep.subr.bf16.mxu0 %v20447_v37  ;;  %v20507_v48 = vld [vmem:[#allocation8 + $0x1f4] ss:$24 sps:$4 sm:$0xff]   ;;  %v20505_v37 = vld [vmem:[#allocation8 + $0x1f0] ss:$24 sps:$4 sm:$0xff]  }
 0x3a0   : > { %v20508_v40 = vld [vmem:[#allocation8 + $0x4e8] ss:$24 sps:$4 sm:$0xff]  }
 0x3a1   : > { %5873 = vmatpush1.bf16.msra.mxu1 %v20442_v39  ;;  %v20513_v39 = vld [vmem:[#allocation8 + $0x1c4] ss:$24 sps:$4 sm:$0xff]  }
 0x3a2   : > { %5916 = vmatpush1.bf16.msra.mxu0 %v20445_v41  ;;  %5874 = vmatprep.subr.bf16.mxu1 %v20450_v42  ;;  %v20511_v41 = vld [vmem:[#allocation8 + $0x1c0] ss:$24 sps:$4 sm:$0xff]   ;;  %v20516_v42 = vld [vmem:[#allocation8 + $0x4bc] ss:$24 sps:$4 sm:$0xff]  }
 0x3a3   : > { %5917 = vmatprep.subr.bf16.mxu0 %v20453_v43  ;;  %v20519_v43 = vld [vmem:[#allocation8 + $0x194] ss:$24 sps:$4 sm:$0xff]  }
 0x3a5   : > { %5875 = vmatpush1.bf16.msra.mxu1 %v20448_v45  ;;  %v6019_v45 = vld [vmem:[#allocation5 + $0x560] sm:$0xff] }
 0x3a6   : > { %5918 = vmatpush1.bf16.msra.mxu0 %v20451_v51  ;;  %5876 = vmatprep.subr.bf16.mxu1 %v20456_v47  ;;  %v6021_v51 = vld [vmem:[#allocation5 + $0x5c0] sm:$0xff]  ;;  %v20514_v47 = vld [vmem:[#allocation8 + $0x4b8] ss:$24 sps:$4 sm:$0xff]  }
 0x3a7   : > { %5919 = vmatprep.subr.bf16.mxu0 %v20459_v49  ;;  %v20517_v49 = vld [vmem:[#allocation8 + $0x190] ss:$24 sps:$4 sm:$0xff]  }
 0x3a9   : > { %5877 = vmatpush1.bf16.msra.mxu1 %v20454_v55  ;;  %v20522_v55 = vld [vmem:[#allocation8 + $0x48c] ss:$24 sps:$4 sm:$0xff]  }
 0x3aa   : > { %5920 = vmatpush1.bf16.msra.mxu0 %v20457_v31  ;;  %5878 = vmatprep.subr.bf16.mxu1 %v20462_v56  ;;  %v18390_v31 = vcombine.high %v6019_v45, %v6021_v51  ;;  %v6015_v56 = vld [vmem:[#allocation5 + $0x4a0] sm:$0xff] }
 0x3ab   : > { %5921 = vmatprep.subr.bf16.mxu0 %v20465_v62  ;;  %v6017_v62 = vld [vmem:[#allocation5 + $0x500] sm:$0xff] }
 0x3ad   : > { %5879 = vmatpush1.bf16.msra.mxu1 %v20460_v0  ;;  %v20520_v0 = vld [vmem:[#allocation8 + $0x488] ss:$24 sps:$4 sm:$0xff]  }
 0x3ae   : > { %5922 = vmatpush1.bf16.msra.mxu0 %v20463_v32  ;;  %5880 = vmatprep.subr.bf16.mxu1 %v20468_v2  ;;  %v20525_v32 = vld [vmem:[#allocation8 + $0x464] ss:$24 sps:$4 sm:$0xff]   ;;  %v18389_v2 = vcombine.low %v6019_v45, %v6021_v51  ;;  %v20535_v45 = vld [vmem:[#allocation8 + $0x3a0] ss:$24 sps:$4 sm:$0xff]   ;;  %v20540_v51 = vld [vmem:[#allocation8 + $0x374] ss:$24 sps:$4 sm:$0xff]  }
 0x3af   : > { %5923 = vmatprep.subr.bf16.mxu0 %v20471_v3  ;;  %v18386_v3 = vcombine.high %v6015_v56, %v6017_v62 }
 0x3b1   : > { %5881 = vmatpush1.bf16.msra.mxu1 %v20466_v5  ;;  %v6011_v5 = vld [vmem:[#allocation5 + $0x3e0] sm:$0xff] }
 0x3b2   : > { %5924 = vmatpush1.bf16.msra.mxu0 %v20469_v6  ;;  %5882 = vmatprep.subr.bf16.mxu1 %v20474_v8  ;;  %v6013_v6 = vld [vmem:[#allocation5 + $0x440] sm:$0xff] }
 0x3b3   : > { %5925 = vmatprep.subr.bf16.mxu0 %v20477_v30  ;;  %v20523_v30 = vld [vmem:[#allocation8 + $0x460] ss:$24 sps:$4 sm:$0xff]  }
 0x3b5   : > { %5883 = vmatpush1.bf16.msra.mxu1 %v20472_v10  ;;  %v20528_v10 = vld [vmem:[#allocation8 + $0x434] ss:$24 sps:$4 sm:$0xff]  }
 0x3b6   : > { %5926 = vmatpush2.bf16.msra.mxu0 %v20475_v50  ;;  %5884 = vmatprep.subr.bf16.mxu1 %v20480_v11  ;;  %v18385_v50 = vcombine.low %v6015_v56, %v6017_v62  ;;  %v20538_v56 = vld [vmem:[#allocation8 + $0x370] ss:$24 sps:$4 sm:$0xff]   ;;  %v20543_v62 = vld [vmem:[#allocation8 + $0x344] ss:$24 sps:$4 sm:$0xff]  }
 0x3b7   : > { %5927 = vmatprep.subr.bf16.mxu0 %v20483_v13  ;;  %v18382_v13 = vcombine.high %v6011_v5, %v6013_v6 }
 0x3b9   : > { %5885 = vmatpush2.bf16.msra.mxu1 %v20478_v14 }
 0x3ba   : > { %5928 = vmatpush2.bf16.msra.mxu0 %v20481_v60  ;;  %5886 = vmatprep.subr.bf16.mxu1 %v20486_v15  ;;  %v6007_v60 = vld [vmem:[#allocation5 + $0x320] sm:$0xff] }
 0x3bb   : > { %5929 = vmatprep.subr.bf16.mxu0 %v20489_v17  ;;  %v6009_v15 = vld [vmem:[#allocation5 + $0x380] sm:$0xff] }
 0x3bc   : > { %v20526_v17 = vld [vmem:[#allocation8 + $0x430] ss:$24 sps:$4 sm:$0xff]  }
 0x3bd   : > { %5887 = vmatpush2.bf16.msra.mxu1 %v20484_v18 }
 0x3be   : > { %5930 = vmatpush2.bf16.msra.mxu0 %v20487_v1  ;;  %5888 = vmatprep.subr.bf16.mxu1 %v20492_v9  ;;  %v20531_v1 = vld [vmem:[#allocation8 + $0x404] ss:$24 sps:$4 sm:$0xff]   ;;  %v18381_v9 = vcombine.low %v6011_v5, %v6013_v6  ;;  %v20541_v5 = vld [vmem:[#allocation8 + $0x340] ss:$24 sps:$4 sm:$0xff]   ;;  %v20546_v6 = vld [vmem:[#allocation8 + $0x314] ss:$24 sps:$4 sm:$0xff]  }
 0x3bf   : > { %5931 = vmatprep.subr.bf16.mxu0 %v20495_v21 }
 0x3c1   : > { %5889 = vmatpush2.bf16.msra.mxu1 %v20490_v22  ;;  %v18378_v22 = vcombine.high %v6007_v60, %v6009_v15 }
 0x3c2   : > { %5932 = vmatpush2.bf16.msra.mxu0 %v20493_v25  ;;  %5890 = vmatprep.subr.bf16.mxu1 %v20498_v26  ;;  %v6003_v26 = vld [vmem:[#allocation5 + $0x260] sm:$0xff] }
 0x3c3   : > { %5933 = vmatprep.subr.bf16.mxu0 %v20501_v27  ;;  %v6005_v27 = vld [vmem:[#allocation5 + $0x2c0] sm:$0xff] }
 0x3c5   : > { %5891 = vmatpush2.bf16.msra.mxu1 %v20496_v52  ;;  %v20529_v52 = vld [vmem:[#allocation8 + $0x400] ss:$24 sps:$4 sm:$0xff]  }
 0x3c6   : > { %5934 = vmatpush2.bf16.msra.mxu0 %v20499_v34  ;;  %5892 = vmatprep.subr.bf16.mxu1 %v20504_v19  ;;  %v18377_v19 = vcombine.low %v6007_v60, %v6009_v15  ;;  %v20544_v60 = vld [vmem:[#allocation8 + $0x310] ss:$24 sps:$4 sm:$0xff]   ;;  %v20549_v15 = vld [vmem:[#allocation8 + $0x5e4] ss:$24 sps:$4 sm:$0xff]  }
 0x3c7   : > { %5935 = vmatprep.subr.bf16.mxu0 %v20507_v48  ;;  %v18374_v48 = vcombine.high %v6003_v26, %v6005_v27 }
 0x3c9   : > { %5893 = vmatpush2.bf16.msra.mxu1 %v20502_v36  ;;  %v5999_v36 = vld [vmem:[#allocation5 + $0x1a0] sm:$0xff] }
 0x3ca   : > { %5936 = vmatpush2.bf16.msra.mxu0 %v20505_v37  ;;  %5894 = vmatprep.subr.bf16.mxu1 %v20510_v38  ;;  %v6001_v37 = vld [vmem:[#allocation5 + $0x200] sm:$0xff] }
 0x3cb   : > { %5937 = vmatprep.subr.bf16.mxu0 %v20513_v39  ;;  %v20532_v38 = vld [vmem:[#allocation8 + $0x3d0] ss:$24 sps:$4 sm:$0xff]   ;;  %v20537_v39 = vld [vmem:[#allocation8 + $0x3a4] ss:$24 sps:$4 sm:$0xff]  }
 0x3cd   : > { %5895 = vmatpush2.bf16.msra.mxu1 %v20508_v40  ;;  %v18373_v40 = vcombine.low %v6003_v26, %v6005_v27  ;;  %v6039_v27 = vld [vmem:[#allocation5 + $0x920] sm:$0xff] }
 0x3ce   : > { %5938 = vmatpush2.bf16.msra.mxu0 %v20511_v41  ;;  %5896 = vmatprep.subr.bf16.mxu1 %v20516_v42  ;;  %v18370_v41 = vcombine.high %v5999_v36, %v6001_v37  ;;  %v5995_v42 = vld [vmem:[#allocation5 + $0xe0] sm:$0xff] }
 0x3cf   : > { %5939 = vmatprep.subr.bf16.mxu0 %v20519_v43  ;;  %v5997_v43 = vld [vmem:[#allocation5 + $0x140] sm:$0xff] }
 0x3d1   : > { %5897 = vmatpush2.bf16.msra.mxu1 %v20514_v47  ;;  %v18369_v47 = vcombine.low %v5999_v36, %v6001_v37  ;;  %v6035_v36 = vld [vmem:[#allocation5 + $0x860] sm:$0xff] }
 0x3d2   : > { %5940 = vmatpush2.bf16.msra.mxu0 %v20517_v49  ;;  %5898 = vmatprep.subr.bf16.mxu1 %v20522_v55  ;;  %v18366_v49 = vcombine.high %v5995_v42, %v5997_v43  ;;  %v5991_v55 = vld [vmem:[#allocation5 + $0x20] sm:$0xff] }
 0x3d3   : > { %7165 = vmatprep.subr.bf16.mxu0 %v18390_v31  ;;  %v5993_v31 = vld [vmem:[#allocation5 + $0x80] sm:$0xff] }
 0x3d4   : > { %v6037_v37 = vld [vmem:[#allocation5 + $0x8c0] sm:$0xff] }
 0x3d5   : > { %5899 = vmatpush2.bf16.msra.mxu1 %v20520_v0  ;;  %v22344_v8 = vpop.f32.mrf.mxu0  ;;  %5942 = vmatmul.mubr.bf16.vlgmr.msra.gmra.mxu0 %v22316_v46  ;;  %v18365_v0 = vcombine.low %v5995_v42, %v5997_v43  ;;  %v6031_v42 = vld [vmem:[#allocation5 + $0x7a0] sm:$0xff] }
 0x3d6   : > { %5950 = vmatprep.subr.bf16.mxu1 %v20525_v32  ;;  %7166 = vmatpush1.bf16.msra.mxu0 %v18389_v2  ;;  %v18362_v32 = vcombine.high %v5991_v55, %v5993_v31  ;;  %v6051_v2 = vld [vmem:[#allocation5 + $0xb60] sm:$0xff] }
 0x3d7   : > { %v22347_v11 = vpop.f32.mrf.mxu0  ;;  %7167 = vmatprep.subr.bf16.mxu0 %v18386_v3  ;;  %7197 = vmatprep.mubr.bf16.mxu0 %v22194_v58  ;;  %v6053_v3 = vld [vmem:[#allocation5 + $0xbc0] sm:$0xff] }
 0x3d8   : > { %v22350_v14 = vpop.f32.mrf.mxu1  ;;  %5901 = vmatmul.mubr.bf16.vlgmr.msra.gmra.mxu1 %v22333_v23  ;;  %v6033_v43 = vld [vmem:[#allocation5 + $0x800] sm:$0xff] }
 0x3d9   : > { %5951 = vmatpush1.bf16.msra.mxu1 %v20523_v30  ;;  %5982 = vmatprep.mubr.bf16.mxu1 %v22324_v61  ;;  %v4741_v46 = vpop.f32.mrf.mxu0  ;;  %v20534_v61 = vld [vmem:[#allocation8 + $0x3d4] ss:$24 sps:$4 sm:$0xff]   ;;  %v18361_v30 = vcombine.low %v5991_v55, %v5993_v31 }
 0x3da   : > { %v22354_v18 = vpop.f32.mrf.mxu1  ;;  %5952 = vmatprep.subr.bf16.mxu1 %v20528_v10  ;;  %7168 = vmatpush1.bf16.msra.mxu0 %v18385_v50  ;;  %v18422_v10 = vcombine.high %v6051_v2, %v6053_v3  ;;  %v6047_v50 = vld [vmem:[#allocation5 + $0xaa0] sm:$0xff]  ;;  %v18421_v46 = vcombine.low %v6051_v2, %v6053_v3 }
 0x3db   : > { %v4742_v21 = vpop.f32.mrf.mxu0  ;;  %7169 = vmatprep.subr.bf16.mxu0 %v18382_v13  ;;  %v6049_v13 = vld [vmem:[#allocation5 + $0xb00] sm:$0xff] }
 0x3dc   : > { %v4700_v25 = vpop.f32.mrf.mxu1  ;;  %v20547_v21 = vld [vmem:[#allocation8 + $0x5e0] ss:$24 sps:$4 sm:$0xff]   ;;  %v6027_v55 = vld [vmem:[#allocation5 + $0x6e0] sm:$0xff] }
 0x3dd   : > { %5953 = vmatpush1.bf16.msra.mxu1 %v20526_v17  ;;  %v18418_v17 = vcombine.high %v6047_v50, %v6049_v13  ;;  %v18417_v25 = vcombine.low %v6047_v50, %v6049_v13  ;;  %v6029_v31 = vld [vmem:[#allocation5 + $0x740] sm:$0xff] }
 0x3de   : > { %v4701_v34 = vpop.f32.mrf.mxu1  ;;  %5954 = vmatprep.subr.bf16.mxu1 %v20531_v1  ;;  %7170 = vmatpush1.bf16.msra.mxu0 %v18381_v9  ;;  %v6043_v1 = vld [vmem:[#allocation5 + $0x9e0] sm:$0xff] }
 0x3df   : > { %7171 = vmatprep.subr.bf16.mxu0 %v18378_v22  ;;  %v6045_v9 = vld [vmem:[#allocation5 + $0xa40] sm:$0xff] }
 0x3e0   : > { %v20552_v22 = vld [vmem:[#allocation8 + $0x5b4] ss:$24 sps:$4 sm:$0xff]   ;;  %v18414_v26 = vcombine.high %v6043_v1, %v6045_v9  ;;  %v20550_v34 = vld [vmem:[#allocation8 + $0x5b0] ss:$24 sps:$4 sm:$0xff]  }
 0x3e1   : > { %5955 = vmatpush1.bf16.msra.mxu1 %v20529_v52  ;;  %v6041_v52 = vld [vmem:[#allocation5 + $0x980] sm:$0xff] }
 0x3e2   : > { %5956 = vmatprep.subr.bf16.mxu1 %v20534_v61  ;;  %7172 = vmatpush1.bf16.msra.mxu0 %v18377_v19  ;;  %v20555_v61 = vld [vmem:[#allocation8 + $0x584] ss:$24 sps:$4 sm:$0xff]   ;;  %v18413_v19 = vcombine.low %v6043_v1, %v6045_v9  ;;  %v6023_v2 = vld [vmem:[#allocation5 + $0x620] sm:$0xff] }
 0x3e3   : > { %7173 = vmatprep.subr.bf16.mxu0 %v18374_v48  ;;  %v18410_v48 = vcombine.high %v6039_v27, %v6041_v52  ;;  %v6025_v3 = vld [vmem:[#allocation5 + $0x680] sm:$0xff] }
 0x3e4   : > { %v6147_v50 = vld [vmem:[#allocation5 + $0x1d60] sm:$0xff] }
 0x3e5   : > { %5957 = vmatpush1.bf16.msra.mxu1 %v20532_v38  ;;  %v20553_v38 = vld [vmem:[#allocation8 + $0x580] ss:$24 sps:$4 sm:$0xff]   ;;  %v6149_v13 = vld [vmem:[#allocation5 + $0x1dc0] sm:$0xff] }
 0x3e6   : > { %5958 = vmatprep.subr.bf16.mxu1 %v20537_v39  ;;  %7174 = vmatpush1.bf16.msra.mxu0 %v18373_v40  ;;  %v20558_v39 = vld [vmem:[#allocation8 + $0x554] ss:$24 sps:$4 sm:$0xff]   ;;  %v18409_v40 = vcombine.low %v6039_v27, %v6041_v52  ;;  %v18518_v9 = vcombine.high %v6147_v50, %v6149_v13  ;;  %v18517_v27 = vcombine.low %v6147_v50, %v6149_v13 }
 0x3e7   : > { %7175 = vmatprep.subr.bf16.mxu0 %v18370_v41  ;;  %v18406_v41 = vcombine.high %v6035_v36, %v6037_v37  ;;  %v6085_v1 = vld [vmem:[#allocation5 + $0x11c0] sm:$0xff] }
 0x3e8   : > { %v6079_v52 = vld [vmem:[#allocation5 + $0x10a0] sm:$0xff] }
 0x3e9   : > { %5959 = vmatpush1.bf16.msra.mxu1 %v20535_v45  ;;  %v20556_v45 = vld [vmem:[#allocation8 + $0x550] ss:$24 sps:$4 sm:$0xff]  }
 0x3ea   : > { %5960 = vmatprep.subr.bf16.mxu1 %v20540_v51  ;;  %7176 = vmatpush1.bf16.msra.mxu0 %v18369_v47  ;;  %v20561_v51 = vld [vmem:[#allocation8 + $0x524] ss:$24 sps:$4 sm:$0xff]   ;;  %v18405_v47 = vcombine.low %v6035_v36, %v6037_v37  ;;  %v6141_v36 = vld [vmem:[#allocation5 + $0x1c40] sm:$0xff] }
 0x3eb   : > { %7177 = vmatprep.subr.bf16.mxu0 %v18366_v49  ;;  %v18402_v49 = vcombine.high %v6031_v42, %v6033_v43 }
 0x3ed   : > { %5961 = vmatpush1.bf16.msra.mxu1 %v20538_v56  ;;  %v20559_v56 = vld [vmem:[#allocation8 + $0x520] ss:$24 sps:$4 sm:$0xff]  }
 0x3ee   : > { %5962 = vmatprep.subr.bf16.mxu1 %v20543_v62  ;;  %7178 = vmatpush1.bf16.msra.mxu0 %v18365_v0  ;;  %v20564_v62 = vld [vmem:[#allocation8 + $0x4f4] ss:$24 sps:$4 sm:$0xff]   ;;  %v18401_v0 = vcombine.low %v6031_v42, %v6033_v43 }
 0x3ef   : > { %7179 = vmatprep.subr.bf16.mxu0 %v18362_v32  ;;  %v18398_v32 = vcombine.high %v6027_v55, %v6029_v31 }
 0x3f1   : > { %5963 = vmatpush1.bf16.msra.mxu1 %v20541_v5  ;;  %v20562_v5 = vld [vmem:[#allocation8 + $0x4f0] ss:$24 sps:$4 sm:$0xff]  }
 0x3f2   : > { %5964 = vmatprep.subr.bf16.mxu1 %v20546_v6  ;;  %7180 = vmatpush1.bf16.msra.mxu0 %v18361_v30  ;;  %v20567_v6 = vld [vmem:[#allocation8 + $0x4c4] ss:$24 sps:$4 sm:$0xff]   ;;  %v18397_v30 = vcombine.low %v6027_v55, %v6029_v31 }
 0x3f3   : > { %7181 = vmatprep.subr.bf16.mxu0 %v18422_v10  ;;  %v18394_v10 = vcombine.high %v6023_v2, %v6025_v3 }
 0x3f5   : > { %5965 = vmatpush1.bf16.msra.mxu1 %v20544_v60  ;;  %v20565_v60 = vld [vmem:[#allocation8 + $0x4c0] ss:$24 sps:$4 sm:$0xff]  }
 0x3f6   : > { %5966 = vmatprep.subr.bf16.mxu1 %v20549_v15  ;;  %7182 = vmatpush2.bf16.msra.mxu0 %v18421_v46  ;;  %v20570_v15 = vld [vmem:[#allocation8 + $0x494] ss:$24 sps:$4 sm:$0xff]   ;;  %v18393_v46 = vcombine.low %v6023_v2, %v6025_v3 }
 0x3f7   : > { %7183 = vmatprep.subr.bf16.mxu0 %v18418_v17  ;;  %v6083_v17 = vld [vmem:[#allocation5 + $0x1160] sm:$0xff] }
 0x3f8   : > { %v6073_v2 = vld [vmem:[#allocation5 + $0xf80] sm:$0xff] }
 0x3f9   : > { %5967 = vmatpush2.bf16.msra.mxu1 %v20547_v21  ;;  %v6143_v21 = vld [vmem:[#allocation5 + $0x1ca0] sm:$0xff] }
 0x3fa   : > { %5968 = vmatprep.subr.bf16.mxu1 %v20552_v22  ;;  %7184 = vmatpush2.bf16.msra.mxu0 %v18417_v25  ;;  %v6145_v22 = vld [vmem:[#allocation5 + $0x1d00] sm:$0xff] }
 0x3fb   : > { %7185 = vmatprep.subr.bf16.mxu0 %v18414_v26  ;;  %v20568_v25 = vld [vmem:[#allocation8 + $0x490] ss:$24 sps:$4 sm:$0xff]   ;;  %v18454_v26 = vcombine.high %v6083_v17, %v6085_v1  ;;  %v18513_v42 = vcombine.low %v6143_v21, %v6145_v22 }
 0x3fd   : > { %5969 = vmatpush2.bf16.msra.mxu1 %v20550_v34  ;;  %v6081_v34 = vld [vmem:[#allocation5 + $0x1100] sm:$0xff] }
 0x3fe   : > { %5970 = vmatprep.subr.bf16.mxu1 %v20555_v61  ;;  %7186 = vmatpush2.bf16.msra.mxu0 %v18413_v19  ;;  %v18514_v61 = vcombine.high %v6143_v21, %v6145_v22  ;;  %v4615_v19 = vadd.f32 %v22339_v29, %v22319_v53  ;;  %v6077_v53 = vld [vmem:[#allocation5 + $0x1040] sm:$0xff]  ;;  %v18449_v55 = vcombine.low %v6079_v52, %v6081_v34 }
 0x3ff   : > { %7187 = vmatprep.subr.bf16.mxu0 %v18410_v48  ;;  %v6139_v48 = vld [vmem:[#allocation5 + $0x1be0] sm:$0xff] }
 0x400   : > { %v18510_v29 = vcombine.high %v6139_v48, %v6141_v36 }
 0x401   : > { %5971 = vmatpush2.bf16.msra.mxu1 %v20553_v38  ;;  %v18453_v38 = vcombine.low %v6083_v17, %v6085_v1  ;;  %v6127_v17 = vld [vmem:[#allocation5 + $0x19a0] sm:$0xff] }
 0x402   : > { %5972 = vmatprep.subr.bf16.mxu1 %v20558_v39  ;;  %7188 = vmatpush2.bf16.msra.mxu0 %v18409_v40  ;;  %v18450_v39 = vcombine.high %v6079_v52, %v6081_v34  ;;  %v4617_v40 = vadd.f32 %v22342_v24, %v22322_v57  ;;  %v6137_v57 = vld [vmem:[#allocation5 + $0x1b80] sm:$0xff] }
 0x403   : > { %7189 = vmatprep.subr.bf16.mxu0 %v18406_v41  ;;  %v6129_v1 = vld [vmem:[#allocation5 + $0x1a00] sm:$0xff] }
 0x404   : > { %v6123_v52 = vld [vmem:[#allocation5 + $0x18e0] sm:$0xff] }
 0x405   : > { %5973 = vmatpush2.bf16.msra.mxu1 %v20556_v45  ;;  %v6075_v45 = vld [vmem:[#allocation5 + $0xfe0] sm:$0xff] }
 0x406   : > { %5974 = vmatprep.subr.bf16.mxu1 %v20561_v51  ;;  %7190 = vmatpush2.bf16.msra.mxu0 %v18405_v47  ;;  %v6125_v34 = vld [vmem:[#allocation5 + $0x1940] sm:$0xff] }
 0x407   : > { %7191 = vmatprep.subr.bf16.mxu0 %v18402_v49  ;;  %v6135_v49 = vld [vmem:[#allocation5 + $0x1b20] sm:$0xff] }
 0x408   : > { %v18506_v3 = vcombine.high %v6135_v49, %v6137_v57  ;;  %v18505_v13 = vcombine.low %v6135_v49, %v6137_v57  ;;  %v6179_v57 = vld [vmem:[#allocation5 + $0x2360] sm:$0xff] }
 0x409   : > { %5975 = vmatpush2.bf16.msra.mxu1 %v20559_v56  ;;  %v18446_v56 = vcombine.high %v6075_v45, %v6077_v53 }
 0x40a   : > { %5976 = vmatprep.subr.bf16.mxu1 %v20564_v62  ;;  %7192 = vmatpush2.bf16.msra.mxu0 %v18401_v0  ;;  %v18509_v62 = vcombine.low %v6139_v48, %v6141_v36  ;;  %v18497_v48 = vcombine.low %v6127_v17, %v6129_v1  ;;  %v6059_v36 = vld [vmem:[#allocation5 + $0xce0] sm:$0xff] }
 0x40b   : > { %7193 = vmatprep.subr.bf16.mxu0 %v18398_v32  ;;  %v6071_v32 = vld [vmem:[#allocation5 + $0xf20] sm:$0xff] }
 0x40c   : > { %v18442_v50 = vcombine.high %v6071_v32, %v6073_v2 }
 0x40d   : > { %5977 = vmatpush2.bf16.msra.mxu1 %v20562_v5 }
 0x40e   : > { %5978 = vmatprep.subr.bf16.mxu1 %v20567_v6  ;;  %7194 = vmatpush2.bf16.msra.mxu0 %v18397_v30  ;;  %v6133_v6 = vld [vmem:[#allocation5 + $0x1ac0] sm:$0xff]  ;;  %v18445_v30 = vcombine.low %v6075_v45, %v6077_v53  ;;  %v18493_v45 = vcombine.low %v6123_v52, %v6125_v34 }
 0x40f   : > { %7195 = vmatprep.subr.bf16.mxu0 %v18394_v10  ;;  %v6055_v53 = vld [vmem:[#allocation5 + $0xc20] sm:$0xff] }
 0x411   : > { %5979 = vmatpush2.bf16.msra.mxu1 %v20565_v60  ;;  %v6067_v60 = vld [vmem:[#allocation5 + $0xe60] sm:$0xff] }
 0x412   : > { %5980 = vmatprep.subr.bf16.mxu1 %v20570_v15  ;;  %7196 = vmatpush2.bf16.msra.mxu0 %v18393_v46  ;;  %v6069_v15 = vld [vmem:[#allocation5 + $0xec0] sm:$0xff] }
 0x413   : > { %7247 = vmatprep.subr.bf16.mxu0 %v18518_v9  ;;  %v18441_v9 = vcombine.low %v6071_v32, %v6073_v2  ;;  %v18438_v21 = vcombine.high %v6067_v60, %v6069_v15  ;;  %v6117_v32 = vld [vmem:[#allocation5 + $0x17c0] sm:$0xff] }
 0x415   : > { %5981 = vmatpush2.bf16.msra.mxu1 %v20568_v25  ;;  %v5779_v37 = vpop.f32.mrf.mxu0  ;;  %7198 = vmatmul.mubr.bf16.vlgmr.msra.gmra.mxu0 %v22202_v16  ;;  %v6063_v25 = vld [vmem:[#allocation5 + $0xda0] sm:$0xff] }
 0x416   : > { %v22361_v41 = vadd.f32 %v5779_v37, %v4615_v19  ;;  %7206 = vmatprep.subr.bf16.mxu1 %v18454_v26  ;;  %7248 = vmatpush1.bf16.msra.mxu0 %v18517_v27  ;;  %v6065_v26 = vld [vmem:[#allocation5 + $0xe00] sm:$0xff]  ;;  %v18498_v27 = vcombine.high %v6127_v17, %v6129_v1 }
 0x417   : > { %v5781_v43 = vpop.f32.mrf.mxu0  ;;  %7249 = vmatprep.subr.bf16.mxu0 %v18514_v61  ;;  %7279 = vmatprep.mubr.bf16.mxu0 %v22207_v28  ;;  %v18437_v61 = vcombine.low %v6067_v60, %v6069_v15  ;;  %v18434_v19 = vcombine.high %v6063_v25, %v6065_v26  ;;  %v6061_v37 = vld [vmem:[#allocation5 + $0xd40] sm:$0xff] }
 0x418   : > { %v22364_v51 = vpop.f32.mrf.mxu1  ;;  %v22366_v47 = vadd.f32 %v5781_v43, %v4617_v40  ;;  %5983 = vmatmul.mubr.bf16.vlgmr.msra.gmra.mxu1 %v22333_v23  ;;  %v6131_v23 = vld [vmem:[#allocation5 + $0x1a60] sm:$0xff]  ;;  %v18430_v43 = vcombine.high %v6059_v36, %v6061_v37 }
 0x419   : > { %7207 = vmatpush1.bf16.msra.mxu1 %v18453_v38  ;;  %v5783_v24 = vpop.f32.mrf.mxu0  ;;  %7238 = vmatprep.mubr.bf16.mxu1 %v22196_v59  ;;  %v18502_v46 = vcombine.high %v6131_v23, %v6133_v6  ;;  %v18501_v22 = vcombine.low %v6131_v23, %v6133_v6  ;;  %v18494_v38 = vcombine.high %v6123_v52, %v6125_v34  ;;  %v6121_v40 = vld [vmem:[#allocation5 + $0x1880] sm:$0xff] }
 0x41a   : > { %v22370_v31 = vpop.f32.mrf.mxu1  ;;  %7208 = vmatprep.subr.bf16.mxu1 %v18450_v39  ;;  %7250 = vmatpush1.bf16.msra.mxu0 %v18513_v42  ;;  %v6119_v39 = vld [vmem:[#allocation5 + $0x1820] sm:$0xff]  ;;  %v18433_v42 = vcombine.low %v6063_v25, %v6065_v26 }
 0x41b   : > { %v5784_v0 = vpop.f32.mrf.mxu0  ;;  %7251 = vmatprep.subr.bf16.mxu0 %v18510_v29  ;;  %v6057_v29 = vld [vmem:[#allocation5 + $0xc80] sm:$0xff]  ;;  %v18490_v49 = vcombine.high %v6119_v39, %v6121_v40 }
 0x41c   : > { %v4782_v5 = vpop.f32.mrf.mxu1  ;;  %v6181_v24 = vld [vmem:[#allocation5 + $0x23c0] sm:$0xff]  ;;  %v18425_v23 = vcombine.low %v6055_v53, %v6057_v29 }
 0x41d   : > { %7209 = vmatpush1.bf16.msra.mxu1 %v18449_v55  ;;  %v18429_v55 = vcombine.low %v6059_v36, %v6061_v37  ;;  %v6115_v0 = vld [vmem:[#allocation5 + $0x1760] sm:$0xff]  ;;  %v18550_v2 = vcombine.high %v6179_v57, %v6181_v24 }
 0x41e   : > { %v4783_v10 = vpop.f32.mrf.mxu1  ;;  %7210 = vmatprep.subr.bf16.mxu1 %v18446_v56  ;;  %7252 = vmatpush1.bf16.msra.mxu0 %v18509_v62  ;;  %v18426_v56 = vcombine.high %v6055_v53, %v6057_v29  ;;  %v18489_v62 = vcombine.low %v6119_v39, %v6121_v40  ;;  %v6177_v5 = vld [vmem:[#allocation5 + $0x2300] sm:$0xff]  ;;  %v18486_v6 = vcombine.high %v6115_v0, %v6117_v32 }
 0x41f   : > { %7253 = vmatprep.subr.bf16.mxu0 %v18506_v3  ;;  %v6175_v3 = vld [vmem:[#allocation5 + $0x22a0] sm:$0xff] }
 0x420   : > { %v6111_v10 = vld [vmem:[#allocation5 + $0x16a0] sm:$0xff]  ;;  %v18545_v1 = vcombine.low %v6175_v3, %v6177_v5 }
 0x421   : > { %7211 = vmatpush1.bf16.msra.mxu1 %v18445_v30  ;;  %v18549_v30 = vcombine.low %v6179_v57, %v6181_v24  ;;  %v6171_v60 = vld [vmem:[#allocation5 + $0x21e0] sm:$0xff] }
 0x422   : > { %7212 = vmatprep.subr.bf16.mxu1 %v18442_v50  ;;  %7254 = vmatpush1.bf16.msra.mxu0 %v18505_v13  ;;  %v6113_v50 = vld [vmem:[#allocation5 + $0x1700] sm:$0xff]  ;;  %v18546_v13 = vcombine.high %v6175_v3, %v6177_v5 }
 0x423   : > { %7255 = vmatprep.subr.bf16.mxu0 %v18502_v46  ;;  %v6173_v15 = vld [vmem:[#allocation5 + $0x2240] sm:$0xff]  ;;  %v18485_v46 = vcombine.low %v6115_v0, %v6117_v32  ;;  %v18482_v17 = vcombine.high %v6111_v10, %v6113_v50 }
 0x424   : > { %v6167_v25 = vld [vmem:[#allocation5 + $0x2120] sm:$0xff]  ;;  %v18541_v34 = vcombine.low %v6171_v60, %v6173_v15 }
 0x425   : > { %7213 = vmatpush1.bf16.msra.mxu1 %v18441_v9  ;;  %v6107_v9 = vld [vmem:[#allocation5 + $0x15e0] sm:$0xff] }
 0x426   : > { %7214 = vmatprep.subr.bf16.mxu1 %v18438_v21  ;;  %7256 = vmatpush1.bf16.msra.mxu0 %v18501_v22  ;;  %v6109_v21 = vld [vmem:[#allocation5 + $0x1640] sm:$0xff]  ;;  %v18542_v22 = vcombine.high %v6171_v60, %v6173_v15 }
 0x427   : > { %7257 = vmatprep.subr.bf16.mxu0 %v18498_v27  ;;  %v6169_v26 = vld [vmem:[#allocation5 + $0x2180] sm:$0xff]  ;;  %v18481_v27 = vcombine.low %v6111_v10, %v6113_v50  ;;  %v18478_v52 = vcombine.high %v6107_v9, %v6109_v21 }
 0x428   : > { %v6163_v36 = vld [vmem:[#allocation5 + $0x2060] sm:$0xff]  ;;  %v18537_v40 = vcombine.low %v6167_v25, %v6169_v26 }
 0x429   : > { %7215 = vmatpush1.bf16.msra.mxu1 %v18437_v61  ;;  %v6103_v61 = vld [vmem:[#allocation5 + $0x1520] sm:$0xff] }
 0x42a   : > { %7216 = vmatprep.subr.bf16.mxu1 %v18434_v19  ;;  %7258 = vmatpush1.bf16.msra.mxu0 %v18497_v48  ;;  %v6105_v19 = vld [vmem:[#allocation5 + $0x1580] sm:$0xff]  ;;  %v18538_v48 = vcombine.high %v6167_v25, %v6169_v26 }
 0x42b   : > { %7259 = vmatprep.subr.bf16.mxu0 %v18494_v38  ;;  %v6165_v37 = vld [vmem:[#allocation5 + $0x20c0] sm:$0xff]  ;;  %v18477_v38 = vcombine.low %v6107_v9, %v6109_v21  ;;  %v18474_v39 = vcombine.high %v6103_v61, %v6105_v19  ;;  %v6084_v9 = vld [vmem:[#allocation5 + $0x1168] sm:$0xff] }
 0x42c   : > { %v6159_v53 = vld [vmem:[#allocation5 + $0x1fa0] sm:$0xff]  ;;  %v18533_v24 = vcombine.low %v6163_v36, %v6165_v37  ;;  %v6086_v21 = vld [vmem:[#allocation5 + $0x11c8] sm:$0xff] }
 0x42d   : > { %7217 = vmatpush1.bf16.msra.mxu1 %v18433_v42  ;;  %v6099_v42 = vld [vmem:[#allocation5 + $0x1460] sm:$0xff] }
 0x42e   : > { %7218 = vmatprep.subr.bf16.mxu1 %v18430_v43  ;;  %7260 = vmatpush1.bf16.msra.mxu0 %v18493_v45  ;;  %v6101_v43 = vld [vmem:[#allocation5 + $0x14c0] sm:$0xff]  ;;  %v18534_v45 = vcombine.high %v6163_v36, %v6165_v37  ;;  %v18455_v37 = vcombine.low %v6084_v9, %v6086_v21 }
 0x42f   : > { %7261 = vmatprep.subr.bf16.mxu0 %v18490_v49  ;;  %v6161_v29 = vld [vmem:[#allocation5 + $0x2000] sm:$0xff]  ;;  %v18473_v49 = vcombine.low %v6103_v61, %v6105_v19  ;;  %v18470_v57 = vcombine.high %v6099_v42, %v6101_v43  ;;  %v6080_v61 = vld [vmem:[#allocation5 + $0x10a8] sm:$0xff] }
 0x430   : > { %v6155_v0 = vld [vmem:[#allocation5 + $0x1ee0] sm:$0xff]  ;;  %v18529_v5 = vcombine.low %v6159_v53, %v6161_v29  ;;  %v6082_v19 = vld [vmem:[#allocation5 + $0x1108] sm:$0xff] }
 0x431   : > { %7219 = vmatpush1.bf16.msra.mxu1 %v18429_v55  ;;  %v6095_v55 = vld [vmem:[#allocation5 + $0x13a0] sm:$0xff] }
 0x432   : > { %7220 = vmatprep.subr.bf16.mxu1 %v18426_v56  ;;  %7262 = vmatpush1.bf16.msra.mxu0 %v18489_v62  ;;  %v6097_v56 = vld [vmem:[#allocation5 + $0x1400] sm:$0xff]  ;;  %v18530_v62 = vcombine.high %v6159_v53, %v6161_v29 }
 0x433   : > { %7263 = vmatprep.subr.bf16.mxu0 %v18550_v2  ;;  %v6157_v32 = vld [vmem:[#allocation5 + $0x1f40] sm:$0xff]  ;;  %v18469_v2 = vcombine.low %v6099_v42, %v6101_v43  ;;  %v18466_v3 = vcombine.high %v6095_v55, %v6097_v56  ;;  %v4697_v42 = vadd.f32 %v22350_v14, %v22330_v12  ;;  %v6076_v43 = vld [vmem:[#allocation5 + $0xfe8] sm:$0xff] }
 0x434   : > { %v6151_v10 = vld [vmem:[#allocation5 + $0x1e20] sm:$0xff]  ;;  %v18525_v15 = vcombine.low %v6155_v0, %v6157_v32  ;;  %v6014_v12 = vld [vmem:[#allocation5 + $0x448] sm:$0xff] }
 0x435   : > { %7221 = vmatpush1.bf16.msra.mxu1 %v18425_v23  ;;  %v6091_v23 = vld [vmem:[#allocation5 + $0x12e0] sm:$0xff] }
 0x436   : > { %7222 = vmatprep.subr.bf16.mxu1 %v18486_v6  ;;  %7264 = vmatpush2.bf16.msra.mxu0 %v18549_v30  ;;  %v6093_v6 = vld [vmem:[#allocation5 + $0x1340] sm:$0xff]  ;;  %v18526_v30 = vcombine.high %v6155_v0, %v6157_v32 }
 0x437   : > { %7265 = vmatprep.subr.bf16.mxu0 %v18546_v13  ;;  %v6153_v50 = vld [vmem:[#allocation5 + $0x1e80] sm:$0xff]  ;;  %v18465_v13 = vcombine.low %v6095_v55, %v6097_v56  ;;  %v18462_v60 = vcombine.high %v6091_v23, %v6093_v6  ;;  %v18451_v55 = vcombine.low %v6080_v61, %v6082_v19 }
 0x438   : > { %v18521_v26 = vcombine.low %v6151_v10, %v6153_v50 }
 0x439   : > { %7223 = vmatpush2.bf16.msra.mxu1 %v18485_v46  ;;  %v6087_v46 = vld [vmem:[#allocation5 + $0x1220] sm:$0xff] }
 0x43a   : > { %7224 = vmatprep.subr.bf16.mxu1 %v18482_v17  ;;  %7266 = vmatpush2.bf16.msra.mxu0 %v18545_v1  ;;  %v6089_v17 = vld [vmem:[#allocation5 + $0x1280] sm:$0xff]  ;;  %v18522_v1 = vcombine.high %v6151_v10, %v6153_v50 }
 0x43b   : > { %7267 = vmatprep.subr.bf16.mxu0 %v18542_v22  ;;  %v18461_v22 = vcombine.low %v6091_v23, %v6093_v6  ;;  %v18458_v25 = vcombine.high %v6087_v46, %v6089_v17 }
 0x43d   : > { %7225 = vmatpush2.bf16.msra.mxu1 %v18481_v27  ;;  %v6020_v27 = vld [vmem:[#allocation5 + $0x568] sm:$0xff] }
 0x43e   : > { %7226 = vmatprep.subr.bf16.mxu1 %v18478_v52  ;;  %7268 = vmatpush2.bf16.msra.mxu0 %v18541_v34  ;;  %v6022_v52 = vld [vmem:[#allocation5 + $0x5c8] sm:$0xff]  ;;  %v18456_v34 = vcombine.high %v6084_v9, %v6086_v21 }
 0x43f   : > { %7269 = vmatprep.subr.bf16.mxu0 %v18538_v48  ;;  %v18457_v48 = vcombine.low %v6087_v46, %v6089_v17  ;;  %v18392_v36 = vcombine.high %v6020_v27, %v6022_v52  ;;  %v18391_v29 = vcombine.low %v6020_v27, %v6022_v52  ;;  %v6068_v46 = vld [vmem:[#allocation5 + $0xe68] sm:$0xff] }
 0x440   : > { %v6070_v17 = vld [vmem:[#allocation5 + $0xec8] sm:$0xff] }
 0x441   : > { %7227 = vmatpush2.bf16.msra.mxu1 %v18477_v38  ;;  %v6016_v38 = vld [vmem:[#allocation5 + $0x4a8] sm:$0xff] }
 0x442   : > { %7228 = vmatprep.subr.bf16.mxu1 %v18474_v39  ;;  %7270 = vmatpush2.bf16.msra.mxu0 %v18537_v40  ;;  %v6018_v39 = vld [vmem:[#allocation5 + $0x508] sm:$0xff]  ;;  %v18452_v40 = vcombine.high %v6080_v61, %v6082_v19  ;;  %v18439_v19 = vcombine.low %v6068_v46, %v6070_v17 }
 0x443   : > { %7271 = vmatprep.subr.bf16.mxu0 %v18534_v45  ;;  %v6078_v45 = vld [vmem:[#allocation5 + $0x1048] sm:$0xff] }
 0x444   : > { %v18448_v14 = vcombine.high %v6076_v43, %v6078_v45  ;;  %v6064_v27 = vld [vmem:[#allocation5 + $0xda8] sm:$0xff] }
 0x445   : > { %7229 = vmatpush2.bf16.msra.mxu1 %v18473_v49  ;;  %v18388_v49 = vcombine.high %v6016_v38, %v6018_v39  ;;  %v6066_v52 = vld [vmem:[#allocation5 + $0xe08] sm:$0xff] }
 0x446   : > { %7230 = vmatprep.subr.bf16.mxu1 %v18470_v57  ;;  %7272 = vmatpush2.bf16.msra.mxu0 %v18533_v24  ;;  %v4699_v57 = vadd.f32 %v22354_v18, %v22336_v35 }
 0x447   : > { %7273 = vmatprep.subr.bf16.mxu0 %v18530_v62  ;;  %v6012_v62 = vld [vmem:[#allocation5 + $0x3e8] sm:$0xff] }
 0x448   : > { %v18384_v6 = vcombine.high %v6012_v62, %v6014_v12 }
 0x449   : > { %7231 = vmatpush2.bf16.msra.mxu1 %v18469_v2  ;;  %v6072_v2 = vld [vmem:[#allocation5 + $0xf28] sm:$0xff] }
 0x44a   : > { %7232 = vmatprep.subr.bf16.mxu1 %v18466_v3  ;;  %7274 = vmatpush2.bf16.msra.mxu0 %v18529_v5  ;;  %v6074_v3 = vld [vmem:[#allocation5 + $0xf88] sm:$0xff]  ;;  %v18387_v5 = vcombine.low %v6016_v38, %v6018_v39 }
 0x44b   : > { %7275 = vmatprep.subr.bf16.mxu0 %v18526_v30  ;;  %v18447_v30 = vcombine.low %v6076_v43, %v6078_v45  ;;  %v6060_v38 = vld [vmem:[#allocation5 + $0xce8] sm:$0xff]  ;;  %v18435_v43 = vcombine.low %v6064_v27, %v6066_v52 }
 0x44c   : > { %v6062_v39 = vld [vmem:[#allocation5 + $0xd48] sm:$0xff] }
 0x44d   : > { %7233 = vmatpush2.bf16.msra.mxu1 %v18465_v13  ;;  %v6008_v13 = vld [vmem:[#allocation5 + $0x328] sm:$0xff] }
 0x44e   : > { %7234 = vmatprep.subr.bf16.mxu1 %v18462_v60  ;;  %7276 = vmatpush2.bf16.msra.mxu0 %v18525_v15  ;;  %v6010_v60 = vld [vmem:[#allocation5 + $0x388] sm:$0xff]  ;;  %v18444_v15 = vcombine.high %v6072_v2, %v6074_v3 }
 0x44f   : > { %7277 = vmatprep.subr.bf16.mxu0 %v18522_v1  ;;  %v18383_v1 = vcombine.low %v6012_v62, %v6014_v12  ;;  %v18380_v21 = vcombine.high %v6008_v13, %v6010_v60  ;;  %v5996_v45 = vld [vmem:[#allocation5 + $0xe8] sm:$0xff]  ;;  %v18431_v62 = vcombine.low %v6060_v38, %v6062_v39 }
 0x450   : > { %v5992_v12 = vld [vmem:[#allocation5 + $0x28] sm:$0xff] }
 0x451   : > { %7235 = vmatpush2.bf16.msra.mxu1 %v18461_v22  ;;  %v18443_v22 = vcombine.low %v6072_v2, %v6074_v3  ;;  %v6116_v2 = vld [vmem:[#allocation5 + $0x1768] sm:$0xff] }
 0x452   : > { %7236 = vmatprep.subr.bf16.mxu1 %v18458_v25  ;;  %7278 = vmatpush2.bf16.msra.mxu0 %v18521_v26  ;;  %v6004_v25 = vld [vmem:[#allocation5 + $0x268] sm:$0xff] }
 0x453   : > { %7329 = vmatprep.subr.bf16.mxu0 %v18456_v34  ;;  %v6006_v26 = vld [vmem:[#allocation5 + $0x2c8] sm:$0xff]  ;;  %v18379_v34 = vcombine.low %v6008_v13, %v6010_v60 }
 0x454   : > { %v18376_v61 = vcombine.high %v6004_v25, %v6006_v26  ;;  %v6118_v3 = vld [vmem:[#allocation5 + $0x17c8] sm:$0xff] }
 0x455   : > { %7237 = vmatpush2.bf16.msra.mxu1 %v18457_v48  ;;  %v5861_v53 = vpop.f32.mrf.mxu0  ;;  %7280 = vmatmul.mubr.bf16.vlgmr.msra.gmra.mxu0 %v22214_v33  ;;  %v6000_v48 = vld [vmem:[#allocation5 + $0x1a8] sm:$0xff] }
 0x456   : > { %v22377_v24 = vadd.f32 %v5861_v53, %v4697_v42  ;;  %7288 = vmatprep.subr.bf16.mxu1 %v18392_v36  ;;  %7330 = vmatpush1.bf16.msra.mxu0 %v18455_v37  ;;  %v6002_v36 = vld [vmem:[#allocation5 + $0x208] sm:$0xff]  ;;  %v18436_v37 = vcombine.high %v6064_v27, %v6066_v52 }
 0x457   : > { %v5863_v56 = vpop.f32.mrf.mxu0  ;;  %7331 = vmatprep.subr.bf16.mxu0 %v18452_v40  ;;  %7361 = vmatprep.mubr.bf16.mxu0 %v22196_v59  ;;  %v18375_v40 = vcombine.low %v6004_v25, %v6006_v26  ;;  %v18372_v42 = vcombine.high %v6000_v48, %v6002_v36  ;;  %v5998_v53 = vld [vmem:[#allocation5 + $0x148] sm:$0xff] }
 0x458   : > { %v5820_v0 = vpop.f32.mrf.mxu1  ;;  %v22380_v32 = vadd.f32 %v5863_v56, %v4699_v57  ;;  %7239 = vmatmul.mubr.bf16.vlgmr.msra.gmra.mxu1 %v22205_v20  ;;  %v6058_v57 = vld [vmem:[#allocation5 + $0xc88] sm:$0xff]  ;;  %v18368_v56 = vcombine.high %v5996_v45, %v5998_v53 }
 0x459   : > { %v22384_v35 = vadd.f32 %v5820_v0, %v22361_v41  ;;  %7289 = vmatpush1.bf16.msra.mxu1 %v18391_v29  ;;  %v5865_v18 = vpop.f32.mrf.mxu0  ;;  %7320 = vmatprep.mubr.bf16.mxu1 %v22194_v58  ;;  %v18432_v29 = vcombine.high %v6060_v38, %v6062_v39  ;;  %v6112_v13 = vld [vmem:[#allocation5 + $0x16a8] sm:$0xff] }
 0x45a   : > { %v5822_v23 = vpop.f32.mrf.mxu1  ;;  %7290 = vmatprep.subr.bf16.mxu1 %v18388_v49  ;;  %7332 = vmatpush1.bf16.msra.mxu0 %v18451_v55  ;;  %v6056_v49 = vld [vmem:[#allocation5 + $0xc28] sm:$0xff]  ;;  %v18371_v55 = vcombine.low %v6000_v48, %v6002_v36  ;;  %v18367_v18 = vcombine.low %v5996_v45, %v5998_v53 }
 0x45b   : > { %v22388_v10 = vadd.f32 %v5822_v23, %v22366_v47  ;;  %v5866_v50 = vpop.f32.mrf.mxu0  ;;  %7333 = vmatprep.subr.bf16.mxu0 %v18448_v14  ;;  %v18440_v47 = vcombine.high %v6068_v46, %v6070_v17  ;;  %v5994_v14 = vld [vmem:[#allocation5 + $0x88] sm:$0xff]  ;;  %v18428_v0 = vcombine.high %v6056_v49, %v6058_v57  ;;  %v18427_v23 = vcombine.low %v6056_v49, %v6058_v57 }
 0x45c   : > { %v5824_v41 = vpop.f32.mrf.mxu1  ;;  %v18488_v50 = vcombine.high %v6116_v2, %v6118_v3  ;;  %v6114_v60 = vld [vmem:[#allocation5 + $0x1708] sm:$0xff]  ;;  %v18487_v46 = vcombine.low %v6116_v2, %v6118_v3 }
 0x45d   : > { %7291 = vmatpush1.bf16.msra.mxu1 %v18387_v5  ;;  %v18364_v5 = vcombine.high %v5992_v12, %v5994_v14  ;;  %v6048_v17 = vld [vmem:[#allocation5 + $0xaa8] sm:$0xff] }
 0x45e   : > { %v5825_v9 = vpop.f32.mrf.mxu1  ;;  %7292 = vmatprep.subr.bf16.mxu1 %v18384_v6  ;;  %7334 = vmatpush1.bf16.msra.mxu0 %v18447_v30  ;;  %v6052_v6 = vld [vmem:[#allocation5 + $0xb68] sm:$0xff] }
 0x45f   : > { %7335 = vmatprep.subr.bf16.mxu0 %v18444_v15  ;;  %v6054_v30 = vld [vmem:[#allocation5 + $0xbc8] sm:$0xff]  ;;  %v18363_v15 = vcombine.low %v5992_v12, %v5994_v14  ;;  %v18484_v9 = vcombine.high %v6112_v13, %v6114_v60 }
 0x460   : > { %v18424_v41 = vcombine.high %v6052_v6, %v6054_v30  ;;  %v18423_v25 = vcombine.low %v6052_v6, %v6054_v30  ;;  %v6044_v27 = vld [vmem:[#allocation5 + $0x9e8] sm:$0xff] }
 0x461   : > { %7293 = vmatpush1.bf16.msra.mxu1 %v18383_v1  ;;  %v6050_v1 = vld [vmem:[#allocation5 + $0xb08] sm:$0xff] }
 0x462   : > { %7294 = vmatprep.subr.bf16.mxu1 %v18380_v21  ;;  %7336 = vmatpush1.bf16.msra.mxu0 %v18443_v22  ;;  %v6108_v21 = vld [vmem:[#allocation5 + $0x15e8] sm:$0xff]  ;;  %v18420_v26 = vcombine.high %v6048_v17, %v6050_v1  ;;  %v18419_v48 = vcombine.low %v6048_v17, %v6050_v1 }
 0x463   : > { %7337 = vmatprep.subr.bf16.mxu0 %v18440_v47  ;;  %v6110_v22 = vld [vmem:[#allocation5 + $0x1648] sm:$0xff]  ;;  %v18483_v47 = vcombine.low %v6112_v13, %v6114_v60 }
 0x464   : > { %v6046_v52 = vld [vmem:[#allocation5 + $0xa48] sm:$0xff] }
 0x465   : > { %7295 = vmatpush1.bf16.msra.mxu1 %v18379_v34  ;;  %v18480_v34 = vcombine.high %v6108_v21, %v6110_v22  ;;  %v18416_v36 = vcombine.high %v6044_v27, %v6046_v52  ;;  %v6040_v38 = vld [vmem:[#allocation5 + $0x928] sm:$0xff]  ;;  %v18415_v45 = vcombine.low %v6044_v27, %v6046_v52 }
 0x466   : > { %7296 = vmatprep.subr.bf16.mxu1 %v18376_v61  ;;  %7338 = vmatpush1.bf16.msra.mxu0 %v18439_v19  ;;  %v6104_v61 = vld [vmem:[#allocation5 + $0x1528] sm:$0xff] }
 0x467   : > { %7339 = vmatprep.subr.bf16.mxu0 %v18436_v37  ;;  %v6106_v19 = vld [vmem:[#allocation5 + $0x1588] sm:$0xff]  ;;  %v18479_v37 = vcombine.low %v6108_v21, %v6110_v22 }
 0x468   : > { %v6042_v39 = vld [vmem:[#allocation5 + $0x988] sm:$0xff] }
 0x469   : > { %7297 = vmatpush1.bf16.msra.mxu1 %v18375_v40  ;;  %v18476_v40 = vcombine.high %v6104_v61, %v6106_v19  ;;  %v18412_v53 = vcombine.high %v6040_v38, %v6042_v39  ;;  %v6036_v49 = vld [vmem:[#allocation5 + $0x868] sm:$0xff]  ;;  %v18411_v12 = vcombine.low %v6040_v38, %v6042_v39  ;;  %v20576_v39 = vld [vmem:[#allocation8 + $0xd24] ss:$24 sps:$4 sm:$0xff]  }
 0x46a   : > { %7298 = vmatprep.subr.bf16.mxu1 %v18372_v42  ;;  %7340 = vmatpush1.bf16.msra.mxu0 %v18435_v43  ;;  %v6100_v42 = vld [vmem:[#allocation5 + $0x1468] sm:$0xff] }
 0x46b   : > { %7341 = vmatprep.subr.bf16.mxu0 %v18432_v29  ;;  %v6102_v43 = vld [vmem:[#allocation5 + $0x14c8] sm:$0xff]  ;;  %v18475_v29 = vcombine.low %v6104_v61, %v6106_v19 }
 0x46c   : > { %v6038_v57 = vld [vmem:[#allocation5 + $0x8c8] sm:$0xff] }
 0x46d   : > { %7299 = vmatpush1.bf16.msra.mxu1 %v18371_v55  ;;  %v18472_v55 = vcombine.high %v6100_v42, %v6102_v43  ;;  %v18408_v14 = vcombine.high %v6036_v49, %v6038_v57  ;;  %v6032_v2 = vld [vmem:[#allocation5 + $0x7a8] sm:$0xff]  ;;  %v18407_v6 = vcombine.low %v6036_v49, %v6038_v57  ;;  %v20574_v49 = vld [vmem:[#allocation8 + $0xd20] ss:$24 sps:$4 sm:$0xff]  }
 0x46e   : > { %7300 = vmatprep.subr.bf16.mxu1 %v18368_v56  ;;  %7342 = vmatpush1.bf16.msra.mxu0 %v18431_v62  ;;  %v6096_v56 = vld [vmem:[#allocation5 + $0x13a8] sm:$0xff] }
 0x46f   : > { %7343 = vmatprep.subr.bf16.mxu0 %v18428_v0  ;;  %v6098_v62 = vld [vmem:[#allocation5 + $0x1408] sm:$0xff]  ;;  %v18471_v0 = vcombine.low %v6100_v42, %v6102_v43 }
 0x470   : > { %v6034_v3 = vld [vmem:[#allocation5 + $0x808] sm:$0xff] }
 0x471   : > { %7301 = vmatpush1.bf16.msra.mxu1 %v18367_v18  ;;  %v18468_v18 = vcombine.high %v6096_v56, %v6098_v62  ;;  %v18404_v30 = vcombine.high %v6032_v2, %v6034_v3  ;;  %v6028_v13 = vld [vmem:[#allocation5 + $0x6e8] sm:$0xff]  ;;  %v18403_v17 = vcombine.low %v6032_v2, %v6034_v3 }
 0x472   : > { %7302 = vmatprep.subr.bf16.mxu1 %v18364_v5  ;;  %7344 = vmatpush1.bf16.msra.mxu0 %v18427_v23  ;;  %v6092_v5 = vld [vmem:[#allocation5 + $0x12e8] sm:$0xff] }
 0x473   : > { %7345 = vmatprep.subr.bf16.mxu0 %v18488_v50  ;;  %v6094_v23 = vld [vmem:[#allocation5 + $0x1348] sm:$0xff]  ;;  %v18467_v50 = vcombine.low %v6096_v56, %v6098_v62 }
 0x474   : > { %v6030_v60 = vld [vmem:[#allocation5 + $0x748] sm:$0xff] }
 0x475   : > { %7303 = vmatpush1.bf16.msra.mxu1 %v18363_v15  ;;  %v18464_v15 = vcombine.high %v6092_v5, %v6094_v23  ;;  %v18400_v1 = vcombine.high %v6028_v13, %v6030_v60  ;;  %v6024_v21 = vld [vmem:[#allocation5 + $0x628] sm:$0xff] }
 0x476   : > { %7304 = vmatprep.subr.bf16.mxu1 %v18424_v41  ;;  %7346 = vmatpush2.bf16.msra.mxu0 %v18487_v46  ;;  %v6088_v41 = vld [vmem:[#allocation5 + $0x1228] sm:$0xff] }
 0x477   : > { %7347 = vmatprep.subr.bf16.mxu0 %v18484_v9  ;;  %v6090_v46 = vld [vmem:[#allocation5 + $0x1288] sm:$0xff]  ;;  %v18463_v9 = vcombine.low %v6092_v5, %v6094_v23 }
 0x478   : > { %v6026_v22 = vld [vmem:[#allocation5 + $0x688] sm:$0xff]  ;;  %v18459_v27 = vcombine.low %v6088_v41, %v6090_v46 }
 0x479   : > { %7305 = vmatpush2.bf16.msra.mxu1 %v18423_v25  ;;  %v18460_v25 = vcombine.high %v6088_v41, %v6090_v46  ;;  %v6148_v52 = vld [vmem:[#allocation5 + $0x1d68] sm:$0xff]  ;;  %v18395_v19 = vcombine.low %v6024_v21, %v6026_v22 }
 0x47a   : > { %7306 = vmatprep.subr.bf16.mxu1 %v18420_v26  ;;  %7348 = vmatpush2.bf16.msra.mxu0 %v18483_v47  ;;  %v18399_v26 = vcombine.low %v6028_v13, %v6030_v60  ;;  %v18396_v47 = vcombine.high %v6024_v21, %v6026_v22  ;;  %v20573_v61 = vld [vmem:[#allocation8 + $0xd54] ss:$24 sps:$4 sm:$0xff]   ;;  %v20577_v2 = vld [vmem:[#allocation8 + $0xcf0] ss:$24 sps:$4 sm:$0xff]   ;;  %v20580_v60 = vld [vmem:[#allocation8 + $0xcc0] ss:$24 sps:$4 sm:$0xff]  }
 0x47b   : > { %7349 = vmatprep.subr.bf16.mxu0 %v18480_v34  ;;  %v6150_v34 = vld [vmem:[#allocation5 + $0x1dc8] sm:$0xff]  ;;  %v20588_v22 = vld [vmem:[#allocation8 + $0xc64] ss:$24 sps:$4 sm:$0xff]  }
 0x47c   : > { %v6146_v38 = vld [vmem:[#allocation5 + $0x1d08] sm:$0xff]  ;;  %v18519_v43 = vcombine.low %v6148_v52, %v6150_v34 }
 0x47d   : > { %7307 = vmatpush2.bf16.msra.mxu1 %v18419_v48  ;;  %v18520_v48 = vcombine.high %v6148_v52, %v6150_v34  ;;  %v6142_v56 = vld [vmem:[#allocation5 + $0x1c48] sm:$0xff] }
 0x47e   : > { %7308 = vmatprep.subr.bf16.mxu1 %v18416_v36  ;;  %7350 = vmatpush2.bf16.msra.mxu0 %v18479_v37  ;;  %v20571_v36 = vld [vmem:[#allocation8 + $0xd50] ss:$24 sps:$4 sm:$0xff]   ;;  %v20579_v62 = vld [vmem:[#allocation8 + $0xcf4] ss:$24 sps:$4 sm:$0xff]  }
 0x47f   : > { %7351 = vmatprep.subr.bf16.mxu0 %v18476_v40  ;;  %v6144_v37 = vld [vmem:[#allocation5 + $0x1ca8] sm:$0xff]  ;;  %v4779_v40 = vadd.f32 %v22364_v51, %v22344_v8 }
 0x480   : > { %v6136_v5 = vld [vmem:[#allocation5 + $0x1b28] sm:$0xff] }
 0x481   : > { %7309 = vmatpush2.bf16.msra.mxu1 %v18415_v45  ;;  %v4781_v45 = vadd.f32 %v22370_v31, %v22347_v11  ;;  %v18515_v31 = vcombine.low %v6144_v37, %v6146_v38  ;;  %v6138_v23 = vld [vmem:[#allocation5 + $0x1b88] sm:$0xff] }
 0x482   : > { %7310 = vmatprep.subr.bf16.mxu1 %v18412_v53  ;;  %7352 = vmatpush2.bf16.msra.mxu0 %v18475_v29  ;;  %v18516_v29 = vcombine.high %v6144_v37, %v6146_v38  ;;  %v18508_v13 = vcombine.high %v6136_v5, %v6138_v23  ;;  %v6134_v41 = vld [vmem:[#allocation5 + $0x1ac8] sm:$0xff]  ;;  %v20594_v38 = vld [vmem:[#allocation8 + $0xc04] ss:$24 sps:$4 sm:$0xff]  }
 0x483   : > { %7353 = vmatprep.subr.bf16.mxu0 %v18472_v55  ;;  %v6140_v55 = vld [vmem:[#allocation5 + $0x1be8] sm:$0xff] }
 0x484   : > { %v20585_v46 = vld [vmem:[#allocation8 + $0xc94] ss:$24 sps:$4 sm:$0xff]  }
 0x485   : > { %7311 = vmatpush2.bf16.msra.mxu1 %v18411_v12  ;;  %v6130_v21 = vld [vmem:[#allocation5 + $0x1a08] sm:$0xff] }
 0x486   : > { %7312 = vmatprep.subr.bf16.mxu1 %v18408_v14  ;;  %7354 = vmatpush2.bf16.msra.mxu0 %v18471_v0  ;;  %v18512_v0 = vcombine.high %v6140_v55, %v6142_v56  ;;  %v6126_v52 = vld [vmem:[#allocation5 + $0x1948] sm:$0xff] }
 0x487   : > { %7355 = vmatprep.subr.bf16.mxu0 %v18468_v18  ;;  %v20591_v34 = vld [vmem:[#allocation8 + $0xc34] ss:$24 sps:$4 sm:$0xff]  }
 0x488   : > { %v6122_v37 = vld [vmem:[#allocation5 + $0x1888] sm:$0xff] }
 0x489   : > { %7313 = vmatpush2.bf16.msra.mxu1 %v18407_v6  ;;  %v20582_v6 = vld [vmem:[#allocation8 + $0xcc4] ss:$24 sps:$4 sm:$0xff]  }
 0x48a   : > { %7314 = vmatprep.subr.bf16.mxu1 %v18404_v30  ;;  %7356 = vmatpush2.bf16.msra.mxu0 %v18467_v50  ;;  %v18511_v30 = vcombine.low %v6140_v55, %v6142_v56  ;;  %v20595_v55 = vld [vmem:[#allocation8 + $0xed0] ss:$24 sps:$4 sm:$0xff]  }
 0x48b   : > { %7357 = vmatprep.subr.bf16.mxu0 %v18464_v15  ;;  %v6132_v15 = vld [vmem:[#allocation5 + $0x1a68] sm:$0xff] }
 0x48c   : > { %v6176_v56 = vld [vmem:[#allocation5 + $0x22a8] sm:$0xff] }
 0x48d   : > { %7315 = vmatpush2.bf16.msra.mxu1 %v18403_v17  ;;  %v18504_v17 = vcombine.high %v6132_v15, %v6134_v41 }
 0x48e   : > { %7316 = vmatprep.subr.bf16.mxu1 %v18400_v1  ;;  %7358 = vmatpush2.bf16.msra.mxu0 %v18463_v9  ;;  %v20583_v1 = vld [vmem:[#allocation8 + $0xc90] ss:$24 sps:$4 sm:$0xff]  }
 0x48f   : > { %7359 = vmatprep.subr.bf16.mxu0 %v18460_v25  ;;  %v6128_v9 = vld [vmem:[#allocation5 + $0x19a8] sm:$0xff]  ;;  %v18503_v25 = vcombine.low %v6132_v15, %v6134_v41  ;;  %v20604_v15 = vld [vmem:[#allocation8 + $0xe40] ss:$24 sps:$4 sm:$0xff]  }
 0x490   : > { %v6164_v41 = vld [vmem:[#allocation5 + $0x2068] sm:$0xff] }
 0x491   : > { %7317 = vmatpush2.bf16.msra.mxu1 %v18399_v26  ;;  %v18500_v26 = vcombine.high %v6128_v9, %v6130_v21 }
 0x492   : > { %7318 = vmatprep.subr.bf16.mxu1 %v18396_v47  ;;  %7360 = vmatpush2.bf16.msra.mxu0 %v18459_v27  ;;  %v20586_v47 = vld [vmem:[#allocation8 + $0xc60] ss:$24 sps:$4 sm:$0xff]   ;;  %v6124_v27 = vld [vmem:[#allocation5 + $0x18e8] sm:$0xff] }
 0x493   : > { %8587 = vmatprep.subr.bf16.mxu0 %v20573_v61  ;;  %v18499_v61 = vcombine.low %v6128_v9, %v6130_v21  ;;  %v20607_v9 = vld [vmem:[#allocation8 + $0xe10] ss:$24 sps:$4 sm:$0xff]  }
 0x494   : > { %v6160_v21 = vld [vmem:[#allocation5 + $0x1fa8] sm:$0xff] }
 0x495   : > { %7319 = vmatpush2.bf16.msra.mxu1 %v18395_v19  ;;  %v5943_v42 = vpop.f32.mrf.mxu0  ;;  %7362 = vmatmul.mubr.bf16.vlgmr.msra.gmra.mxu0 %v22205_v20  ;;  %v18496_v19 = vcombine.high %v6124_v27, %v6126_v52 }
 0x496   : > { %v22395_v53 = vadd.f32 %v5943_v42, %v4779_v40  ;;  %7370 = vmatprep.subr.bf16.mxu1 %v18520_v48  ;;  %8588 = vmatpush1.bf16.msra.mxu0 %v20571_v36  ;;  %v20589_v48 = vld [vmem:[#allocation8 + $0xc30] ss:$24 sps:$4 sm:$0xff]   ;;  %v20592_v42 = vld [vmem:[#allocation8 + $0xc00] ss:$24 sps:$4 sm:$0xff]  }
 0x497   : > { %v5945_v57 = vpop.f32.mrf.mxu0  ;;  %8589 = vmatprep.subr.bf16.mxu0 %v20576_v39  ;;  %v6120_v36 = vld [vmem:[#allocation5 + $0x1828] sm:$0xff]  ;;  %v18495_v39 = vcombine.low %v6124_v27, %v6126_v52  ;;  %v20610_v27 = vld [vmem:[#allocation8 + $0xde0] ss:$24 sps:$4 sm:$0xff]  }
 0x498   : > { %v5902_v8 = vpop.f32.mrf.mxu1  ;;  %v22397_v51 = vadd.f32 %v5945_v57, %v4781_v45  ;;  %7321 = vmatmul.mubr.bf16.vlgmr.msra.gmra.mxu1 %v22202_v16  ;;  %v18492_v40 = vcombine.high %v6120_v36, %v6122_v37  ;;  %v6182_v45 = vld [vmem:[#allocation5 + $0x23c8] sm:$0xff] }
 0x499   : > { %v22401_v12 = vadd.f32 %v5902_v8, %v22377_v24  ;;  %7371 = vmatpush1.bf16.msra.mxu1 %v18519_v43  ;;  %v5947_v11 = vpop.f32.mrf.mxu0  ;;  %7402 = vmatprep.mubr.bf16.mxu1 %v22207_v28  ;;  %v6180_v43 = vld [vmem:[#allocation5 + $0x2368] sm:$0xff]  ;;  %v20600_v8 = vld [vmem:[#allocation8 + $0xea4] ss:$24 sps:$4 sm:$0xff]  }
 0x49a   : > { %v5904_v14 = vpop.f32.mrf.mxu1  ;;  %7372 = vmatprep.subr.bf16.mxu1 %v18516_v29  ;;  %8590 = vmatpush1.bf16.msra.mxu0 %v20574_v49  ;;  %v20597_v29 = vld [vmem:[#allocation8 + $0xed4] ss:$24 sps:$4 sm:$0xff]   ;;  %v18491_v49 = vcombine.low %v6120_v36, %v6122_v37  ;;  %v18552_v57 = vcombine.high %v6180_v43, %v6182_v45  ;;  %v18551_v11 = vcombine.low %v6180_v43, %v6182_v45  ;;  %v20613_v36 = vld [vmem:[#allocation8 + $0xdb0] ss:$24 sps:$4 sm:$0xff]   ;;  %v20616_v43 = vld [vmem:[#allocation8 + $0xd80] ss:$24 sps:$4 sm:$0xff]  }
 0x49b   : > { %v22405_v3 = vadd.f32 %v5904_v14, %v22380_v32  ;;  %v5948_v18 = vpop.f32.mrf.mxu0  ;;  %8591 = vmatprep.subr.bf16.mxu0 %v20579_v62  ;;  %v18507_v32 = vcombine.low %v6136_v5, %v6138_v23  ;;  %v6178_v62 = vld [vmem:[#allocation5 + $0x2308] sm:$0xff]  ;;  %v20598_v14 = vld [vmem:[#allocation8 + $0xea0] ss:$24 sps:$4 sm:$0xff]  }
 0x49c   : > { %v5906_v24 = vpop.f32.mrf.mxu1  ;;  %v20603_v18 = vld [vmem:[#allocation8 + $0xe74] ss:$24 sps:$4 sm:$0xff]   ;;  %v18547_v5 = vcombine.low %v6176_v56, %v6178_v62 }
 0x49d   : > { %7373 = vmatpush1.bf16.msra.mxu1 %v18515_v31  ;;  %v18548_v31 = vcombine.high %v6176_v56, %v6178_v62  ;;  %v6168_v24 = vld [vmem:[#allocation5 + $0x2128] sm:$0xff] }
 0x49e   : > { %v5907_v50 = vpop.f32.mrf.mxu1  ;;  %7374 = vmatprep.subr.bf16.mxu1 %v18512_v0  ;;  %8592 = vmatpush1.bf16.msra.mxu0 %v20577_v2  ;;  %v6172_v0 = vld [vmem:[#allocation5 + $0x21e8] sm:$0xff] }
 0x49f   : > { %8593 = vmatprep.subr.bf16.mxu0 %v20582_v6  ;;  %v6174_v2 = vld [vmem:[#allocation5 + $0x2248] sm:$0xff]  ;;  %v20606_v50 = vld [vmem:[#allocation8 + $0xe44] ss:$24 sps:$4 sm:$0xff]  }
 0x4a0   : > { %v18544_v23 = vcombine.high %v6172_v0, %v6174_v2  ;;  %v20601_v6 = vld [vmem:[#allocation8 + $0xe70] ss:$24 sps:$4 sm:$0xff]   ;;  %v20621_v45 = vld [vmem:[#allocation8 + $0xd5c] ss:$24 sps:$4 sm:$0xff]  }
 0x4a1   : > { %7375 = vmatpush1.bf16.msra.mxu1 %v18511_v30  ;;  %v6170_v30 = vld [vmem:[#allocation5 + $0x2188] sm:$0xff] }
 0x4a2   : > { %7376 = vmatprep.subr.bf16.mxu1 %v18508_v13  ;;  %8594 = vmatpush1.bf16.msra.mxu0 %v20580_v60  ;;  %v18543_v13 = vcombine.low %v6172_v0, %v6174_v2  ;;  %v18540_v60 = vcombine.high %v6168_v24, %v6170_v30  ;;  %v6156_v52 = vld [vmem:[#allocation5 + $0x1ee8] sm:$0xff] }
 0x4a3   : > { %8595 = vmatprep.subr.bf16.mxu0 %v20585_v46  ;;  %v6166_v46 = vld [vmem:[#allocation5 + $0x20c8] sm:$0xff] }
 0x4a4   : > { %v6152_v37 = vld [vmem:[#allocation5 + $0x1e28] sm:$0xff] }
 0x4a5   : > { %7377 = vmatpush1.bf16.msra.mxu1 %v18507_v32  ;;  %v20609_v32 = vld [vmem:[#allocation8 + $0xe14] ss:$24 sps:$4 sm:$0xff]  }
 0x4a6   : > { %7378 = vmatprep.subr.bf16.mxu1 %v18504_v17  ;;  %8596 = vmatpush1.bf16.msra.mxu0 %v20583_v1  ;;  %v18539_v17 = vcombine.low %v6168_v24, %v6170_v30  ;;  %v18536_v1 = vcombine.high %v6164_v41, %v6166_v46  ;;  %v20669_v2 = vld [vmem:[#allocation8 + $0x1054] ss:$24 sps:$4 sm:$0xff]   ;;  %v20679_v24 = vld [vmem:[#allocation8 + $0xff0] ss:$24 sps:$4 sm:$0xff]   ;;  %v20685_v30 = vld [vmem:[#allocation8 + $0xfc0] ss:$24 sps:$4 sm:$0xff]  }
 0x4a7   : > { %8597 = vmatprep.subr.bf16.mxu0 %v20588_v22  ;;  %v6162_v22 = vld [vmem:[#allocation5 + $0x2008] sm:$0xff] }
 0x4a9   : > { %7379 = vmatpush1.bf16.msra.mxu1 %v18503_v25  ;;  %v20612_v25 = vld [vmem:[#allocation8 + $0xde4] ss:$24 sps:$4 sm:$0xff]  }
 0x4aa   : > { %7380 = vmatprep.subr.bf16.mxu1 %v18500_v26  ;;  %8598 = vmatpush1.bf16.msra.mxu0 %v20586_v47  ;;  %v18535_v26 = vcombine.low %v6164_v41, %v6166_v46  ;;  %v18532_v47 = vcombine.high %v6160_v21, %v6162_v22  ;;  %v20703_v41 = vld [vmem:[#allocation8 + $0xf30] ss:$24 sps:$4 sm:$0xff]  }
 0x4ab   : > { %8599 = vmatprep.subr.bf16.mxu0 %v20591_v34  ;;  %v6158_v34 = vld [vmem:[#allocation5 + $0x1f48] sm:$0xff] }
 0x4ac   : > { %v22414_v46 = vld [vmem:[#allocation7 + $0x8] sm:$0xf] }
 0x4ad   : > { %7381 = vmatpush1.bf16.msra.mxu1 %v18499_v61  ;;  %v20615_v61 = vld [vmem:[#allocation8 + $0xdb4] ss:$24 sps:$4 sm:$0xff]  }
 0x4ae   : > { %7382 = vmatprep.subr.bf16.mxu1 %v18496_v19  ;;  %8600 = vmatpush1.bf16.msra.mxu0 %v20589_v48  ;;  %v18531_v19 = vcombine.low %v6160_v21, %v6162_v22  ;;  %v18528_v48 = vcombine.high %v6156_v52, %v6158_v34  ;;  %v6192_v21 = vrot.slane %v22414_v46, %v22230_v63  ;;  %v20715_v22 = vld [vmem:[#allocation8 + $0x11d0] ss:$24 sps:$4 sm:$0xff]  }
 0x4af   : > { %8601 = vmatprep.subr.bf16.mxu0 %v20594_v38  ;;  %v6154_v38 = vld [vmem:[#allocation5 + $0x1e88] sm:$0xff] }
 0x4b1   : > { %7383 = vmatpush1.bf16.msra.mxu1 %v18495_v39  ;;  %v20618_v39 = vld [vmem:[#allocation8 + $0xd84] ss:$24 sps:$4 sm:$0xff]  }
 0x4b2   : > { %7384 = vmatprep.subr.bf16.mxu1 %v18492_v40  ;;  %8602 = vmatpush1.bf16.msra.mxu0 %v20592_v42  ;;  %v18527_v40 = vcombine.low %v6156_v52, %v6158_v34  ;;  %v18524_v42 = vcombine.high %v6152_v37, %v6154_v38  ;;  %v20721_v34 = vld [vmem:[#allocation8 + $0x11a0] ss:$24 sps:$4 sm:$0xff]  }
 0x4b3   : > { %8603 = vmatprep.subr.bf16.mxu0 %v20597_v29  ;;  %v18523_v29 = vcombine.low %v6152_v37, %v6154_v38  ;;  %v20729_v37 = vld [vmem:[#allocation8 + $0x1174] ss:$24 sps:$4 sm:$0xff]  }
 0x4b5   : > { %7385 = vmatpush1.bf16.msra.mxu1 %v18491_v49 }
 0x4b6   : > { %7386 = vmatprep.subr.bf16.mxu1 %v18552_v57  ;;  %8604 = vmatpush2.bf16.msra.mxu0 %v20595_v55 }
 0x4b7   : > { %8605 = vmatprep.subr.bf16.mxu0 %v20600_v8 }
 0x4b9   : > { %7387 = vmatpush2.bf16.msra.mxu1 %v18551_v11 }
 0x4ba   : > { %7388 = vmatprep.subr.bf16.mxu1 %v18548_v31  ;;  %8606 = vmatpush2.bf16.msra.mxu0 %v20598_v14 }
 0x4bb   : > { %8607 = vmatprep.subr.bf16.mxu0 %v20603_v18  ;;  %v20667_v18 = vld [vmem:[#allocation8 + $0x1050] ss:$24 sps:$4 sm:$0xff]  }
 0x4bd   : > { %7389 = vmatpush2.bf16.msra.mxu1 %v18547_v5  ;;  %v20675_v5 = vld [vmem:[#allocation8 + $0x1024] ss:$24 sps:$4 sm:$0xff]  }
 0x4be   : > { %7390 = vmatprep.subr.bf16.mxu1 %v18544_v23  ;;  %8608 = vmatpush2.bf16.msra.mxu0 %v20601_v6  ;;  %v20673_v23 = vld [vmem:[#allocation8 + $0x1020] ss:$24 sps:$4 sm:$0xff]   ;;  %v20681_v6 = vld [vmem:[#allocation8 + $0xff4] ss:$24 sps:$4 sm:$0xff]  }
 0x4bf   : > { %8609 = vmatprep.subr.bf16.mxu0 %v20606_v50  ;;  %v20691_v50 = vld [vmem:[#allocation8 + $0xf90] ss:$24 sps:$4 sm:$0xff]  }
 0x4c1   : > { %7391 = vmatpush2.bf16.msra.mxu1 %v18543_v13  ;;  %v20699_v13 = vld [vmem:[#allocation8 + $0xf64] ss:$24 sps:$4 sm:$0xff]  }
 0x4c2   : > { %7392 = vmatprep.subr.bf16.mxu1 %v18540_v60  ;;  %8610 = vmatpush2.bf16.msra.mxu0 %v20604_v15  ;;  %v20697_v60 = vld [vmem:[#allocation8 + $0xf60] ss:$24 sps:$4 sm:$0xff]   ;;  %v20705_v15 = vld [vmem:[#allocation8 + $0xf34] ss:$24 sps:$4 sm:$0xff]  }
 0x4c3   : > { %8611 = vmatprep.subr.bf16.mxu0 %v20609_v32  ;;  %v20711_v32 = vld [vmem:[#allocation8 + $0xf04] ss:$24 sps:$4 sm:$0xff]  }
 0x4c5   : > { %7393 = vmatpush2.bf16.msra.mxu1 %v18539_v17  ;;  %v20709_v17 = vld [vmem:[#allocation8 + $0xf00] ss:$24 sps:$4 sm:$0xff]  }
 0x4c6   : > { %7394 = vmatprep.subr.bf16.mxu1 %v18536_v1  ;;  %8612 = vmatpush2.bf16.msra.mxu0 %v20607_v9  ;;  %v6188_v1 = vrot.slane %v22414_v46, %v22227_v54  ;;  %v20717_v9 = vld [vmem:[#allocation8 + $0x11d4] ss:$24 sps:$4 sm:$0xff]  }
 0x4c7   : > { %8613 = vmatprep.subr.bf16.mxu0 %v20612_v25 }
 0x4c9   : > { %7395 = vmatpush2.bf16.msra.mxu1 %v18535_v26 }
 0x4ca   : > { %7396 = vmatprep.subr.bf16.mxu1 %v18532_v47  ;;  %8614 = vmatpush2.bf16.msra.mxu0 %v20610_v27  ;;  %v20723_v47 = vld [vmem:[#allocation8 + $0x11a4] ss:$24 sps:$4 sm:$0xff]  }
 0x4cb   : > { %8615 = vmatprep.subr.bf16.mxu0 %v20615_v61 }
 0x4cd   : > { %7397 = vmatpush2.bf16.msra.mxu1 %v18531_v19 }
 0x4ce   : > { %7398 = vmatprep.subr.bf16.mxu1 %v18528_v48  ;;  %8616 = vmatpush2.bf16.msra.mxu0 %v20613_v36 }
 0x4cf   : > { %8617 = vmatprep.subr.bf16.mxu0 %v20618_v39 }
 0x4d1   : > { %7399 = vmatpush2.bf16.msra.mxu1 %v18527_v40 }
 0x4d2   : > { %7400 = vmatprep.subr.bf16.mxu1 %v18524_v42  ;;  %8618 = vmatpush2.bf16.msra.mxu0 %v20616_v43  ;;  %v20727_v42 = vld [vmem:[#allocation8 + $0x1170] ss:$24 sps:$4 sm:$0xff]  }
 0x4d3   : > { %8669 = vmatprep.subr.bf16.mxu0 %v20621_v45 }
 0x4d5   : > { %7401 = vmatpush2.bf16.msra.mxu1 %v18523_v29  ;;  %v7199_v49 = vpop.f32.mrf.mxu0 }
 0x4d6   : > { %8628 = vmatprep.subr.bf16.mxu1 %v20669_v2  ;;  %v7200_v25 = vadd.f32 %v7199_v49, %v6188_v1  ;;  %v20753_v2 = vld [vmem:[#allocation8 + $0x10b4] ss:$24 sps:$4 sm:$0xff]  }
 0x4d7   : > { %v7201_v57 = vpop.f32.mrf.mxu0  ;;  %v20624_v1 = vld [vmem:[#allocation8 + $0xd2c] ss:$24 sps:$4 sm:$0xff]  }
 0x4d8   : > { %v5984_v55 = vpop.f32.mrf.mxu1  ;;  %7403 = vmatmul.mubr.bf16.vlgmr.msra.gmra.mxu1 %v22214_v33  ;;  %v7202_v27 = vadd.f32 %v7201_v57, %v6192_v21  ;;  %v20735_v57 = vld [vmem:[#allocation8 + $0x1144] ss:$24 sps:$4 sm:$0xff]  }
 0x4d9   : > { %v22409_v56 = vadd.f32 %v5984_v55, %v22395_v53  ;;  %v7203_v62 = vpop.f32.mrf.mxu0  ;;  %8629 = vmatpush1.bf16.msra.mxu1 %v20667_v18  ;;  %v20687_v53 = vld [vmem:[#allocation8 + $0xfc4] ss:$24 sps:$4 sm:$0xff]   ;;  %v20751_v18 = vld [vmem:[#allocation8 + $0x10b0] ss:$24 sps:$4 sm:$0xff]  }
 0x4da   : > { %v5986_v8 = vpop.f32.mrf.mxu1  ;;  %8630 = vmatprep.subr.bf16.mxu1 %v20675_v5  ;;  %v20733_v62 = vld [vmem:[#allocation8 + $0x1140] ss:$24 sps:$4 sm:$0xff]   ;;  %v20627_v21 = vld [vmem:[#allocation8 + $0xcfc] ss:$24 sps:$4 sm:$0xff]  }
 0x4db   : > { %v22412_v11 = vadd.f32 %v5986_v8, %v22397_v51  ;;  %v7204_v31 = vpop.f32.mrf.mxu0  ;;  %v20693_v51 = vld [vmem:[#allocation8 + $0xf94] ss:$24 sps:$4 sm:$0xff]  }
 0x4dc   : > { %v5988_v14 = vpop.f32.mrf.mxu1  ;;  %v20741_v8 = vld [vmem:[#allocation8 + $0x1114] ss:$24 sps:$4 sm:$0xff]   ;;  %v20739_v31 = vld [vmem:[#allocation8 + $0x1110] ss:$24 sps:$4 sm:$0xff]  }
 0x4dd   : > { %8631 = vmatpush1.bf16.msra.mxu1 %v20673_v23  ;;  %v20747_v14 = vld [vmem:[#allocation8 + $0x10e4] ss:$24 sps:$4 sm:$0xff]  }
 0x4de   : > { %v5989_v0 = vpop.f32.mrf.mxu1  ;;  %8632 = vmatprep.subr.bf16.mxu1 %v20681_v6 }
 0x4df   : > { %v20745_v0 = vld [vmem:[#allocation8 + $0x10e0] ss:$24 sps:$4 sm:$0xff]  }
 0x4e1   : > { %8633 = vmatpush1.bf16.msra.mxu1 %v20679_v24 }
 0x4e2   : > { %8634 = vmatprep.subr.bf16.mxu1 %v20687_v53  ;;  %v20759_v53 = vld [vmem:[#allocation8 + $0x1084] ss:$24 sps:$4 sm:$0xff]  }
 0x4e5   : > { %8635 = vmatpush1.bf16.msra.mxu1 %v20685_v30 }
 0x4e6   : > { %8636 = vmatprep.subr.bf16.mxu1 %v20693_v51 }
 0x4e9   : > { %8637 = vmatpush1.bf16.msra.mxu1 %v20691_v50  ;;  %v20757_v50 = vld [vmem:[#allocation8 + $0x1080] ss:$24 sps:$4 sm:$0xff]  }
 0x4ea   : > { %8638 = vmatprep.subr.bf16.mxu1 %v20699_v13 }
 0x4ed   : > { %8639 = vmatpush1.bf16.msra.mxu1 %v20697_v60 }
 0x4ee   : > { %8640 = vmatprep.subr.bf16.mxu1 %v20705_v15  ;;  %v20765_v15 = vld [vmem:[#allocation8 + $0x105c] ss:$24 sps:$4 sm:$0xff]  }
 0x4f1   : > { %8641 = vmatpush1.bf16.msra.mxu1 %v20703_v41 }
 0x4f2   : > { %8642 = vmatprep.subr.bf16.mxu1 %v20711_v32  ;;  %v20619_v32 = vld [vmem:[#allocation8 + $0xd58] ss:$24 sps:$4 sm:$0xff]  }
 0x4f5   : > { %8643 = vmatpush1.bf16.msra.mxu1 %v20709_v17 }
 0x4f6   : > { %8644 = vmatprep.subr.bf16.mxu1 %v20717_v9  ;;  %v20622_v9 = vld [vmem:[#allocation8 + $0xd28] ss:$24 sps:$4 sm:$0xff]  }
 0x4f9   : > { %8645 = vmatpush2.bf16.msra.mxu1 %v20715_v22  ;;  %v20625_v22 = vld [vmem:[#allocation8 + $0xcf8] ss:$24 sps:$4 sm:$0xff]  }
 0x4fa   : > { %8646 = vmatprep.subr.bf16.mxu1 %v20723_v47  ;;  %v20633_v47 = vld [vmem:[#allocation8 + $0xc9c] ss:$24 sps:$4 sm:$0xff]  }
 0x4fd   : > { %8647 = vmatpush2.bf16.msra.mxu1 %v20721_v34  ;;  %v20634_v34 = vld [vmem:[#allocation8 + $0xc68] ss:$24 sps:$4 sm:$0xff]  }
 0x4fe   : > { %8648 = vmatprep.subr.bf16.mxu1 %v20729_v37  ;;  %v20645_v37 = vld [vmem:[#allocation8 + $0xedc] ss:$24 sps:$4 sm:$0xff]  }
 0x501   : > { %8649 = vmatpush2.bf16.msra.mxu1 %v20727_v42  ;;  %v20646_v42 = vld [vmem:[#allocation8 + $0xea8] ss:$24 sps:$4 sm:$0xff]  }
 0x502   : > { %8650 = vmatprep.subr.bf16.mxu1 %v20735_v57 }
 0x505   : > { %8651 = vmatpush2.bf16.msra.mxu1 %v20733_v62 }
 0x506   : > { %8652 = vmatprep.subr.bf16.mxu1 %v20741_v8 }
 0x509   : > { %8653 = vmatpush2.bf16.msra.mxu1 %v20739_v31  ;;  %v20654_v31 = vld [vmem:[#allocation8 + $0xe4c] ss:$24 sps:$4 sm:$0xff]  }
 0x50a   : > { %8654 = vmatprep.subr.bf16.mxu1 %v20747_v14 }
 0x50d   : > { %8655 = vmatpush2.bf16.msra.mxu1 %v20745_v0  ;;  %v20652_v0 = vld [vmem:[#allocation8 + $0xe48] ss:$24 sps:$4 sm:$0xff]  }
 0x50e   : > { %8656 = vmatprep.subr.bf16.mxu1 %v20753_v2  ;;  %v20657_v2 = vld [vmem:[#allocation8 + $0xe1c] ss:$24 sps:$4 sm:$0xff]  }
 0x511   : > { %8657 = vmatpush2.bf16.msra.mxu1 %v20751_v18  ;;  %v20655_v18 = vld [vmem:[#allocation8 + $0xe18] ss:$24 sps:$4 sm:$0xff]  }
 0x512   : > { %8658 = vmatprep.subr.bf16.mxu1 %v20759_v53  ;;  %v20666_v53 = vld [vmem:[#allocation8 + $0xd8c] ss:$24 sps:$4 sm:$0xff]  }
 0x515   : > { %v7281_v26 = vpop.f32.mrf.mxu0  ;;  %8659 = vmatpush2.bf16.msra.mxu1 %v20757_v50  ;;  %v20670_v50 = vld [vmem:[#allocation8 + $0xd60] ss:$24 sps:$4 sm:$0xff]  }
 0x516   : > { %8710 = vmatprep.subr.bf16.mxu1 %v20765_v15  ;;  %v20684_v15 = vld [vmem:[#allocation8 + $0xd04] ss:$24 sps:$4 sm:$0xff]  }
 0x517   : > { %v7283_v52 = vpop.f32.mrf.mxu0 }
 0x518   : > { %v7240_v61 = vpop.f32.mrf.mxu1 }
 0x519   : > { %v7241_v19 = vadd.f32 %v7240_v61, %v7200_v25  ;;  %v7285_v48 = vpop.f32.mrf.mxu0  ;;  %v20630_v25 = vld [vmem:[#allocation8 + $0xccc] ss:$24 sps:$4 sm:$0xff]   ;;  %v20639_v61 = vld [vmem:[#allocation8 + $0xc3c] ss:$24 sps:$4 sm:$0xff]  }
 0x51a   : > { %v7242_v36 = vpop.f32.mrf.mxu1  ;;  %v20642_v48 = vld [vmem:[#allocation8 + $0xc0c] ss:$24 sps:$4 sm:$0xff]  }
 0x51b   : > { %v7243_v38 = vadd.f32 %v7242_v36, %v7202_v27  ;;  %v7282_v39 = vadd.f32 %v7281_v26, %v7241_v19  ;;  %v7286_v40 = vpop.f32.mrf.mxu0  ;;  %v20628_v26 = vld [vmem:[#allocation8 + $0xcc8] ss:$24 sps:$4 sm:$0xff]   ;;  %v20631_v27 = vld [vmem:[#allocation8 + $0xc98] ss:$24 sps:$4 sm:$0xff]  }
 0x51c   : > { %v7244_v43 = vpop.f32.mrf.mxu1  ;;  %v20637_v19 = vld [vmem:[#allocation8 + $0xc38] ss:$24 sps:$4 sm:$0xff]   ;;  %v20640_v36 = vld [vmem:[#allocation8 + $0xc08] ss:$24 sps:$4 sm:$0xff]  }
 0x51d   : > { %v7415_v45 = vmul.f32 0.70710677, %v7282_v39  ;;  %v7284_v29 = vadd.f32 %v7283_v52, %v7243_v38  ;;  %v7411_v24 = vmul.f32 0.5, %v7282_v39  ;;  %v20636_v52 = vld [vmem:[#allocation8 + $0xc6c] ss:$24 sps:$4 sm:$0xff]  }
 0x51e   : > { %v7245_v49 = vpop.f32.mrf.mxu1  ;;  %v20643_v38 = vld [vmem:[#allocation8 + $0xed8] ss:$24 sps:$4 sm:$0xff]   ;;  %v20648_v39 = vld [vmem:[#allocation8 + $0xeac] ss:$24 sps:$4 sm:$0xff]  }
 0x51f   : > { %21739 = verf.f32 %v7415_v45  ;;  %v7416_v55 = vmul.f32 0.70710677, %v7284_v29  ;;  %v7412_v30 = vmul.f32 0.5, %v7284_v29  ;;  %v20651_v29 = vld [vmem:[#allocation8 + $0xe7c] ss:$24 sps:$4 sm:$0xff]  }
 0x521   : > { %21741 = verf.f32 %v7416_v55  ;;  %v20649_v55 = vld [vmem:[#allocation8 + $0xe78] ss:$24 sps:$4 sm:$0xff]  }
 0x52c   : > { %v21740_v5 = vpop.eup %21739 }
 0x52d   : > { %v7423_v23 = vadd.f32 1.0, %v21740_v5  ;;  %v20660_v5 = vld [vmem:[#allocation8 + $0xdec] ss:$24 sps:$4 sm:$0xff]  }
 0x52e   : > { %v21742_v6 = vpop.eup %21741 }
 0x52f   : > { %v7424_v51 = vadd.f32 1.0, %v21742_v6  ;;  %v7427_v13 = vmul.f32 %v7423_v23, %v7411_v24  ;;  %v20658_v23 = vld [vmem:[#allocation8 + $0xde8] ss:$24 sps:$4 sm:$0xff]   ;;  %v20663_v6 = vld [vmem:[#allocation8 + $0xdbc] ss:$24 sps:$4 sm:$0xff]  }
 0x530   : > { %v20661_v24 = vld [vmem:[#allocation8 + $0xdb8] ss:$24 sps:$4 sm:$0xff]  }
 0x531   : > { %v7428_v60 = vmul.f32 %v7424_v51, %v7412_v30  ;;  %v22422_v17 = vpack.c.bf16 %v7427_v13, %v7427_v13  ;;  %v20664_v30 = vld [vmem:[#allocation8 + $0xd88] ss:$24 sps:$4 sm:$0xff]   ;;  %v20672_v51 = vld [vmem:[#allocation8 + $0xd64] ss:$24 sps:$4 sm:$0xff]   ;;  %v20678_v13 = vld [vmem:[#allocation8 + $0xd34] ss:$24 sps:$4 sm:$0xff]  }
 0x533   : > { %v22420_v41 = vpack.c.bf16 %v7428_v60, %v7428_v60  ;;  %v20676_v60 = vld [vmem:[#allocation8 + $0xd30] ss:$24 sps:$4 sm:$0xff]  }
 0x535   : > { %8619 = vmatprep.mubr.bf16.mxu0 %v22420_v41 }
 0x536   : > { %8620 = vmatmul.mubr.bf16.vlgmr.msra.gmra.mxu0 %v22422_v17 }
 0x537   : > { %8670 = vmatpush1.bf16.msra.mxu0 %v20619_v32  ;;  %8701 = vmatprep.mubr.bf16.mxu0 %v22420_v41  ;;  %v20682_v32 = vld [vmem:[#allocation8 + $0xd00] ss:$24 sps:$4 sm:$0xff]  }
 0x538   : > { %8671 = vmatprep.subr.bf16.mxu0 %v20624_v1  ;;  %v20690_v1 = vld [vmem:[#allocation8 + $0xcd4] ss:$24 sps:$4 sm:$0xff]  }
 0x53b   : > { %8672 = vmatpush1.bf16.msra.mxu0 %v20622_v9  ;;  %v20688_v9 = vld [vmem:[#allocation8 + $0xcd0] ss:$24 sps:$4 sm:$0xff]  }
 0x53c   : > { %8673 = vmatprep.subr.bf16.mxu0 %v20627_v21  ;;  %v20696_v21 = vld [vmem:[#allocation8 + $0xca4] ss:$24 sps:$4 sm:$0xff]  }
 0x53f   : > { %8674 = vmatpush1.bf16.msra.mxu0 %v20625_v22  ;;  %v20694_v22 = vld [vmem:[#allocation8 + $0xca0] ss:$24 sps:$4 sm:$0xff]  }
 0x540   : > { %8675 = vmatprep.subr.bf16.mxu0 %v20630_v25  ;;  %v20702_v25 = vld [vmem:[#allocation8 + $0xc74] ss:$24 sps:$4 sm:$0xff]  }
 0x543   : > { %8676 = vmatpush1.bf16.msra.mxu0 %v20628_v26  ;;  %v20700_v26 = vld [vmem:[#allocation8 + $0xc70] ss:$24 sps:$4 sm:$0xff]  }
 0x544   : > { %8677 = vmatprep.subr.bf16.mxu0 %v20633_v47  ;;  %v20708_v47 = vld [vmem:[#allocation8 + $0xc44] ss:$24 sps:$4 sm:$0xff]  }
 0x547   : > { %8678 = vmatpush1.bf16.msra.mxu0 %v20631_v27  ;;  %v20714_v27 = vld [vmem:[#allocation8 + $0xc14] ss:$24 sps:$4 sm:$0xff]  }
 0x548   : > { %8679 = vmatprep.subr.bf16.mxu0 %v20636_v52  ;;  %v6196_v52 = vrot.slane %v22414_v46, %v22257_v4 }
 0x54b   : > { %8680 = vmatpush1.bf16.msra.mxu0 %v20634_v34  ;;  %v20712_v34 = vld [vmem:[#allocation8 + $0xc10] ss:$24 sps:$4 sm:$0xff]  }
 0x54c   : > { %8681 = vmatprep.subr.bf16.mxu0 %v20639_v61  ;;  %v20720_v61 = vld [vmem:[#allocation8 + $0xee4] ss:$24 sps:$4 sm:$0xff]  }
 0x54f   : > { %8682 = vmatpush1.bf16.msra.mxu0 %v20637_v19  ;;  %v6200_v19 = vrot.slane %v22414_v46, %v22260_v7 }
 0x550   : > { %8683 = vmatprep.subr.bf16.mxu0 %v20642_v48 }
 0x553   : > { %8684 = vmatpush1.bf16.msra.mxu0 %v20640_v36  ;;  %v20718_v36 = vld [vmem:[#allocation8 + $0xee0] ss:$24 sps:$4 sm:$0xff]  }
 0x554   : > { %8685 = vmatprep.subr.bf16.mxu0 %v20645_v37  ;;  %v20726_v37 = vld [vmem:[#allocation8 + $0xeb4] ss:$24 sps:$4 sm:$0xff]  }
 0x555   : > { %v22427_v40 = vpop.f32.mrf.mxu0 }
 0x557   : > { %8686 = vmatpush2.bf16.msra.mxu0 %v20643_v38  ;;  %v22429_v43 = vpop.f32.mrf.mxu0 }
 0x558   : > { %v22431_v45 = vpop.f32.mrf.mxu1  ;;  %8687 = vmatprep.subr.bf16.mxu0 %v20648_v39 }
 0x559   : > { %v7367_v49 = vpop.f32.mrf.mxu0  ;;  %v7323_v48 = vadd.f32 %v22431_v45, %v6196_v52  ;;  %v20730_v45 = vld [vmem:[#allocation8 + $0xe80] ss:$24 sps:$4 sm:$0xff]  }
 0x55a   : > { %v22433_v57 = vpop.f32.mrf.mxu1  ;;  %v20732_v49 = vld [vmem:[#allocation8 + $0xe84] ss:$24 sps:$4 sm:$0xff]  }
 0x55b   : > { %8688 = vmatpush2.bf16.msra.mxu0 %v20646_v42  ;;  %v7368_v62 = vpop.f32.mrf.mxu0  ;;  %v7325_v38 = vadd.f32 %v22433_v57, %v6200_v19  ;;  %v7364_v39 = vadd.f32 %v22427_v40, %v7323_v48  ;;  %v20724_v42 = vld [vmem:[#allocation8 + $0xeb0] ss:$24 sps:$4 sm:$0xff]  }
 0x55c   : > { %v7326_v8 = vpop.f32.mrf.mxu1  ;;  %8689 = vmatprep.subr.bf16.mxu0 %v20651_v29  ;;  %v20736_v40 = vld [vmem:[#allocation8 + $0xe50] ss:$24 sps:$4 sm:$0xff]  }
 0x55d   : > { %v20766_v48 = vld [vmem:[#allocation8 + $0x1028] ss:$24 sps:$4 sm:$0xff]  }
 0x55e   : > { %v7327_v14 = vpop.f32.mrf.mxu1 }
 0x55f   : > { %8690 = vmatpush2.bf16.msra.mxu0 %v20649_v55  ;;  %v7366_v55 = vadd.f32 %v22429_v43, %v7325_v38  ;;  %v20750_v43 = vld [vmem:[#allocation8 + $0xdf4] ss:$24 sps:$4 sm:$0xff]  }
 0x560   : > { %8691 = vmatprep.subr.bf16.mxu0 %v20654_v31  ;;  %v20771_v38 = vld [vmem:[#allocation8 + $0xffc] ss:$24 sps:$4 sm:$0xff]  }
 0x563   : > { %8692 = vmatpush2.bf16.msra.mxu0 %v20652_v0  ;;  %v20738_v0 = vld [vmem:[#allocation8 + $0xe54] ss:$24 sps:$4 sm:$0xff]  }
 0x564   : > { %8693 = vmatprep.subr.bf16.mxu0 %v20657_v2 }
 0x567   : > { %8694 = vmatpush2.bf16.msra.mxu0 %v20655_v18  ;;  %v20744_v18 = vld [vmem:[#allocation8 + $0xe24] ss:$24 sps:$4 sm:$0xff]  }
 0x568   : > { %8695 = vmatprep.subr.bf16.mxu0 %v20660_v5  ;;  %v20742_v5 = vld [vmem:[#allocation8 + $0xe20] ss:$24 sps:$4 sm:$0xff]  }
 0x56b   : > { %8696 = vmatpush2.bf16.msra.mxu0 %v20658_v23  ;;  %v20748_v23 = vld [vmem:[#allocation8 + $0xdf0] ss:$24 sps:$4 sm:$0xff]  }
 0x56c   : > { %8697 = vmatprep.subr.bf16.mxu0 %v20663_v6  ;;  %v20756_v6 = vld [vmem:[#allocation8 + $0xdc4] ss:$24 sps:$4 sm:$0xff]  }
 0x56f   : > { %8698 = vmatpush2.bf16.msra.mxu0 %v20661_v24 }
 0x570   : > { %8699 = vmatprep.subr.bf16.mxu0 %v20666_v53 }
 0x573   : > { %8700 = vmatpush2.bf16.msra.mxu0 %v20664_v30  ;;  %v20754_v30 = vld [vmem:[#allocation8 + $0xdc0] ss:$24 sps:$4 sm:$0xff]  }
 0x574   : > { %8751 = vmatprep.subr.bf16.mxu0 %v20672_v51 }
 0x576   : > { %8702 = vmatmul.mubr.bf16.vlgmr.msra.gmra.mxu0 %v22422_v17 }
 0x577   : > { %8752 = vmatpush1.bf16.msra.mxu0 %v20670_v50  ;;  %8783 = vmatprep.mubr.bf16.mxu0 %v22420_v41  ;;  %v20706_v41 = vld [vmem:[#allocation8 + $0xc40] ss:$24 sps:$4 sm:$0xff]  }
 0x578   : > { %8753 = vmatprep.subr.bf16.mxu0 %v20678_v13  ;;  %v20762_v13 = vld [vmem:[#allocation8 + $0xd94] ss:$24 sps:$4 sm:$0xff]  }
 0x57b   : > { %8754 = vmatpush1.bf16.msra.mxu0 %v20676_v60 }
 0x57c   : > { %8755 = vmatprep.subr.bf16.mxu0 %v20684_v15 }
 0x57f   : > { %8756 = vmatpush1.bf16.msra.mxu0 %v20682_v32  ;;  %v8867_v32 = vld [vmem:[#allocation5 + $0x570] sm:$0xff] }
 0x580   : > { %8757 = vmatprep.subr.bf16.mxu0 %v20690_v1  ;;  %v8869_v1 = vld [vmem:[#allocation5 + $0x5d0] sm:$0xff] }
 0x583   : > { %8758 = vmatpush1.bf16.msra.mxu0 %v20688_v9 }
 0x584   : > { %8759 = vmatprep.subr.bf16.mxu0 %v20696_v21  ;;  %v20760_v21 = vld [vmem:[#allocation8 + $0xd90] ss:$24 sps:$4 sm:$0xff]  }
 0x587   : > { %8760 = vmatpush1.bf16.msra.mxu0 %v20694_v22 }
 0x588   : > { %8761 = vmatprep.subr.bf16.mxu0 %v20702_v25  ;;  %v18774_v25 = vcombine.high %v8867_v32, %v8869_v1 }
 0x58b   : > { %8762 = vmatpush1.bf16.msra.mxu0 %v20700_v26 }
 0x58c   : > { %8763 = vmatprep.subr.bf16.mxu0 %v20708_v47  ;;  %v20763_v47 = vld [vmem:[#allocation8 + $0x1058] ss:$24 sps:$4 sm:$0xff]  }
 0x58f   : > { %8764 = vmatpush1.bf16.msra.mxu0 %v20706_v41  ;;  %v8863_v41 = vld [vmem:[#allocation5 + $0x4b0] sm:$0xff] }
 0x590   : > { %8765 = vmatprep.subr.bf16.mxu0 %v20714_v27  ;;  %v8865_v27 = vld [vmem:[#allocation5 + $0x510] sm:$0xff] }
 0x591   : > { %v18770_v19 = vcombine.high %v8863_v41, %v8865_v27 }
 0x593   : > { %8766 = vmatpush1.bf16.msra.mxu0 %v20712_v34  ;;  %v20768_v34 = vld [vmem:[#allocation8 + $0x102c] ss:$24 sps:$4 sm:$0xff]  }
 0x594   : > { %8767 = vmatprep.subr.bf16.mxu0 %v20720_v61  ;;  %v18773_v61 = vcombine.low %v8867_v32, %v8869_v1  ;;  %v20786_v32 = vld [vmem:[#allocation8 + $0xf0c] ss:$24 sps:$4 sm:$0xff]  }
 0x597   : > { %8768 = vmatpush2.bf16.msra.mxu0 %v20718_v36  ;;  %v8859_v36 = vld [vmem:[#allocation5 + $0x3f0] sm:$0xff] }
 0x598   : > { %v7404_v29 = vpop.f32.mrf.mxu1  ;;  %8769 = vmatprep.subr.bf16.mxu0 %v20726_v37  ;;  %v8861_v37 = vld [vmem:[#allocation5 + $0x450] sm:$0xff] }
 0x599   : > { %v7405_v62 = vadd.f32 %v7404_v29, %v7364_v39  ;;  %v18769_v39 = vcombine.low %v8863_v41, %v8865_v27  ;;  %v20769_v29 = vld [vmem:[#allocation8 + $0xff8] ss:$24 sps:$4 sm:$0xff]  }
 0x59a   : > { %v7406_v8 = vpop.f32.mrf.mxu1 }
 0x59b   : > { %v7417_v46 = vmul.f32 0.70710677, %v7405_v62  ;;  %v7407_v31 = vadd.f32 %v7406_v8, %v7366_v55  ;;  %8770 = vmatpush2.bf16.msra.mxu0 %v20724_v42  ;;  %v7413_v50 = vmul.f32 0.5, %v7405_v62  ;;  %v18766_v42 = vcombine.high %v8859_v36, %v8861_v37  ;;  %v8857_v55 = vld [vmem:[#allocation5 + $0x390] sm:$0xff]  ;;  %v20774_v62 = vld [vmem:[#allocation8 + $0xfcc] ss:$24 sps:$4 sm:$0xff]  }
 0x59c   : > { %v7408_v14 = vpop.f32.mrf.mxu1  ;;  %8771 = vmatprep.subr.bf16.mxu0 %v20732_v49  ;;  %v8855_v49 = vld [vmem:[#allocation5 + $0x330] sm:$0xff]  ;;  %v18765_v8 = vcombine.low %v8859_v36, %v8861_v37 }
 0x59d   : > { %21743 = verf.f32 %v7417_v46  ;;  %v7418_v57 = vmul.f32 0.70710677, %v7407_v31  ;;  %v7414_v60 = vmul.f32 0.5, %v7407_v31  ;;  %v18762_v46 = vcombine.high %v8855_v49, %v8857_v55  ;;  %v8851_v31 = vld [vmem:[#allocation5 + $0x270] sm:$0xff] }
 0x59e   : > { %v7409_v2 = vpop.f32.mrf.mxu1  ;;  %v20777_v14 = vld [vmem:[#allocation8 + $0xf9c] ss:$24 sps:$4 sm:$0xff]  }
 0x59f   : > { %21745 = verf.f32 %v7418_v57  ;;  %8772 = vmatpush2.bf16.msra.mxu0 %v20730_v45  ;;  %v8853_v45 = vld [vmem:[#allocation5 + $0x2d0] sm:$0xff] }
 0x5a0   : > { %8773 = vmatprep.subr.bf16.mxu0 %v20738_v0  ;;  %v18761_v0 = vcombine.low %v8855_v49, %v8857_v55  ;;  %v18758_v57 = vcombine.high %v8851_v31, %v8853_v45  ;;  %v20775_v2 = vld [vmem:[#allocation8 + $0xf98] ss:$24 sps:$4 sm:$0xff]  }
 0x5a3   : > { %8774 = vmatpush2.bf16.msra.mxu0 %v20736_v40  ;;  %v8847_v40 = vld [vmem:[#allocation5 + $0x1b0] sm:$0xff] }
 0x5a4   : > { %8775 = vmatprep.subr.bf16.mxu0 %v20744_v18  ;;  %v8849_v18 = vld [vmem:[#allocation5 + $0x210] sm:$0xff] }
 0x5a7   : > { %8776 = vmatpush2.bf16.msra.mxu0 %v20742_v5  ;;  %v20780_v5 = vld [vmem:[#allocation8 + $0xf6c] ss:$24 sps:$4 sm:$0xff]  }
 0x5a8   : > { %8777 = vmatprep.subr.bf16.mxu0 %v20750_v43  ;;  %v18757_v43 = vcombine.low %v8851_v31, %v8853_v45 }
 0x5aa   : > { %v21744_v24 = vpop.eup %21743 }
 0x5ab   : > { %v7425_v53 = vadd.f32 1.0, %v21744_v24  ;;  %8778 = vmatpush2.bf16.msra.mxu0 %v20748_v23  ;;  %v18754_v23 = vcombine.high %v8847_v40, %v8849_v18  ;;  %v8843_v24 = vld [vmem:[#allocation5 + $0xf0] sm:$0xff] }
 0x5ac   : > { %v21746_v51 = vpop.eup %21745  ;;  %8779 = vmatprep.subr.bf16.mxu0 %v20756_v6  ;;  %v20778_v6 = vld [vmem:[#allocation8 + $0xf68] ss:$24 sps:$4 sm:$0xff]  }
 0x5ad   : > { %v7426_v15 = vadd.f32 1.0, %v21746_v51  ;;  %v7429_v9 = vmul.f32 %v7425_v53, %v7413_v50  ;;  %v8845_v53 = vld [vmem:[#allocation5 + $0x150] sm:$0xff]  ;;  %v18753_v51 = vcombine.low %v8847_v40, %v8849_v18 }
 0x5ae   : > { %v18750_v50 = vcombine.high %v8843_v24, %v8845_v53  ;;  %v18749_v1 = vcombine.low %v8843_v24, %v8845_v53 }
 0x5af   : > { %8780 = vmatpush2.bf16.msra.mxu0 %v20754_v30  ;;  %v7430_v22 = vmul.f32 %v7426_v15, %v7414_v60  ;;  %v22447_v52 = vpack.c.bf16 %v7429_v9, %v7429_v9  ;;  %v20783_v30 = vld [vmem:[#allocation8 + $0xf3c] ss:$24 sps:$4 sm:$0xff]  }
 0x5b0   : > { %8781 = vmatprep.subr.bf16.mxu0 %v20762_v13  ;;  %v20781_v13 = vld [vmem:[#allocation8 + $0xf38] ss:$24 sps:$4 sm:$0xff]  }
 0x5b1   : > { %v22445_v26 = vpack.c.bf16 %v7430_v22, %v7430_v22  ;;  %v8839_v60 = vld [vmem:[#allocation5 + $0x30] sm:$0xff] }
 0x5b2   : > { %v8841_v15 = vld [vmem:[#allocation5 + $0x90] sm:$0xff] }
 0x5b3   : > { %8782 = vmatpush2.bf16.msra.mxu0 %v20760_v21  ;;  %8660 = vmatprep.mubr.bf16.mxu1 %v22445_v26  ;;  %v18746_v9 = vcombine.high %v8839_v60, %v8841_v15  ;;  %v20784_v21 = vld [vmem:[#allocation8 + $0xf08] ss:$24 sps:$4 sm:$0xff]   ;;  %v8899_v22 = vld [vmem:[#allocation5 + $0xb70] sm:$0xff]  ;;  %v18745_v41 = vcombine.low %v8839_v60, %v8841_v15 }
 0x5b4   : > { %8661 = vmatmul.mubr.bf16.vlgmr.msra.gmra.mxu1 %v22447_v52  ;;  %10013 = vmatprep.subr.bf16.mxu0 %v18774_v25  ;;  %v8901_v25 = vld [vmem:[#allocation5 + $0xbd0] sm:$0xff] }
 0x5b5   : > { %8711 = vmatpush1.bf16.msra.mxu1 %v20763_v47  ;;  %8742 = vmatprep.mubr.bf16.mxu1 %v22445_v26  ;;  %v20789_v47 = vld [vmem:[#allocation8 + $0x11dc] ss:$24 sps:$4 sm:$0xff]   ;;  %v18806_v27 = vcombine.high %v8899_v22, %v8901_v25  ;;  %v18805_v36 = vcombine.low %v8899_v22, %v8901_v25 }
 0x5b6   : > { %8784 = vmatmul.mubr.bf16.vlgmr.msra.gmra.mxu0 %v22422_v17  ;;  %8712 = vmatprep.subr.bf16.mxu1 %v20768_v34  ;;  %v20772_v17 = vld [vmem:[#allocation8 + $0xfc8] ss:$24 sps:$4 sm:$0xff]   ;;  %v20787_v34 = vld [vmem:[#allocation8 + $0x11d8] ss:$24 sps:$4 sm:$0xff]  }
 0x5b7   : > { %10014 = vmatpush1.bf16.msra.mxu0 %v18773_v61  ;;  %10045 = vmatprep.mubr.bf16.mxu0 %v22194_v58  ;;  %v8895_v61 = vld [vmem:[#allocation5 + $0xab0] sm:$0xff] }
 0x5b8   : > { %10015 = vmatprep.subr.bf16.mxu0 %v18770_v19  ;;  %v8897_v19 = vld [vmem:[#allocation5 + $0xb10] sm:$0xff] }
 0x5b9   : > { %8713 = vmatpush1.bf16.msra.mxu1 %v20766_v48  ;;  %v20792_v48 = vld [vmem:[#allocation8 + $0x11ac] ss:$24 sps:$4 sm:$0xff]   ;;  %v18802_v37 = vcombine.high %v8895_v61, %v8897_v19  ;;  %v18801_v49 = vcombine.low %v8895_v61, %v8897_v19 }
 0x5ba   : > { %8714 = vmatprep.subr.bf16.mxu1 %v20771_v38  ;;  %v20790_v38 = vld [vmem:[#allocation8 + $0x11a8] ss:$24 sps:$4 sm:$0xff]  }
 0x5bb   : > { %10016 = vmatpush1.bf16.msra.mxu0 %v18769_v39  ;;  %v8891_v39 = vld [vmem:[#allocation5 + $0x9f0] sm:$0xff] }
 0x5bc   : > { %10017 = vmatprep.subr.bf16.mxu0 %v18766_v42  ;;  %v8893_v42 = vld [vmem:[#allocation5 + $0xa50] sm:$0xff] }
 0x5bd   : > { %8715 = vmatpush1.bf16.msra.mxu1 %v20769_v29  ;;  %v20795_v29 = vld [vmem:[#allocation8 + $0x117c] ss:$24 sps:$4 sm:$0xff]   ;;  %v18798_v55 = vcombine.high %v8891_v39, %v8893_v42  ;;  %v18797_v31 = vcombine.low %v8891_v39, %v8893_v42 }
 0x5be   : > { %8716 = vmatprep.subr.bf16.mxu1 %v20774_v62  ;;  %v20793_v62 = vld [vmem:[#allocation8 + $0x1178] ss:$24 sps:$4 sm:$0xff]  }
 0x5bf   : > { %10018 = vmatpush1.bf16.msra.mxu0 %v18765_v8  ;;  %v8887_v8 = vld [vmem:[#allocation5 + $0x930] sm:$0xff] }
 0x5c0   : > { %10019 = vmatprep.subr.bf16.mxu0 %v18762_v46  ;;  %v8889_v46 = vld [vmem:[#allocation5 + $0x990] sm:$0xff] }
 0x5c1   : > { %8717 = vmatpush1.bf16.msra.mxu1 %v20772_v17  ;;  %v20798_v17 = vld [vmem:[#allocation8 + $0x114c] ss:$24 sps:$4 sm:$0xff]   ;;  %v18794_v45 = vcombine.high %v8887_v8, %v8889_v46  ;;  %v18793_v40 = vcombine.low %v8887_v8, %v8889_v46 }
 0x5c2   : > { %8718 = vmatprep.subr.bf16.mxu1 %v20777_v14  ;;  %v20796_v14 = vld [vmem:[#allocation8 + $0x1148] ss:$24 sps:$4 sm:$0xff]   ;;  %v20819_v8 = vld [vmem:[#allocation8 + $0x1004] ss:$24 sps:$4 sm:$0xff]  }
 0x5c3   : > { %10020 = vmatpush1.bf16.msra.mxu0 %v18761_v0  ;;  %v8883_v0 = vld [vmem:[#allocation5 + $0x870] sm:$0xff] }
 0x5c4   : > { %10021 = vmatprep.subr.bf16.mxu0 %v18758_v57  ;;  %v8885_v57 = vld [vmem:[#allocation5 + $0x8d0] sm:$0xff] }
 0x5c5   : > { %8719 = vmatpush1.bf16.msra.mxu1 %v20775_v2  ;;  %v20801_v2 = vld [vmem:[#allocation8 + $0x111c] ss:$24 sps:$4 sm:$0xff]   ;;  %v18790_v18 = vcombine.high %v8883_v0, %v8885_v57  ;;  %v18789_v24 = vcombine.low %v8883_v0, %v8885_v57 }
 0x5c6   : > { %8720 = vmatprep.subr.bf16.mxu1 %v20780_v5  ;;  %v20799_v5 = vld [vmem:[#allocation8 + $0x1118] ss:$24 sps:$4 sm:$0xff]   ;;  %v20822_v57 = vld [vmem:[#allocation8 + $0xfd4] ss:$24 sps:$4 sm:$0xff]  }
 0x5c7   : > { %10022 = vmatpush1.bf16.msra.mxu0 %v18757_v43  ;;  %v8879_v43 = vld [vmem:[#allocation5 + $0x7b0] sm:$0xff] }
 0x5c8   : > { %10023 = vmatprep.subr.bf16.mxu0 %v18754_v23  ;;  %v8881_v23 = vld [vmem:[#allocation5 + $0x810] sm:$0xff] }
 0x5c9   : > { %8721 = vmatpush1.bf16.msra.mxu1 %v20778_v6  ;;  %v20804_v6 = vld [vmem:[#allocation8 + $0x10ec] ss:$24 sps:$4 sm:$0xff]   ;;  %v18786_v53 = vcombine.high %v8879_v43, %v8881_v23  ;;  %v18785_v60 = vcombine.low %v8879_v43, %v8881_v23  ;;  %v8979_v43 = vld [vmem:[#allocation5 + $0x1a70] sm:$0xff] }
 0x5ca   : > { %8722 = vmatprep.subr.bf16.mxu1 %v20783_v30  ;;  %v20802_v30 = vld [vmem:[#allocation8 + $0x10e8] ss:$24 sps:$4 sm:$0xff]   ;;  %v8981_v23 = vld [vmem:[#allocation5 + $0x1ad0] sm:$0xff] }
 0x5cb   : > { %10024 = vmatpush1.bf16.msra.mxu0 %v18753_v51  ;;  %v8875_v51 = vld [vmem:[#allocation5 + $0x6f0] sm:$0xff] }
 0x5cc   : > { %10025 = vmatprep.subr.bf16.mxu0 %v18750_v50  ;;  %v8877_v50 = vld [vmem:[#allocation5 + $0x750] sm:$0xff] }
 0x5cd   : > { %8723 = vmatpush1.bf16.msra.mxu1 %v20781_v13  ;;  %v20807_v13 = vld [vmem:[#allocation8 + $0x10bc] ss:$24 sps:$4 sm:$0xff]   ;;  %v18782_v15 = vcombine.high %v8875_v51, %v8877_v50  ;;  %v18781_v22 = vcombine.low %v8875_v51, %v8877_v50 }
 0x5ce   : > { %8724 = vmatprep.subr.bf16.mxu1 %v20786_v32  ;;  %v20805_v32 = vld [vmem:[#allocation8 + $0x10b8] ss:$24 sps:$4 sm:$0xff]  }
 0x5cf   : > { %10026 = vmatpush1.bf16.msra.mxu0 %v18749_v1  ;;  %v8871_v1 = vld [vmem:[#allocation5 + $0x630] sm:$0xff] }
 0x5d0   : > { %10027 = vmatprep.subr.bf16.mxu0 %v18746_v9  ;;  %v8873_v9 = vld [vmem:[#allocation5 + $0x690] sm:$0xff] }
 0x5d1   : > { %8725 = vmatpush1.bf16.msra.mxu1 %v20784_v21  ;;  %v20810_v21 = vld [vmem:[#allocation8 + $0x108c] ss:$24 sps:$4 sm:$0xff]   ;;  %v18778_v25 = vcombine.high %v8871_v1, %v8873_v9  ;;  %v18777_v61 = vcombine.low %v8871_v1, %v8873_v9  ;;  %v8975_v51 = vld [vmem:[#allocation5 + $0x19b0] sm:$0xff] }
 0x5d2   : > { %8726 = vmatprep.subr.bf16.mxu1 %v20789_v47  ;;  %v20808_v47 = vld [vmem:[#allocation8 + $0x1088] ss:$24 sps:$4 sm:$0xff]   ;;  %v8977_v50 = vld [vmem:[#allocation5 + $0x1a10] sm:$0xff] }
 0x5d3   : > { %10028 = vmatpush1.bf16.msra.mxu0 %v18745_v41  ;;  %v8995_v41 = vld [vmem:[#allocation5 + $0x1d70] sm:$0xff] }
 0x5d4   : > { %10029 = vmatprep.subr.bf16.mxu0 %v18806_v27  ;;  %v8997_v27 = vld [vmem:[#allocation5 + $0x1dd0] sm:$0xff] }
 0x5d5   : > { %8727 = vmatpush2.bf16.msra.mxu1 %v20787_v34  ;;  %v20813_v34 = vld [vmem:[#allocation8 + $0x1064] ss:$24 sps:$4 sm:$0xff]   ;;  %v18902_v19 = vcombine.high %v8995_v41, %v8997_v27  ;;  %v18901_v39 = vcombine.low %v8995_v41, %v8997_v27 }
 0x5d6   : > { %8728 = vmatprep.subr.bf16.mxu1 %v20792_v48  ;;  %v20811_v48 = vld [vmem:[#allocation8 + $0x1060] ss:$24 sps:$4 sm:$0xff]  }
 0x5d7   : > { %10030 = vmatpush2.bf16.msra.mxu0 %v18805_v36  ;;  %v8991_v36 = vld [vmem:[#allocation5 + $0x1cb0] sm:$0xff] }
 0x5d8   : > { %10031 = vmatprep.subr.bf16.mxu0 %v18802_v37  ;;  %v8993_v37 = vld [vmem:[#allocation5 + $0x1d10] sm:$0xff] }
 0x5d9   : > { %8729 = vmatpush2.bf16.msra.mxu1 %v20790_v38  ;;  %v20816_v38 = vld [vmem:[#allocation8 + $0x1034] ss:$24 sps:$4 sm:$0xff]   ;;  %v18898_v42 = vcombine.high %v8991_v36, %v8993_v37  ;;  %v18897_v46 = vcombine.low %v8991_v36, %v8993_v37  ;;  %v8971_v1 = vld [vmem:[#allocation5 + $0x18f0] sm:$0xff] }
 0x5da   : > { %8730 = vmatprep.subr.bf16.mxu1 %v20795_v29  ;;  %v20814_v29 = vld [vmem:[#allocation8 + $0x1030] ss:$24 sps:$4 sm:$0xff]   ;;  %v8973_v9 = vld [vmem:[#allocation5 + $0x1950] sm:$0xff] }
 0x5db   : > { %10032 = vmatpush2.bf16.msra.mxu0 %v18801_v49  ;;  %v8987_v49 = vld [vmem:[#allocation5 + $0x1bf0] sm:$0xff] }
 0x5dc   : > { %10033 = vmatprep.subr.bf16.mxu0 %v18798_v55  ;;  %v8989_v55 = vld [vmem:[#allocation5 + $0x1c50] sm:$0xff] }
 0x5dd   : > { %8731 = vmatpush2.bf16.msra.mxu1 %v20793_v62  ;;  %v8967_v41 = vld [vmem:[#allocation5 + $0x1830] sm:$0xff] }
 0x5de   : > { %8732 = vmatprep.subr.bf16.mxu1 %v20798_v17  ;;  %v8969_v27 = vld [vmem:[#allocation5 + $0x1890] sm:$0xff] }
 0x5df   : > { %10034 = vmatpush2.bf16.msra.mxu0 %v18797_v31  ;;  %v18894_v31 = vcombine.high %v8987_v49, %v8989_v55  ;;  %v9027_v36 = vld [vmem:[#allocation5 + $0x2370] sm:$0xff] }
 0x5e0   : > { %10035 = vmatprep.subr.bf16.mxu0 %v18794_v45  ;;  %v20817_v45 = vld [vmem:[#allocation8 + $0x1000] ss:$24 sps:$4 sm:$0xff]  }
 0x5e1   : > { %8733 = vmatpush2.bf16.msra.mxu1 %v20796_v14  ;;  %v8985_v14 = vld [vmem:[#allocation5 + $0x1b90] sm:$0xff] }
 0x5e2   : > { %8734 = vmatprep.subr.bf16.mxu1 %v20801_v2  ;;  %v18893_v2 = vcombine.low %v8987_v49, %v8989_v55  ;;  %v9029_v37 = vld [vmem:[#allocation5 + $0x23d0] sm:$0xff] }
 0x5e3   : > { %10036 = vmatpush2.bf16.msra.mxu0 %v18793_v40  ;;  %v9023_v49 = vld [vmem:[#allocation5 + $0x22b0] sm:$0xff] }
 0x5e4   : > { %10037 = vmatprep.subr.bf16.mxu0 %v18790_v18  ;;  %v9025_v55 = vld [vmem:[#allocation5 + $0x2310] sm:$0xff] }
 0x5e5   : > { %8735 = vmatpush2.bf16.msra.mxu1 %v20799_v5  ;;  %v20820_v5 = vld [vmem:[#allocation8 + $0xfd0] ss:$24 sps:$4 sm:$0xff]  }
 0x5e6   : > { %8736 = vmatprep.subr.bf16.mxu1 %v20804_v6  ;;  %v20825_v6 = vld [vmem:[#allocation8 + $0xfa4] ss:$24 sps:$4 sm:$0xff]  }
 0x5e7   : > { %10038 = vmatpush2.bf16.msra.mxu0 %v18789_v24 }
 0x5e8   : > { %10039 = vmatprep.subr.bf16.mxu0 %v18786_v53  ;;  %v18886_v53 = vcombine.high %v8979_v43, %v8981_v23 }
 0x5e9   : > { %8737 = vmatpush2.bf16.msra.mxu1 %v20802_v30  ;;  %v20823_v30 = vld [vmem:[#allocation8 + $0xfa0] ss:$24 sps:$4 sm:$0xff]  }
 0x5ea   : > { %8738 = vmatprep.subr.bf16.mxu1 %v20807_v13  ;;  %v20828_v13 = vld [vmem:[#allocation8 + $0xf74] ss:$24 sps:$4 sm:$0xff]  }
 0x5eb   : > { %10040 = vmatpush2.bf16.msra.mxu0 %v18785_v60  ;;  %v18885_v60 = vcombine.low %v8979_v43, %v8981_v23  ;;  %v20846_v43 = vld [vmem:[#allocation8 + $0x1154] ss:$24 sps:$4 sm:$0xff]  }
 0x5ec   : > { %10041 = vmatprep.subr.bf16.mxu0 %v18782_v15  ;;  %v18882_v15 = vcombine.high %v8975_v51, %v8977_v50 }
 0x5ed   : > { %8739 = vmatpush2.bf16.msra.mxu1 %v20805_v32  ;;  %v20826_v32 = vld [vmem:[#allocation8 + $0xf70] ss:$24 sps:$4 sm:$0xff]  }
 0x5ee   : > { %8740 = vmatprep.subr.bf16.mxu1 %v20810_v21  ;;  %v20831_v21 = vld [vmem:[#allocation8 + $0xf44] ss:$24 sps:$4 sm:$0xff]  }
 0x5ef   : > { %10042 = vmatpush2.bf16.msra.mxu0 %v18781_v22  ;;  %v18881_v22 = vcombine.low %v8975_v51, %v8977_v50  ;;  %v20849_v51 = vld [vmem:[#allocation8 + $0x1124] ss:$24 sps:$4 sm:$0xff]  }
 0x5f0   : > { %10043 = vmatprep.subr.bf16.mxu0 %v18778_v25  ;;  %v18878_v25 = vcombine.high %v8971_v1, %v8973_v9 }
 0x5f1   : > { %8741 = vmatpush2.bf16.msra.mxu1 %v20808_v47  ;;  %v20829_v47 = vld [vmem:[#allocation8 + $0xf40] ss:$24 sps:$4 sm:$0xff]  }
 0x5f2   : > { %8792 = vmatprep.subr.bf16.mxu1 %v20813_v34  ;;  %v20834_v34 = vld [vmem:[#allocation8 + $0xf14] ss:$24 sps:$4 sm:$0xff]  }
 0x5f3   : > { %10044 = vmatpush2.bf16.msra.mxu0 %v18777_v61  ;;  %v18877_v61 = vcombine.low %v8971_v1, %v8973_v9  ;;  %v20852_v1 = vld [vmem:[#allocation8 + $0x10f4] ss:$24 sps:$4 sm:$0xff]  }
 0x5f4   : > { %8743 = vmatmul.mubr.bf16.vlgmr.msra.gmra.mxu1 %v22447_v52  ;;  %10095 = vmatprep.subr.bf16.mxu0 %v18902_v19  ;;  %v18874_v19 = vcombine.high %v8967_v41, %v8969_v27 }
 0x5f5   : > { %8793 = vmatpush1.bf16.msra.mxu1 %v20811_v48  ;;  %8824 = vmatprep.mubr.bf16.mxu1 %v22445_v26  ;;  %v8983_v26 = vld [vmem:[#allocation5 + $0x1b30] sm:$0xff]  ;;  %v20832_v48 = vld [vmem:[#allocation8 + $0xf10] ss:$24 sps:$4 sm:$0xff]  }
 0x5f6   : > { %v22456_v62 = vpop.f32.mrf.mxu0  ;;  %8794 = vmatprep.subr.bf16.mxu1 %v20816_v38  ;;  %10046 = vmatmul.mubr.bf16.vlgmr.msra.gmra.mxu0 %v22202_v16  ;;  %v18890_v18 = vcombine.high %v8983_v26, %v8985_v14  ;;  %v18889_v24 = vcombine.low %v8983_v26, %v8985_v14  ;;  %v20837_v38 = vld [vmem:[#allocation8 + $0x11e4] ss:$24 sps:$4 sm:$0xff]  }
 0x5f7   : > { %10096 = vmatpush1.bf16.msra.mxu0 %v18901_v39  ;;  %10127 = vmatprep.mubr.bf16.mxu0 %v22207_v28  ;;  %v18873_v39 = vcombine.low %v8967_v41, %v8969_v27  ;;  %v9019_v26 = vld [vmem:[#allocation5 + $0x21f0] sm:$0xff] }
 0x5f8   : > { %v22460_v17 = vpop.f32.mrf.mxu0  ;;  %10097 = vmatprep.subr.bf16.mxu0 %v18898_v42  ;;  %v18934_v42 = vcombine.high %v9027_v36, %v9029_v37  ;;  %v9021_v14 = vld [vmem:[#allocation5 + $0x2250] sm:$0xff] }
 0x5f9   : > { %8795 = vmatpush1.bf16.msra.mxu1 %v20814_v29  ;;  %v20835_v29 = vld [vmem:[#allocation8 + $0x11e0] ss:$24 sps:$4 sm:$0xff]   ;;  %v18925_v23 = vcombine.low %v9019_v26, %v9021_v14  ;;  %v20855_v41 = vld [vmem:[#allocation8 + $0x10c4] ss:$24 sps:$4 sm:$0xff]  }
 0x5fa   : > { %v8625_v0 = vpop.f32.mrf.mxu0  ;;  %8796 = vmatprep.subr.bf16.mxu1 %v20819_v8  ;;  %v20840_v8 = vld [vmem:[#allocation8 + $0x11b4] ss:$24 sps:$4 sm:$0xff]  }
 0x5fb   : > { %10098 = vmatpush1.bf16.msra.mxu0 %v18897_v46  ;;  %v18933_v46 = vcombine.low %v9027_v36, %v9029_v37  ;;  %v20843_v0 = vld [vmem:[#allocation8 + $0x1184] ss:$24 sps:$4 sm:$0xff]   ;;  %v20858_v36 = vld [vmem:[#allocation8 + $0x1094] ss:$24 sps:$4 sm:$0xff]  }
 0x5fc   : > { %v8626_v40 = vpop.f32.mrf.mxu0  ;;  %10099 = vmatprep.subr.bf16.mxu0 %v18894_v31  ;;  %v18930_v31 = vcombine.high %v9023_v49, %v9025_v55  ;;  %v8931_v37 = vld [vmem:[#allocation5 + $0x1170] sm:$0xff] }
 0x5fd   : > { %8797 = vmatpush1.bf16.msra.mxu1 %v20817_v45  ;;  %v20838_v45 = vld [vmem:[#allocation8 + $0x11b0] ss:$24 sps:$4 sm:$0xff]   ;;  %v20841_v40 = vld [vmem:[#allocation8 + $0x1180] ss:$24 sps:$4 sm:$0xff]  }
 0x5fe   : > { %8798 = vmatprep.subr.bf16.mxu1 %v20822_v57  ;;  %v18929_v57 = vcombine.low %v9023_v49, %v9025_v55  ;;  %v8932_v49 = vld [vmem:[#allocation5 + $0x1178] sm:$0xff] }
 0x5ff   : > { %10100 = vmatpush1.bf16.msra.mxu0 %v18893_v2  ;;  %v18926_v2 = vcombine.high %v9019_v26, %v9021_v14  ;;  %v8934_v55 = vld [vmem:[#allocation5 + $0x11d8] sm:$0xff] }
 0x600   : > { %10101 = vmatprep.subr.bf16.mxu0 %v18890_v18  ;;  %v9015_v18 = vld [vmem:[#allocation5 + $0x2130] sm:$0xff]  ;;  %v18840_v26 = vcombine.high %v8932_v49, %v8934_v55 }
 0x601   : > { %8799 = vmatpush1.bf16.msra.mxu1 %v20820_v5  ;;  %v9017_v5 = vld [vmem:[#allocation5 + $0x2190] sm:$0xff] }
 0x602   : > { %8800 = vmatprep.subr.bf16.mxu1 %v20825_v6  ;;  %v18922_v6 = vcombine.high %v9015_v18, %v9017_v5  ;;  %v18921_v50 = vcombine.low %v9015_v18, %v9017_v5  ;;  %v8925_v18 = vld [vmem:[#allocation5 + $0x1050] sm:$0xff]  ;;  %v18839_v5 = vcombine.low %v8932_v49, %v8934_v55  ;;  %v8914_v49 = vld [vmem:[#allocation5 + $0xe18] sm:$0xff] }
 0x603   : > { %10102 = vmatpush1.bf16.msra.mxu0 %v18889_v24  ;;  %v20844_v24 = vld [vmem:[#allocation8 + $0x1150] ss:$24 sps:$4 sm:$0xff]  }
 0x604   : > { %10103 = vmatprep.subr.bf16.mxu0 %v18886_v53  ;;  %v9011_v53 = vld [vmem:[#allocation5 + $0x2070] sm:$0xff] }
 0x605   : > { %8801 = vmatpush1.bf16.msra.mxu1 %v20823_v30  ;;  %v9013_v30 = vld [vmem:[#allocation5 + $0x20d0] sm:$0xff] }
 0x606   : > { %8802 = vmatprep.subr.bf16.mxu1 %v20828_v13  ;;  %v18918_v13 = vcombine.high %v9011_v53, %v9013_v30  ;;  %v18917_v9 = vcombine.low %v9011_v53, %v9013_v30 }
 0x607   : > { %10104 = vmatpush1.bf16.msra.mxu0 %v18885_v60  ;;  %v20847_v60 = vld [vmem:[#allocation8 + $0x1120] ss:$24 sps:$4 sm:$0xff]  }
 0x608   : > { %10105 = vmatprep.subr.bf16.mxu0 %v18882_v15  ;;  %v9007_v15 = vld [vmem:[#allocation5 + $0x1fb0] sm:$0xff] }
 0x609   : > { %8803 = vmatpush1.bf16.msra.mxu1 %v20826_v32  ;;  %v9009_v32 = vld [vmem:[#allocation5 + $0x2010] sm:$0xff] }
 0x60a   : > { %8804 = vmatprep.subr.bf16.mxu1 %v20831_v21  ;;  %v18914_v21 = vcombine.high %v9007_v15, %v9009_v32  ;;  %v18913_v27 = vcombine.low %v9007_v15, %v9009_v32  ;;  %v8920_v32 = vld [vmem:[#allocation5 + $0xf38] sm:$0xff] }
 0x60b   : > { %10106 = vmatpush1.bf16.msra.mxu0 %v18881_v22  ;;  %v20850_v22 = vld [vmem:[#allocation8 + $0x10f0] ss:$24 sps:$4 sm:$0xff]  }
 0x60c   : > { %10107 = vmatprep.subr.bf16.mxu0 %v18878_v25  ;;  %v9003_v25 = vld [vmem:[#allocation5 + $0x1ef0] sm:$0xff] }
 0x60d   : > { %8805 = vmatpush1.bf16.msra.mxu1 %v20829_v47  ;;  %v9005_v47 = vld [vmem:[#allocation5 + $0x1f50] sm:$0xff] }
 0x60e   : > { %8806 = vmatprep.subr.bf16.mxu1 %v20834_v34  ;;  %v18910_v34 = vcombine.high %v9003_v25, %v9005_v47 }
 0x60f   : > { %10108 = vmatpush1.bf16.msra.mxu0 %v18877_v61  ;;  %v20853_v61 = vld [vmem:[#allocation8 + $0x10c0] ss:$24 sps:$4 sm:$0xff]  }
 0x610   : > { %10109 = vmatprep.subr.bf16.mxu0 %v18874_v19  ;;  %v8999_v19 = vld [vmem:[#allocation5 + $0x1e30] sm:$0xff] }
 0x611   : > { %8807 = vmatpush1.bf16.msra.mxu1 %v20832_v48  ;;  %v9001_v48 = vld [vmem:[#allocation5 + $0x1e90] sm:$0xff] }
 0x612   : > { %8808 = vmatprep.subr.bf16.mxu1 %v20837_v38  ;;  %v8933_v38 = vld [vmem:[#allocation5 + $0x11d0] sm:$0xff] }
 0x613   : > { %10110 = vmatpush1.bf16.msra.mxu0 %v18873_v39  ;;  %v18909_v39 = vcombine.low %v9003_v25, %v9005_v47  ;;  %v18837_v14 = vcombine.low %v8931_v37, %v8933_v38  ;;  %v8917_v25 = vld [vmem:[#allocation5 + $0xed0] sm:$0xff] }
 0x614   : > { %10111 = vmatprep.subr.bf16.mxu0 %v18934_v42  ;;  %v18906_v42 = vcombine.high %v8999_v19, %v9001_v48 }
 0x615   : > { %8809 = vmatpush2.bf16.msra.mxu1 %v20835_v29  ;;  %v20856_v29 = vld [vmem:[#allocation8 + $0x1090] ss:$24 sps:$4 sm:$0xff]  }
 0x616   : > { %8810 = vmatprep.subr.bf16.mxu1 %v20840_v8  ;;  %v18838_v8 = vcombine.high %v8931_v37, %v8933_v38  ;;  %v8913_v37 = vld [vmem:[#allocation5 + $0xe10] sm:$0xff] }
 0x617   : > { %10112 = vmatpush2.bf16.msra.mxu0 %v18933_v46  ;;  %v8927_v46 = vld [vmem:[#allocation5 + $0x10b0] sm:$0xff] }
 0x618   : > { %10113 = vmatprep.subr.bf16.mxu0 %v18930_v31  ;;  %v8929_v31 = vld [vmem:[#allocation5 + $0x1110] sm:$0xff] }
 0x619   : > { %8811 = vmatpush2.bf16.msra.mxu1 %v20838_v45  ;;  %v18905_v45 = vcombine.low %v8999_v19, %v9001_v48  ;;  %v8918_v19 = vld [vmem:[#allocation5 + $0xed8] sm:$0xff] }
 0x61a   : > { %8812 = vmatprep.subr.bf16.mxu1 %v20843_v0  ;;  %v8928_v0 = vld [vmem:[#allocation5 + $0x10b8] sm:$0xff] }
 0x61b   : > { %10114 = vmatpush2.bf16.msra.mxu0 %v18929_v57  ;;  %v8930_v57 = vld [vmem:[#allocation5 + $0x1118] sm:$0xff] }
 0x61c   : > { %10115 = vmatprep.subr.bf16.mxu0 %v18926_v2  ;;  %v18834_v2 = vcombine.high %v8927_v46, %v8929_v31 }
 0x61d   : > { %8813 = vmatpush2.bf16.msra.mxu1 %v20841_v40  ;;  %v8923_v40 = vld [vmem:[#allocation5 + $0xff0] sm:$0xff] }
 0x61e   : > { %8814 = vmatprep.subr.bf16.mxu1 %v20846_v43  ;;  %v18836_v43 = vcombine.high %v8928_v0, %v8930_v57  ;;  %v18830_v30 = vcombine.high %v8923_v40, %v8925_v18  ;;  %v18829_v15 = vcombine.low %v8923_v40, %v8925_v18  ;;  %v8905_v40 = vld [vmem:[#allocation5 + $0xc90] sm:$0xff] }
 0x61f   : > { %10116 = vmatpush2.bf16.msra.mxu0 %v18925_v23  ;;  %v18833_v23 = vcombine.low %v8927_v46, %v8929_v31  ;;  %v8909_v46 = vld [vmem:[#allocation5 + $0xd50] sm:$0xff] }
 0x620   : > { %10117 = vmatprep.subr.bf16.mxu0 %v18922_v6  ;;  %v8924_v6 = vld [vmem:[#allocation5 + $0xff8] sm:$0xff] }
 0x621   : > { %8815 = vmatpush2.bf16.msra.mxu1 %v20844_v24  ;;  %v8926_v24 = vld [vmem:[#allocation5 + $0x1058] sm:$0xff] }
 0x622   : > { %8816 = vmatprep.subr.bf16.mxu1 %v20849_v51  ;;  %v8919_v51 = vld [vmem:[#allocation5 + $0xf30] sm:$0xff]  ;;  %v18831_v47 = vcombine.low %v8924_v6, %v8926_v24 }
 0x623   : > { %10118 = vmatpush2.bf16.msra.mxu0 %v18921_v50  ;;  %v8921_v50 = vld [vmem:[#allocation5 + $0xf90] sm:$0xff] }
 0x624   : > { %10119 = vmatprep.subr.bf16.mxu0 %v18918_v13  ;;  %v18835_v13 = vcombine.low %v8928_v0, %v8930_v57  ;;  %v8910_v0 = vld [vmem:[#allocation5 + $0xd58] sm:$0xff] }
 0x625   : > { %8817 = vmatpush2.bf16.msra.mxu1 %v20847_v60  ;;  %v18832_v60 = vcombine.high %v8924_v6, %v8926_v24  ;;  %v8906_v6 = vld [vmem:[#allocation5 + $0xc98] sm:$0xff] }
 0x626   : > { %8818 = vmatprep.subr.bf16.mxu1 %v20852_v1  ;;  %v8922_v1 = vld [vmem:[#allocation5 + $0xf98] sm:$0xff] }
 0x627   : > { %10120 = vmatpush2.bf16.msra.mxu0 %v18917_v9  ;;  %v18827_v38 = vcombine.low %v8920_v32, %v8922_v1 }
 0x628   : > { %10121 = vmatprep.subr.bf16.mxu0 %v18914_v21  ;;  %v18826_v21 = vcombine.high %v8919_v51, %v8921_v50 }
 0x629   : > { %8819 = vmatpush2.bf16.msra.mxu1 %v20850_v22  ;;  %v8915_v22 = vld [vmem:[#allocation5 + $0xe70] sm:$0xff] }
 0x62a   : > { %8820 = vmatprep.subr.bf16.mxu1 %v20855_v41  ;;  %v18822_v48 = vcombine.high %v8915_v22, %v8917_v25 }
 0x62b   : > { %10122 = vmatpush2.bf16.msra.mxu0 %v18913_v27  ;;  %v18828_v27 = vcombine.high %v8920_v32, %v8922_v1  ;;  %v8966_v32 = vld [vmem:[#allocation5 + $0x17d8] sm:$0xff] }
 0x62c   : > { %10123 = vmatprep.subr.bf16.mxu0 %v18910_v34  ;;  %v18825_v34 = vcombine.low %v8919_v51, %v8921_v50  ;;  %v8965_v51 = vld [vmem:[#allocation5 + $0x17d0] sm:$0xff] }
 0x62d   : > { %8821 = vmatpush2.bf16.msra.mxu1 %v20853_v61  ;;  %v8916_v61 = vld [vmem:[#allocation5 + $0xe78] sm:$0xff] }
 0x62e   : > { %8822 = vmatprep.subr.bf16.mxu1 %v20858_v36  ;;  %v8911_v36 = vld [vmem:[#allocation5 + $0xdb0] sm:$0xff]  ;;  %v18823_v31 = vcombine.low %v8916_v61, %v8918_v19 }
 0x62f   : > { %10124 = vmatpush2.bf16.msra.mxu0 %v18909_v39  ;;  %v18824_v39 = vcombine.high %v8916_v61, %v8918_v19  ;;  %v18818_v55 = vcombine.high %v8911_v36, %v8913_v37  ;;  %v8955_v61 = vld [vmem:[#allocation5 + $0x15f0] sm:$0xff] }
 0x630   : > { %10125 = vmatprep.subr.bf16.mxu0 %v18906_v42  ;;  %v18821_v42 = vcombine.low %v8915_v22, %v8917_v25  ;;  %v8957_v19 = vld [vmem:[#allocation5 + $0x1650] sm:$0xff] }
 0x631   : > { %8823 = vmatpush2.bf16.msra.mxu1 %v20856_v29  ;;  %v8912_v29 = vld [vmem:[#allocation5 + $0xdb8] sm:$0xff] }
 0x632   : > { %10054 = vmatprep.subr.bf16.mxu1 %v18838_v8  ;;  %v8907_v8 = vld [vmem:[#allocation5 + $0xcf0] sm:$0xff]  ;;  %v18819_v18 = vcombine.low %v8912_v29, %v8914_v49 }
 0x633   : > { %10126 = vmatpush2.bf16.msra.mxu0 %v18905_v45  ;;  %v18820_v45 = vcombine.high %v8912_v29, %v8914_v49  ;;  %v18814_v57 = vcombine.high %v8907_v8, %v8909_v46  ;;  %v8951_v29 = vld [vmem:[#allocation5 + $0x1530] sm:$0xff] }
 0x634   : > { %8825 = vmatmul.mubr.bf16.vlgmr.msra.gmra.mxu1 %v22447_v52  ;;  %10177 = vmatprep.subr.bf16.mxu0 %v18840_v26  ;;  %v18817_v26 = vcombine.low %v8911_v36, %v8913_v37  ;;  %v8953_v49 = vld [vmem:[#allocation5 + $0x1590] sm:$0xff] }
 0x635   : > { %10055 = vmatpush1.bf16.msra.mxu1 %v18837_v14  ;;  %10086 = vmatprep.mubr.bf16.mxu1 %v22196_v59  ;;  %v8908_v14 = vld [vmem:[#allocation5 + $0xcf8] sm:$0xff] }
 0x636   : > { %v22464_v53 = vpop.f32.mrf.mxu0  ;;  %10056 = vmatprep.subr.bf16.mxu1 %v18834_v2  ;;  %10128 = vmatmul.mubr.bf16.vlgmr.msra.gmra.mxu0 %v22214_v33  ;;  %v8903_v2 = vld [vmem:[#allocation5 + $0xc30] sm:$0xff]  ;;  %v18815_v50 = vcombine.low %v8908_v14, %v8910_v0 }
 0x637   : > { %10178 = vmatpush1.bf16.msra.mxu0 %v18839_v5  ;;  %10209 = vmatprep.mubr.bf16.mxu0 %v22196_v59  ;;  %v18816_v5 = vcombine.high %v8908_v14, %v8910_v0  ;;  %v18810_v24 = vcombine.high %v8903_v2, %v8905_v40  ;;  %v8947_v14 = vld [vmem:[#allocation5 + $0x1470] sm:$0xff] }
 0x638   : > { %v22468_v52 = vpop.f32.mrf.mxu0  ;;  %10179 = vmatprep.subr.bf16.mxu0 %v18836_v43  ;;  %v18813_v43 = vcombine.low %v8907_v8, %v8909_v46  ;;  %v18861_v46 = vcombine.low %v8955_v61, %v8957_v19  ;;  %v8949_v0 = vld [vmem:[#allocation5 + $0x14d0] sm:$0xff] }
 0x639   : > { %10057 = vmatpush1.bf16.msra.mxu1 %v18833_v23  ;;  %v8904_v23 = vld [vmem:[#allocation5 + $0xc38] sm:$0xff] }
 0x63a   : > { %v8707_v9 = vpop.f32.mrf.mxu0  ;;  %10058 = vmatprep.subr.bf16.mxu1 %v18830_v30  ;;  %v8963_v30 = vld [vmem:[#allocation5 + $0x1770] sm:$0xff]  ;;  %v18811_v22 = vcombine.low %v8904_v23, %v8906_v6 }
 0x63b   : > { %10180 = vmatpush1.bf16.msra.mxu0 %v18835_v13  ;;  %v18812_v13 = vcombine.high %v8904_v23, %v8906_v6  ;;  %v18870_v1 = vcombine.high %v8963_v30, %v8965_v51  ;;  %v8959_v9 = vld [vmem:[#allocation5 + $0x16b0] sm:$0xff] }
 0x63c   : > { %v8708_v41 = vpop.f32.mrf.mxu0  ;;  %10181 = vmatprep.subr.bf16.mxu0 %v18832_v60  ;;  %v18809_v60 = vcombine.low %v8903_v2, %v8905_v40  ;;  %v18857_v40 = vcombine.low %v8951_v29, %v8953_v49  ;;  %v8943_v23 = vld [vmem:[#allocation5 + $0x13b0] sm:$0xff] }
 0x63d   : > { %10059 = vmatpush1.bf16.msra.mxu1 %v18829_v15  ;;  %v8964_v15 = vld [vmem:[#allocation5 + $0x1778] sm:$0xff]  ;;  %v8945_v6 = vld [vmem:[#allocation5 + $0x1410] sm:$0xff] }
 0x63e   : > { %10060 = vmatprep.subr.bf16.mxu1 %v18826_v21  ;;  %v8961_v21 = vld [vmem:[#allocation5 + $0x1710] sm:$0xff]  ;;  %v18872_v25 = vcombine.high %v8964_v15, %v8966_v32  ;;  %v8960_v41 = vld [vmem:[#allocation5 + $0x16b8] sm:$0xff] }
 0x63f   : > { %10182 = vmatpush1.bf16.msra.mxu0 %v18831_v47  ;;  %v18869_v47 = vcombine.low %v8963_v30, %v8965_v51  ;;  %v18865_v37 = vcombine.low %v8959_v9, %v8961_v21  ;;  %v18853_v51 = vcombine.low %v8947_v14, %v8949_v0 }
 0x640   : > { %10183 = vmatprep.subr.bf16.mxu0 %v18828_v27  ;;  %v8962_v27 = vld [vmem:[#allocation5 + $0x1718] sm:$0xff] }
 0x641   : > { %10061 = vmatpush1.bf16.msra.mxu1 %v18825_v34  ;;  %v18866_v34 = vcombine.high %v8959_v9, %v8961_v21  ;;  %v18868_v36 = vcombine.high %v8960_v41, %v8962_v27  ;;  %v18849_v21 = vcombine.low %v8943_v23, %v8945_v6 }
 0x642   : > { %10062 = vmatprep.subr.bf16.mxu1 %v18822_v48  ;;  %v18871_v48 = vcombine.low %v8964_v15, %v8966_v32  ;;  %v8939_v15 = vld [vmem:[#allocation5 + $0x12f0] sm:$0xff] }
 0x643   : > { %10184 = vmatpush1.bf16.msra.mxu0 %v18827_v38  ;;  %v8956_v38 = vld [vmem:[#allocation5 + $0x15f8] sm:$0xff]  ;;  %v8941_v32 = vld [vmem:[#allocation5 + $0x1350] sm:$0xff] }
 0x644   : > { %10185 = vmatprep.subr.bf16.mxu0 %v18824_v39  ;;  %v8958_v39 = vld [vmem:[#allocation5 + $0x1658] sm:$0xff] }
 0x645   : > { %10063 = vmatpush1.bf16.msra.mxu1 %v18821_v42  ;;  %v18862_v42 = vcombine.high %v8955_v61, %v8957_v19  ;;  %v18864_v8 = vcombine.high %v8956_v38, %v8958_v39  ;;  %v18845_v19 = vcombine.low %v8939_v15, %v8941_v32 }
 0x646   : > { %10064 = vmatprep.subr.bf16.mxu1 %v18818_v55  ;;  %v18867_v55 = vcombine.low %v8960_v41, %v8962_v27  ;;  %v8935_v41 = vld [vmem:[#allocation5 + $0x1230] sm:$0xff] }
 0x647   : > { %10186 = vmatpush1.bf16.msra.mxu0 %v18823_v31  ;;  %v8952_v31 = vld [vmem:[#allocation5 + $0x1538] sm:$0xff]  ;;  %v8937_v27 = vld [vmem:[#allocation5 + $0x1290] sm:$0xff] }
 0x648   : > { %10187 = vmatprep.subr.bf16.mxu0 %v18820_v45  ;;  %v8954_v45 = vld [vmem:[#allocation5 + $0x1598] sm:$0xff] }
 0x649   : > { %10065 = vmatpush1.bf16.msra.mxu1 %v18817_v26  ;;  %v18858_v26 = vcombine.high %v8951_v29, %v8953_v49  ;;  %v18860_v2 = vcombine.high %v8952_v31, %v8954_v45  ;;  %v18841_v49 = vcombine.low %v8935_v41, %v8937_v27 }
 0x64a   : > { %10066 = vmatprep.subr.bf16.mxu1 %v18814_v57  ;;  %v18863_v57 = vcombine.low %v8956_v38, %v8958_v39  ;;  %v8868_v38 = vld [vmem:[#allocation5 + $0x578] sm:$0xff] }
 0x64b   : > { %10188 = vmatpush1.bf16.msra.mxu0 %v18819_v18  ;;  %v8948_v18 = vld [vmem:[#allocation5 + $0x1478] sm:$0xff] }
 0x64c   : > { %10189 = vmatprep.subr.bf16.mxu0 %v18816_v5  ;;  %v8950_v5 = vld [vmem:[#allocation5 + $0x14d8] sm:$0xff] }
 0x64d   : > { %10067 = vmatpush1.bf16.msra.mxu1 %v18813_v43  ;;  %v18854_v43 = vcombine.high %v8947_v14, %v8949_v0  ;;  %v18856_v30 = vcombine.high %v8948_v18, %v8950_v5  ;;  %v8870_v39 = vld [vmem:[#allocation5 + $0x5d8] sm:$0xff] }
 0x64e   : > { %10068 = vmatprep.subr.bf16.mxu1 %v18810_v24  ;;  %v18859_v24 = vcombine.low %v8952_v31, %v8954_v45  ;;  %v18775_v45 = vcombine.low %v8868_v38, %v8870_v39  ;;  %v8860_v14 = vld [vmem:[#allocation5 + $0x3f8] sm:$0xff] }
 0x64f   : > { %10190 = vmatpush1.bf16.msra.mxu0 %v18815_v50  ;;  %v8944_v50 = vld [vmem:[#allocation5 + $0x13b8] sm:$0xff] }
 0x650   : > { %10191 = vmatprep.subr.bf16.mxu0 %v18812_v13  ;;  %v8946_v13 = vld [vmem:[#allocation5 + $0x1418] sm:$0xff] }
 0x651   : > { %10069 = vmatpush1.bf16.msra.mxu1 %v18809_v60  ;;  %v18850_v60 = vcombine.high %v8943_v23, %v8945_v6  ;;  %v18852_v9 = vcombine.high %v8944_v50, %v8946_v13  ;;  %v8862_v0 = vld [vmem:[#allocation5 + $0x458] sm:$0xff] }
 0x652   : > { %10070 = vmatprep.subr.bf16.mxu1 %v18870_v1  ;;  %v18855_v1 = vcombine.low %v8948_v18, %v8950_v5 }
 0x653   : > { %10192 = vmatpush1.bf16.msra.mxu0 %v18811_v22  ;;  %v8940_v22 = vld [vmem:[#allocation5 + $0x12f8] sm:$0xff] }
 0x654   : > { %10193 = vmatprep.subr.bf16.mxu0 %v18872_v25  ;;  %v8942_v25 = vld [vmem:[#allocation5 + $0x1358] sm:$0xff] }
 0x655   : > { %10071 = vmatpush2.bf16.msra.mxu1 %v18869_v47  ;;  %v18846_v47 = vcombine.high %v8939_v15, %v8941_v32  ;;  %v18848_v61 = vcombine.high %v8940_v22, %v8942_v25 }
 0x656   : > { %10072 = vmatprep.subr.bf16.mxu1 %v18866_v34  ;;  %v18851_v34 = vcombine.low %v8944_v50, %v8946_v13  ;;  %v18767_v13 = vcombine.low %v8860_v14, %v8862_v0 }
 0x657   : > { %10194 = vmatpush2.bf16.msra.mxu0 %v18871_v48  ;;  %v8936_v48 = vld [vmem:[#allocation5 + $0x1238] sm:$0xff] }
 0x658   : > { %10195 = vmatprep.subr.bf16.mxu0 %v18868_v36  ;;  %v8938_v36 = vld [vmem:[#allocation5 + $0x1298] sm:$0xff] }
 0x659   : > { %10073 = vmatpush2.bf16.msra.mxu1 %v18865_v37  ;;  %v18842_v37 = vcombine.high %v8935_v41, %v8937_v27  ;;  %v18844_v29 = vcombine.high %v8936_v48, %v8938_v36  ;;  %v18843_v31 = vcombine.low %v8936_v48, %v8938_v36  ;;  %v20867_v41 = vld [vmem:[#allocation8 + $0x12f4] ss:$24 sps:$4 sm:$0xff]   ;;  %v8848_v27 = vld [vmem:[#allocation5 + $0x1b8] sm:$0xff] }
 0x65a   : > { %10074 = vmatprep.subr.bf16.mxu1 %v18862_v42  ;;  %v18847_v42 = vcombine.low %v8940_v22, %v8942_v25  ;;  %v20864_v22 = vld [vmem:[#allocation8 + $0x1324] ss:$24 sps:$4 sm:$0xff]  }
 0x65b   : > { %10196 = vmatpush2.bf16.msra.mxu0 %v18867_v55  ;;  %v18776_v55 = vcombine.high %v8868_v38, %v8870_v39  ;;  %v20870_v36 = vld [vmem:[#allocation8 + $0x12c4] ss:$24 sps:$4 sm:$0xff]  }
 0x65c   : > { %10197 = vmatprep.subr.bf16.mxu0 %v18864_v8  ;;  %v8864_v8 = vld [vmem:[#allocation5 + $0x4b8] sm:$0xff] }
 0x65d   : > { %10075 = vmatpush2.bf16.msra.mxu1 %v18861_v46  ;;  %v8866_v46 = vld [vmem:[#allocation5 + $0x518] sm:$0xff] }
 0x65e   : > { %10076 = vmatprep.subr.bf16.mxu1 %v18858_v26  ;;  %v18772_v26 = vcombine.high %v8864_v8, %v8866_v46  ;;  %v8846_v38 = vld [vmem:[#allocation5 + $0x158] sm:$0xff] }
 0x65f   : > { %10198 = vmatpush2.bf16.msra.mxu0 %v18863_v57 }
 0x660   : > { %10199 = vmatprep.subr.bf16.mxu0 %v18860_v2 }
 0x661   : > { %10077 = vmatpush2.bf16.msra.mxu1 %v18857_v40  ;;  %v18771_v40 = vcombine.low %v8864_v8, %v8866_v46  ;;  %v8842_v8 = vld [vmem:[#allocation5 + $0x98] sm:$0xff] }
 0x662   : > { %10078 = vmatprep.subr.bf16.mxu1 %v18854_v43  ;;  %v18768_v43 = vcombine.high %v8860_v14, %v8862_v0  ;;  %v8900_v14 = vld [vmem:[#allocation5 + $0xb78] sm:$0xff] }
 0x663   : > { %10200 = vmatpush2.bf16.msra.mxu0 %v18859_v24  ;;  %v8856_v24 = vld [vmem:[#allocation5 + $0x338] sm:$0xff] }
 0x664   : > { %10201 = vmatprep.subr.bf16.mxu0 %v18856_v30  ;;  %v8858_v30 = vld [vmem:[#allocation5 + $0x398] sm:$0xff] }
 0x665   : > { %10079 = vmatpush2.bf16.msra.mxu1 %v18853_v51  ;;  %v18764_v32 = vcombine.high %v8856_v24, %v8858_v30  ;;  %v18763_v25 = vcombine.low %v8856_v24, %v8858_v30  ;;  %v8902_v0 = vld [vmem:[#allocation5 + $0xbd8] sm:$0xff]  ;;  %v20877_v30 = vld [vmem:[#allocation8 + $0x1230] ss:$24 sps:$4 sm:$0xff]  }
 0x666   : > { %10080 = vmatprep.subr.bf16.mxu1 %v18850_v60  ;;  %v18807_v24 = vcombine.low %v8900_v14, %v8902_v0 }
 0x667   : > { %10202 = vmatpush2.bf16.msra.mxu0 %v18855_v1  ;;  %v20859_v1 = vld [vmem:[#allocation8 + $0x1350] ss:$24 sps:$4 sm:$0xff]  }
 0x668   : > { %10203 = vmatprep.subr.bf16.mxu0 %v18852_v9  ;;  %v20861_v9 = vld [vmem:[#allocation8 + $0x1354] ss:$24 sps:$4 sm:$0xff]  }
 0x669   : > { %10081 = vmatpush2.bf16.msra.mxu1 %v18849_v21  ;;  %v8854_v21 = vld [vmem:[#allocation5 + $0x2d8] sm:$0xff] }
 0x66a   : > { %10082 = vmatprep.subr.bf16.mxu1 %v18846_v47  ;;  %v20862_v47 = vld [vmem:[#allocation8 + $0x1320] ss:$24 sps:$4 sm:$0xff]  }
 0x66b   : > { %10204 = vmatpush2.bf16.msra.mxu0 %v18851_v34  ;;  %v8850_v34 = vld [vmem:[#allocation5 + $0x218] sm:$0xff] }
 0x66c   : > { %10205 = vmatprep.subr.bf16.mxu0 %v18848_v61  ;;  %v18756_v48 = vcombine.high %v8848_v27, %v8850_v34  ;;  %v18755_v39 = vcombine.low %v8848_v27, %v8850_v34 }
 0x66d   : > { %10083 = vmatpush2.bf16.msra.mxu1 %v18845_v19  ;;  %v20865_v19 = vld [vmem:[#allocation8 + $0x12f0] ss:$24 sps:$4 sm:$0xff]  }
 0x66e   : > { %10084 = vmatprep.subr.bf16.mxu1 %v18842_v37  ;;  %v8844_v37 = vld [vmem:[#allocation5 + $0xf8] sm:$0xff] }
 0x66f   : > { %10206 = vmatpush2.bf16.msra.mxu0 %v18847_v42  ;;  %v20868_v42 = vld [vmem:[#allocation8 + $0x12c0] ss:$24 sps:$4 sm:$0xff]   ;;  %v18751_v46 = vcombine.low %v8844_v37, %v8846_v38 }
 0x670   : > { %10207 = vmatprep.subr.bf16.mxu0 %v18844_v29  ;;  %v18752_v29 = vcombine.high %v8844_v37, %v8846_v38  ;;  %v8876_v37 = vld [vmem:[#allocation5 + $0x6f8] sm:$0xff] }
 0x671   : > { %10085 = vmatpush2.bf16.msra.mxu1 %v18841_v49  ;;  %v20873_v49 = vld [vmem:[#allocation8 + $0x1294] ss:$24 sps:$4 sm:$0xff]   ;;  %v8878_v38 = vld [vmem:[#allocation5 + $0x758] sm:$0xff] }
 0x672   : > { %10136 = vmatprep.subr.bf16.mxu1 %v18776_v55  ;;  %v8840_v55 = vld [vmem:[#allocation5 + $0x38] sm:$0xff] }
 0x673   : > { %10208 = vmatpush2.bf16.msra.mxu0 %v18843_v31  ;;  %v20871_v31 = vld [vmem:[#allocation8 + $0x1290] ss:$24 sps:$4 sm:$0xff]  }
 0x674   : > { %10087 = vmatmul.mubr.bf16.vlgmr.msra.gmra.mxu1 %v22205_v20  ;;  %v8662_v57 = vpop.f32.mrf.mxu1  ;;  %11435 = vmatprep.subr.bf16.mxu0 %v20861_v9 }
 0x675   : > { %v8663_v2 = vadd.f32 %v8662_v57, %v22456_v62  ;;  %10137 = vmatpush1.bf16.msra.mxu1 %v18775_v45  ;;  %10168 = vmatprep.mubr.bf16.mxu1 %v22194_v58  ;;  %v18748_v45 = vcombine.high %v8840_v55, %v8842_v8  ;;  %v18747_v57 = vcombine.low %v8840_v55, %v8842_v8 }
 0x676   : > { %v22473_v18 = vpop.f32.mrf.mxu0  ;;  %v8664_v5 = vpop.f32.mrf.mxu1  ;;  %10138 = vmatprep.subr.bf16.mxu1 %v18772_v26  ;;  %10210 = vmatmul.mubr.bf16.vlgmr.msra.gmra.mxu0 %v22205_v20  ;;  %v20876_v26 = vld [vmem:[#allocation8 + $0x1264] ss:$24 sps:$4 sm:$0xff]   ;;  %v18783_v55 = vcombine.low %v8876_v37, %v8878_v38 }
 0x677   : > { %v22477_v23 = vadd.f32 %v8663_v2, %v22384_v35  ;;  %v8665_v6 = vadd.f32 %v8664_v5, %v22460_v17  ;;  %v8852_v35 = vld [vmem:[#allocation5 + $0x278] sm:$0xff]  ;;  %11436 = vmatpush1.bf16.msra.mxu0 %v20859_v1  ;;  %v20879_v5 = vld [vmem:[#allocation8 + $0x1234] ss:$24 sps:$4 sm:$0xff]  }
 0x678   : > { %v22480_v51 = vpop.f32.mrf.mxu0  ;;  %v8666_v62 = vpop.f32.mrf.mxu1  ;;  %11437 = vmatprep.subr.bf16.mxu0 %v20864_v22  ;;  %v18759_v61 = vcombine.low %v8852_v35, %v8854_v21  ;;  %v20874_v2 = vld [vmem:[#allocation8 + $0x1260] ss:$24 sps:$4 sm:$0xff]  }
 0x679   : > { %v22483_v50 = vadd.f32 %v8665_v6, %v22388_v10  ;;  %10139 = vmatpush1.bf16.msra.mxu1 %v18771_v40  ;;  %v18760_v10 = vcombine.high %v8852_v35, %v8854_v21  ;;  %v18808_v40 = vcombine.high %v8900_v14, %v8902_v0  ;;  %v8898_v6 = vld [vmem:[#allocation5 + $0xb18] sm:$0xff]  ;;  %v20885_v35 = vld [vmem:[#allocation8 + $0x14d4] ss:$24 sps:$4 sm:$0xff]  }
 0x67a   : > { %v8789_v60 = vpop.f32.mrf.mxu0  ;;  %v8667_v15 = vpop.f32.mrf.mxu1  ;;  %10140 = vmatprep.subr.bf16.mxu1 %v18768_v43  ;;  %v8896_v43 = vld [vmem:[#allocation5 + $0xab8] sm:$0xff] }
 0x67b   : > { %11438 = vmatpush1.bf16.msra.mxu0 %v20862_v47  ;;  %v18804_v62 = vcombine.high %v8896_v43, %v8898_v6  ;;  %v8892_v60 = vld [vmem:[#allocation5 + $0x9f8] sm:$0xff] }
 0x67c   : > { %v8790_v17 = vpop.f32.mrf.mxu0  ;;  %11439 = vmatprep.subr.bf16.mxu0 %v20867_v41  ;;  %v8894_v15 = vld [vmem:[#allocation5 + $0xa58] sm:$0xff] }
 0x67d   : > { %10141 = vmatpush1.bf16.msra.mxu1 %v18767_v13  ;;  %v20882_v13 = vld [vmem:[#allocation8 + $0x1204] ss:$24 sps:$4 sm:$0xff]   ;;  %v20880_v1 = vld [vmem:[#allocation8 + $0x1200] ss:$24 sps:$4 sm:$0xff]   ;;  %v18800_v9 = vcombine.high %v8892_v60, %v8894_v15  ;;  %v18799_v17 = vcombine.low %v8892_v60, %v8894_v15 }
 0x67e   : > { %10142 = vmatprep.subr.bf16.mxu1 %v18764_v32  ;;  %v18803_v32 = vcombine.low %v8896_v43, %v8898_v6  ;;  %v8888_v21 = vld [vmem:[#allocation5 + $0x938] sm:$0xff] }
 0x67f   : > { %11440 = vmatpush1.bf16.msra.mxu0 %v20865_v19  ;;  %v8890_v22 = vld [vmem:[#allocation5 + $0x998] sm:$0xff] }
 0x680   : > { %11441 = vmatprep.subr.bf16.mxu0 %v20870_v36  ;;  %v18796_v47 = vcombine.high %v8888_v21, %v8890_v22  ;;  %v8886_v41 = vld [vmem:[#allocation5 + $0x8d8] sm:$0xff]  ;;  %v18795_v27 = vcombine.low %v8888_v21, %v8890_v22  ;;  %v20891_v21 = vld [vmem:[#allocation8 + $0x1474] ss:$24 sps:$4 sm:$0xff]  }
 0x681   : > { %10143 = vmatpush1.bf16.msra.mxu1 %v18763_v25  ;;  %v20883_v25 = vld [vmem:[#allocation8 + $0x14d0] ss:$24 sps:$4 sm:$0xff]   ;;  %v8882_v19 = vld [vmem:[#allocation5 + $0x818] sm:$0xff] }
 0x682   : > { %10144 = vmatprep.subr.bf16.mxu1 %v18760_v10  ;;  %v8884_v10 = vld [vmem:[#allocation5 + $0x878] sm:$0xff] }
 0x683   : > { %11442 = vmatpush1.bf16.msra.mxu0 %v20868_v42  ;;  %v18792_v34 = vcombine.high %v8884_v10, %v8886_v41  ;;  %v18784_v42 = vcombine.high %v8876_v37, %v8878_v38  ;;  %v8992_v14 = vld [vmem:[#allocation5 + $0x1cb8] sm:$0xff]  ;;  %v20897_v38 = vld [vmem:[#allocation8 + $0x1414] ss:$24 sps:$4 sm:$0xff]  }
 0x684   : > { %11443 = vmatprep.subr.bf16.mxu0 %v20873_v49  ;;  %v8874_v49 = vld [vmem:[#allocation5 + $0x698] sm:$0xff] }
 0x685   : > { %10145 = vmatpush1.bf16.msra.mxu1 %v18759_v61  ;;  %v8880_v61 = vld [vmem:[#allocation5 + $0x7b8] sm:$0xff] }
 0x686   : > { %10146 = vmatprep.subr.bf16.mxu1 %v18756_v48  ;;  %v18791_v48 = vcombine.low %v8884_v10, %v8886_v41  ;;  %v18788_v36 = vcombine.high %v8880_v61, %v8882_v19  ;;  %v8994_v0 = vld [vmem:[#allocation5 + $0x1d18] sm:$0xff] }
 0x687   : > { %11444 = vmatpush1.bf16.msra.mxu0 %v20871_v31  ;;  %v8998_v31 = vld [vmem:[#allocation5 + $0x1dd8] sm:$0xff] }
 0x688   : > { %11445 = vmatprep.subr.bf16.mxu0 %v20876_v26  ;;  %v20888_v43 = vld [vmem:[#allocation8 + $0x14a4] ss:$24 sps:$4 sm:$0xff]  }
 0x689   : > { %10147 = vmatpush1.bf16.msra.mxu1 %v18755_v39  ;;  %v18787_v39 = vcombine.low %v8880_v61, %v8882_v19  ;;  %v20892_v19 = vld [vmem:[#allocation8 + $0x1440] ss:$24 sps:$4 sm:$0xff]  }
 0x68a   : > { %10148 = vmatprep.subr.bf16.mxu1 %v18752_v29  ;;  %v8872_v29 = vld [vmem:[#allocation5 + $0x638] sm:$0xff] }
 0x68b   : > { %11446 = vmatpush1.bf16.msra.mxu0 %v20874_v2  ;;  %v18780_v8 = vcombine.high %v8872_v29, %v8874_v49  ;;  %v18900_v2 = vcombine.high %v8992_v14, %v8994_v0  ;;  %v8978_v37 = vld [vmem:[#allocation5 + $0x1a18] sm:$0xff] }
 0x68c   : > { %11447 = vmatprep.subr.bf16.mxu0 %v20879_v5  ;;  %v8990_v5 = vld [vmem:[#allocation5 + $0x1c58] sm:$0xff] }
 0x68d   : > { %10149 = vmatpush1.bf16.msra.mxu1 %v18751_v46  ;;  %v8996_v46 = vld [vmem:[#allocation5 + $0x1d78] sm:$0xff] }
 0x68e   : > { %10150 = vmatprep.subr.bf16.mxu1 %v18748_v45  ;;  %v18779_v45 = vcombine.low %v8872_v29, %v8874_v49  ;;  %v18904_v26 = vcombine.high %v8996_v46, %v8998_v31  ;;  %v8972_v49 = vld [vmem:[#allocation5 + $0x18f8] sm:$0xff] }
 0x68f   : > { %11448 = vmatpush1.bf16.msra.mxu0 %v20877_v30 }
 0x690   : > { %11449 = vmatprep.subr.bf16.mxu0 %v20882_v13 }
 0x691   : > { %10151 = vmatpush1.bf16.msra.mxu1 %v18747_v57  ;;  %v18903_v57 = vcombine.low %v8996_v46, %v8998_v31  ;;  %v20898_v46 = vld [vmem:[#allocation8 + $0x13e0] ss:$24 sps:$4 sm:$0xff]  }
 0x692   : > { %10152 = vmatprep.subr.bf16.mxu1 %v18808_v40  ;;  %v8988_v40 = vld [vmem:[#allocation5 + $0x1bf8] sm:$0xff] }
 0x693   : > { %11450 = vmatpush1.bf16.msra.mxu0 %v20880_v1  ;;  %v18896_v60 = vcombine.high %v8988_v40, %v8990_v5 }
 0x694   : > { %11451 = vmatprep.subr.bf16.mxu0 %v20885_v35  ;;  %v8986_v35 = vld [vmem:[#allocation5 + $0x1b98] sm:$0xff] }
 0x695   : > { %10153 = vmatpush2.bf16.msra.mxu1 %v18807_v24  ;;  %v20886_v24 = vld [vmem:[#allocation8 + $0x14a0] ss:$24 sps:$4 sm:$0xff]  }
 0x696   : > { %10154 = vmatprep.subr.bf16.mxu1 %v18804_v62  ;;  %v18899_v62 = vcombine.low %v8992_v14, %v8994_v0  ;;  %v8970_v14 = vld [vmem:[#allocation5 + $0x1898] sm:$0xff]  ;;  %v20903_v0 = vld [vmem:[#allocation8 + $0x13b4] ss:$24 sps:$4 sm:$0xff]  }
 0x697   : > { %11452 = vmatpush2.bf16.msra.mxu0 %v20883_v25 }
 0x698   : > { %11453 = vmatprep.subr.bf16.mxu0 %v20888_v43  ;;  %v9030_v43 = vld [vmem:[#allocation5 + $0x23d8] sm:$0xff] }
 0x699   : > { %10155 = vmatpush2.bf16.msra.mxu1 %v18803_v32 }
 0x69a   : > { %10156 = vmatprep.subr.bf16.mxu1 %v18800_v9  ;;  %v8984_v9 = vld [vmem:[#allocation5 + $0x1b38] sm:$0xff] }
 0x69b   : > { %11454 = vmatpush2.bf16.msra.mxu0 %v20886_v24  ;;  %v20904_v24 = vld [vmem:[#allocation8 + $0x1380] ss:$24 sps:$4 sm:$0xff]  }
 0x69c   : > { %11455 = vmatprep.subr.bf16.mxu0 %v20891_v21  ;;  %v9020_v21 = vld [vmem:[#allocation5 + $0x21f8] sm:$0xff] }
 0x69d   : > { %10157 = vmatpush2.bf16.msra.mxu1 %v18799_v17  ;;  %v20889_v17 = vld [vmem:[#allocation8 + $0x1470] ss:$24 sps:$4 sm:$0xff]  }
 0x69e   : > { %10158 = vmatprep.subr.bf16.mxu1 %v18796_v47  ;;  %v18895_v47 = vcombine.low %v8988_v40, %v8990_v5  ;;  %v9028_v5 = vld [vmem:[#allocation5 + $0x2378] sm:$0xff] }
 0x69f   : > { %11456 = vmatpush2.bf16.msra.mxu0 %v20889_v17 }
 0x6a1   : > { %10159 = vmatpush2.bf16.msra.mxu1 %v18795_v27  ;;  %v8980_v27 = vld [vmem:[#allocation5 + $0x1a78] sm:$0xff] }
 0x6a2   : > { %10160 = vmatprep.subr.bf16.mxu1 %v18792_v34  ;;  %v20894_v34 = vld [vmem:[#allocation8 + $0x1444] ss:$24 sps:$4 sm:$0xff]  }
 0x6a3   : > { %11457 = vmatprep.subr.bf16.mxu0 %v20894_v34  ;;  %v9014_v34 = vld [vmem:[#allocation5 + $0x20d8] sm:$0xff] }
 0x6a4   : > { %11458 = vmatpush2.bf16.msra.mxu0 %v20892_v19 }
 0x6a5   : > { %10161 = vmatpush2.bf16.msra.mxu1 %v18791_v48  ;;  %v18891_v48 = vcombine.low %v8984_v9, %v8986_v35  ;;  %11459 = vmatprep.subr.bf16.mxu0 %v20897_v38  ;;  %v9004_v38 = vld [vmem:[#allocation5 + $0x1ef8] sm:$0xff] }
 0x6a6   : > { %10162 = vmatprep.subr.bf16.mxu1 %v18788_v36 }
 0x6a9   : > { %10163 = vmatpush2.bf16.msra.mxu1 %v18787_v39  ;;  %v20895_v39 = vld [vmem:[#allocation8 + $0x1410] ss:$24 sps:$4 sm:$0xff]  }
 0x6aa   : > { %10164 = vmatprep.subr.bf16.mxu1 %v18784_v42  ;;  %11460 = vmatpush2.bf16.msra.mxu0 %v20895_v39  ;;  %v9006_v39 = vld [vmem:[#allocation5 + $0x1f58] sm:$0xff] }
 0x6ad   : > { %10165 = vmatpush2.bf16.msra.mxu1 %v18783_v55  ;;  %v8974_v55 = vld [vmem:[#allocation5 + $0x1958] sm:$0xff] }
 0x6ae   : > { %10166 = vmatprep.subr.bf16.mxu1 %v18780_v8  ;;  %v20900_v8 = vld [vmem:[#allocation8 + $0x13e4] ss:$24 sps:$4 sm:$0xff]  }
 0x6af   : > { %11461 = vmatprep.subr.bf16.mxu0 %v20900_v8  ;;  %v18911_v8 = vcombine.low %v9004_v38, %v9006_v39 }
 0x6b0   : > { %11462 = vmatpush2.bf16.msra.mxu0 %v20898_v46 }
 0x6b1   : > { %10167 = vmatpush2.bf16.msra.mxu1 %v18779_v45  ;;  %v18880_v45 = vcombine.high %v8972_v49, %v8974_v55  ;;  %11463 = vmatprep.subr.bf16.mxu0 %v20903_v0 }
 0x6b2   : > { %10218 = vmatprep.subr.bf16.mxu1 %v18904_v26  ;;  %v8968_v26 = vld [vmem:[#allocation5 + $0x1838] sm:$0xff] }
 0x6b3   : > { %v18876_v40 = vcombine.high %v8968_v26, %v8970_v14 }
 0x6b4   : > { %v8744_v6 = vpop.f32.mrf.mxu1  ;;  %10169 = vmatmul.mubr.bf16.vlgmr.msra.gmra.mxu1 %v22202_v16 }
 0x6b5   : > { %v8745_v30 = vadd.f32 %v8744_v6, %v22464_v53  ;;  %10219 = vmatpush1.bf16.msra.mxu1 %v18903_v57  ;;  %10250 = vmatprep.mubr.bf16.mxu1 %v22207_v28  ;;  %v20901_v57 = vld [vmem:[#allocation8 + $0x13b0] ss:$24 sps:$4 sm:$0xff]   ;;  %v20906_v6 = vld [vmem:[#allocation8 + $0x1384] ss:$24 sps:$4 sm:$0xff]  }
 0x6b6   : > { %v8746_v13 = vpop.f32.mrf.mxu1  ;;  %10220 = vmatprep.subr.bf16.mxu1 %v18900_v2  ;;  %v22488_v15 = vpop.f32.mrf.mxu0  ;;  %v18879_v2 = vcombine.low %v8972_v49, %v8974_v55  ;;  %11464 = vmatpush2.bf16.msra.mxu0 %v20901_v57  ;;  %v9000_v49 = vld [vmem:[#allocation5 + $0x1e38] sm:$0xff] }
 0x6b7   : > { %v22491_v32 = vadd.f32 %v8745_v30, %v22401_v12  ;;  %v8747_v1 = vadd.f32 %v8746_v13, %v22468_v52  ;;  %v18892_v12 = vcombine.high %v8984_v9, %v8986_v35  ;;  %v8982_v52 = vld [vmem:[#allocation5 + $0x1ad8] sm:$0xff]  ;;  %v18875_v30 = vcombine.low %v8968_v26, %v8970_v14  ;;  %11465 = vmatprep.subr.bf16.mxu0 %v20906_v6 }
 0x6b8   : > { %v8748_v53 = vpop.f32.mrf.mxu1  ;;  %v22494_v22 = vpop.f32.mrf.mxu0  ;;  %v18888_v36 = vcombine.high %v8980_v27, %v8982_v52  ;;  %v18887_v42 = vcombine.low %v8980_v27, %v8982_v52  ;;  %v9024_v13 = vld [vmem:[#allocation5 + $0x22b8] sm:$0xff]  ;;  %v18935_v9 = vcombine.low %v9028_v5, %v9030_v43 }
 0x6b9   : > { %v22497_v25 = vadd.f32 %v8747_v1, %v22405_v3  ;;  %10221 = vmatpush1.bf16.msra.mxu1 %v18899_v62  ;;  %v8976_v3 = vld [vmem:[#allocation5 + $0x19b8] sm:$0xff]  ;;  %v18936_v62 = vcombine.high %v9028_v5, %v9030_v43  ;;  %v20909_v1 = vld [vmem:[#allocation8 + $0x135c] ss:$24 sps:$4 sm:$0xff]  }
 0x6ba   : > { %v8749_v10 = vpop.f32.mrf.mxu1  ;;  %10222 = vmatprep.subr.bf16.mxu1 %v18896_v60  ;;  %v10051_v41 = vpop.f32.mrf.mxu0  ;;  %v18884_v29 = vcombine.high %v8976_v3, %v8978_v37  ;;  %v18883_v31 = vcombine.low %v8976_v3, %v8978_v37  ;;  %v9026_v60 = vld [vmem:[#allocation5 + $0x2318] sm:$0xff]  ;;  %11466 = vmatpush2.bf16.msra.mxu0 %v20904_v24 }
 0x6bb   : > { %11517 = vmatprep.subr.bf16.mxu0 %v20909_v1  ;;  %v18932_v35 = vcombine.high %v9024_v13, %v9026_v60  ;;  %v9022_v53 = vld [vmem:[#allocation5 + $0x2258] sm:$0xff]  ;;  %v18931_v17 = vcombine.low %v9024_v13, %v9026_v60  ;;  %v20955_v13 = vld [vmem:[#allocation8 + $0x1650] ss:$24 sps:$4 sm:$0xff]  }
 0x6bc   : > { %v10052_v61 = vpop.f32.mrf.mxu0  ;;  %v9016_v10 = vld [vmem:[#allocation5 + $0x2138] sm:$0xff]  ;;  %v18927_v41 = vcombine.low %v9020_v21, %v9022_v53  ;;  %v20967_v1 = vld [vmem:[#allocation8 + $0x15f0] ss:$24 sps:$4 sm:$0xff]  }
 0x6bd   : > { %10223 = vmatpush1.bf16.msra.mxu1 %v18895_v47  ;;  %v18928_v47 = vcombine.high %v9020_v21, %v9022_v53  ;;  %v9012_v52 = vld [vmem:[#allocation5 + $0x2078] sm:$0xff] }
 0x6be   : > { %10224 = vmatprep.subr.bf16.mxu1 %v18892_v12  ;;  %v9018_v12 = vld [vmem:[#allocation5 + $0x2198] sm:$0xff]  ;;  %v18920_v19 = vcombine.high %v9012_v52, %v9014_v34  ;;  %v18919_v3 = vcombine.low %v9012_v52, %v9014_v34  ;;  %v21005_v52 = vld [vmem:[#allocation8 + $0x17d4] ss:$24 sps:$4 sm:$0xff]  }
 0x6bf   : > { %v18924_v27 = vcombine.high %v9016_v10, %v9018_v12  ;;  %v18923_v61 = vcombine.low %v9016_v10, %v9018_v12  ;;  %v9002_v55 = vld [vmem:[#allocation5 + $0x1e98] sm:$0xff]  ;;  %v22508_v10 = vld [vmem:[#allocation7 + $0xc] sm:$0xf] }
 0x6c0   : > { %v18908_v46 = vcombine.high %v9000_v49, %v9002_v55  ;;  %v20961_v60 = vld [vmem:[#allocation8 + $0x1620] ss:$24 sps:$4 sm:$0xff]   ;;  %v20987_v21 = vld [vmem:[#allocation8 + $0x1564] ss:$24 sps:$4 sm:$0xff]   ;;  %v9040_v34 = vrot.slane %v22508_v10, %v22230_v63 }
 0x6c1   : > { %10225 = vmatpush1.bf16.msra.mxu1 %v18891_v48  ;;  %v9008_v48 = vld [vmem:[#allocation5 + $0x1fb8] sm:$0xff] }
 0x6c2   : > { %10226 = vmatprep.subr.bf16.mxu1 %v18888_v36  ;;  %v9010_v36 = vld [vmem:[#allocation5 + $0x2018] sm:$0xff] }
 0x6c3   : > { %v18916_v37 = vcombine.high %v9008_v48, %v9010_v36  ;;  %v20985_v53 = vld [vmem:[#allocation8 + $0x1560] ss:$24 sps:$4 sm:$0xff]   ;;  %v20999_v12 = vld [vmem:[#allocation8 + $0x1504] ss:$24 sps:$4 sm:$0xff]  }
 0x6c5   : > { %10227 = vmatpush1.bf16.msra.mxu1 %v18887_v42  ;;  %v18915_v42 = vcombine.low %v9008_v48, %v9010_v36  ;;  %v21011_v48 = vld [vmem:[#allocation8 + $0x17a4] ss:$24 sps:$4 sm:$0xff]   ;;  %v10050_v36 = vadd.f32 %v22494_v22, %v9040_v34 }
 0x6c6   : > { %10228 = vmatprep.subr.bf16.mxu1 %v18884_v29  ;;  %v18912_v29 = vcombine.high %v9004_v38, %v9006_v39  ;;  %v20915_v34 = vld [vmem:[#allocation8 + $0x12fc] ss:$24 sps:$4 sm:$0xff]  }
 0x6c9   : > { %10229 = vmatpush1.bf16.msra.mxu1 %v18883_v31  ;;  %v18907_v31 = vcombine.low %v9000_v49, %v9002_v55 }
 0x6ca   : > { %10230 = vmatprep.subr.bf16.mxu1 %v18880_v45 }
 0x6cd   : > { %10231 = vmatpush1.bf16.msra.mxu1 %v18879_v2 }
 0x6ce   : > { %10232 = vmatprep.subr.bf16.mxu1 %v18876_v40 }
 0x6d1   : > { %10233 = vmatpush1.bf16.msra.mxu1 %v18875_v30 }
 0x6d2   : > { %10234 = vmatprep.subr.bf16.mxu1 %v18936_v62  ;;  %v20957_v62 = vld [vmem:[#allocation8 + $0x1654] ss:$24 sps:$4 sm:$0xff]  }
 0x6d5   : > { %10235 = vmatpush2.bf16.msra.mxu1 %v18935_v9  ;;  %v20973_v9 = vld [vmem:[#allocation8 + $0x15c0] ss:$24 sps:$4 sm:$0xff]  }
 0x6d6   : > { %10236 = vmatprep.subr.bf16.mxu1 %v18932_v35  ;;  %v20979_v35 = vld [vmem:[#allocation8 + $0x1590] ss:$24 sps:$4 sm:$0xff]  }
 0x6d9   : > { %10237 = vmatpush2.bf16.msra.mxu1 %v18931_v17  ;;  %v20993_v17 = vld [vmem:[#allocation8 + $0x1534] ss:$24 sps:$4 sm:$0xff]  }
 0x6da   : > { %10238 = vmatprep.subr.bf16.mxu1 %v18928_v47  ;;  %v20991_v47 = vld [vmem:[#allocation8 + $0x1530] ss:$24 sps:$4 sm:$0xff]  }
 0x6dd   : > { %10239 = vmatpush2.bf16.msra.mxu1 %v18927_v41  ;;  %v20997_v41 = vld [vmem:[#allocation8 + $0x1500] ss:$24 sps:$4 sm:$0xff]  }
 0x6de   : > { %10240 = vmatprep.subr.bf16.mxu1 %v18924_v27  ;;  %v9036_v27 = vrot.slane %v22508_v10, %v22227_v54 }
 0x6e1   : > { %10241 = vmatpush2.bf16.msra.mxu1 %v18923_v61  ;;  %v21003_v61 = vld [vmem:[#allocation8 + $0x17d0] ss:$24 sps:$4 sm:$0xff]  }
 0x6e2   : > { %10242 = vmatprep.subr.bf16.mxu1 %v18920_v19  ;;  %v10048_v19 = vadd.f32 %v22488_v15, %v9036_v27  ;;  %v20912_v27 = vld [vmem:[#allocation8 + $0x132c] ss:$24 sps:$4 sm:$0xff]  }
 0x6e5   : > { %10243 = vmatpush2.bf16.msra.mxu1 %v18919_v3  ;;  %v21009_v3 = vld [vmem:[#allocation8 + $0x17a0] ss:$24 sps:$4 sm:$0xff]  }
 0x6e6   : > { %10244 = vmatprep.subr.bf16.mxu1 %v18916_v37 }
 0x6e9   : > { %10245 = vmatpush2.bf16.msra.mxu1 %v18915_v42 }
 0x6ea   : > { %10246 = vmatprep.subr.bf16.mxu1 %v18912_v29  ;;  %v21017_v29 = vld [vmem:[#allocation8 + $0x1774] ss:$24 sps:$4 sm:$0xff]  }
 0x6ed   : > { %10247 = vmatpush2.bf16.msra.mxu1 %v18911_v8  ;;  %v21015_v8 = vld [vmem:[#allocation8 + $0x1770] ss:$24 sps:$4 sm:$0xff]  }
 0x6ee   : > { %10248 = vmatprep.subr.bf16.mxu1 %v18908_v46 }
 0x6f1   : > { %10249 = vmatpush2.bf16.msra.mxu1 %v18907_v31 }
 0x6f2   : > { %11476 = vmatprep.subr.bf16.mxu1 %v20957_v62  ;;  %v21033_v62 = vld [vmem:[#allocation8 + $0x16e0] ss:$24 sps:$4 sm:$0xff]  }
 0x6f4   : > { %v8826_v45 = vpop.f32.mrf.mxu1  ;;  %10251 = vmatmul.mubr.bf16.vlgmr.msra.gmra.mxu1 %v22214_v33 }
 0x6f5   : > { %v8827_v26 = vadd.f32 %v8826_v45, %v22473_v18  ;;  %11477 = vmatpush1.bf16.msra.mxu1 %v20955_v13  ;;  %v20963_v18 = vld [vmem:[#allocation8 + $0x1624] ss:$24 sps:$4 sm:$0xff]   ;;  %v21039_v13 = vld [vmem:[#allocation8 + $0x16b0] ss:$24 sps:$4 sm:$0xff]  }
 0x6f6   : > { %v8828_v14 = vpop.f32.mrf.mxu1  ;;  %v10129_v0 = vpop.f32.mrf.mxu0  ;;  %11478 = vmatprep.subr.bf16.mxu1 %v20963_v18 }
 0x6f7   : > { %v22502_v57 = vadd.f32 %v8827_v26, %v22409_v56  ;;  %v8829_v2 = vadd.f32 %v8828_v14, %v22480_v51  ;;  %v20969_v56 = vld [vmem:[#allocation8 + $0x15f4] ss:$24 sps:$4 sm:$0xff]   ;;  %v20975_v51 = vld [vmem:[#allocation8 + $0x15c4] ss:$24 sps:$4 sm:$0xff]  }
 0x6f8   : > { %v8830_v40 = vpop.f32.mrf.mxu1  ;;  %v10131_v5 = vpop.f32.mrf.mxu0  ;;  %v21023_v14 = vld [vmem:[#allocation8 + $0x1744] ss:$24 sps:$4 sm:$0xff]  }
 0x6f9   : > { %v22506_v43 = vadd.f32 %v8829_v2, %v22412_v11  ;;  %11479 = vmatpush1.bf16.msra.mxu1 %v20961_v60  ;;  %v20981_v11 = vld [vmem:[#allocation8 + $0x1594] ss:$24 sps:$4 sm:$0xff]   ;;  %v21021_v40 = vld [vmem:[#allocation8 + $0x1740] ss:$24 sps:$4 sm:$0xff]  }
 0x6fa   : > { %v8831_v6 = vpop.f32.mrf.mxu1  ;;  %v10133_v24 = vpop.f32.mrf.mxu0  ;;  %11480 = vmatprep.subr.bf16.mxu1 %v20969_v56 }
 0x6fb   : > { %v21029_v24 = vld [vmem:[#allocation8 + $0x1714] ss:$24 sps:$4 sm:$0xff]  }
 0x6fc   : > { %v10134_v30 = vpop.f32.mrf.mxu0 }
 0x6fd   : > { %11481 = vmatpush1.bf16.msra.mxu1 %v20967_v1  ;;  %v21035_v30 = vld [vmem:[#allocation8 + $0x16e4] ss:$24 sps:$4 sm:$0xff]  }
 0x6fe   : > { %11482 = vmatprep.subr.bf16.mxu1 %v20975_v51  ;;  %v21047_v51 = vld [vmem:[#allocation8 + $0x1684] ss:$24 sps:$4 sm:$0xff]  }
 0x701   : > { %11483 = vmatpush1.bf16.msra.mxu1 %v20973_v9 }
 0x702   : > { %11484 = vmatprep.subr.bf16.mxu1 %v20981_v11 }
 0x705   : > { %11485 = vmatpush1.bf16.msra.mxu1 %v20979_v35  ;;  %v21045_v35 = vld [vmem:[#allocation8 + $0x1680] ss:$24 sps:$4 sm:$0xff]  }
 0x706   : > { %11486 = vmatprep.subr.bf16.mxu1 %v20987_v21 }
 0x709   : > { %11487 = vmatpush1.bf16.msra.mxu1 %v20985_v53 }
 0x70a   : > { %11488 = vmatprep.subr.bf16.mxu1 %v20993_v17  ;;  %v21053_v17 = vld [vmem:[#allocation8 + $0x165c] ss:$24 sps:$4 sm:$0xff]  }
 0x70d   : > { %11489 = vmatpush1.bf16.msra.mxu1 %v20991_v47 }
 0x70e   : > { %11490 = vmatprep.subr.bf16.mxu1 %v20999_v12  ;;  %v20907_v12 = vld [vmem:[#allocation8 + $0x1358] ss:$24 sps:$4 sm:$0xff]  }
 0x711   : > { %11491 = vmatpush1.bf16.msra.mxu1 %v20997_v41 }
 0x712   : > { %11492 = vmatprep.subr.bf16.mxu1 %v21005_v52  ;;  %v20910_v52 = vld [vmem:[#allocation8 + $0x1328] ss:$24 sps:$4 sm:$0xff]  }
 0x715   : > { %11493 = vmatpush2.bf16.msra.mxu1 %v21003_v61  ;;  %v20913_v61 = vld [vmem:[#allocation8 + $0x12f8] ss:$24 sps:$4 sm:$0xff]  }
 0x716   : > { %11494 = vmatprep.subr.bf16.mxu1 %v21011_v48  ;;  %v20916_v48 = vld [vmem:[#allocation8 + $0x12c8] ss:$24 sps:$4 sm:$0xff]  }
 0x719   : > { %11495 = vmatpush2.bf16.msra.mxu1 %v21009_v3  ;;  %v20919_v3 = vld [vmem:[#allocation8 + $0x1298] ss:$24 sps:$4 sm:$0xff]  }
 0x71a   : > { %11496 = vmatprep.subr.bf16.mxu1 %v21017_v29  ;;  %v20925_v29 = vld [vmem:[#allocation8 + $0x1238] ss:$24 sps:$4 sm:$0xff]  }
 0x71d   : > { %11497 = vmatpush2.bf16.msra.mxu1 %v21015_v8  ;;  %v20933_v8 = vld [vmem:[#allocation8 + $0x14dc] ss:$24 sps:$4 sm:$0xff]  }
 0x71e   : > { %11498 = vmatprep.subr.bf16.mxu1 %v21023_v14 }
 0x721   : > { %11499 = vmatpush2.bf16.msra.mxu1 %v21021_v40 }
 0x722   : > { %11500 = vmatprep.subr.bf16.mxu1 %v21029_v24 }
 0x734   : > { %v10088_v37 = vpop.f32.mrf.mxu1 }
 0x735   : > { %v10089_v38 = vadd.f32 %v10088_v37, %v10048_v19  ;;  %v20918_v19 = vld [vmem:[#allocation8 + $0x12cc] ss:$24 sps:$4 sm:$0xff]  }
 0x736   : > { %v10090_v39 = vpop.f32.mrf.mxu1  ;;  %v22516_v42 = vpop.f32.mrf.mxu0  ;;  %v20924_v37 = vld [vmem:[#allocation8 + $0x126c] ss:$24 sps:$4 sm:$0xff]  }
 0x737   : > { %v10091_v49 = vadd.f32 %v10090_v39, %v10050_v36  ;;  %v10130_v55 = vadd.f32 %v10129_v0, %v10089_v38  ;;  %v21027_v0 = vld [vmem:[#allocation8 + $0x1710] ss:$24 sps:$4 sm:$0xff]   ;;  %v20921_v36 = vld [vmem:[#allocation8 + $0x129c] ss:$24 sps:$4 sm:$0xff]  }
 0x738   : > { %v10092_v46 = vpop.f32.mrf.mxu1  ;;  %v22518_v31 = vpop.f32.mrf.mxu0  ;;  %11501 = vmatpush2.bf16.msra.mxu1 %v21027_v0  ;;  %v20922_v38 = vld [vmem:[#allocation8 + $0x1268] ss:$24 sps:$4 sm:$0xff]   ;;  %v20927_v39 = vld [vmem:[#allocation8 + $0x123c] ss:$24 sps:$4 sm:$0xff]  }
 0x739   : > { %v10263_v15 = vmul.f32 0.70710677, %v10130_v55  ;;  %v10132_v45 = vadd.f32 %v10131_v5, %v10091_v49  ;;  %11502 = vmatprep.subr.bf16.mxu1 %v21035_v30  ;;  %v21041_v5 = vld [vmem:[#allocation8 + $0x16b4] ss:$24 sps:$4 sm:$0xff]   ;;  %v10259_v1 = vmul.f32 0.5, %v10130_v55 }
 0x73a   : > { %v10093_v22 = vpop.f32.mrf.mxu1  ;;  %v10215_v26 = vpop.f32.mrf.mxu0  ;;  %v20930_v49 = vld [vmem:[#allocation8 + $0x120c] ss:$24 sps:$4 sm:$0xff]   ;;  %v20928_v55 = vld [vmem:[#allocation8 + $0x1208] ss:$24 sps:$4 sm:$0xff]   ;;  %v20931_v46 = vld [vmem:[#allocation8 + $0x14d8] ss:$24 sps:$4 sm:$0xff]  }
 0x73b   : > { %21747 = verf.f32 %v10263_v15  ;;  %v10264_v2 = vmul.f32 0.70710677, %v10132_v45  ;;  %v10260_v9 = vmul.f32 0.5, %v10132_v45  ;;  %v20936_v15 = vld [vmem:[#allocation8 + $0x14ac] ss:$24 sps:$4 sm:$0xff]  }
 0x73c   : > { %v10216_v6 = vpop.f32.mrf.mxu0  ;;  %11503 = vmatpush2.bf16.msra.mxu1 %v21033_v62  ;;  %v20934_v45 = vld [vmem:[#allocation8 + $0x14a8] ss:$24 sps:$4 sm:$0xff]   ;;  %v20939_v26 = vld [vmem:[#allocation8 + $0x147c] ss:$24 sps:$4 sm:$0xff]   ;;  %v20943_v62 = vld [vmem:[#allocation8 + $0x1418] ss:$24 sps:$4 sm:$0xff]  }
 0x73d   : > { %21749 = verf.f32 %v10264_v2  ;;  %11504 = vmatprep.subr.bf16.mxu1 %v21041_v5  ;;  %v20937_v2 = vld [vmem:[#allocation8 + $0x1478] ss:$24 sps:$4 sm:$0xff]   ;;  %v20942_v6 = vld [vmem:[#allocation8 + $0x144c] ss:$24 sps:$4 sm:$0xff]   ;;  %v20940_v0 = vld [vmem:[#allocation8 + $0x1448] ss:$24 sps:$4 sm:$0xff]  }
 0x73e   : > { %v20945_v30 = vld [vmem:[#allocation8 + $0x141c] ss:$24 sps:$4 sm:$0xff]   ;;  %v20948_v5 = vld [vmem:[#allocation8 + $0x13ec] ss:$24 sps:$4 sm:$0xff]  }
 0x740   : > { %11505 = vmatpush2.bf16.msra.mxu1 %v21039_v13  ;;  %v20946_v13 = vld [vmem:[#allocation8 + $0x13e8] ss:$24 sps:$4 sm:$0xff]  }
 0x741   : > { %11506 = vmatprep.subr.bf16.mxu1 %v21047_v51  ;;  %v20960_v51 = vld [vmem:[#allocation8 + $0x1364] ss:$24 sps:$4 sm:$0xff]  }
 0x744   : > { %11507 = vmatpush2.bf16.msra.mxu1 %v21045_v35  ;;  %v20964_v35 = vld [vmem:[#allocation8 + $0x1330] ss:$24 sps:$4 sm:$0xff]  }
 0x745   : > { %11558 = vmatprep.subr.bf16.mxu1 %v21053_v17  ;;  %v20978_v17 = vld [vmem:[#allocation8 + $0x12d4] ss:$24 sps:$4 sm:$0xff]  }
 0x748   : > { %v21748_v18 = vpop.eup %21747 }
 0x749   : > { %v10271_v60 = vadd.f32 1.0, %v21748_v18  ;;  %v20951_v18 = vld [vmem:[#allocation8 + $0x13bc] ss:$24 sps:$4 sm:$0xff]  }
 0x74a   : > { %v21750_v56 = vpop.eup %21749 }
 0x74b   : > { %v10272_v11 = vadd.f32 1.0, %v21750_v56  ;;  %v10275_v21 = vmul.f32 %v10271_v60, %v10259_v1  ;;  %v20949_v60 = vld [vmem:[#allocation8 + $0x13b8] ss:$24 sps:$4 sm:$0xff]   ;;  %v20954_v56 = vld [vmem:[#allocation8 + $0x138c] ss:$24 sps:$4 sm:$0xff]  }
 0x74c   : > { %v20952_v1 = vld [vmem:[#allocation8 + $0x1388] ss:$24 sps:$4 sm:$0xff]  }
 0x74d   : > { %v10276_v53 = vmul.f32 %v10272_v11, %v10260_v9  ;;  %v22522_v41 = vpack.c.bf16 %v10275_v21, %v10275_v21  ;;  %v20958_v9 = vld [vmem:[#allocation8 + $0x1360] ss:$24 sps:$4 sm:$0xff]   ;;  %v20966_v11 = vld [vmem:[#allocation8 + $0x1334] ss:$24 sps:$4 sm:$0xff]   ;;  %v20972_v21 = vld [vmem:[#allocation8 + $0x1304] ss:$24 sps:$4 sm:$0xff]  }
 0x74f   : > { %v22520_v47 = vpack.c.bf16 %v10276_v53, %v10276_v53  ;;  %v20970_v53 = vld [vmem:[#allocation8 + $0x1300] ss:$24 sps:$4 sm:$0xff]  }
 0x751   : > { %11467 = vmatprep.mubr.bf16.mxu0 %v22520_v47 }
 0x752   : > { %11468 = vmatmul.mubr.bf16.vlgmr.msra.gmra.mxu0 %v22522_v41 }
 0x753   : > { %11518 = vmatpush1.bf16.msra.mxu0 %v20907_v12  ;;  %11549 = vmatprep.mubr.bf16.mxu0 %v22520_v47  ;;  %v20976_v12 = vld [vmem:[#allocation8 + $0x12d0] ss:$24 sps:$4 sm:$0xff]  }
 0x754   : > { %11519 = vmatprep.subr.bf16.mxu0 %v20912_v27  ;;  %v20984_v27 = vld [vmem:[#allocation8 + $0x12a4] ss:$24 sps:$4 sm:$0xff]  }
 0x757   : > { %11520 = vmatpush1.bf16.msra.mxu0 %v20910_v52  ;;  %v20982_v52 = vld [vmem:[#allocation8 + $0x12a0] ss:$24 sps:$4 sm:$0xff]  }
 0x758   : > { %11521 = vmatprep.subr.bf16.mxu0 %v20915_v34  ;;  %v20990_v34 = vld [vmem:[#allocation8 + $0x1274] ss:$24 sps:$4 sm:$0xff]  }
 0x75b   : > { %11522 = vmatpush1.bf16.msra.mxu0 %v20913_v61  ;;  %v20988_v61 = vld [vmem:[#allocation8 + $0x1270] ss:$24 sps:$4 sm:$0xff]  }
 0x75c   : > { %11523 = vmatprep.subr.bf16.mxu0 %v20918_v19  ;;  %v20996_v19 = vld [vmem:[#allocation8 + $0x1244] ss:$24 sps:$4 sm:$0xff]  }
 0x75f   : > { %11524 = vmatpush1.bf16.msra.mxu0 %v20916_v48  ;;  %v21002_v48 = vld [vmem:[#allocation8 + $0x1214] ss:$24 sps:$4 sm:$0xff]  }
 0x760   : > { %11525 = vmatprep.subr.bf16.mxu0 %v20921_v36  ;;  %v9044_v36 = vrot.slane %v22508_v10, %v22257_v4 }
 0x763   : > { %11526 = vmatpush1.bf16.msra.mxu0 %v20919_v3  ;;  %v21000_v3 = vld [vmem:[#allocation8 + $0x1210] ss:$24 sps:$4 sm:$0xff]  }
 0x764   : > { %11527 = vmatprep.subr.bf16.mxu0 %v20924_v37  ;;  %v21008_v37 = vld [vmem:[#allocation8 + $0x14e4] ss:$24 sps:$4 sm:$0xff]  }
 0x767   : > { %11528 = vmatpush1.bf16.msra.mxu0 %v20922_v38  ;;  %v9048_v38 = vrot.slane %v22508_v10, %v22260_v7 }
 0x768   : > { %11529 = vmatprep.subr.bf16.mxu0 %v20927_v39 }
 0x76b   : > { %11530 = vmatpush1.bf16.msra.mxu0 %v20925_v29  ;;  %v21006_v29 = vld [vmem:[#allocation8 + $0x14e0] ss:$24 sps:$4 sm:$0xff]  }
 0x76c   : > { %11531 = vmatprep.subr.bf16.mxu0 %v20930_v49  ;;  %v21014_v49 = vld [vmem:[#allocation8 + $0x14b4] ss:$24 sps:$4 sm:$0xff]  }
 0x76f   : > { %11532 = vmatpush1.bf16.msra.mxu0 %v20928_v55 }
 0x770   : > { %11533 = vmatprep.subr.bf16.mxu0 %v20933_v8 }
 0x773   : > { %11534 = vmatpush2.bf16.msra.mxu0 %v20931_v46  ;;  %v21012_v46 = vld [vmem:[#allocation8 + $0x14b0] ss:$24 sps:$4 sm:$0xff]  }
 0x774   : > { %v22527_v22 = vpop.f32.mrf.mxu1  ;;  %11535 = vmatprep.subr.bf16.mxu0 %v20936_v15 }
 0x775   : > { %v10171_v39 = vadd.f32 %v22527_v22, %v9044_v36  ;;  %v21018_v22 = vld [vmem:[#allocation8 + $0x1480] ss:$24 sps:$4 sm:$0xff]  }
 0x776   : > { %v22529_v14 = vpop.f32.mrf.mxu1 }
 0x777   : > { %11536 = vmatpush2.bf16.msra.mxu0 %v20934_v45  ;;  %v10173_v55 = vadd.f32 %v22529_v14, %v9048_v38  ;;  %v10212_v8 = vadd.f32 %v22516_v42, %v10171_v39  ;;  %v21020_v45 = vld [vmem:[#allocation8 + $0x1484] ss:$24 sps:$4 sm:$0xff]   ;;  %v21024_v42 = vld [vmem:[#allocation8 + $0x1450] ss:$24 sps:$4 sm:$0xff]  }
 0x778   : > { %v10174_v40 = vpop.f32.mrf.mxu1  ;;  %11537 = vmatprep.subr.bf16.mxu0 %v20939_v26  ;;  %v21054_v39 = vld [vmem:[#allocation8 + $0x1628] ss:$24 sps:$4 sm:$0xff]  }
 0x779   : > { %v10214_v26 = vadd.f32 %v22518_v31, %v10173_v55  ;;  %v21038_v31 = vld [vmem:[#allocation8 + $0x13f4] ss:$24 sps:$4 sm:$0xff]  }
 0x77a   : > { %v10175_v24 = vpop.f32.mrf.mxu1  ;;  %v21059_v55 = vld [vmem:[#allocation8 + $0x15fc] ss:$24 sps:$4 sm:$0xff]  }
 0x77b   : > { %11538 = vmatpush2.bf16.msra.mxu0 %v20937_v2 }
 0x77c   : > { %11539 = vmatprep.subr.bf16.mxu0 %v20942_v6 }
 0x77f   : > { %11540 = vmatpush2.bf16.msra.mxu0 %v20940_v0  ;;  %v21026_v0 = vld [vmem:[#allocation8 + $0x1454] ss:$24 sps:$4 sm:$0xff]  }
 0x780   : > { %11541 = vmatprep.subr.bf16.mxu0 %v20945_v30 }
 0x783   : > { %11542 = vmatpush2.bf16.msra.mxu0 %v20943_v62  ;;  %v21032_v62 = vld [vmem:[#allocation8 + $0x1424] ss:$24 sps:$4 sm:$0xff]  }
 0x784   : > { %11543 = vmatprep.subr.bf16.mxu0 %v20948_v5  ;;  %v21030_v5 = vld [vmem:[#allocation8 + $0x1420] ss:$24 sps:$4 sm:$0xff]  }
 0x787   : > { %11544 = vmatpush2.bf16.msra.mxu0 %v20946_v13  ;;  %v21036_v13 = vld [vmem:[#allocation8 + $0x13f0] ss:$24 sps:$4 sm:$0xff]  }
 0x788   : > { %11545 = vmatprep.subr.bf16.mxu0 %v20951_v18  ;;  %v21044_v18 = vld [vmem:[#allocation8 + $0x13c4] ss:$24 sps:$4 sm:$0xff]  }
 0x78b   : > { %11546 = vmatpush2.bf16.msra.mxu0 %v20949_v60 }
 0x78c   : > { %11547 = vmatprep.subr.bf16.mxu0 %v20954_v56 }
 0x78f   : > { %11548 = vmatpush2.bf16.msra.mxu0 %v20952_v1  ;;  %v21042_v1 = vld [vmem:[#allocation8 + $0x13c0] ss:$24 sps:$4 sm:$0xff]  }
 0x790   : > { %11599 = vmatprep.subr.bf16.mxu0 %v20960_v51 }
 0x792   : > { %11550 = vmatmul.mubr.bf16.vlgmr.msra.gmra.mxu0 %v22522_v41 }
 0x793   : > { %11600 = vmatpush1.bf16.msra.mxu0 %v20958_v9  ;;  %11631 = vmatprep.mubr.bf16.mxu0 %v22520_v47  ;;  %v20994_v47 = vld [vmem:[#allocation8 + $0x1240] ss:$24 sps:$4 sm:$0xff]  }
 0x794   : > { %11601 = vmatprep.subr.bf16.mxu0 %v20966_v11  ;;  %v21050_v11 = vld [vmem:[#allocation8 + $0x1394] ss:$24 sps:$4 sm:$0xff]  }
 0x797   : > { %11602 = vmatpush1.bf16.msra.mxu0 %v20964_v35 }
 0x798   : > { %11603 = vmatprep.subr.bf16.mxu0 %v20972_v21 }
 0x79b   : > { %11604 = vmatpush1.bf16.msra.mxu0 %v20970_v53  ;;  %v11715_v53 = vld [vmem:[#allocation5 + $0x580] sm:$0xff] }
 0x79c   : > { %11605 = vmatprep.subr.bf16.mxu0 %v20978_v17  ;;  %v11717_v17 = vld [vmem:[#allocation5 + $0x5e0] sm:$0xff] }
 0x79f   : > { %11606 = vmatpush1.bf16.msra.mxu0 %v20976_v12 }
 0x7a0   : > { %11607 = vmatprep.subr.bf16.mxu0 %v20984_v27  ;;  %v21048_v27 = vld [vmem:[#allocation8 + $0x1390] ss:$24 sps:$4 sm:$0xff]  }
 0x7a3   : > { %11608 = vmatpush1.bf16.msra.mxu0 %v20982_v52 }
 0x7a4   : > { %11609 = vmatprep.subr.bf16.mxu0 %v20990_v34  ;;  %v19158_v34 = vcombine.high %v11715_v53, %v11717_v17 }
 0x7a7   : > { %11610 = vmatpush1.bf16.msra.mxu0 %v20988_v61 }
 0x7a8   : > { %11611 = vmatprep.subr.bf16.mxu0 %v20996_v19  ;;  %v21051_v19 = vld [vmem:[#allocation8 + $0x1658] ss:$24 sps:$4 sm:$0xff]  }
 0x7ab   : > { %11612 = vmatpush1.bf16.msra.mxu0 %v20994_v47  ;;  %v11711_v47 = vld [vmem:[#allocation5 + $0x4c0] sm:$0xff] }
 0x7ac   : > { %11613 = vmatprep.subr.bf16.mxu0 %v21002_v48  ;;  %v11713_v48 = vld [vmem:[#allocation5 + $0x520] sm:$0xff] }
 0x7ad   : > { %v19154_v38 = vcombine.high %v11711_v47, %v11713_v48 }
 0x7af   : > { %11614 = vmatpush1.bf16.msra.mxu0 %v21000_v3  ;;  %v21056_v3 = vld [vmem:[#allocation8 + $0x162c] ss:$24 sps:$4 sm:$0xff]  }
 0x7b0   : > { %11615 = vmatprep.subr.bf16.mxu0 %v21008_v37  ;;  %v19157_v37 = vcombine.low %v11715_v53, %v11717_v17  ;;  %v21074_v53 = vld [vmem:[#allocation8 + $0x150c] ss:$24 sps:$4 sm:$0xff]  }
 0x7b3   : > { %11616 = vmatpush2.bf16.msra.mxu0 %v21006_v29  ;;  %v11707_v29 = vld [vmem:[#allocation5 + $0x400] sm:$0xff] }
 0x7b4   : > { %v10252_v15 = vpop.f32.mrf.mxu1  ;;  %11617 = vmatprep.subr.bf16.mxu0 %v21014_v49  ;;  %v11709_v49 = vld [vmem:[#allocation5 + $0x460] sm:$0xff] }
 0x7b5   : > { %v10253_v2 = vadd.f32 %v10252_v15, %v10212_v8  ;;  %v19153_v8 = vcombine.low %v11711_v47, %v11713_v48  ;;  %v21057_v15 = vld [vmem:[#allocation8 + $0x15f8] ss:$24 sps:$4 sm:$0xff]  }
 0x7b6   : > { %v10254_v40 = vpop.f32.mrf.mxu1 }
 0x7b7   : > { %v10265_v10 = vmul.f32 0.70710677, %v10253_v2  ;;  %v10255_v6 = vadd.f32 %v10254_v40, %v10214_v26  ;;  %11618 = vmatpush2.bf16.msra.mxu0 %v21012_v46  ;;  %v10261_v9 = vmul.f32 0.5, %v10253_v2  ;;  %v19150_v46 = vcombine.high %v11707_v29, %v11709_v49  ;;  %v11705_v26 = vld [vmem:[#allocation5 + $0x3a0] sm:$0xff] }
 0x7b8   : > { %v10256_v24 = vpop.f32.mrf.mxu1  ;;  %11619 = vmatprep.subr.bf16.mxu0 %v21020_v45  ;;  %v11703_v45 = vld [vmem:[#allocation5 + $0x340] sm:$0xff]  ;;  %v19149_v40 = vcombine.low %v11707_v29, %v11709_v49 }
 0x7b9   : > { %21751 = verf.f32 %v10265_v10  ;;  %v10266_v14 = vmul.f32 0.70710677, %v10255_v6  ;;  %v10262_v35 = vmul.f32 0.5, %v10255_v6  ;;  %v21062_v2 = vld [vmem:[#allocation8 + $0x15cc] ss:$24 sps:$4 sm:$0xff]   ;;  %v19146_v10 = vcombine.high %v11703_v45, %v11705_v26 }
 0x7ba   : > { %v10257_v30 = vpop.f32.mrf.mxu1  ;;  %v11699_v6 = vld [vmem:[#allocation5 + $0x280] sm:$0xff]  ;;  %v21065_v24 = vld [vmem:[#allocation8 + $0x159c] ss:$24 sps:$4 sm:$0xff]  }
 0x7bb   : > { %21753 = verf.f32 %v10266_v14  ;;  %11620 = vmatpush2.bf16.msra.mxu0 %v21018_v22  ;;  %v11701_v22 = vld [vmem:[#allocation5 + $0x2e0] sm:$0xff]  ;;  %v21063_v30 = vld [vmem:[#allocation8 + $0x1598] ss:$24 sps:$4 sm:$0xff]  }
 0x7bc   : > { %11621 = vmatprep.subr.bf16.mxu0 %v21026_v0  ;;  %v19145_v0 = vcombine.low %v11703_v45, %v11705_v26  ;;  %v19142_v14 = vcombine.high %v11699_v6, %v11701_v22 }
 0x7bf   : > { %11622 = vmatpush2.bf16.msra.mxu0 %v21024_v42  ;;  %v11695_v42 = vld [vmem:[#allocation5 + $0x1c0] sm:$0xff] }
 0x7c0   : > { %11623 = vmatprep.subr.bf16.mxu0 %v21032_v62  ;;  %v11697_v62 = vld [vmem:[#allocation5 + $0x220] sm:$0xff] }
 0x7c3   : > { %11624 = vmatpush2.bf16.msra.mxu0 %v21030_v5  ;;  %v21068_v5 = vld [vmem:[#allocation8 + $0x156c] ss:$24 sps:$4 sm:$0xff]  }
 0x7c4   : > { %11625 = vmatprep.subr.bf16.mxu0 %v21038_v31  ;;  %v19141_v31 = vcombine.low %v11699_v6, %v11701_v22 }
 0x7c6   : > { %v21752_v60 = vpop.eup %21751 }
 0x7c7   : > { %v10273_v56 = vadd.f32 1.0, %v21752_v60  ;;  %11626 = vmatpush2.bf16.msra.mxu0 %v21036_v13  ;;  %v19138_v13 = vcombine.high %v11695_v42, %v11697_v62  ;;  %v11691_v60 = vld [vmem:[#allocation5 + $0x100] sm:$0xff] }
 0x7c8   : > { %v21754_v51 = vpop.eup %21753  ;;  %11627 = vmatprep.subr.bf16.mxu0 %v21044_v18  ;;  %v21066_v18 = vld [vmem:[#allocation8 + $0x1568] ss:$24 sps:$4 sm:$0xff]  }
 0x7c9   : > { %v10274_v21 = vadd.f32 1.0, %v21754_v51  ;;  %v10277_v12 = vmul.f32 %v10273_v56, %v10261_v9  ;;  %v11693_v56 = vld [vmem:[#allocation5 + $0x160] sm:$0xff]  ;;  %v19137_v51 = vcombine.low %v11695_v42, %v11697_v62 }
 0x7ca   : > { %v19134_v9 = vcombine.high %v11691_v60, %v11693_v56  ;;  %v19133_v17 = vcombine.low %v11691_v60, %v11693_v56 }
 0x7cb   : > { %11628 = vmatpush2.bf16.msra.mxu0 %v21042_v1  ;;  %v10278_v52 = vmul.f32 %v10274_v21, %v10262_v35  ;;  %v22543_v36 = vpack.c.bf16 %v10277_v12, %v10277_v12  ;;  %v21071_v1 = vld [vmem:[#allocation8 + $0x153c] ss:$24 sps:$4 sm:$0xff]   ;;  %v11687_v35 = vld [vmem:[#allocation5 + $0x40] sm:$0xff] }
 0x7cc   : > { %11629 = vmatprep.subr.bf16.mxu0 %v21050_v11  ;;  %v21069_v11 = vld [vmem:[#allocation8 + $0x1538] ss:$24 sps:$4 sm:$0xff]   ;;  %v11689_v21 = vld [vmem:[#allocation5 + $0xa0] sm:$0xff] }
 0x7cd   : > { %v22541_v61 = vpack.c.bf16 %v10278_v52, %v10278_v52  ;;  %v19130_v12 = vcombine.high %v11687_v35, %v11689_v21  ;;  %v11747_v52 = vld [vmem:[#allocation5 + $0xb80] sm:$0xff]  ;;  %v19129_v47 = vcombine.low %v11687_v35, %v11689_v21 }
 0x7cf   : > { %11630 = vmatpush2.bf16.msra.mxu0 %v21048_v27  ;;  %11508 = vmatprep.mubr.bf16.mxu1 %v22541_v61  ;;  %v21072_v27 = vld [vmem:[#allocation8 + $0x1508] ss:$24 sps:$4 sm:$0xff]  }
 0x7d0   : > { %11509 = vmatmul.mubr.bf16.vlgmr.msra.gmra.mxu1 %v22543_v36  ;;  %12861 = vmatprep.subr.bf16.mxu0 %v19158_v34  ;;  %v11749_v34 = vld [vmem:[#allocation5 + $0xbe0] sm:$0xff] }
 0x7d1   : > { %11559 = vmatpush1.bf16.msra.mxu1 %v21051_v19  ;;  %11590 = vmatprep.mubr.bf16.mxu1 %v22541_v61  ;;  %v21077_v19 = vld [vmem:[#allocation8 + $0x17dc] ss:$24 sps:$4 sm:$0xff]   ;;  %v19190_v48 = vcombine.high %v11747_v52, %v11749_v34  ;;  %v19189_v29 = vcombine.low %v11747_v52, %v11749_v34 }
 0x7d2   : > { %11632 = vmatmul.mubr.bf16.vlgmr.msra.gmra.mxu0 %v22522_v41  ;;  %11560 = vmatprep.subr.bf16.mxu1 %v21056_v3  ;;  %v21060_v41 = vld [vmem:[#allocation8 + $0x15c8] ss:$24 sps:$4 sm:$0xff]   ;;  %v21075_v3 = vld [vmem:[#allocation8 + $0x17d8] ss:$24 sps:$4 sm:$0xff]  }
 0x7d3   : > { %12862 = vmatpush1.bf16.msra.mxu0 %v19157_v37  ;;  %12893 = vmatprep.mubr.bf16.mxu0 %v22194_v58  ;;  %v11743_v37 = vld [vmem:[#allocation5 + $0xac0] sm:$0xff] }
 0x7d4   : > { %12863 = vmatprep.subr.bf16.mxu0 %v19154_v38  ;;  %v11745_v38 = vld [vmem:[#allocation5 + $0xb20] sm:$0xff] }
 0x7d5   : > { %11561 = vmatpush1.bf16.msra.mxu1 %v21054_v39  ;;  %v21080_v39 = vld [vmem:[#allocation8 + $0x17ac] ss:$24 sps:$4 sm:$0xff]   ;;  %v19186_v49 = vcombine.high %v11743_v37, %v11745_v38  ;;  %v19185_v45 = vcombine.low %v11743_v37, %v11745_v38 }
 0x7d6   : > { %11562 = vmatprep.subr.bf16.mxu1 %v21059_v55  ;;  %v21078_v55 = vld [vmem:[#allocation8 + $0x17a8] ss:$24 sps:$4 sm:$0xff]  }
 0x7d7   : > { %12864 = vmatpush1.bf16.msra.mxu0 %v19153_v8  ;;  %v11739_v8 = vld [vmem:[#allocation5 + $0xa00] sm:$0xff] }
 0x7d8   : > { %12865 = vmatprep.subr.bf16.mxu0 %v19150_v46  ;;  %v11741_v46 = vld [vmem:[#allocation5 + $0xa60] sm:$0xff] }
 0x7d9   : > { %11563 = vmatpush1.bf16.msra.mxu1 %v21057_v15  ;;  %v21083_v15 = vld [vmem:[#allocation8 + $0x177c] ss:$24 sps:$4 sm:$0xff]   ;;  %v19182_v26 = vcombine.high %v11739_v8, %v11741_v46  ;;  %v19181_v6 = vcombine.low %v11739_v8, %v11741_v46 }
 0x7da   : > { %11564 = vmatprep.subr.bf16.mxu1 %v21062_v2  ;;  %v21081_v2 = vld [vmem:[#allocation8 + $0x1778] ss:$24 sps:$4 sm:$0xff]  }
 0x7db   : > { %12866 = vmatpush1.bf16.msra.mxu0 %v19149_v40  ;;  %v11735_v40 = vld [vmem:[#allocation5 + $0x940] sm:$0xff] }
 0x7dc   : > { %12867 = vmatprep.subr.bf16.mxu0 %v19146_v10  ;;  %v11737_v10 = vld [vmem:[#allocation5 + $0x9a0] sm:$0xff] }
 0x7dd   : > { %11565 = vmatpush1.bf16.msra.mxu1 %v21060_v41  ;;  %v21086_v41 = vld [vmem:[#allocation8 + $0x174c] ss:$24 sps:$4 sm:$0xff]   ;;  %v19178_v22 = vcombine.high %v11735_v40, %v11737_v10  ;;  %v19177_v42 = vcombine.low %v11735_v40, %v11737_v10 }
 0x7de   : > { %11566 = vmatprep.subr.bf16.mxu1 %v21065_v24  ;;  %v21084_v24 = vld [vmem:[#allocation8 + $0x1748] ss:$24 sps:$4 sm:$0xff]   ;;  %v21107_v40 = vld [vmem:[#allocation8 + $0x1604] ss:$24 sps:$4 sm:$0xff]  }
 0x7df   : > { %12868 = vmatpush1.bf16.msra.mxu0 %v19145_v0  ;;  %v11731_v0 = vld [vmem:[#allocation5 + $0x880] sm:$0xff] }
 0x7e0   : > { %12869 = vmatprep.subr.bf16.mxu0 %v19142_v14  ;;  %v11733_v14 = vld [vmem:[#allocation5 + $0x8e0] sm:$0xff] }
 0x7e1   : > { %11567 = vmatpush1.bf16.msra.mxu1 %v21063_v30  ;;  %v21089_v30 = vld [vmem:[#allocation8 + $0x171c] ss:$24 sps:$4 sm:$0xff]   ;;  %v19174_v62 = vcombine.high %v11731_v0, %v11733_v14  ;;  %v19173_v60 = vcombine.low %v11731_v0, %v11733_v14 }
 0x7e2   : > { %11568 = vmatprep.subr.bf16.mxu1 %v21068_v5  ;;  %v21087_v5 = vld [vmem:[#allocation8 + $0x1718] ss:$24 sps:$4 sm:$0xff]   ;;  %v21110_v14 = vld [vmem:[#allocation8 + $0x15d4] ss:$24 sps:$4 sm:$0xff]  }
 0x7e3   : > { %12870 = vmatpush1.bf16.msra.mxu0 %v19141_v31  ;;  %v11727_v31 = vld [vmem:[#allocation5 + $0x7c0] sm:$0xff] }
 0x7e4   : > { %12871 = vmatprep.subr.bf16.mxu0 %v19138_v13  ;;  %v11729_v13 = vld [vmem:[#allocation5 + $0x820] sm:$0xff] }
 0x7e5   : > { %11569 = vmatpush1.bf16.msra.mxu1 %v21066_v18  ;;  %v21092_v18 = vld [vmem:[#allocation8 + $0x16ec] ss:$24 sps:$4 sm:$0xff]   ;;  %v19170_v56 = vcombine.high %v11727_v31, %v11729_v13  ;;  %v19169_v35 = vcombine.low %v11727_v31, %v11729_v13 }
 0x7e6   : > { %11570 = vmatprep.subr.bf16.mxu1 %v21071_v1  ;;  %v21090_v1 = vld [vmem:[#allocation8 + $0x16e8] ss:$24 sps:$4 sm:$0xff]  }
 0x7e7   : > { %12872 = vmatpush1.bf16.msra.mxu0 %v19137_v51  ;;  %v11723_v51 = vld [vmem:[#allocation5 + $0x700] sm:$0xff] }
 0x7e8   : > { %12873 = vmatprep.subr.bf16.mxu0 %v19134_v9  ;;  %v11725_v9 = vld [vmem:[#allocation5 + $0x760] sm:$0xff] }
 0x7e9   : > { %11571 = vmatpush1.bf16.msra.mxu1 %v21069_v11  ;;  %v21095_v11 = vld [vmem:[#allocation8 + $0x16bc] ss:$24 sps:$4 sm:$0xff]   ;;  %v19166_v21 = vcombine.high %v11723_v51, %v11725_v9  ;;  %v19165_v52 = vcombine.low %v11723_v51, %v11725_v9  ;;  %v11827_v31 = vld [vmem:[#allocation5 + $0x1a80] sm:$0xff] }
 0x7ea   : > { %11572 = vmatprep.subr.bf16.mxu1 %v21074_v53  ;;  %v21093_v53 = vld [vmem:[#allocation8 + $0x16b8] ss:$24 sps:$4 sm:$0xff]   ;;  %v11829_v13 = vld [vmem:[#allocation5 + $0x1ae0] sm:$0xff] }
 0x7eb   : > { %12874 = vmatpush1.bf16.msra.mxu0 %v19133_v17  ;;  %v11719_v17 = vld [vmem:[#allocation5 + $0x640] sm:$0xff] }
 0x7ec   : > { %12875 = vmatprep.subr.bf16.mxu0 %v19130_v12  ;;  %v11721_v12 = vld [vmem:[#allocation5 + $0x6a0] sm:$0xff] }
 0x7ed   : > { %11573 = vmatpush1.bf16.msra.mxu1 %v21072_v27  ;;  %v21098_v27 = vld [vmem:[#allocation8 + $0x168c] ss:$24 sps:$4 sm:$0xff]   ;;  %v19162_v34 = vcombine.high %v11719_v17, %v11721_v12  ;;  %v19161_v37 = vcombine.low %v11719_v17, %v11721_v12 }
 0x7ee   : > { %11574 = vmatprep.subr.bf16.mxu1 %v21077_v19  ;;  %v21096_v19 = vld [vmem:[#allocation8 + $0x1688] ss:$24 sps:$4 sm:$0xff]  }
 0x7ef   : > { %12876 = vmatpush1.bf16.msra.mxu0 %v19129_v47  ;;  %v11843_v47 = vld [vmem:[#allocation5 + $0x1d80] sm:$0xff] }
 0x7f0   : > { %12877 = vmatprep.subr.bf16.mxu0 %v19190_v48  ;;  %v11845_v48 = vld [vmem:[#allocation5 + $0x1de0] sm:$0xff] }
 0x7f1   : > { %11575 = vmatpush2.bf16.msra.mxu1 %v21075_v3  ;;  %v21101_v3 = vld [vmem:[#allocation8 + $0x1664] ss:$24 sps:$4 sm:$0xff]   ;;  %v19286_v38 = vcombine.high %v11843_v47, %v11845_v48  ;;  %v19285_v8 = vcombine.low %v11843_v47, %v11845_v48  ;;  %v11823_v51 = vld [vmem:[#allocation5 + $0x19c0] sm:$0xff] }
 0x7f2   : > { %11576 = vmatprep.subr.bf16.mxu1 %v21080_v39  ;;  %v21099_v39 = vld [vmem:[#allocation8 + $0x1660] ss:$24 sps:$4 sm:$0xff]   ;;  %v11825_v9 = vld [vmem:[#allocation5 + $0x1a20] sm:$0xff] }
 0x7f3   : > { %12878 = vmatpush2.bf16.msra.mxu0 %v19189_v29  ;;  %v11839_v29 = vld [vmem:[#allocation5 + $0x1cc0] sm:$0xff] }
 0x7f4   : > { %12879 = vmatprep.subr.bf16.mxu0 %v19186_v49  ;;  %v11841_v49 = vld [vmem:[#allocation5 + $0x1d20] sm:$0xff] }
 0x7f5   : > { %11577 = vmatpush2.bf16.msra.mxu1 %v21078_v55  ;;  %v21104_v55 = vld [vmem:[#allocation8 + $0x1634] ss:$24 sps:$4 sm:$0xff]   ;;  %v19282_v46 = vcombine.high %v11839_v29, %v11841_v49  ;;  %v19281_v10 = vcombine.low %v11839_v29, %v11841_v49 }
 0x7f6   : > { %11578 = vmatprep.subr.bf16.mxu1 %v21083_v15  ;;  %v21102_v15 = vld [vmem:[#allocation8 + $0x1630] ss:$24 sps:$4 sm:$0xff]  }
 0x7f7   : > { %12880 = vmatpush2.bf16.msra.mxu0 %v19185_v45  ;;  %v11835_v45 = vld [vmem:[#allocation5 + $0x1c00] sm:$0xff] }
 0x7f8   : > { %12881 = vmatprep.subr.bf16.mxu0 %v19182_v26  ;;  %v11837_v26 = vld [vmem:[#allocation5 + $0x1c60] sm:$0xff] }
 0x7f9   : > { %11579 = vmatpush2.bf16.msra.mxu1 %v21081_v2  ;;  %v11819_v17 = vld [vmem:[#allocation5 + $0x1900] sm:$0xff] }
 0x7fa   : > { %11580 = vmatprep.subr.bf16.mxu1 %v21086_v41  ;;  %v11821_v12 = vld [vmem:[#allocation5 + $0x1960] sm:$0xff] }
 0x7fb   : > { %12882 = vmatpush2.bf16.msra.mxu0 %v19181_v6  ;;  %v19278_v6 = vcombine.high %v11835_v45, %v11837_v26  ;;  %v11815_v47 = vld [vmem:[#allocation5 + $0x1840] sm:$0xff] }
 0x7fc   : > { %12883 = vmatprep.subr.bf16.mxu0 %v19178_v22  ;;  %v21105_v22 = vld [vmem:[#allocation8 + $0x1600] ss:$24 sps:$4 sm:$0xff]   ;;  %v11817_v48 = vld [vmem:[#allocation5 + $0x18a0] sm:$0xff] }
 0x7fd   : > { %11581 = vmatpush2.bf16.msra.mxu1 %v21084_v24  ;;  %v11833_v24 = vld [vmem:[#allocation5 + $0x1ba0] sm:$0xff] }
 0x7fe   : > { %11582 = vmatprep.subr.bf16.mxu1 %v21089_v30  ;;  %v19277_v30 = vcombine.low %v11835_v45, %v11837_v26  ;;  %v11875_v29 = vld [vmem:[#allocation5 + $0x2380] sm:$0xff] }
 0x7ff   : > { %12884 = vmatpush2.bf16.msra.mxu0 %v19177_v42  ;;  %v11877_v49 = vld [vmem:[#allocation5 + $0x23e0] sm:$0xff] }
 0x800   : > { %12885 = vmatprep.subr.bf16.mxu0 %v19174_v62  ;;  %v11871_v45 = vld [vmem:[#allocation5 + $0x22c0] sm:$0xff] }
 0x801   : > { %11583 = vmatpush2.bf16.msra.mxu1 %v21087_v5  ;;  %v21108_v5 = vld [vmem:[#allocation8 + $0x15d0] ss:$24 sps:$4 sm:$0xff]  }
 0x802   : > { %11584 = vmatprep.subr.bf16.mxu1 %v21092_v18  ;;  %v21113_v18 = vld [vmem:[#allocation8 + $0x15a4] ss:$24 sps:$4 sm:$0xff]   ;;  %v11873_v26 = vld [vmem:[#allocation5 + $0x2320] sm:$0xff] }
 0x803   : > { %12886 = vmatpush2.bf16.msra.mxu0 %v19173_v60 }
 0x804   : > { %12887 = vmatprep.subr.bf16.mxu0 %v19170_v56  ;;  %v19270_v56 = vcombine.high %v11827_v31, %v11829_v13 }
 0x805   : > { %11585 = vmatpush2.bf16.msra.mxu1 %v21090_v1  ;;  %v21111_v1 = vld [vmem:[#allocation8 + $0x15a0] ss:$24 sps:$4 sm:$0xff]  }
 0x806   : > { %11586 = vmatprep.subr.bf16.mxu1 %v21095_v11  ;;  %v21116_v11 = vld [vmem:[#allocation8 + $0x1574] ss:$24 sps:$4 sm:$0xff]  }
 0x807   : > { %12888 = vmatpush2.bf16.msra.mxu0 %v19169_v35  ;;  %v19269_v35 = vcombine.low %v11827_v31, %v11829_v13  ;;  %v21134_v31 = vld [vmem:[#allocation8 + $0x1754] ss:$24 sps:$4 sm:$0xff]  }
 0x808   : > { %12889 = vmatprep.subr.bf16.mxu0 %v19166_v21  ;;  %v19266_v21 = vcombine.high %v11823_v51, %v11825_v9 }
 0x809   : > { %11587 = vmatpush2.bf16.msra.mxu1 %v21093_v53  ;;  %v21114_v53 = vld [vmem:[#allocation8 + $0x1570] ss:$24 sps:$4 sm:$0xff]  }
 0x80a   : > { %11588 = vmatprep.subr.bf16.mxu1 %v21098_v27  ;;  %v21119_v27 = vld [vmem:[#allocation8 + $0x1544] ss:$24 sps:$4 sm:$0xff]  }
 0x80b   : > { %12890 = vmatpush2.bf16.msra.mxu0 %v19165_v52  ;;  %v19265_v52 = vcombine.low %v11823_v51, %v11825_v9  ;;  %v21137_v51 = vld [vmem:[#allocation8 + $0x1724] ss:$24 sps:$4 sm:$0xff]  }
 0x80c   : > { %12891 = vmatprep.subr.bf16.mxu0 %v19162_v34  ;;  %v19262_v34 = vcombine.high %v11819_v17, %v11821_v12 }
 0x80d   : > { %11589 = vmatpush2.bf16.msra.mxu1 %v21096_v19  ;;  %v21117_v19 = vld [vmem:[#allocation8 + $0x1540] ss:$24 sps:$4 sm:$0xff]  }
 0x80e   : > { %11640 = vmatprep.subr.bf16.mxu1 %v21101_v3  ;;  %v21122_v3 = vld [vmem:[#allocation8 + $0x1514] ss:$24 sps:$4 sm:$0xff]  }
 0x80f   : > { %12892 = vmatpush2.bf16.msra.mxu0 %v19161_v37  ;;  %v19261_v37 = vcombine.low %v11819_v17, %v11821_v12  ;;  %v21140_v17 = vld [vmem:[#allocation8 + $0x16f4] ss:$24 sps:$4 sm:$0xff]  }
 0x810   : > { %11591 = vmatmul.mubr.bf16.vlgmr.msra.gmra.mxu1 %v22543_v36  ;;  %12943 = vmatprep.subr.bf16.mxu0 %v19286_v38  ;;  %v19258_v38 = vcombine.high %v11815_v47, %v11817_v48 }
 0x811   : > { %11641 = vmatpush1.bf16.msra.mxu1 %v21099_v39  ;;  %11672 = vmatprep.mubr.bf16.mxu1 %v22541_v61  ;;  %v11831_v61 = vld [vmem:[#allocation5 + $0x1b40] sm:$0xff] }
 0x812   : > { %v22552_v2 = vpop.f32.mrf.mxu0  ;;  %11642 = vmatprep.subr.bf16.mxu1 %v21104_v55  ;;  %12894 = vmatmul.mubr.bf16.vlgmr.msra.gmra.mxu0 %v22202_v16  ;;  %v19274_v62 = vcombine.high %v11831_v61, %v11833_v24  ;;  %v19273_v60 = vcombine.low %v11831_v61, %v11833_v24  ;;  %v21120_v39 = vld [vmem:[#allocation8 + $0x1510] ss:$24 sps:$4 sm:$0xff]   ;;  %v21125_v55 = vld [vmem:[#allocation8 + $0x17e4] ss:$24 sps:$4 sm:$0xff]  }
 0x813   : > { %12944 = vmatpush1.bf16.msra.mxu0 %v19285_v8  ;;  %12975 = vmatprep.mubr.bf16.mxu0 %v22207_v28  ;;  %v19257_v8 = vcombine.low %v11815_v47, %v11817_v48  ;;  %v11867_v61 = vld [vmem:[#allocation5 + $0x2200] sm:$0xff]  ;;  %v21143_v47 = vld [vmem:[#allocation8 + $0x16c4] ss:$24 sps:$4 sm:$0xff]  }
 0x814   : > { %v22556_v41 = vpop.f32.mrf.mxu0  ;;  %12945 = vmatprep.subr.bf16.mxu0 %v19282_v46  ;;  %v19318_v46 = vcombine.high %v11875_v29, %v11877_v49  ;;  %v11869_v24 = vld [vmem:[#allocation5 + $0x2260] sm:$0xff] }
 0x815   : > { %11643 = vmatpush1.bf16.msra.mxu1 %v21102_v15  ;;  %v21123_v15 = vld [vmem:[#allocation8 + $0x17e0] ss:$24 sps:$4 sm:$0xff]   ;;  %v19309_v13 = vcombine.low %v11867_v61, %v11869_v24 }
 0x816   : > { %v11473_v0 = vpop.f32.mrf.mxu0  ;;  %11644 = vmatprep.subr.bf16.mxu1 %v21107_v40  ;;  %v21128_v40 = vld [vmem:[#allocation8 + $0x17b4] ss:$24 sps:$4 sm:$0xff]  }
 0x817   : > { %12946 = vmatpush1.bf16.msra.mxu0 %v19281_v10  ;;  %v19317_v10 = vcombine.low %v11875_v29, %v11877_v49  ;;  %v21131_v0 = vld [vmem:[#allocation8 + $0x1784] ss:$24 sps:$4 sm:$0xff]   ;;  %v21146_v29 = vld [vmem:[#allocation8 + $0x1694] ss:$24 sps:$4 sm:$0xff]  }
 0x818   : > { %v11474_v42 = vpop.f32.mrf.mxu0  ;;  %12947 = vmatprep.subr.bf16.mxu0 %v19278_v6  ;;  %v19314_v6 = vcombine.high %v11871_v45, %v11873_v26  ;;  %v11779_v49 = vld [vmem:[#allocation5 + $0x1180] sm:$0xff] }
 0x819   : > { %11645 = vmatpush1.bf16.msra.mxu1 %v21105_v22  ;;  %v21126_v22 = vld [vmem:[#allocation8 + $0x17b0] ss:$24 sps:$4 sm:$0xff]   ;;  %v21129_v42 = vld [vmem:[#allocation8 + $0x1780] ss:$24 sps:$4 sm:$0xff]  }
 0x81a   : > { %11646 = vmatprep.subr.bf16.mxu1 %v21110_v14  ;;  %v19313_v14 = vcombine.low %v11871_v45, %v11873_v26  ;;  %v11780_v45 = vld [vmem:[#allocation5 + $0x1188] sm:$0xff] }
 0x81b   : > { %12948 = vmatpush1.bf16.msra.mxu0 %v19277_v30  ;;  %v19310_v30 = vcombine.high %v11867_v61, %v11869_v24  ;;  %v11782_v26 = vld [vmem:[#allocation5 + $0x11e8] sm:$0xff] }
 0x81c   : > { %12949 = vmatprep.subr.bf16.mxu0 %v19274_v62  ;;  %v11863_v62 = vld [vmem:[#allocation5 + $0x2140] sm:$0xff]  ;;  %v19224_v61 = vcombine.high %v11780_v45, %v11782_v26 }
 0x81d   : > { %11647 = vmatpush1.bf16.msra.mxu1 %v21108_v5  ;;  %v11865_v5 = vld [vmem:[#allocation5 + $0x21a0] sm:$0xff] }
 0x81e   : > { %11648 = vmatprep.subr.bf16.mxu1 %v21113_v18  ;;  %v19306_v18 = vcombine.high %v11863_v62, %v11865_v5  ;;  %v19305_v9 = vcombine.low %v11863_v62, %v11865_v5  ;;  %v11773_v62 = vld [vmem:[#allocation5 + $0x1060] sm:$0xff]  ;;  %v19223_v5 = vcombine.low %v11780_v45, %v11782_v26  ;;  %v11762_v45 = vld [vmem:[#allocation5 + $0xe28] sm:$0xff] }
 0x81f   : > { %12950 = vmatpush1.bf16.msra.mxu0 %v19273_v60  ;;  %v21132_v60 = vld [vmem:[#allocation8 + $0x1750] ss:$24 sps:$4 sm:$0xff]  }
 0x820   : > { %12951 = vmatprep.subr.bf16.mxu0 %v19270_v56  ;;  %v11859_v56 = vld [vmem:[#allocation5 + $0x2080] sm:$0xff] }
 0x821   : > { %11649 = vmatpush1.bf16.msra.mxu1 %v21111_v1  ;;  %v11861_v1 = vld [vmem:[#allocation5 + $0x20e0] sm:$0xff] }
 0x822   : > { %11650 = vmatprep.subr.bf16.mxu1 %v21116_v11  ;;  %v19302_v11 = vcombine.high %v11859_v56, %v11861_v1  ;;  %v19301_v12 = vcombine.low %v11859_v56, %v11861_v1 }
 0x823   : > { %12952 = vmatpush1.bf16.msra.mxu0 %v19269_v35  ;;  %v21135_v35 = vld [vmem:[#allocation8 + $0x1720] ss:$24 sps:$4 sm:$0xff]  }
 0x824   : > { %12953 = vmatprep.subr.bf16.mxu0 %v19266_v21  ;;  %v11855_v21 = vld [vmem:[#allocation5 + $0x1fc0] sm:$0xff] }
 0x825   : > { %11651 = vmatpush1.bf16.msra.mxu1 %v21114_v53  ;;  %v11857_v53 = vld [vmem:[#allocation5 + $0x2020] sm:$0xff] }
 0x826   : > { %11652 = vmatprep.subr.bf16.mxu1 %v21119_v27  ;;  %v19298_v27 = vcombine.high %v11855_v21, %v11857_v53  ;;  %v19297_v48 = vcombine.low %v11855_v21, %v11857_v53  ;;  %v11768_v53 = vld [vmem:[#allocation5 + $0xf48] sm:$0xff] }
 0x827   : > { %12954 = vmatpush1.bf16.msra.mxu0 %v19265_v52  ;;  %v21138_v52 = vld [vmem:[#allocation8 + $0x16f0] ss:$24 sps:$4 sm:$0xff]  }
 0x828   : > { %12955 = vmatprep.subr.bf16.mxu0 %v19262_v34  ;;  %v11851_v34 = vld [vmem:[#allocation5 + $0x1f00] sm:$0xff] }
 0x829   : > { %11653 = vmatpush1.bf16.msra.mxu1 %v21117_v19  ;;  %v11853_v19 = vld [vmem:[#allocation5 + $0x1f60] sm:$0xff] }
 0x82a   : > { %11654 = vmatprep.subr.bf16.mxu1 %v21122_v3  ;;  %v19294_v3 = vcombine.high %v11851_v34, %v11853_v19 }
 0x82b   : > { %12956 = vmatpush1.bf16.msra.mxu0 %v19261_v37  ;;  %v21141_v37 = vld [vmem:[#allocation8 + $0x16c0] ss:$24 sps:$4 sm:$0xff]  }
 0x82c   : > { %12957 = vmatprep.subr.bf16.mxu0 %v19258_v38  ;;  %v11847_v38 = vld [vmem:[#allocation5 + $0x1e40] sm:$0xff] }
 0x82d   : > { %11655 = vmatpush1.bf16.msra.mxu1 %v21120_v39  ;;  %v11849_v39 = vld [vmem:[#allocation5 + $0x1ea0] sm:$0xff] }
 0x82e   : > { %11656 = vmatprep.subr.bf16.mxu1 %v21125_v55  ;;  %v11781_v55 = vld [vmem:[#allocation5 + $0x11e0] sm:$0xff] }
 0x82f   : > { %12958 = vmatpush1.bf16.msra.mxu0 %v19257_v8  ;;  %v19293_v8 = vcombine.low %v11851_v34, %v11853_v19  ;;  %v19221_v24 = vcombine.low %v11779_v49, %v11781_v55  ;;  %v11765_v34 = vld [vmem:[#allocation5 + $0xee0] sm:$0xff] }
 0x830   : > { %12959 = vmatprep.subr.bf16.mxu0 %v19318_v46  ;;  %v19290_v46 = vcombine.high %v11847_v38, %v11849_v39 }
 0x831   : > { %11657 = vmatpush2.bf16.msra.mxu1 %v21123_v15  ;;  %v21144_v15 = vld [vmem:[#allocation8 + $0x1690] ss:$24 sps:$4 sm:$0xff]  }
 0x832   : > { %11658 = vmatprep.subr.bf16.mxu1 %v21128_v40  ;;  %v19222_v40 = vcombine.high %v11779_v49, %v11781_v55  ;;  %v11761_v49 = vld [vmem:[#allocation5 + $0xe20] sm:$0xff] }
 0x833   : > { %12960 = vmatpush2.bf16.msra.mxu0 %v19317_v10  ;;  %v11775_v10 = vld [vmem:[#allocation5 + $0x10c0] sm:$0xff] }
 0x834   : > { %12961 = vmatprep.subr.bf16.mxu0 %v19314_v6  ;;  %v11777_v6 = vld [vmem:[#allocation5 + $0x1120] sm:$0xff] }
 0x835   : > { %11659 = vmatpush2.bf16.msra.mxu1 %v21126_v22  ;;  %v19289_v22 = vcombine.low %v11847_v38, %v11849_v39  ;;  %v11766_v38 = vld [vmem:[#allocation5 + $0xee8] sm:$0xff] }
 0x836   : > { %11660 = vmatprep.subr.bf16.mxu1 %v21131_v0  ;;  %v11776_v0 = vld [vmem:[#allocation5 + $0x10c8] sm:$0xff] }
 0x837   : > { %12962 = vmatpush2.bf16.msra.mxu0 %v19313_v14  ;;  %v11778_v14 = vld [vmem:[#allocation5 + $0x1128] sm:$0xff] }
 0x838   : > { %12963 = vmatprep.subr.bf16.mxu0 %v19310_v30  ;;  %v19218_v30 = vcombine.high %v11775_v10, %v11777_v6 }
 0x839   : > { %11661 = vmatpush2.bf16.msra.mxu1 %v21129_v42  ;;  %v11771_v42 = vld [vmem:[#allocation5 + $0x1000] sm:$0xff] }
 0x83a   : > { %11662 = vmatprep.subr.bf16.mxu1 %v21134_v31  ;;  %v19220_v31 = vcombine.high %v11776_v0, %v11778_v14  ;;  %v19214_v1 = vcombine.high %v11771_v42, %v11773_v62  ;;  %v19213_v21 = vcombine.low %v11771_v42, %v11773_v62  ;;  %v11753_v42 = vld [vmem:[#allocation5 + $0xca0] sm:$0xff] }
 0x83b   : > { %12964 = vmatpush2.bf16.msra.mxu0 %v19309_v13  ;;  %v19217_v13 = vcombine.low %v11775_v10, %v11777_v6  ;;  %v11757_v10 = vld [vmem:[#allocation5 + $0xd60] sm:$0xff] }
 0x83c   : > { %12965 = vmatprep.subr.bf16.mxu0 %v19306_v18  ;;  %v11772_v18 = vld [vmem:[#allocation5 + $0x1008] sm:$0xff] }
 0x83d   : > { %11663 = vmatpush2.bf16.msra.mxu1 %v21132_v60  ;;  %v11774_v60 = vld [vmem:[#allocation5 + $0x1068] sm:$0xff] }
 0x83e   : > { %11664 = vmatprep.subr.bf16.mxu1 %v21137_v51  ;;  %v11767_v51 = vld [vmem:[#allocation5 + $0xf40] sm:$0xff]  ;;  %v19215_v19 = vcombine.low %v11772_v18, %v11774_v60 }
 0x83f   : > { %12966 = vmatpush2.bf16.msra.mxu0 %v19305_v9  ;;  %v11769_v9 = vld [vmem:[#allocation5 + $0xfa0] sm:$0xff] }
 0x840   : > { %12967 = vmatprep.subr.bf16.mxu0 %v19302_v11  ;;  %v19219_v11 = vcombine.low %v11776_v0, %v11778_v14  ;;  %v11758_v0 = vld [vmem:[#allocation5 + $0xd68] sm:$0xff] }
 0x841   : > { %11665 = vmatpush2.bf16.msra.mxu1 %v21135_v35  ;;  %v19216_v35 = vcombine.high %v11772_v18, %v11774_v60  ;;  %v11754_v18 = vld [vmem:[#allocation5 + $0xca8] sm:$0xff] }
 0x842   : > { %11666 = vmatprep.subr.bf16.mxu1 %v21140_v17  ;;  %v11770_v17 = vld [vmem:[#allocation5 + $0xfa8] sm:$0xff] }
 0x843   : > { %12968 = vmatpush2.bf16.msra.mxu0 %v19301_v12  ;;  %v19211_v55 = vcombine.low %v11768_v53, %v11770_v17 }
 0x844   : > { %12969 = vmatprep.subr.bf16.mxu0 %v19298_v27  ;;  %v19210_v27 = vcombine.high %v11767_v51, %v11769_v9 }
 0x845   : > { %11667 = vmatpush2.bf16.msra.mxu1 %v21138_v52  ;;  %v11763_v52 = vld [vmem:[#allocation5 + $0xe80] sm:$0xff] }
 0x846   : > { %11668 = vmatprep.subr.bf16.mxu1 %v21143_v47  ;;  %v19206_v39 = vcombine.high %v11763_v52, %v11765_v34 }
 0x847   : > { %12970 = vmatpush2.bf16.msra.mxu0 %v19297_v48  ;;  %v19212_v48 = vcombine.high %v11768_v53, %v11770_v17  ;;  %v11814_v53 = vld [vmem:[#allocation5 + $0x17e8] sm:$0xff] }
 0x848   : > { %12971 = vmatprep.subr.bf16.mxu0 %v19294_v3  ;;  %v19209_v3 = vcombine.low %v11767_v51, %v11769_v9  ;;  %v11813_v51 = vld [vmem:[#allocation5 + $0x17e0] sm:$0xff] }
 0x849   : > { %11669 = vmatpush2.bf16.msra.mxu1 %v21141_v37  ;;  %v11764_v37 = vld [vmem:[#allocation5 + $0xe88] sm:$0xff] }
 0x84a   : > { %11670 = vmatprep.subr.bf16.mxu1 %v21146_v29  ;;  %v11759_v29 = vld [vmem:[#allocation5 + $0xdc0] sm:$0xff]  ;;  %v19207_v6 = vcombine.low %v11764_v37, %v11766_v38 }
 0x84b   : > { %12972 = vmatpush2.bf16.msra.mxu0 %v19293_v8  ;;  %v19208_v8 = vcombine.high %v11764_v37, %v11766_v38  ;;  %v19202_v26 = vcombine.high %v11759_v29, %v11761_v49  ;;  %v11803_v37 = vld [vmem:[#allocation5 + $0x1600] sm:$0xff] }
 0x84c   : > { %12973 = vmatprep.subr.bf16.mxu0 %v19290_v46  ;;  %v19205_v46 = vcombine.low %v11763_v52, %v11765_v34  ;;  %v11805_v38 = vld [vmem:[#allocation5 + $0x1660] sm:$0xff] }
 0x84d   : > { %11671 = vmatpush2.bf16.msra.mxu1 %v21144_v15  ;;  %v11760_v15 = vld [vmem:[#allocation5 + $0xdc8] sm:$0xff] }
 0x84e   : > { %12902 = vmatprep.subr.bf16.mxu1 %v19222_v40  ;;  %v11755_v40 = vld [vmem:[#allocation5 + $0xd00] sm:$0xff]  ;;  %v19203_v62 = vcombine.low %v11760_v15, %v11762_v45 }
 0x84f   : > { %12974 = vmatpush2.bf16.msra.mxu0 %v19289_v22  ;;  %v19204_v22 = vcombine.high %v11760_v15, %v11762_v45  ;;  %v19198_v14 = vcombine.high %v11755_v40, %v11757_v10  ;;  %v11799_v15 = vld [vmem:[#allocation5 + $0x1540] sm:$0xff] }
 0x850   : > { %11673 = vmatmul.mubr.bf16.vlgmr.msra.gmra.mxu1 %v22543_v36  ;;  %13025 = vmatprep.subr.bf16.mxu0 %v19224_v61  ;;  %v19201_v61 = vcombine.low %v11759_v29, %v11761_v49  ;;  %v11801_v45 = vld [vmem:[#allocation5 + $0x15a0] sm:$0xff] }
 0x851   : > { %12903 = vmatpush1.bf16.msra.mxu1 %v19221_v24  ;;  %12934 = vmatprep.mubr.bf16.mxu1 %v22196_v59  ;;  %v11756_v24 = vld [vmem:[#allocation5 + $0xd08] sm:$0xff] }
 0x852   : > { %v22560_v56 = vpop.f32.mrf.mxu0  ;;  %12904 = vmatprep.subr.bf16.mxu1 %v19218_v30  ;;  %12976 = vmatmul.mubr.bf16.vlgmr.msra.gmra.mxu0 %v22214_v33  ;;  %v11751_v30 = vld [vmem:[#allocation5 + $0xc40] sm:$0xff]  ;;  %v19199_v9 = vcombine.low %v11756_v24, %v11758_v0 }
 0x853   : > { %13026 = vmatpush1.bf16.msra.mxu0 %v19223_v5  ;;  %13057 = vmatprep.mubr.bf16.mxu0 %v22196_v59  ;;  %v19200_v5 = vcombine.high %v11756_v24, %v11758_v0  ;;  %v19194_v60 = vcombine.high %v11751_v30, %v11753_v42  ;;  %v11795_v24 = vld [vmem:[#allocation5 + $0x1480] sm:$0xff] }
 0x854   : > { %v22564_v36 = vpop.f32.mrf.mxu0  ;;  %13027 = vmatprep.subr.bf16.mxu0 %v19220_v31  ;;  %v19197_v31 = vcombine.low %v11755_v40, %v11757_v10  ;;  %v19245_v10 = vcombine.low %v11803_v37, %v11805_v38  ;;  %v11797_v0 = vld [vmem:[#allocation5 + $0x14e0] sm:$0xff] }
 0x855   : > { %12905 = vmatpush1.bf16.msra.mxu1 %v19217_v13  ;;  %v11752_v13 = vld [vmem:[#allocation5 + $0xc48] sm:$0xff] }
 0x856   : > { %v11555_v12 = vpop.f32.mrf.mxu0  ;;  %12906 = vmatprep.subr.bf16.mxu1 %v19214_v1  ;;  %v11811_v1 = vld [vmem:[#allocation5 + $0x1780] sm:$0xff]  ;;  %v19195_v52 = vcombine.low %v11752_v13, %v11754_v18 }
 0x857   : > { %13028 = vmatpush1.bf16.msra.mxu0 %v19219_v11  ;;  %v19196_v11 = vcombine.high %v11752_v13, %v11754_v18  ;;  %v19254_v17 = vcombine.high %v11811_v1, %v11813_v51  ;;  %v11807_v12 = vld [vmem:[#allocation5 + $0x16c0] sm:$0xff] }
 0x858   : > { %v11556_v47 = vpop.f32.mrf.mxu0  ;;  %13029 = vmatprep.subr.bf16.mxu0 %v19216_v35  ;;  %v19193_v35 = vcombine.low %v11751_v30, %v11753_v42  ;;  %v19241_v42 = vcombine.low %v11799_v15, %v11801_v45  ;;  %v11791_v13 = vld [vmem:[#allocation5 + $0x13c0] sm:$0xff] }
 0x859   : > { %12907 = vmatpush1.bf16.msra.mxu1 %v19213_v21  ;;  %v11812_v21 = vld [vmem:[#allocation5 + $0x1788] sm:$0xff]  ;;  %v11793_v18 = vld [vmem:[#allocation5 + $0x1420] sm:$0xff] }
 0x85a   : > { %12908 = vmatprep.subr.bf16.mxu1 %v19210_v27  ;;  %v11809_v27 = vld [vmem:[#allocation5 + $0x1720] sm:$0xff]  ;;  %v19256_v34 = vcombine.high %v11812_v21, %v11814_v53  ;;  %v11808_v47 = vld [vmem:[#allocation5 + $0x16c8] sm:$0xff] }
 0x85b   : > { %13030 = vmatpush1.bf16.msra.mxu0 %v19215_v19  ;;  %v19253_v19 = vcombine.low %v11811_v1, %v11813_v51  ;;  %v19249_v49 = vcombine.low %v11807_v12, %v11809_v27  ;;  %v19237_v51 = vcombine.low %v11795_v24, %v11797_v0 }
 0x85c   : > { %13031 = vmatprep.subr.bf16.mxu0 %v19212_v48  ;;  %v11810_v48 = vld [vmem:[#allocation5 + $0x1728] sm:$0xff] }
 0x85d   : > { %12909 = vmatpush1.bf16.msra.mxu1 %v19209_v3  ;;  %v19250_v3 = vcombine.high %v11807_v12, %v11809_v27  ;;  %v19252_v29 = vcombine.high %v11808_v47, %v11810_v48  ;;  %v19233_v27 = vcombine.low %v11791_v13, %v11793_v18 }
 0x85e   : > { %12910 = vmatprep.subr.bf16.mxu1 %v19206_v39  ;;  %v19255_v39 = vcombine.low %v11812_v21, %v11814_v53  ;;  %v11787_v21 = vld [vmem:[#allocation5 + $0x1300] sm:$0xff] }
 0x85f   : > { %13032 = vmatpush1.bf16.msra.mxu0 %v19211_v55  ;;  %v11804_v55 = vld [vmem:[#allocation5 + $0x1608] sm:$0xff]  ;;  %v11789_v53 = vld [vmem:[#allocation5 + $0x1360] sm:$0xff] }
 0x860   : > { %13033 = vmatprep.subr.bf16.mxu0 %v19208_v8  ;;  %v11806_v8 = vld [vmem:[#allocation5 + $0x1668] sm:$0xff] }
 0x861   : > { %12911 = vmatpush1.bf16.msra.mxu1 %v19205_v46  ;;  %v19246_v46 = vcombine.high %v11803_v37, %v11805_v38  ;;  %v19248_v40 = vcombine.high %v11804_v55, %v11806_v8  ;;  %v19229_v38 = vcombine.low %v11787_v21, %v11789_v53 }
 0x862   : > { %12912 = vmatprep.subr.bf16.mxu1 %v19202_v26  ;;  %v19251_v26 = vcombine.low %v11808_v47, %v11810_v48  ;;  %v11783_v47 = vld [vmem:[#allocation5 + $0x1240] sm:$0xff] }
 0x863   : > { %13034 = vmatpush1.bf16.msra.mxu0 %v19207_v6  ;;  %v11800_v6 = vld [vmem:[#allocation5 + $0x1548] sm:$0xff]  ;;  %v11785_v48 = vld [vmem:[#allocation5 + $0x12a0] sm:$0xff] }
 0x864   : > { %13035 = vmatprep.subr.bf16.mxu0 %v19204_v22  ;;  %v11802_v22 = vld [vmem:[#allocation5 + $0x15a8] sm:$0xff] }
 0x865   : > { %12913 = vmatpush1.bf16.msra.mxu1 %v19201_v61  ;;  %v19242_v61 = vcombine.high %v11799_v15, %v11801_v45  ;;  %v19244_v30 = vcombine.high %v11800_v6, %v11802_v22  ;;  %v19225_v45 = vcombine.low %v11783_v47, %v11785_v48 }
 0x866   : > { %12914 = vmatprep.subr.bf16.mxu1 %v19198_v14  ;;  %v19247_v14 = vcombine.low %v11804_v55, %v11806_v8  ;;  %v11716_v55 = vld [vmem:[#allocation5 + $0x588] sm:$0xff] }
 0x867   : > { %13036 = vmatpush1.bf16.msra.mxu0 %v19203_v62  ;;  %v11796_v62 = vld [vmem:[#allocation5 + $0x1488] sm:$0xff] }
 0x868   : > { %13037 = vmatprep.subr.bf16.mxu0 %v19200_v5  ;;  %v11798_v5 = vld [vmem:[#allocation5 + $0x14e8] sm:$0xff] }
 0x869   : > { %12915 = vmatpush1.bf16.msra.mxu1 %v19197_v31  ;;  %v19238_v31 = vcombine.high %v11795_v24, %v11797_v0  ;;  %v19240_v1 = vcombine.high %v11796_v62, %v11798_v5  ;;  %v11718_v8 = vld [vmem:[#allocation5 + $0x5e8] sm:$0xff] }
 0x86a   : > { %12916 = vmatprep.subr.bf16.mxu1 %v19194_v60  ;;  %v19243_v60 = vcombine.low %v11800_v6, %v11802_v22  ;;  %v19159_v22 = vcombine.low %v11716_v55, %v11718_v8  ;;  %v11708_v24 = vld [vmem:[#allocation5 + $0x408] sm:$0xff] }
 0x86b   : > { %13038 = vmatpush1.bf16.msra.mxu0 %v19199_v9  ;;  %v11792_v9 = vld [vmem:[#allocation5 + $0x13c8] sm:$0xff] }
 0x86c   : > { %13039 = vmatprep.subr.bf16.mxu0 %v19196_v11  ;;  %v11794_v11 = vld [vmem:[#allocation5 + $0x1428] sm:$0xff] }
 0x86d   : > { %12917 = vmatpush1.bf16.msra.mxu1 %v19193_v35  ;;  %v19234_v35 = vcombine.high %v11791_v13, %v11793_v18  ;;  %v19236_v12 = vcombine.high %v11792_v9, %v11794_v11  ;;  %v11710_v0 = vld [vmem:[#allocation5 + $0x468] sm:$0xff] }
 0x86e   : > { %12918 = vmatprep.subr.bf16.mxu1 %v19254_v17  ;;  %v19239_v17 = vcombine.low %v11796_v62, %v11798_v5 }
 0x86f   : > { %13040 = vmatpush1.bf16.msra.mxu0 %v19195_v52  ;;  %v11788_v52 = vld [vmem:[#allocation5 + $0x1308] sm:$0xff] }
 0x870   : > { %13041 = vmatprep.subr.bf16.mxu0 %v19256_v34  ;;  %v11790_v34 = vld [vmem:[#allocation5 + $0x1368] sm:$0xff] }
 0x871   : > { %12919 = vmatpush2.bf16.msra.mxu1 %v19253_v19  ;;  %v19230_v19 = vcombine.high %v11787_v21, %v11789_v53  ;;  %v19232_v37 = vcombine.high %v11788_v52, %v11790_v34 }
 0x872   : > { %12920 = vmatprep.subr.bf16.mxu1 %v19250_v3  ;;  %v19235_v3 = vcombine.low %v11792_v9, %v11794_v11  ;;  %v19151_v11 = vcombine.low %v11708_v24, %v11710_v0 }
 0x873   : > { %13042 = vmatpush2.bf16.msra.mxu0 %v19255_v39  ;;  %v11784_v39 = vld [vmem:[#allocation5 + $0x1248] sm:$0xff] }
 0x874   : > { %13043 = vmatprep.subr.bf16.mxu0 %v19252_v29  ;;  %v11786_v29 = vld [vmem:[#allocation5 + $0x12a8] sm:$0xff] }
 0x875   : > { %12921 = vmatpush2.bf16.msra.mxu1 %v19249_v49  ;;  %v19226_v49 = vcombine.high %v11783_v47, %v11785_v48  ;;  %v19228_v15 = vcombine.high %v11784_v39, %v11786_v29  ;;  %v19227_v6 = vcombine.low %v11784_v39, %v11786_v29  ;;  %v21155_v47 = vld [vmem:[#allocation8 + $0x18f4] ss:$24 sps:$4 sm:$0xff]   ;;  %v21158_v29 = vld [vmem:[#allocation8 + $0x18c4] ss:$24 sps:$4 sm:$0xff]  }
 0x876   : > { %12922 = vmatprep.subr.bf16.mxu1 %v19246_v46  ;;  %v19231_v46 = vcombine.low %v11788_v52, %v11790_v34  ;;  %v21152_v52 = vld [vmem:[#allocation8 + $0x1924] ss:$24 sps:$4 sm:$0xff]   ;;  %v11696_v48 = vld [vmem:[#allocation5 + $0x1c8] sm:$0xff] }
 0x877   : > { %13044 = vmatpush2.bf16.msra.mxu0 %v19251_v26  ;;  %v19160_v26 = vcombine.high %v11716_v55, %v11718_v8  ;;  %v11694_v55 = vld [vmem:[#allocation5 + $0x168] sm:$0xff] }
 0x878   : > { %13045 = vmatprep.subr.bf16.mxu0 %v19248_v40  ;;  %v11712_v40 = vld [vmem:[#allocation5 + $0x4c8] sm:$0xff] }
 0x879   : > { %12923 = vmatpush2.bf16.msra.mxu1 %v19245_v10  ;;  %v11714_v10 = vld [vmem:[#allocation5 + $0x528] sm:$0xff] }
 0x87a   : > { %12924 = vmatprep.subr.bf16.mxu1 %v19242_v61  ;;  %v19156_v61 = vcombine.high %v11712_v40, %v11714_v10 }
 0x87b   : > { %13046 = vmatpush2.bf16.msra.mxu0 %v19247_v14 }
 0x87c   : > { %13047 = vmatprep.subr.bf16.mxu0 %v19244_v30 }
 0x87d   : > { %12925 = vmatpush2.bf16.msra.mxu1 %v19241_v42  ;;  %v19155_v42 = vcombine.low %v11712_v40, %v11714_v10  ;;  %v11690_v40 = vld [vmem:[#allocation5 + $0xa8] sm:$0xff] }
 0x87e   : > { %12926 = vmatprep.subr.bf16.mxu1 %v19238_v31  ;;  %v19152_v31 = vcombine.high %v11708_v24, %v11710_v0  ;;  %v11748_v24 = vld [vmem:[#allocation5 + $0xb88] sm:$0xff] }
 0x87f   : > { %13048 = vmatpush2.bf16.msra.mxu0 %v19243_v60  ;;  %v11704_v60 = vld [vmem:[#allocation5 + $0x348] sm:$0xff] }
 0x880   : > { %13049 = vmatprep.subr.bf16.mxu0 %v19240_v1  ;;  %v11706_v1 = vld [vmem:[#allocation5 + $0x3a8] sm:$0xff] }
 0x881   : > { %12927 = vmatpush2.bf16.msra.mxu1 %v19237_v51  ;;  %v19148_v53 = vcombine.high %v11704_v60, %v11706_v1  ;;  %v19147_v34 = vcombine.low %v11704_v60, %v11706_v1  ;;  %v11750_v0 = vld [vmem:[#allocation5 + $0xbe8] sm:$0xff] }
 0x882   : > { %12928 = vmatprep.subr.bf16.mxu1 %v19234_v35  ;;  %v19191_v60 = vcombine.low %v11748_v24, %v11750_v0  ;;  %v21165_v1 = vld [vmem:[#allocation8 + $0x1830] ss:$24 sps:$4 sm:$0xff]  }
 0x883   : > { %13050 = vmatpush2.bf16.msra.mxu0 %v19239_v17  ;;  %v21147_v17 = vld [vmem:[#allocation8 + $0x1950] ss:$24 sps:$4 sm:$0xff]  }
 0x884   : > { %13051 = vmatprep.subr.bf16.mxu0 %v19236_v12  ;;  %v21149_v12 = vld [vmem:[#allocation8 + $0x1954] ss:$24 sps:$4 sm:$0xff]  }
 0x885   : > { %12929 = vmatpush2.bf16.msra.mxu1 %v19233_v27  ;;  %v11702_v27 = vld [vmem:[#allocation5 + $0x2e8] sm:$0xff] }
 0x886   : > { %12930 = vmatprep.subr.bf16.mxu1 %v19230_v19  ;;  %v21150_v19 = vld [vmem:[#allocation8 + $0x1920] ss:$24 sps:$4 sm:$0xff]  }
 0x887   : > { %13052 = vmatpush2.bf16.msra.mxu0 %v19235_v3  ;;  %v11698_v3 = vld [vmem:[#allocation5 + $0x228] sm:$0xff] }
 0x888   : > { %13053 = vmatprep.subr.bf16.mxu0 %v19232_v37  ;;  %v19140_v39 = vcombine.high %v11696_v48, %v11698_v3  ;;  %v19139_v8 = vcombine.low %v11696_v48, %v11698_v3 }
 0x889   : > { %12931 = vmatpush2.bf16.msra.mxu1 %v19229_v38  ;;  %v21153_v38 = vld [vmem:[#allocation8 + $0x18f0] ss:$24 sps:$4 sm:$0xff]  }
 0x88a   : > { %12932 = vmatprep.subr.bf16.mxu1 %v19226_v49  ;;  %v11692_v49 = vld [vmem:[#allocation5 + $0x108] sm:$0xff] }
 0x88b   : > { %13054 = vmatpush2.bf16.msra.mxu0 %v19231_v46  ;;  %v21156_v46 = vld [vmem:[#allocation8 + $0x18c0] ss:$24 sps:$4 sm:$0xff]   ;;  %v19135_v10 = vcombine.low %v11692_v49, %v11694_v55 }
 0x88c   : > { %13055 = vmatprep.subr.bf16.mxu0 %v19228_v15  ;;  %v19136_v15 = vcombine.high %v11692_v49, %v11694_v55  ;;  %v11724_v49 = vld [vmem:[#allocation5 + $0x708] sm:$0xff] }
 0x88d   : > { %12933 = vmatpush2.bf16.msra.mxu1 %v19225_v45  ;;  %v21161_v45 = vld [vmem:[#allocation8 + $0x1894] ss:$24 sps:$4 sm:$0xff]  }
 0x88e   : > { %12984 = vmatprep.subr.bf16.mxu1 %v19160_v26  ;;  %v11688_v26 = vld [vmem:[#allocation5 + $0x48] sm:$0xff] }
 0x88f   : > { %13056 = vmatpush2.bf16.msra.mxu0 %v19227_v6  ;;  %v21159_v6 = vld [vmem:[#allocation8 + $0x1890] ss:$24 sps:$4 sm:$0xff]  }
 0x890   : > { %12935 = vmatmul.mubr.bf16.vlgmr.msra.gmra.mxu1 %v22205_v20  ;;  %v11510_v14 = vpop.f32.mrf.mxu1  ;;  %14283 = vmatprep.subr.bf16.mxu0 %v21149_v12  ;;  %v11726_v55 = vld [vmem:[#allocation5 + $0x768] sm:$0xff] }
 0x891   : > { %v11511_v30 = vadd.f32 %v11510_v14, %v22552_v2  ;;  %12985 = vmatpush1.bf16.msra.mxu1 %v19159_v22  ;;  %13016 = vmatprep.mubr.bf16.mxu1 %v22194_v58  ;;  %v19132_v22 = vcombine.high %v11688_v26, %v11690_v40  ;;  %v19131_v14 = vcombine.low %v11688_v26, %v11690_v40 }
 0x892   : > { %v22569_v62 = vpop.f32.mrf.mxu0  ;;  %v11512_v5 = vpop.f32.mrf.mxu1  ;;  %12986 = vmatprep.subr.bf16.mxu1 %v19156_v61  ;;  %13058 = vmatmul.mubr.bf16.vlgmr.msra.gmra.mxu0 %v22205_v20  ;;  %v21164_v61 = vld [vmem:[#allocation8 + $0x1864] ss:$24 sps:$4 sm:$0xff]   ;;  %v19167_v26 = vcombine.low %v11724_v49, %v11726_v55 }
 0x893   : > { %v22573_v13 = vadd.f32 %v11511_v30, %v22477_v23  ;;  %v11513_v18 = vadd.f32 %v11512_v5, %v22556_v41  ;;  %v11700_v23 = vld [vmem:[#allocation5 + $0x288] sm:$0xff]  ;;  %14284 = vmatpush1.bf16.msra.mxu0 %v21147_v17  ;;  %v21162_v30 = vld [vmem:[#allocation8 + $0x1860] ss:$24 sps:$4 sm:$0xff]  }
 0x894   : > { %v22576_v51 = vpop.f32.mrf.mxu0  ;;  %v11514_v2 = vpop.f32.mrf.mxu1  ;;  %14285 = vmatprep.subr.bf16.mxu0 %v21152_v52  ;;  %v19143_v37 = vcombine.low %v11700_v23, %v11702_v27  ;;  %v21167_v5 = vld [vmem:[#allocation8 + $0x1834] ss:$24 sps:$4 sm:$0xff]   ;;  %v21168_v17 = vld [vmem:[#allocation8 + $0x1800] ss:$24 sps:$4 sm:$0xff]  }
 0x895   : > { %v22579_v9 = vadd.f32 %v11513_v18, %v22483_v50  ;;  %12987 = vmatpush1.bf16.msra.mxu1 %v19155_v42  ;;  %v19144_v50 = vcombine.high %v11700_v23, %v11702_v27  ;;  %v19192_v42 = vcombine.high %v11748_v24, %v11750_v0  ;;  %v11746_v18 = vld [vmem:[#allocation5 + $0xb28] sm:$0xff] }
 0x896   : > { %v11637_v35 = vpop.f32.mrf.mxu0  ;;  %v11515_v21 = vpop.f32.mrf.mxu1  ;;  %12988 = vmatprep.subr.bf16.mxu1 %v19152_v31  ;;  %v11744_v31 = vld [vmem:[#allocation5 + $0xac8] sm:$0xff] }
 0x897   : > { %14286 = vmatpush1.bf16.msra.mxu0 %v21150_v19  ;;  %v19188_v2 = vcombine.high %v11744_v31, %v11746_v18  ;;  %v11740_v35 = vld [vmem:[#allocation5 + $0xa08] sm:$0xff] }
 0x898   : > { %v11638_v41 = vpop.f32.mrf.mxu0  ;;  %14287 = vmatprep.subr.bf16.mxu0 %v21155_v47  ;;  %v11742_v21 = vld [vmem:[#allocation5 + $0xa68] sm:$0xff] }
 0x899   : > { %12989 = vmatpush1.bf16.msra.mxu1 %v19151_v11  ;;  %v21170_v11 = vld [vmem:[#allocation8 + $0x1804] ss:$24 sps:$4 sm:$0xff]   ;;  %v19184_v12 = vcombine.high %v11740_v35, %v11742_v21  ;;  %v21173_v23 = vld [vmem:[#allocation8 + $0x1ad4] ss:$24 sps:$4 sm:$0xff]   ;;  %v19183_v41 = vcombine.low %v11740_v35, %v11742_v21 }
 0x89a   : > { %12990 = vmatprep.subr.bf16.mxu1 %v19148_v53  ;;  %v19187_v53 = vcombine.low %v11744_v31, %v11746_v18  ;;  %v11736_v27 = vld [vmem:[#allocation5 + $0x948] sm:$0xff]  ;;  %v21176_v31 = vld [vmem:[#allocation8 + $0x1aa4] ss:$24 sps:$4 sm:$0xff]  }
 0x89b   : > { %14288 = vmatpush1.bf16.msra.mxu0 %v21153_v38  ;;  %v11738_v52 = vld [vmem:[#allocation5 + $0x9a8] sm:$0xff] }
 0x89c   : > { %14289 = vmatprep.subr.bf16.mxu0 %v21158_v29  ;;  %v19180_v19 = vcombine.high %v11736_v27, %v11738_v52  ;;  %v11734_v47 = vld [vmem:[#allocation5 + $0x8e8] sm:$0xff]  ;;  %v19179_v48 = vcombine.low %v11736_v27, %v11738_v52 }
 0x89d   : > { %12991 = vmatpush1.bf16.msra.mxu1 %v19147_v34  ;;  %v21171_v34 = vld [vmem:[#allocation8 + $0x1ad0] ss:$24 sps:$4 sm:$0xff]   ;;  %v21179_v27 = vld [vmem:[#allocation8 + $0x1a74] ss:$24 sps:$4 sm:$0xff]  }
 0x89e   : > { %12992 = vmatprep.subr.bf16.mxu1 %v19144_v50  ;;  %v11732_v50 = vld [vmem:[#allocation5 + $0x888] sm:$0xff] }
 0x89f   : > { %14290 = vmatpush1.bf16.msra.mxu0 %v21156_v46  ;;  %v19176_v3 = vcombine.high %v11732_v50, %v11734_v47  ;;  %v11730_v38 = vld [vmem:[#allocation5 + $0x828] sm:$0xff]  ;;  %v19168_v46 = vcombine.high %v11724_v49, %v11726_v55 }
 0x8a0   : > { %14291 = vmatprep.subr.bf16.mxu0 %v21161_v45  ;;  %v11722_v45 = vld [vmem:[#allocation5 + $0x6a8] sm:$0xff] }
 0x8a1   : > { %12993 = vmatpush1.bf16.msra.mxu1 %v19143_v37  ;;  %v11728_v37 = vld [vmem:[#allocation5 + $0x7c8] sm:$0xff] }
 0x8a2   : > { %12994 = vmatprep.subr.bf16.mxu1 %v19140_v39  ;;  %v19175_v39 = vcombine.low %v11732_v50, %v11734_v47  ;;  %v19172_v29 = vcombine.high %v11728_v37, %v11730_v38  ;;  %v11840_v24 = vld [vmem:[#allocation5 + $0x1cc8] sm:$0xff] }
 0x8a3   : > { %14292 = vmatpush1.bf16.msra.mxu0 %v21159_v6  ;;  %v11846_v6 = vld [vmem:[#allocation5 + $0x1de8] sm:$0xff] }
 0x8a4   : > { %14293 = vmatprep.subr.bf16.mxu0 %v21164_v61  ;;  %v11842_v0 = vld [vmem:[#allocation5 + $0x1d28] sm:$0xff] }
 0x8a5   : > { %12995 = vmatpush1.bf16.msra.mxu1 %v19139_v8  ;;  %v19171_v8 = vcombine.low %v11728_v37, %v11730_v38  ;;  %v21180_v38 = vld [vmem:[#allocation8 + $0x1a40] ss:$24 sps:$4 sm:$0xff]   ;;  %v11826_v49 = vld [vmem:[#allocation5 + $0x1a28] sm:$0xff] }
 0x8a6   : > { %12996 = vmatprep.subr.bf16.mxu1 %v19136_v15  ;;  %v11720_v15 = vld [vmem:[#allocation5 + $0x648] sm:$0xff] }
 0x8a7   : > { %14294 = vmatpush1.bf16.msra.mxu0 %v21162_v30  ;;  %v19164_v40 = vcombine.high %v11720_v15, %v11722_v45  ;;  %v19284_v30 = vcombine.high %v11840_v24, %v11842_v0  ;;  %v21185_v55 = vld [vmem:[#allocation8 + $0x1a14] ss:$24 sps:$4 sm:$0xff]  }
 0x8a8   : > { %14295 = vmatprep.subr.bf16.mxu0 %v21167_v5  ;;  %v11838_v5 = vld [vmem:[#allocation5 + $0x1c68] sm:$0xff] }
 0x8a9   : > { %12997 = vmatpush1.bf16.msra.mxu1 %v19135_v10  ;;  %v11844_v10 = vld [vmem:[#allocation5 + $0x1d88] sm:$0xff] }
 0x8aa   : > { %12998 = vmatprep.subr.bf16.mxu1 %v19132_v22  ;;  %v19163_v22 = vcombine.low %v11720_v15, %v11722_v45  ;;  %v19288_v61 = vcombine.high %v11844_v10, %v11846_v6  ;;  %v11820_v45 = vld [vmem:[#allocation5 + $0x1908] sm:$0xff] }
 0x8ab   : > { %14296 = vmatpush1.bf16.msra.mxu0 %v21165_v1 }
 0x8ac   : > { %14297 = vmatprep.subr.bf16.mxu0 %v21170_v11 }
 0x8ad   : > { %12999 = vmatpush1.bf16.msra.mxu1 %v19131_v14  ;;  %v19287_v14 = vcombine.low %v11844_v10, %v11846_v6  ;;  %v21186_v10 = vld [vmem:[#allocation8 + $0x19e0] ss:$24 sps:$4 sm:$0xff]  }
 0x8ae   : > { %13000 = vmatprep.subr.bf16.mxu1 %v19192_v42  ;;  %v11836_v42 = vld [vmem:[#allocation5 + $0x1c08] sm:$0xff] }
 0x8af   : > { %14298 = vmatpush1.bf16.msra.mxu0 %v21168_v17  ;;  %v19280_v35 = vcombine.high %v11836_v42, %v11838_v5 }
 0x8b0   : > { %14299 = vmatprep.subr.bf16.mxu0 %v21173_v23  ;;  %v11834_v23 = vld [vmem:[#allocation5 + $0x1ba8] sm:$0xff] }
 0x8b1   : > { %13001 = vmatpush2.bf16.msra.mxu1 %v19191_v60  ;;  %v21174_v60 = vld [vmem:[#allocation8 + $0x1aa0] ss:$24 sps:$4 sm:$0xff]  }
 0x8b2   : > { %13002 = vmatprep.subr.bf16.mxu1 %v19188_v2  ;;  %v19283_v2 = vcombine.low %v11840_v24, %v11842_v0  ;;  %v11818_v24 = vld [vmem:[#allocation5 + $0x18a8] sm:$0xff] }
 0x8b3   : > { %14300 = vmatpush2.bf16.msra.mxu0 %v21171_v34  ;;  %v21191_v0 = vld [vmem:[#allocation8 + $0x19b4] ss:$24 sps:$4 sm:$0xff]  }
 0x8b4   : > { %14301 = vmatprep.subr.bf16.mxu0 %v21176_v31  ;;  %v11878_v31 = vld [vmem:[#allocation5 + $0x23e8] sm:$0xff] }
 0x8b5   : > { %13003 = vmatpush2.bf16.msra.mxu1 %v19187_v53 }
 0x8b6   : > { %13004 = vmatprep.subr.bf16.mxu1 %v19184_v12  ;;  %v11832_v12 = vld [vmem:[#allocation5 + $0x1b48] sm:$0xff] }
 0x8b7   : > { %14302 = vmatpush2.bf16.msra.mxu0 %v21174_v60  ;;  %v21192_v60 = vld [vmem:[#allocation8 + $0x1980] ss:$24 sps:$4 sm:$0xff]  }
 0x8b8   : > { %14303 = vmatprep.subr.bf16.mxu0 %v21179_v27  ;;  %v11868_v27 = vld [vmem:[#allocation5 + $0x2208] sm:$0xff] }
 0x8b9   : > { %13005 = vmatpush2.bf16.msra.mxu1 %v19183_v41  ;;  %v21177_v41 = vld [vmem:[#allocation8 + $0x1a70] ss:$24 sps:$4 sm:$0xff]  }
 0x8ba   : > { %13006 = vmatprep.subr.bf16.mxu1 %v19180_v19  ;;  %v19279_v19 = vcombine.low %v11836_v42, %v11838_v5  ;;  %v11876_v5 = vld [vmem:[#allocation5 + $0x2388] sm:$0xff] }
 0x8bb   : > { %14304 = vmatpush2.bf16.msra.mxu0 %v21177_v41 }
 0x8bd   : > { %13007 = vmatpush2.bf16.msra.mxu1 %v19179_v48  ;;  %v11828_v48 = vld [vmem:[#allocation5 + $0x1a88] sm:$0xff] }
 0x8be   : > { %13008 = vmatprep.subr.bf16.mxu1 %v19176_v3  ;;  %v21182_v3 = vld [vmem:[#allocation8 + $0x1a44] ss:$24 sps:$4 sm:$0xff]  }
 0x8bf   : > { %14305 = vmatprep.subr.bf16.mxu0 %v21182_v3  ;;  %v11862_v3 = vld [vmem:[#allocation5 + $0x20e8] sm:$0xff] }
 0x8c0   : > { %14306 = vmatpush2.bf16.msra.mxu0 %v21180_v38 }
 0x8c1   : > { %13009 = vmatpush2.bf16.msra.mxu1 %v19175_v39  ;;  %v19275_v39 = vcombine.low %v11832_v12, %v11834_v23  ;;  %14307 = vmatprep.subr.bf16.mxu0 %v21185_v55  ;;  %v11852_v55 = vld [vmem:[#allocation5 + $0x1f08] sm:$0xff] }
 0x8c2   : > { %13010 = vmatprep.subr.bf16.mxu1 %v19172_v29 }
 0x8c5   : > { %13011 = vmatpush2.bf16.msra.mxu1 %v19171_v8  ;;  %v21183_v8 = vld [vmem:[#allocation8 + $0x1a10] ss:$24 sps:$4 sm:$0xff]  }
 0x8c6   : > { %13012 = vmatprep.subr.bf16.mxu1 %v19168_v46  ;;  %14308 = vmatpush2.bf16.msra.mxu0 %v21183_v8  ;;  %v11854_v8 = vld [vmem:[#allocation5 + $0x1f68] sm:$0xff] }
 0x8c9   : > { %13013 = vmatpush2.bf16.msra.mxu1 %v19167_v26  ;;  %v11822_v26 = vld [vmem:[#allocation5 + $0x1968] sm:$0xff] }
 0x8ca   : > { %13014 = vmatprep.subr.bf16.mxu1 %v19164_v40  ;;  %v21188_v40 = vld [vmem:[#allocation8 + $0x19e4] ss:$24 sps:$4 sm:$0xff]  }
 0x8cb   : > { %14309 = vmatprep.subr.bf16.mxu0 %v21188_v40  ;;  %v19295_v40 = vcombine.low %v11852_v55, %v11854_v8 }
 0x8cc   : > { %14310 = vmatpush2.bf16.msra.mxu0 %v21186_v10 }
 0x8cd   : > { %13015 = vmatpush2.bf16.msra.mxu1 %v19163_v22  ;;  %v19264_v22 = vcombine.high %v11820_v45, %v11822_v26  ;;  %14311 = vmatprep.subr.bf16.mxu0 %v21191_v0 }
 0x8ce   : > { %13066 = vmatprep.subr.bf16.mxu1 %v19288_v61  ;;  %v11816_v61 = vld [vmem:[#allocation5 + $0x1848] sm:$0xff] }
 0x8cf   : > { %v19260_v42 = vcombine.high %v11816_v61, %v11818_v24 }
 0x8d0   : > { %v11592_v18 = vpop.f32.mrf.mxu1  ;;  %13017 = vmatmul.mubr.bf16.vlgmr.msra.gmra.mxu1 %v22202_v16 }
 0x8d1   : > { %v11593_v1 = vadd.f32 %v11592_v18, %v22560_v56  ;;  %13067 = vmatpush1.bf16.msra.mxu1 %v19287_v14  ;;  %13098 = vmatprep.mubr.bf16.mxu1 %v22207_v28  ;;  %v21189_v14 = vld [vmem:[#allocation8 + $0x19b0] ss:$24 sps:$4 sm:$0xff]   ;;  %v21194_v18 = vld [vmem:[#allocation8 + $0x1984] ss:$24 sps:$4 sm:$0xff]  }
 0x8d2   : > { %v11594_v11 = vpop.f32.mrf.mxu1  ;;  %13068 = vmatprep.subr.bf16.mxu1 %v19284_v30  ;;  %v22584_v21 = vpop.f32.mrf.mxu0  ;;  %v19263_v30 = vcombine.low %v11820_v45, %v11822_v26  ;;  %14312 = vmatpush2.bf16.msra.mxu0 %v21189_v14  ;;  %v11848_v45 = vld [vmem:[#allocation5 + $0x1e48] sm:$0xff] }
 0x8d3   : > { %v22587_v53 = vadd.f32 %v11593_v1, %v22491_v32  ;;  %v11595_v17 = vadd.f32 %v11594_v11, %v22564_v36  ;;  %v19276_v32 = vcombine.high %v11832_v12, %v11834_v23  ;;  %v11830_v36 = vld [vmem:[#allocation5 + $0x1ae8] sm:$0xff]  ;;  %v19259_v1 = vcombine.low %v11816_v61, %v11818_v24  ;;  %14313 = vmatprep.subr.bf16.mxu0 %v21194_v18 }
 0x8d4   : > { %v11596_v56 = vpop.f32.mrf.mxu1  ;;  %v22590_v52 = vpop.f32.mrf.mxu0  ;;  %v19272_v29 = vcombine.high %v11828_v48, %v11830_v36  ;;  %v19271_v46 = vcombine.low %v11828_v48, %v11830_v36  ;;  %v11872_v11 = vld [vmem:[#allocation5 + $0x22c8] sm:$0xff]  ;;  %v19319_v12 = vcombine.low %v11876_v5, %v11878_v31 }
 0x8d5   : > { %v22593_v34 = vadd.f32 %v11595_v17, %v22497_v25  ;;  %13069 = vmatpush1.bf16.msra.mxu1 %v19283_v2  ;;  %v11824_v25 = vld [vmem:[#allocation5 + $0x19c8] sm:$0xff]  ;;  %v19320_v2 = vcombine.high %v11876_v5, %v11878_v31 }
 0x8d6   : > { %v11597_v50 = vpop.f32.mrf.mxu1  ;;  %13070 = vmatprep.subr.bf16.mxu1 %v19280_v35  ;;  %v12899_v47 = vpop.f32.mrf.mxu0  ;;  %v19268_v15 = vcombine.high %v11824_v25, %v11826_v49  ;;  %v19267_v6 = vcombine.low %v11824_v25, %v11826_v49  ;;  %v11874_v35 = vld [vmem:[#allocation5 + $0x2328] sm:$0xff]  ;;  %14314 = vmatpush2.bf16.msra.mxu0 %v21192_v60 }
 0x8d7   : > { %v21197_v17 = vld [vmem:[#allocation8 + $0x195c] ss:$24 sps:$4 sm:$0xff]   ;;  %v19316_v23 = vcombine.high %v11872_v11, %v11874_v35  ;;  %v19315_v41 = vcombine.low %v11872_v11, %v11874_v35  ;;  %v21243_v11 = vld [vmem:[#allocation8 + $0x1c50] ss:$24 sps:$4 sm:$0xff]   ;;  %v21249_v35 = vld [vmem:[#allocation8 + $0x1c20] ss:$24 sps:$4 sm:$0xff]  }
 0x8d8   : > { %v12900_v37 = vpop.f32.mrf.mxu0  ;;  %14365 = vmatprep.subr.bf16.mxu0 %v21197_v17  ;;  %v11870_v56 = vld [vmem:[#allocation5 + $0x2268] sm:$0xff] }
 0x8d9   : > { %13071 = vmatpush1.bf16.msra.mxu1 %v19279_v19  ;;  %v19312_v19 = vcombine.high %v11868_v27, %v11870_v56  ;;  %v11864_v50 = vld [vmem:[#allocation5 + $0x2148] sm:$0xff]  ;;  %v19311_v47 = vcombine.low %v11868_v27, %v11870_v56  ;;  %v21275_v27 = vld [vmem:[#allocation8 + $0x1b64] ss:$24 sps:$4 sm:$0xff]   ;;  %v21273_v56 = vld [vmem:[#allocation8 + $0x1b60] ss:$24 sps:$4 sm:$0xff]  }
 0x8da   : > { %13072 = vmatprep.subr.bf16.mxu1 %v19276_v32  ;;  %v11866_v32 = vld [vmem:[#allocation5 + $0x21a8] sm:$0xff] }
 0x8db   : > { %v19308_v48 = vcombine.high %v11864_v50, %v11866_v32  ;;  %v11860_v36 = vld [vmem:[#allocation5 + $0x2088] sm:$0xff]  ;;  %v19307_v37 = vcombine.low %v11864_v50, %v11866_v32  ;;  %v22604_v50 = vld [vmem:[#allocation7 + $0x10] sm:$0xf]  ;;  %v21287_v32 = vld [vmem:[#allocation8 + $0x1b04] ss:$24 sps:$4 sm:$0xff]  }
 0x8dc   : > { %v19304_v38 = vcombine.high %v11860_v36, %v11862_v3  ;;  %v19303_v25 = vcombine.low %v11860_v36, %v11862_v3  ;;  %v11850_v26 = vld [vmem:[#allocation5 + $0x1ea8] sm:$0xff]  ;;  %v11888_v3 = vrot.slane %v22604_v50, %v22230_v63 }
 0x8dd   : > { %13073 = vmatpush1.bf16.msra.mxu1 %v19275_v39  ;;  %v11856_v39 = vld [vmem:[#allocation5 + $0x1fc8] sm:$0xff]  ;;  %v19292_v10 = vcombine.high %v11848_v45, %v11850_v26 }
 0x8de   : > { %13074 = vmatprep.subr.bf16.mxu1 %v19272_v29  ;;  %v11858_v29 = vld [vmem:[#allocation5 + $0x2028] sm:$0xff] }
 0x8df   : > { %v19300_v49 = vcombine.high %v11856_v39, %v11858_v29  ;;  %v21255_v17 = vld [vmem:[#allocation8 + $0x1bf0] ss:$24 sps:$4 sm:$0xff]   ;;  %v21293_v36 = vld [vmem:[#allocation8 + $0x1dd4] ss:$24 sps:$4 sm:$0xff]  }
 0x8e1   : > { %13075 = vmatpush1.bf16.msra.mxu1 %v19271_v46  ;;  %v19299_v46 = vcombine.low %v11856_v39, %v11858_v29  ;;  %v21299_v39 = vld [vmem:[#allocation8 + $0x1da4] ss:$24 sps:$4 sm:$0xff]   ;;  %v12898_v29 = vadd.f32 %v22590_v52, %v11888_v3 }
 0x8e2   : > { %13076 = vmatprep.subr.bf16.mxu1 %v19268_v15  ;;  %v19296_v15 = vcombine.high %v11852_v55, %v11854_v8  ;;  %v21203_v3 = vld [vmem:[#allocation8 + $0x18fc] ss:$24 sps:$4 sm:$0xff]  }
 0x8e5   : > { %13077 = vmatpush1.bf16.msra.mxu1 %v19267_v6  ;;  %v19291_v6 = vcombine.low %v11848_v45, %v11850_v26 }
 0x8e6   : > { %13078 = vmatprep.subr.bf16.mxu1 %v19264_v22 }
 0x8e9   : > { %13079 = vmatpush1.bf16.msra.mxu1 %v19263_v30 }
 0x8ea   : > { %13080 = vmatprep.subr.bf16.mxu1 %v19260_v42 }
 0x8ed   : > { %13081 = vmatpush1.bf16.msra.mxu1 %v19259_v1 }
 0x8ee   : > { %13082 = vmatprep.subr.bf16.mxu1 %v19320_v2  ;;  %v21245_v2 = vld [vmem:[#allocation8 + $0x1c54] ss:$24 sps:$4 sm:$0xff]  }
 0x8f1   : > { %13083 = vmatpush2.bf16.msra.mxu1 %v19319_v12  ;;  %v21261_v12 = vld [vmem:[#allocation8 + $0x1bc0] ss:$24 sps:$4 sm:$0xff]  }
 0x8f2   : > { %13084 = vmatprep.subr.bf16.mxu1 %v19316_v23  ;;  %v21267_v23 = vld [vmem:[#allocation8 + $0x1b90] ss:$24 sps:$4 sm:$0xff]  }
 0x8f5   : > { %13085 = vmatpush2.bf16.msra.mxu1 %v19315_v41  ;;  %v21281_v41 = vld [vmem:[#allocation8 + $0x1b34] ss:$24 sps:$4 sm:$0xff]  }
 0x8f6   : > { %13086 = vmatprep.subr.bf16.mxu1 %v19312_v19  ;;  %v21279_v19 = vld [vmem:[#allocation8 + $0x1b30] ss:$24 sps:$4 sm:$0xff]  }
 0x8f9   : > { %13087 = vmatpush2.bf16.msra.mxu1 %v19311_v47  ;;  %v21285_v47 = vld [vmem:[#allocation8 + $0x1b00] ss:$24 sps:$4 sm:$0xff]  }
 0x8fa   : > { %13088 = vmatprep.subr.bf16.mxu1 %v19308_v48  ;;  %v11884_v48 = vrot.slane %v22604_v50, %v22227_v54 }
 0x8fd   : > { %13089 = vmatpush2.bf16.msra.mxu1 %v19307_v37  ;;  %v21291_v37 = vld [vmem:[#allocation8 + $0x1dd0] ss:$24 sps:$4 sm:$0xff]  }
 0x8fe   : > { %13090 = vmatprep.subr.bf16.mxu1 %v19304_v38  ;;  %v12896_v38 = vadd.f32 %v22584_v21, %v11884_v48  ;;  %v21200_v48 = vld [vmem:[#allocation8 + $0x192c] ss:$24 sps:$4 sm:$0xff]  }
 0x901   : > { %13091 = vmatpush2.bf16.msra.mxu1 %v19303_v25  ;;  %v21297_v25 = vld [vmem:[#allocation8 + $0x1da0] ss:$24 sps:$4 sm:$0xff]  }
 0x902   : > { %13092 = vmatprep.subr.bf16.mxu1 %v19300_v49 }
 0x905   : > { %13093 = vmatpush2.bf16.msra.mxu1 %v19299_v46 }
 0x906   : > { %13094 = vmatprep.subr.bf16.mxu1 %v19296_v15  ;;  %v21305_v15 = vld [vmem:[#allocation8 + $0x1d74] ss:$24 sps:$4 sm:$0xff]  }
 0x909   : > { %13095 = vmatpush2.bf16.msra.mxu1 %v19295_v40  ;;  %v21303_v40 = vld [vmem:[#allocation8 + $0x1d70] ss:$24 sps:$4 sm:$0xff]  }
 0x90a   : > { %13096 = vmatprep.subr.bf16.mxu1 %v19292_v10 }
 0x90d   : > { %13097 = vmatpush2.bf16.msra.mxu1 %v19291_v6 }
 0x90e   : > { %14324 = vmatprep.subr.bf16.mxu1 %v21245_v2  ;;  %v21321_v2 = vld [vmem:[#allocation8 + $0x1ce0] ss:$24 sps:$4 sm:$0xff]  }
 0x910   : > { %v11674_v22 = vpop.f32.mrf.mxu1  ;;  %13099 = vmatmul.mubr.bf16.vlgmr.msra.gmra.mxu1 %v22214_v33 }
 0x911   : > { %v11675_v61 = vadd.f32 %v11674_v22, %v22569_v62  ;;  %14325 = vmatpush1.bf16.msra.mxu1 %v21243_v11  ;;  %v21251_v62 = vld [vmem:[#allocation8 + $0x1c24] ss:$24 sps:$4 sm:$0xff]   ;;  %v21327_v11 = vld [vmem:[#allocation8 + $0x1cb0] ss:$24 sps:$4 sm:$0xff]  }
 0x912   : > { %v11676_v24 = vpop.f32.mrf.mxu1  ;;  %v12977_v0 = vpop.f32.mrf.mxu0  ;;  %14326 = vmatprep.subr.bf16.mxu1 %v21251_v62 }
 0x913   : > { %v22598_v14 = vadd.f32 %v11675_v61, %v22502_v57  ;;  %v11677_v30 = vadd.f32 %v11676_v24, %v22576_v51  ;;  %v21257_v57 = vld [vmem:[#allocation8 + $0x1bf4] ss:$24 sps:$4 sm:$0xff]   ;;  %v21263_v51 = vld [vmem:[#allocation8 + $0x1bc4] ss:$24 sps:$4 sm:$0xff]  }
 0x914   : > { %v11678_v42 = vpop.f32.mrf.mxu1  ;;  %v12979_v5 = vpop.f32.mrf.mxu0  ;;  %v21311_v24 = vld [vmem:[#allocation8 + $0x1d44] ss:$24 sps:$4 sm:$0xff]  }
 0x915   : > { %v22602_v31 = vadd.f32 %v11677_v30, %v22506_v43  ;;  %14327 = vmatpush1.bf16.msra.mxu1 %v21249_v35  ;;  %v21269_v43 = vld [vmem:[#allocation8 + $0x1b94] ss:$24 sps:$4 sm:$0xff]   ;;  %v21309_v42 = vld [vmem:[#allocation8 + $0x1d40] ss:$24 sps:$4 sm:$0xff]  }
 0x916   : > { %v11679_v18 = vpop.f32.mrf.mxu1  ;;  %v12981_v60 = vpop.f32.mrf.mxu0  ;;  %14328 = vmatprep.subr.bf16.mxu1 %v21257_v57 }
 0x917   : > { %v21317_v60 = vld [vmem:[#allocation8 + $0x1d14] ss:$24 sps:$4 sm:$0xff]  }
 0x918   : > { %v12982_v1 = vpop.f32.mrf.mxu0 }
 0x919   : > { %14329 = vmatpush1.bf16.msra.mxu1 %v21255_v17  ;;  %v21323_v1 = vld [vmem:[#allocation8 + $0x1ce4] ss:$24 sps:$4 sm:$0xff]  }
 0x91a   : > { %14330 = vmatprep.subr.bf16.mxu1 %v21263_v51  ;;  %v21335_v51 = vld [vmem:[#allocation8 + $0x1c84] ss:$24 sps:$4 sm:$0xff]  }
 0x91d   : > { %14331 = vmatpush1.bf16.msra.mxu1 %v21261_v12 }
 0x91e   : > { %14332 = vmatprep.subr.bf16.mxu1 %v21269_v43 }
 0x921   : > { %14333 = vmatpush1.bf16.msra.mxu1 %v21267_v23  ;;  %v21333_v23 = vld [vmem:[#allocation8 + $0x1c80] ss:$24 sps:$4 sm:$0xff]  }
 0x922   : > { %14334 = vmatprep.subr.bf16.mxu1 %v21275_v27 }
 0x925   : > { %14335 = vmatpush1.bf16.msra.mxu1 %v21273_v56 }
 0x926   : > { %14336 = vmatprep.subr.bf16.mxu1 %v21281_v41  ;;  %v21341_v41 = vld [vmem:[#allocation8 + $0x1c5c] ss:$24 sps:$4 sm:$0xff]  }
 0x929   : > { %14337 = vmatpush1.bf16.msra.mxu1 %v21279_v19 }
 0x92a   : > { %14338 = vmatprep.subr.bf16.mxu1 %v21287_v32  ;;  %v21195_v32 = vld [vmem:[#allocation8 + $0x1958] ss:$24 sps:$4 sm:$0xff]  }
 0x92d   : > { %14339 = vmatpush1.bf16.msra.mxu1 %v21285_v47 }
 0x92e   : > { %14340 = vmatprep.subr.bf16.mxu1 %v21293_v36  ;;  %v21198_v36 = vld [vmem:[#allocation8 + $0x1928] ss:$24 sps:$4 sm:$0xff]  }
 0x931   : > { %14341 = vmatpush2.bf16.msra.mxu1 %v21291_v37  ;;  %v21201_v37 = vld [vmem:[#allocation8 + $0x18f8] ss:$24 sps:$4 sm:$0xff]  }
 0x932   : > { %14342 = vmatprep.subr.bf16.mxu1 %v21299_v39  ;;  %v21204_v39 = vld [vmem:[#allocation8 + $0x18c8] ss:$24 sps:$4 sm:$0xff]  }
 0x935   : > { %14343 = vmatpush2.bf16.msra.mxu1 %v21297_v25  ;;  %v21207_v25 = vld [vmem:[#allocation8 + $0x1898] ss:$24 sps:$4 sm:$0xff]  }
 0x936   : > { %14344 = vmatprep.subr.bf16.mxu1 %v21305_v15  ;;  %v21213_v15 = vld [vmem:[#allocation8 + $0x1838] ss:$24 sps:$4 sm:$0xff]  }
 0x939   : > { %14345 = vmatpush2.bf16.msra.mxu1 %v21303_v40  ;;  %v21221_v40 = vld [vmem:[#allocation8 + $0x1adc] ss:$24 sps:$4 sm:$0xff]  }
 0x93a   : > { %14346 = vmatprep.subr.bf16.mxu1 %v21311_v24 }
 0x93d   : > { %14347 = vmatpush2.bf16.msra.mxu1 %v21309_v42 }
 0x93e   : > { %14348 = vmatprep.subr.bf16.mxu1 %v21317_v60 }
 0x950   : > { %v12936_v49 = vpop.f32.mrf.mxu1 }
 0x951   : > { %v12937_v55 = vadd.f32 %v12936_v49, %v12896_v38  ;;  %v21206_v38 = vld [vmem:[#allocation8 + $0x18cc] ss:$24 sps:$4 sm:$0xff]  }
 0x952   : > { %v12938_v8 = vpop.f32.mrf.mxu1  ;;  %v22612_v46 = vpop.f32.mrf.mxu0  ;;  %v21212_v49 = vld [vmem:[#allocation8 + $0x186c] ss:$24 sps:$4 sm:$0xff]  }
 0x953   : > { %v12939_v45 = vadd.f32 %v12938_v8, %v12898_v29  ;;  %v12978_v26 = vadd.f32 %v12977_v0, %v12937_v55  ;;  %v21315_v0 = vld [vmem:[#allocation8 + $0x1d10] ss:$24 sps:$4 sm:$0xff]   ;;  %v21209_v29 = vld [vmem:[#allocation8 + $0x189c] ss:$24 sps:$4 sm:$0xff]  }
 0x954   : > { %v12940_v10 = vpop.f32.mrf.mxu1  ;;  %v22614_v6 = vpop.f32.mrf.mxu0  ;;  %14349 = vmatpush2.bf16.msra.mxu1 %v21315_v0  ;;  %v21210_v55 = vld [vmem:[#allocation8 + $0x1868] ss:$24 sps:$4 sm:$0xff]   ;;  %v21215_v8 = vld [vmem:[#allocation8 + $0x183c] ss:$24 sps:$4 sm:$0xff]  }
 0x955   : > { %v13111_v21 = vmul.f32 0.70710677, %v12978_v26  ;;  %v12980_v22 = vadd.f32 %v12979_v5, %v12939_v45  ;;  %14350 = vmatprep.subr.bf16.mxu1 %v21323_v1  ;;  %v21329_v5 = vld [vmem:[#allocation8 + $0x1cb4] ss:$24 sps:$4 sm:$0xff]   ;;  %v13107_v17 = vmul.f32 0.5, %v12978_v26 }
 0x956   : > { %v12941_v52 = vpop.f32.mrf.mxu1  ;;  %v13063_v61 = vpop.f32.mrf.mxu0  ;;  %v21218_v45 = vld [vmem:[#allocation8 + $0x180c] ss:$24 sps:$4 sm:$0xff]   ;;  %v21216_v26 = vld [vmem:[#allocation8 + $0x1808] ss:$24 sps:$4 sm:$0xff]   ;;  %v21219_v10 = vld [vmem:[#allocation8 + $0x1ad8] ss:$24 sps:$4 sm:$0xff]  }
 0x957   : > { %21755 = verf.f32 %v13111_v21  ;;  %v13112_v30 = vmul.f32 0.70710677, %v12980_v22  ;;  %v13108_v12 = vmul.f32 0.5, %v12980_v22  ;;  %v21224_v21 = vld [vmem:[#allocation8 + $0x1aac] ss:$24 sps:$4 sm:$0xff]  }
 0x958   : > { %v13064_v18 = vpop.f32.mrf.mxu0  ;;  %14351 = vmatpush2.bf16.msra.mxu1 %v21321_v2  ;;  %v21222_v22 = vld [vmem:[#allocation8 + $0x1aa8] ss:$24 sps:$4 sm:$0xff]   ;;  %v21227_v61 = vld [vmem:[#allocation8 + $0x1a7c] ss:$24 sps:$4 sm:$0xff]   ;;  %v21231_v2 = vld [vmem:[#allocation8 + $0x1a18] ss:$24 sps:$4 sm:$0xff]  }
 0x959   : > { %21757 = verf.f32 %v13112_v30  ;;  %14352 = vmatprep.subr.bf16.mxu1 %v21329_v5  ;;  %v21225_v30 = vld [vmem:[#allocation8 + $0x1a78] ss:$24 sps:$4 sm:$0xff]   ;;  %v21230_v18 = vld [vmem:[#allocation8 + $0x1a4c] ss:$24 sps:$4 sm:$0xff]   ;;  %v21228_v0 = vld [vmem:[#allocation8 + $0x1a48] ss:$24 sps:$4 sm:$0xff]  }
 0x95a   : > { %v21233_v1 = vld [vmem:[#allocation8 + $0x1a1c] ss:$24 sps:$4 sm:$0xff]   ;;  %v21236_v5 = vld [vmem:[#allocation8 + $0x19ec] ss:$24 sps:$4 sm:$0xff]  }
 0x95c   : > { %14353 = vmatpush2.bf16.msra.mxu1 %v21327_v11  ;;  %v21234_v11 = vld [vmem:[#allocation8 + $0x19e8] ss:$24 sps:$4 sm:$0xff]  }
 0x95d   : > { %14354 = vmatprep.subr.bf16.mxu1 %v21335_v51  ;;  %v21248_v51 = vld [vmem:[#allocation8 + $0x1964] ss:$24 sps:$4 sm:$0xff]  }
 0x960   : > { %14355 = vmatpush2.bf16.msra.mxu1 %v21333_v23  ;;  %v21252_v23 = vld [vmem:[#allocation8 + $0x1930] ss:$24 sps:$4 sm:$0xff]  }
 0x961   : > { %14406 = vmatprep.subr.bf16.mxu1 %v21341_v41  ;;  %v21266_v41 = vld [vmem:[#allocation8 + $0x18d4] ss:$24 sps:$4 sm:$0xff]  }
 0x964   : > { %v21756_v62 = vpop.eup %21755 }
 0x965   : > { %v13119_v35 = vadd.f32 1.0, %v21756_v62  ;;  %v21239_v62 = vld [vmem:[#allocation8 + $0x19bc] ss:$24 sps:$4 sm:$0xff]  }
 0x966   : > { %v21758_v57 = vpop.eup %21757 }
 0x967   : > { %v13120_v43 = vadd.f32 1.0, %v21758_v57  ;;  %v13123_v27 = vmul.f32 %v13119_v35, %v13107_v17  ;;  %v21237_v35 = vld [vmem:[#allocation8 + $0x19b8] ss:$24 sps:$4 sm:$0xff]   ;;  %v21242_v57 = vld [vmem:[#allocation8 + $0x198c] ss:$24 sps:$4 sm:$0xff]  }
 0x968   : > { %v21240_v17 = vld [vmem:[#allocation8 + $0x1988] ss:$24 sps:$4 sm:$0xff]  }
 0x969   : > { %v13124_v56 = vmul.f32 %v13120_v43, %v13108_v12  ;;  %v22618_v47 = vpack.c.bf16 %v13123_v27, %v13123_v27  ;;  %v21246_v12 = vld [vmem:[#allocation8 + $0x1960] ss:$24 sps:$4 sm:$0xff]   ;;  %v21254_v43 = vld [vmem:[#allocation8 + $0x1934] ss:$24 sps:$4 sm:$0xff]   ;;  %v21260_v27 = vld [vmem:[#allocation8 + $0x1904] ss:$24 sps:$4 sm:$0xff]  }
 0x96b   : > { %v22616_v19 = vpack.c.bf16 %v13124_v56, %v13124_v56  ;;  %v21258_v56 = vld [vmem:[#allocation8 + $0x1900] ss:$24 sps:$4 sm:$0xff]  }
 0x96d   : > { %14315 = vmatprep.mubr.bf16.mxu0 %v22616_v19 }
 0x96e   : > { %14316 = vmatmul.mubr.bf16.vlgmr.msra.gmra.mxu0 %v22618_v47 }
 0x96f   : > { %14366 = vmatpush1.bf16.msra.mxu0 %v21195_v32  ;;  %14397 = vmatprep.mubr.bf16.mxu0 %v22616_v19  ;;  %v21264_v32 = vld [vmem:[#allocation8 + $0x18d0] ss:$24 sps:$4 sm:$0xff]  }
 0x970   : > { %14367 = vmatprep.subr.bf16.mxu0 %v21200_v48  ;;  %v21272_v48 = vld [vmem:[#allocation8 + $0x18a4] ss:$24 sps:$4 sm:$0xff]  }
 0x973   : > { %14368 = vmatpush1.bf16.msra.mxu0 %v21198_v36  ;;  %v21270_v36 = vld [vmem:[#allocation8 + $0x18a0] ss:$24 sps:$4 sm:$0xff]  }
 0x974   : > { %14369 = vmatprep.subr.bf16.mxu0 %v21203_v3  ;;  %v21278_v3 = vld [vmem:[#allocation8 + $0x1874] ss:$24 sps:$4 sm:$0xff]  }
 0x977   : > { %14370 = vmatpush1.bf16.msra.mxu0 %v21201_v37  ;;  %v21276_v37 = vld [vmem:[#allocation8 + $0x1870] ss:$24 sps:$4 sm:$0xff]  }
 0x978   : > { %14371 = vmatprep.subr.bf16.mxu0 %v21206_v38  ;;  %v21284_v38 = vld [vmem:[#allocation8 + $0x1844] ss:$24 sps:$4 sm:$0xff]  }
 0x97b   : > { %14372 = vmatpush1.bf16.msra.mxu0 %v21204_v39  ;;  %v21290_v39 = vld [vmem:[#allocation8 + $0x1814] ss:$24 sps:$4 sm:$0xff]  }
 0x97c   : > { %14373 = vmatprep.subr.bf16.mxu0 %v21209_v29  ;;  %v11892_v29 = vrot.slane %v22604_v50, %v22257_v4 }
 0x97f   : > { %14374 = vmatpush1.bf16.msra.mxu0 %v21207_v25  ;;  %v21288_v25 = vld [vmem:[#allocation8 + $0x1810] ss:$24 sps:$4 sm:$0xff]  }
 0x980   : > { %14375 = vmatprep.subr.bf16.mxu0 %v21212_v49  ;;  %v21296_v49 = vld [vmem:[#allocation8 + $0x1ae4] ss:$24 sps:$4 sm:$0xff]  }
 0x983   : > { %14376 = vmatpush1.bf16.msra.mxu0 %v21210_v55  ;;  %v11896_v55 = vrot.slane %v22604_v50, %v22260_v7 }
 0x984   : > { %14377 = vmatprep.subr.bf16.mxu0 %v21215_v8 }
 0x987   : > { %14378 = vmatpush1.bf16.msra.mxu0 %v21213_v15  ;;  %v21294_v15 = vld [vmem:[#allocation8 + $0x1ae0] ss:$24 sps:$4 sm:$0xff]  }
 0x988   : > { %14379 = vmatprep.subr.bf16.mxu0 %v21218_v45  ;;  %v21302_v45 = vld [vmem:[#allocation8 + $0x1ab4] ss:$24 sps:$4 sm:$0xff]  }
 0x98b   : > { %14380 = vmatpush1.bf16.msra.mxu0 %v21216_v26 }
 0x98c   : > { %14381 = vmatprep.subr.bf16.mxu0 %v21221_v40 }
 0x98f   : > { %14382 = vmatpush2.bf16.msra.mxu0 %v21219_v10  ;;  %v21300_v10 = vld [vmem:[#allocation8 + $0x1ab0] ss:$24 sps:$4 sm:$0xff]  }
 0x990   : > { %v22623_v52 = vpop.f32.mrf.mxu1  ;;  %14383 = vmatprep.subr.bf16.mxu0 %v21224_v21 }
 0x991   : > { %v13019_v8 = vadd.f32 %v22623_v52, %v11892_v29  ;;  %v21306_v52 = vld [vmem:[#allocation8 + $0x1a80] ss:$24 sps:$4 sm:$0xff]  }
 0x992   : > { %v22625_v24 = vpop.f32.mrf.mxu1 }
 0x993   : > { %14384 = vmatpush2.bf16.msra.mxu0 %v21222_v22  ;;  %v13021_v26 = vadd.f32 %v22625_v24, %v11896_v55  ;;  %v13060_v40 = vadd.f32 %v22612_v46, %v13019_v8  ;;  %v21308_v22 = vld [vmem:[#allocation8 + $0x1a84] ss:$24 sps:$4 sm:$0xff]   ;;  %v21312_v46 = vld [vmem:[#allocation8 + $0x1a50] ss:$24 sps:$4 sm:$0xff]  }
 0x994   : > { %v13022_v42 = vpop.f32.mrf.mxu1  ;;  %14385 = vmatprep.subr.bf16.mxu0 %v21227_v61  ;;  %v21342_v8 = vld [vmem:[#allocation8 + $0x1c28] ss:$24 sps:$4 sm:$0xff]  }
 0x995   : > { %v13062_v61 = vadd.f32 %v22614_v6, %v13021_v26  ;;  %v21326_v6 = vld [vmem:[#allocation8 + $0x19f4] ss:$24 sps:$4 sm:$0xff]  }
 0x996   : > { %v13023_v60 = vpop.f32.mrf.mxu1  ;;  %v21347_v26 = vld [vmem:[#allocation8 + $0x1bfc] ss:$24 sps:$4 sm:$0xff]  }
 0x997   : > { %14386 = vmatpush2.bf16.msra.mxu0 %v21225_v30 }
 0x998   : > { %14387 = vmatprep.subr.bf16.mxu0 %v21230_v18 }
 0x99b   : > { %14388 = vmatpush2.bf16.msra.mxu0 %v21228_v0  ;;  %v21314_v0 = vld [vmem:[#allocation8 + $0x1a54] ss:$24 sps:$4 sm:$0xff]  }
 0x99c   : > { %14389 = vmatprep.subr.bf16.mxu0 %v21233_v1 }
 0x99f   : > { %14390 = vmatpush2.bf16.msra.mxu0 %v21231_v2  ;;  %v21320_v2 = vld [vmem:[#allocation8 + $0x1a24] ss:$24 sps:$4 sm:$0xff]  }
 0x9a0   : > { %14391 = vmatprep.subr.bf16.mxu0 %v21236_v5  ;;  %v21318_v5 = vld [vmem:[#allocation8 + $0x1a20] ss:$24 sps:$4 sm:$0xff]  }
 0x9a3   : > { %14392 = vmatpush2.bf16.msra.mxu0 %v21234_v11  ;;  %v21324_v11 = vld [vmem:[#allocation8 + $0x19f0] ss:$24 sps:$4 sm:$0xff]  }
 0x9a4   : > { %14393 = vmatprep.subr.bf16.mxu0 %v21239_v62  ;;  %v21332_v62 = vld [vmem:[#allocation8 + $0x19c4] ss:$24 sps:$4 sm:$0xff]  }
 0x9a7   : > { %14394 = vmatpush2.bf16.msra.mxu0 %v21237_v35 }
 0x9a8   : > { %14395 = vmatprep.subr.bf16.mxu0 %v21242_v57 }
 0x9ab   : > { %14396 = vmatpush2.bf16.msra.mxu0 %v21240_v17  ;;  %v21330_v17 = vld [vmem:[#allocation8 + $0x19c0] ss:$24 sps:$4 sm:$0xff]  }
 0x9ac   : > { %14447 = vmatprep.subr.bf16.mxu0 %v21248_v51 }
 0x9ae   : > { %14398 = vmatmul.mubr.bf16.vlgmr.msra.gmra.mxu0 %v22618_v47 }
 0x9af   : > { %14448 = vmatpush1.bf16.msra.mxu0 %v21246_v12  ;;  %14479 = vmatprep.mubr.bf16.mxu0 %v22616_v19  ;;  %v21282_v19 = vld [vmem:[#allocation8 + $0x1840] ss:$24 sps:$4 sm:$0xff]  }
 0x9b0   : > { %14449 = vmatprep.subr.bf16.mxu0 %v21254_v43  ;;  %v21338_v43 = vld [vmem:[#allocation8 + $0x1994] ss:$24 sps:$4 sm:$0xff]  }
 0x9b3   : > { %14450 = vmatpush1.bf16.msra.mxu0 %v21252_v23 }
 0x9b4   : > { %14451 = vmatprep.subr.bf16.mxu0 %v21260_v27 }
 0x9b7   : > { %14452 = vmatpush1.bf16.msra.mxu0 %v21258_v56  ;;  %v14563_v56 = vld [vmem:[#allocation5 + $0x590] sm:$0xff] }
 0x9b8   : > { %14453 = vmatprep.subr.bf16.mxu0 %v21266_v41  ;;  %v14565_v41 = vld [vmem:[#allocation5 + $0x5f0] sm:$0xff] }
 0x9bb   : > { %14454 = vmatpush1.bf16.msra.mxu0 %v21264_v32 }
 0x9bc   : > { %14455 = vmatprep.subr.bf16.mxu0 %v21272_v48  ;;  %v21336_v48 = vld [vmem:[#allocation8 + $0x1990] ss:$24 sps:$4 sm:$0xff]  }
 0x9bf   : > { %14456 = vmatpush1.bf16.msra.mxu0 %v21270_v36 }
 0x9c0   : > { %14457 = vmatprep.subr.bf16.mxu0 %v21278_v3  ;;  %v19542_v3 = vcombine.high %v14563_v56, %v14565_v41 }
 0x9c3   : > { %14458 = vmatpush1.bf16.msra.mxu0 %v21276_v37 }
 0x9c4   : > { %14459 = vmatprep.subr.bf16.mxu0 %v21284_v38  ;;  %v21339_v38 = vld [vmem:[#allocation8 + $0x1c58] ss:$24 sps:$4 sm:$0xff]  }
 0x9c7   : > { %14460 = vmatpush1.bf16.msra.mxu0 %v21282_v19  ;;  %v14559_v19 = vld [vmem:[#allocation5 + $0x4d0] sm:$0xff] }
 0x9c8   : > { %14461 = vmatprep.subr.bf16.mxu0 %v21290_v39  ;;  %v14561_v39 = vld [vmem:[#allocation5 + $0x530] sm:$0xff] }
 0x9c9   : > { %v19538_v55 = vcombine.high %v14559_v19, %v14561_v39 }
 0x9cb   : > { %14462 = vmatpush1.bf16.msra.mxu0 %v21288_v25  ;;  %v21344_v25 = vld [vmem:[#allocation8 + $0x1c2c] ss:$24 sps:$4 sm:$0xff]  }
 0x9cc   : > { %14463 = vmatprep.subr.bf16.mxu0 %v21296_v49  ;;  %v19541_v49 = vcombine.low %v14563_v56, %v14565_v41  ;;  %v21362_v56 = vld [vmem:[#allocation8 + $0x1b0c] ss:$24 sps:$4 sm:$0xff]  }
 0x9cf   : > { %14464 = vmatpush2.bf16.msra.mxu0 %v21294_v15  ;;  %v14555_v15 = vld [vmem:[#allocation5 + $0x410] sm:$0xff] }
 0x9d0   : > { %v13100_v21 = vpop.f32.mrf.mxu1  ;;  %14465 = vmatprep.subr.bf16.mxu0 %v21302_v45  ;;  %v14557_v45 = vld [vmem:[#allocation5 + $0x470] sm:$0xff] }
 0x9d1   : > { %v13101_v30 = vadd.f32 %v13100_v21, %v13060_v40  ;;  %v19537_v40 = vcombine.low %v14559_v19, %v14561_v39  ;;  %v21345_v21 = vld [vmem:[#allocation8 + $0x1bf8] ss:$24 sps:$4 sm:$0xff]  }
 0x9d2   : > { %v13102_v42 = vpop.f32.mrf.mxu1 }
 0x9d3   : > { %v13113_v50 = vmul.f32 0.70710677, %v13101_v30  ;;  %v13103_v18 = vadd.f32 %v13102_v42, %v13062_v61  ;;  %14466 = vmatpush2.bf16.msra.mxu0 %v21300_v10  ;;  %v13109_v12 = vmul.f32 0.5, %v13101_v30  ;;  %v19534_v10 = vcombine.high %v14555_v15, %v14557_v45  ;;  %v14553_v61 = vld [vmem:[#allocation5 + $0x3b0] sm:$0xff]  ;;  %v21350_v30 = vld [vmem:[#allocation8 + $0x1bcc] ss:$24 sps:$4 sm:$0xff]  }
 0x9d4   : > { %v13104_v60 = vpop.f32.mrf.mxu1  ;;  %14467 = vmatprep.subr.bf16.mxu0 %v21308_v22  ;;  %v14551_v22 = vld [vmem:[#allocation5 + $0x350] sm:$0xff]  ;;  %v19533_v42 = vcombine.low %v14555_v15, %v14557_v45 }
 0x9d5   : > { %21759 = verf.f32 %v13113_v50  ;;  %v13114_v24 = vmul.f32 0.70710677, %v13103_v18  ;;  %v13110_v23 = vmul.f32 0.5, %v13103_v18  ;;  %v19530_v50 = vcombine.high %v14551_v22, %v14553_v61  ;;  %v14547_v18 = vld [vmem:[#allocation5 + $0x290] sm:$0xff] }
 0x9d6   : > { %v13105_v1 = vpop.f32.mrf.mxu1  ;;  %v21353_v60 = vld [vmem:[#allocation8 + $0x1b9c] ss:$24 sps:$4 sm:$0xff]  }
 0x9d7   : > { %21761 = verf.f32 %v13114_v24  ;;  %14468 = vmatpush2.bf16.msra.mxu0 %v21306_v52  ;;  %v14549_v52 = vld [vmem:[#allocation5 + $0x2f0] sm:$0xff] }
 0x9d8   : > { %14469 = vmatprep.subr.bf16.mxu0 %v21314_v0  ;;  %v19529_v0 = vcombine.low %v14551_v22, %v14553_v61  ;;  %v19526_v24 = vcombine.high %v14547_v18, %v14549_v52  ;;  %v21351_v1 = vld [vmem:[#allocation8 + $0x1b98] ss:$24 sps:$4 sm:$0xff]  }
 0x9db   : > { %14470 = vmatpush2.bf16.msra.mxu0 %v21312_v46  ;;  %v14543_v46 = vld [vmem:[#allocation5 + $0x1d0] sm:$0xff] }
 0x9dc   : > { %14471 = vmatprep.subr.bf16.mxu0 %v21320_v2  ;;  %v14545_v2 = vld [vmem:[#allocation5 + $0x230] sm:$0xff] }
 0x9df   : > { %14472 = vmatpush2.bf16.msra.mxu0 %v21318_v5  ;;  %v21356_v5 = vld [vmem:[#allocation8 + $0x1b6c] ss:$24 sps:$4 sm:$0xff]  }
 0x9e0   : > { %14473 = vmatprep.subr.bf16.mxu0 %v21326_v6  ;;  %v19525_v6 = vcombine.low %v14547_v18, %v14549_v52 }
 0x9e2   : > { %v21760_v35 = vpop.eup %21759 }
 0x9e3   : > { %v13121_v57 = vadd.f32 1.0, %v21760_v35  ;;  %14474 = vmatpush2.bf16.msra.mxu0 %v21324_v11  ;;  %v19522_v11 = vcombine.high %v14543_v46, %v14545_v2  ;;  %v14539_v35 = vld [vmem:[#allocation5 + $0x110] sm:$0xff] }
 0x9e4   : > { %v21762_v51 = vpop.eup %21761  ;;  %14475 = vmatprep.subr.bf16.mxu0 %v21332_v62  ;;  %v21354_v62 = vld [vmem:[#allocation8 + $0x1b68] ss:$24 sps:$4 sm:$0xff]  }
 0x9e5   : > { %v13122_v27 = vadd.f32 1.0, %v21762_v51  ;;  %v13125_v32 = vmul.f32 %v13121_v57, %v13109_v12  ;;  %v14541_v57 = vld [vmem:[#allocation5 + $0x170] sm:$0xff]  ;;  %v19521_v51 = vcombine.low %v14543_v46, %v14545_v2 }
 0x9e6   : > { %v19518_v12 = vcombine.high %v14539_v35, %v14541_v57  ;;  %v19517_v41 = vcombine.low %v14539_v35, %v14541_v57 }
 0x9e7   : > { %14476 = vmatpush2.bf16.msra.mxu0 %v21330_v17  ;;  %v13126_v36 = vmul.f32 %v13122_v27, %v13110_v23  ;;  %v22639_v29 = vpack.c.bf16 %v13125_v32, %v13125_v32  ;;  %v21359_v17 = vld [vmem:[#allocation8 + $0x1b3c] ss:$24 sps:$4 sm:$0xff]  }
 0x9e8   : > { %14477 = vmatprep.subr.bf16.mxu0 %v21338_v43  ;;  %v21357_v43 = vld [vmem:[#allocation8 + $0x1b38] ss:$24 sps:$4 sm:$0xff]  }
 0x9e9   : > { %v22637_v37 = vpack.c.bf16 %v13126_v36, %v13126_v36  ;;  %v14535_v23 = vld [vmem:[#allocation5 + $0x50] sm:$0xff] }
 0x9ea   : > { %v14537_v27 = vld [vmem:[#allocation5 + $0xb0] sm:$0xff] }
 0x9eb   : > { %14478 = vmatpush2.bf16.msra.mxu0 %v21336_v48  ;;  %14356 = vmatprep.mubr.bf16.mxu1 %v22637_v37  ;;  %v19514_v32 = vcombine.high %v14535_v23, %v14537_v27  ;;  %v21360_v48 = vld [vmem:[#allocation8 + $0x1b08] ss:$24 sps:$4 sm:$0xff]   ;;  %v14595_v36 = vld [vmem:[#allocation5 + $0xb90] sm:$0xff]  ;;  %v19513_v19 = vcombine.low %v14535_v23, %v14537_v27 }
 0x9ec   : > { %14357 = vmatmul.mubr.bf16.vlgmr.msra.gmra.mxu1 %v22639_v29  ;;  %15709 = vmatprep.subr.bf16.mxu0 %v19542_v3  ;;  %v14597_v3 = vld [vmem:[#allocation5 + $0xbf0] sm:$0xff] }
 0x9ed   : > { %14407 = vmatpush1.bf16.msra.mxu1 %v21339_v38  ;;  %14438 = vmatprep.mubr.bf16.mxu1 %v22637_v37  ;;  %v21365_v38 = vld [vmem:[#allocation8 + $0x1ddc] ss:$24 sps:$4 sm:$0xff]   ;;  %v19574_v39 = vcombine.high %v14595_v36, %v14597_v3  ;;  %v19573_v15 = vcombine.low %v14595_v36, %v14597_v3 }
 0x9ee   : > { %14480 = vmatmul.mubr.bf16.vlgmr.msra.gmra.mxu0 %v22618_v47  ;;  %14408 = vmatprep.subr.bf16.mxu1 %v21344_v25  ;;  %v21348_v47 = vld [vmem:[#allocation8 + $0x1bc8] ss:$24 sps:$4 sm:$0xff]   ;;  %v21363_v25 = vld [vmem:[#allocation8 + $0x1dd8] ss:$24 sps:$4 sm:$0xff]  }
 0x9ef   : > { %15710 = vmatpush1.bf16.msra.mxu0 %v19541_v49  ;;  %15741 = vmatprep.mubr.bf16.mxu0 %v22194_v58  ;;  %v14591_v49 = vld [vmem:[#allocation5 + $0xad0] sm:$0xff] }
 0x9f0   : > { %15711 = vmatprep.subr.bf16.mxu0 %v19538_v55  ;;  %v14593_v55 = vld [vmem:[#allocation5 + $0xb30] sm:$0xff] }
 0x9f1   : > { %14409 = vmatpush1.bf16.msra.mxu1 %v21342_v8  ;;  %v21368_v8 = vld [vmem:[#allocation8 + $0x1dac] ss:$24 sps:$4 sm:$0xff]   ;;  %v19570_v45 = vcombine.high %v14591_v49, %v14593_v55  ;;  %v19569_v22 = vcombine.low %v14591_v49, %v14593_v55 }
 0x9f2   : > { %14410 = vmatprep.subr.bf16.mxu1 %v21347_v26  ;;  %v21366_v26 = vld [vmem:[#allocation8 + $0x1da8] ss:$24 sps:$4 sm:$0xff]  }
 0x9f3   : > { %15712 = vmatpush1.bf16.msra.mxu0 %v19537_v40  ;;  %v14587_v40 = vld [vmem:[#allocation5 + $0xa10] sm:$0xff] }
 0x9f4   : > { %15713 = vmatprep.subr.bf16.mxu0 %v19534_v10  ;;  %v14589_v10 = vld [vmem:[#allocation5 + $0xa70] sm:$0xff] }
 0x9f5   : > { %14411 = vmatpush1.bf16.msra.mxu1 %v21345_v21  ;;  %v21371_v21 = vld [vmem:[#allocation8 + $0x1d7c] ss:$24 sps:$4 sm:$0xff]   ;;  %v19566_v61 = vcombine.high %v14587_v40, %v14589_v10  ;;  %v19565_v18 = vcombine.low %v14587_v40, %v14589_v10 }
 0x9f6   : > { %14412 = vmatprep.subr.bf16.mxu1 %v21350_v30  ;;  %v21369_v30 = vld [vmem:[#allocation8 + $0x1d78] ss:$24 sps:$4 sm:$0xff]  }
 0x9f7   : > { %15714 = vmatpush1.bf16.msra.mxu0 %v19533_v42  ;;  %v14583_v42 = vld [vmem:[#allocation5 + $0x950] sm:$0xff] }
 0x9f8   : > { %15715 = vmatprep.subr.bf16.mxu0 %v19530_v50  ;;  %v14585_v50 = vld [vmem:[#allocation5 + $0x9b0] sm:$0xff] }
 0x9f9   : > { %14413 = vmatpush1.bf16.msra.mxu1 %v21348_v47  ;;  %v21374_v47 = vld [vmem:[#allocation8 + $0x1d4c] ss:$24 sps:$4 sm:$0xff]   ;;  %v19562_v52 = vcombine.high %v14583_v42, %v14585_v50  ;;  %v19561_v46 = vcombine.low %v14583_v42, %v14585_v50 }
 0x9fa   : > { %14414 = vmatprep.subr.bf16.mxu1 %v21353_v60  ;;  %v21372_v60 = vld [vmem:[#allocation8 + $0x1d48] ss:$24 sps:$4 sm:$0xff]   ;;  %v21395_v42 = vld [vmem:[#allocation8 + $0x1c04] ss:$24 sps:$4 sm:$0xff]  }
 0x9fb   : > { %15716 = vmatpush1.bf16.msra.mxu0 %v19529_v0  ;;  %v14579_v0 = vld [vmem:[#allocation5 + $0x890] sm:$0xff] }
 0x9fc   : > { %15717 = vmatprep.subr.bf16.mxu0 %v19526_v24  ;;  %v14581_v24 = vld [vmem:[#allocation5 + $0x8f0] sm:$0xff] }
 0x9fd   : > { %14415 = vmatpush1.bf16.msra.mxu1 %v21351_v1  ;;  %v21377_v1 = vld [vmem:[#allocation8 + $0x1d1c] ss:$24 sps:$4 sm:$0xff]   ;;  %v19558_v2 = vcombine.high %v14579_v0, %v14581_v24  ;;  %v19557_v35 = vcombine.low %v14579_v0, %v14581_v24 }
 0x9fe   : > { %14416 = vmatprep.subr.bf16.mxu1 %v21356_v5  ;;  %v21375_v5 = vld [vmem:[#allocation8 + $0x1d18] ss:$24 sps:$4 sm:$0xff]   ;;  %v21398_v24 = vld [vmem:[#allocation8 + $0x1bd4] ss:$24 sps:$4 sm:$0xff]  }
 0x9ff   : > { %15718 = vmatpush1.bf16.msra.mxu0 %v19525_v6  ;;  %v14575_v6 = vld [vmem:[#allocation5 + $0x7d0] sm:$0xff] }
 0xa00   : > { %15719 = vmatprep.subr.bf16.mxu0 %v19522_v11  ;;  %v14577_v11 = vld [vmem:[#allocation5 + $0x830] sm:$0xff] }
 0xa01   : > { %14417 = vmatpush1.bf16.msra.mxu1 %v21354_v62  ;;  %v21380_v62 = vld [vmem:[#allocation8 + $0x1cec] ss:$24 sps:$4 sm:$0xff]   ;;  %v19554_v57 = vcombine.high %v14575_v6, %v14577_v11  ;;  %v19553_v23 = vcombine.low %v14575_v6, %v14577_v11  ;;  %v14675_v6 = vld [vmem:[#allocation5 + $0x1a90] sm:$0xff] }
 0xa02   : > { %14418 = vmatprep.subr.bf16.mxu1 %v21359_v17  ;;  %v21378_v17 = vld [vmem:[#allocation8 + $0x1ce8] ss:$24 sps:$4 sm:$0xff]   ;;  %v14677_v11 = vld [vmem:[#allocation5 + $0x1af0] sm:$0xff] }
 0xa03   : > { %15720 = vmatpush1.bf16.msra.mxu0 %v19521_v51  ;;  %v14571_v51 = vld [vmem:[#allocation5 + $0x710] sm:$0xff] }
 0xa04   : > { %15721 = vmatprep.subr.bf16.mxu0 %v19518_v12  ;;  %v14573_v12 = vld [vmem:[#allocation5 + $0x770] sm:$0xff] }
 0xa05   : > { %14419 = vmatpush1.bf16.msra.mxu1 %v21357_v43  ;;  %v21383_v43 = vld [vmem:[#allocation8 + $0x1cbc] ss:$24 sps:$4 sm:$0xff]   ;;  %v19550_v27 = vcombine.high %v14571_v51, %v14573_v12  ;;  %v19549_v36 = vcombine.low %v14571_v51, %v14573_v12 }
 0xa06   : > { %14420 = vmatprep.subr.bf16.mxu1 %v21362_v56  ;;  %v21381_v56 = vld [vmem:[#allocation8 + $0x1cb8] ss:$24 sps:$4 sm:$0xff]  }
 0xa07   : > { %15722 = vmatpush1.bf16.msra.mxu0 %v19517_v41  ;;  %v14567_v41 = vld [vmem:[#allocation5 + $0x650] sm:$0xff] }
 0xa08   : > { %15723 = vmatprep.subr.bf16.mxu0 %v19514_v32  ;;  %v14569_v32 = vld [vmem:[#allocation5 + $0x6b0] sm:$0xff] }
 0xa09   : > { %14421 = vmatpush1.bf16.msra.mxu1 %v21360_v48  ;;  %v21386_v48 = vld [vmem:[#allocation8 + $0x1c8c] ss:$24 sps:$4 sm:$0xff]   ;;  %v19546_v3 = vcombine.high %v14567_v41, %v14569_v32  ;;  %v19545_v49 = vcombine.low %v14567_v41, %v14569_v32  ;;  %v14671_v51 = vld [vmem:[#allocation5 + $0x19d0] sm:$0xff] }
 0xa0a   : > { %14422 = vmatprep.subr.bf16.mxu1 %v21365_v38  ;;  %v21384_v38 = vld [vmem:[#allocation8 + $0x1c88] ss:$24 sps:$4 sm:$0xff]   ;;  %v14673_v12 = vld [vmem:[#allocation5 + $0x1a30] sm:$0xff] }
 0xa0b   : > { %15724 = vmatpush1.bf16.msra.mxu0 %v19513_v19  ;;  %v14691_v19 = vld [vmem:[#allocation5 + $0x1d90] sm:$0xff] }
 0xa0c   : > { %15725 = vmatprep.subr.bf16.mxu0 %v19574_v39  ;;  %v14693_v39 = vld [vmem:[#allocation5 + $0x1df0] sm:$0xff] }
 0xa0d   : > { %14423 = vmatpush2.bf16.msra.mxu1 %v21363_v25  ;;  %v21389_v25 = vld [vmem:[#allocation8 + $0x1c64] ss:$24 sps:$4 sm:$0xff]   ;;  %v19670_v55 = vcombine.high %v14691_v19, %v14693_v39  ;;  %v19669_v40 = vcombine.low %v14691_v19, %v14693_v39 }
 0xa0e   : > { %14424 = vmatprep.subr.bf16.mxu1 %v21368_v8  ;;  %v21387_v8 = vld [vmem:[#allocation8 + $0x1c60] ss:$24 sps:$4 sm:$0xff]  }
 0xa0f   : > { %15726 = vmatpush2.bf16.msra.mxu0 %v19573_v15  ;;  %v14687_v15 = vld [vmem:[#allocation5 + $0x1cd0] sm:$0xff] }
 0xa10   : > { %15727 = vmatprep.subr.bf16.mxu0 %v19570_v45  ;;  %v14689_v45 = vld [vmem:[#allocation5 + $0x1d30] sm:$0xff] }
 0xa11   : > { %14425 = vmatpush2.bf16.msra.mxu1 %v21366_v26  ;;  %v21392_v26 = vld [vmem:[#allocation8 + $0x1c34] ss:$24 sps:$4 sm:$0xff]   ;;  %v19666_v10 = vcombine.high %v14687_v15, %v14689_v45  ;;  %v19665_v50 = vcombine.low %v14687_v15, %v14689_v45  ;;  %v14667_v41 = vld [vmem:[#allocation5 + $0x1910] sm:$0xff] }
 0xa12   : > { %14426 = vmatprep.subr.bf16.mxu1 %v21371_v21  ;;  %v21390_v21 = vld [vmem:[#allocation8 + $0x1c30] ss:$24 sps:$4 sm:$0xff]   ;;  %v14669_v32 = vld [vmem:[#allocation5 + $0x1970] sm:$0xff] }
 0xa13   : > { %15728 = vmatpush2.bf16.msra.mxu0 %v19569_v22  ;;  %v14683_v22 = vld [vmem:[#allocation5 + $0x1c10] sm:$0xff] }
 0xa14   : > { %15729 = vmatprep.subr.bf16.mxu0 %v19566_v61  ;;  %v14685_v61 = vld [vmem:[#allocation5 + $0x1c70] sm:$0xff] }
 0xa15   : > { %14427 = vmatpush2.bf16.msra.mxu1 %v21369_v30  ;;  %v14663_v19 = vld [vmem:[#allocation5 + $0x1850] sm:$0xff] }
 0xa16   : > { %14428 = vmatprep.subr.bf16.mxu1 %v21374_v47  ;;  %v14665_v39 = vld [vmem:[#allocation5 + $0x18b0] sm:$0xff] }
 0xa17   : > { %15730 = vmatpush2.bf16.msra.mxu0 %v19565_v18  ;;  %v19662_v18 = vcombine.high %v14683_v22, %v14685_v61  ;;  %v14723_v15 = vld [vmem:[#allocation5 + $0x2390] sm:$0xff] }
 0xa18   : > { %15731 = vmatprep.subr.bf16.mxu0 %v19562_v52  ;;  %v21393_v52 = vld [vmem:[#allocation8 + $0x1c00] ss:$24 sps:$4 sm:$0xff]  }
 0xa19   : > { %14429 = vmatpush2.bf16.msra.mxu1 %v21372_v60  ;;  %v14681_v60 = vld [vmem:[#allocation5 + $0x1bb0] sm:$0xff] }
 0xa1a   : > { %14430 = vmatprep.subr.bf16.mxu1 %v21377_v1  ;;  %v19661_v1 = vcombine.low %v14683_v22, %v14685_v61  ;;  %v14725_v45 = vld [vmem:[#allocation5 + $0x23f0] sm:$0xff] }
 0xa1b   : > { %15732 = vmatpush2.bf16.msra.mxu0 %v19561_v46  ;;  %v14719_v22 = vld [vmem:[#allocation5 + $0x22d0] sm:$0xff] }
 0xa1c   : > { %15733 = vmatprep.subr.bf16.mxu0 %v19558_v2  ;;  %v14721_v61 = vld [vmem:[#allocation5 + $0x2330] sm:$0xff] }
 0xa1d   : > { %14431 = vmatpush2.bf16.msra.mxu1 %v21375_v5  ;;  %v21396_v5 = vld [vmem:[#allocation8 + $0x1bd0] ss:$24 sps:$4 sm:$0xff]  }
 0xa1e   : > { %14432 = vmatprep.subr.bf16.mxu1 %v21380_v62  ;;  %v21401_v62 = vld [vmem:[#allocation8 + $0x1ba4] ss:$24 sps:$4 sm:$0xff]  }
 0xa1f   : > { %15734 = vmatpush2.bf16.msra.mxu0 %v19557_v35 }
 0xa20   : > { %15735 = vmatprep.subr.bf16.mxu0 %v19554_v57  ;;  %v19654_v57 = vcombine.high %v14675_v6, %v14677_v11 }
 0xa21   : > { %14433 = vmatpush2.bf16.msra.mxu1 %v21378_v17  ;;  %v21399_v17 = vld [vmem:[#allocation8 + $0x1ba0] ss:$24 sps:$4 sm:$0xff]  }
 0xa22   : > { %14434 = vmatprep.subr.bf16.mxu1 %v21383_v43  ;;  %v21404_v43 = vld [vmem:[#allocation8 + $0x1b74] ss:$24 sps:$4 sm:$0xff]  }
 0xa23   : > { %15736 = vmatpush2.bf16.msra.mxu0 %v19553_v23  ;;  %v19653_v23 = vcombine.low %v14675_v6, %v14677_v11  ;;  %v21422_v6 = vld [vmem:[#allocation8 + $0x1d54] ss:$24 sps:$4 sm:$0xff]  }
 0xa24   : > { %15737 = vmatprep.subr.bf16.mxu0 %v19550_v27  ;;  %v19650_v27 = vcombine.high %v14671_v51, %v14673_v12 }
 0xa25   : > { %14435 = vmatpush2.bf16.msra.mxu1 %v21381_v56  ;;  %v21402_v56 = vld [vmem:[#allocation8 + $0x1b70] ss:$24 sps:$4 sm:$0xff]  }
 0xa26   : > { %14436 = vmatprep.subr.bf16.mxu1 %v21386_v48  ;;  %v21407_v48 = vld [vmem:[#allocation8 + $0x1b44] ss:$24 sps:$4 sm:$0xff]  }
 0xa27   : > { %15738 = vmatpush2.bf16.msra.mxu0 %v19549_v36  ;;  %v19649_v36 = vcombine.low %v14671_v51, %v14673_v12  ;;  %v21425_v51 = vld [vmem:[#allocation8 + $0x1d24] ss:$24 sps:$4 sm:$0xff]  }
 0xa28   : > { %15739 = vmatprep.subr.bf16.mxu0 %v19546_v3  ;;  %v19646_v3 = vcombine.high %v14667_v41, %v14669_v32 }
 0xa29   : > { %14437 = vmatpush2.bf16.msra.mxu1 %v21384_v38  ;;  %v21405_v38 = vld [vmem:[#allocation8 + $0x1b40] ss:$24 sps:$4 sm:$0xff]  }
 0xa2a   : > { %14488 = vmatprep.subr.bf16.mxu1 %v21389_v25  ;;  %v21410_v25 = vld [vmem:[#allocation8 + $0x1b14] ss:$24 sps:$4 sm:$0xff]  }
 0xa2b   : > { %15740 = vmatpush2.bf16.msra.mxu0 %v19545_v49  ;;  %v19645_v49 = vcombine.low %v14667_v41, %v14669_v32  ;;  %v21428_v41 = vld [vmem:[#allocation8 + $0x1cf4] ss:$24 sps:$4 sm:$0xff]  }
 0xa2c   : > { %14439 = vmatmul.mubr.bf16.vlgmr.msra.gmra.mxu1 %v22639_v29  ;;  %15791 = vmatprep.subr.bf16.mxu0 %v19670_v55  ;;  %v19642_v55 = vcombine.high %v14663_v19, %v14665_v39 }
 0xa2d   : > { %14489 = vmatpush1.bf16.msra.mxu1 %v21387_v8  ;;  %14520 = vmatprep.mubr.bf16.mxu1 %v22637_v37  ;;  %v14679_v37 = vld [vmem:[#allocation5 + $0x1b50] sm:$0xff]  ;;  %v21408_v8 = vld [vmem:[#allocation8 + $0x1b10] ss:$24 sps:$4 sm:$0xff]  }
 0xa2e   : > { %v22648_v30 = vpop.f32.mrf.mxu0  ;;  %14490 = vmatprep.subr.bf16.mxu1 %v21392_v26  ;;  %15742 = vmatmul.mubr.bf16.vlgmr.msra.gmra.mxu0 %v22202_v16  ;;  %v19658_v2 = vcombine.high %v14679_v37, %v14681_v60  ;;  %v19657_v35 = vcombine.low %v14679_v37, %v14681_v60  ;;  %v21413_v26 = vld [vmem:[#allocation8 + $0x1de4] ss:$24 sps:$4 sm:$0xff]  }
 0xa2f   : > { %15792 = vmatpush1.bf16.msra.mxu0 %v19669_v40  ;;  %15823 = vmatprep.mubr.bf16.mxu0 %v22207_v28  ;;  %v19641_v40 = vcombine.low %v14663_v19, %v14665_v39  ;;  %v14715_v37 = vld [vmem:[#allocation5 + $0x2210] sm:$0xff] }
 0xa30   : > { %v22652_v47 = vpop.f32.mrf.mxu0  ;;  %15793 = vmatprep.subr.bf16.mxu0 %v19666_v10  ;;  %v19702_v10 = vcombine.high %v14723_v15, %v14725_v45  ;;  %v14717_v60 = vld [vmem:[#allocation5 + $0x2270] sm:$0xff] }
 0xa31   : > { %14491 = vmatpush1.bf16.msra.mxu1 %v21390_v21  ;;  %v21411_v21 = vld [vmem:[#allocation8 + $0x1de0] ss:$24 sps:$4 sm:$0xff]   ;;  %v19693_v11 = vcombine.low %v14715_v37, %v14717_v60  ;;  %v21431_v19 = vld [vmem:[#allocation8 + $0x1cc4] ss:$24 sps:$4 sm:$0xff]  }
 0xa32   : > { %v14321_v0 = vpop.f32.mrf.mxu0  ;;  %14492 = vmatprep.subr.bf16.mxu1 %v21395_v42  ;;  %v21416_v42 = vld [vmem:[#allocation8 + $0x1db4] ss:$24 sps:$4 sm:$0xff]  }
 0xa33   : > { %15794 = vmatpush1.bf16.msra.mxu0 %v19665_v50  ;;  %v19701_v50 = vcombine.low %v14723_v15, %v14725_v45  ;;  %v21419_v0 = vld [vmem:[#allocation8 + $0x1d84] ss:$24 sps:$4 sm:$0xff]   ;;  %v21434_v15 = vld [vmem:[#allocation8 + $0x1c94] ss:$24 sps:$4 sm:$0xff]  }
 0xa34   : > { %v14322_v46 = vpop.f32.mrf.mxu0  ;;  %15795 = vmatprep.subr.bf16.mxu0 %v19662_v18  ;;  %v19698_v18 = vcombine.high %v14719_v22, %v14721_v61  ;;  %v14627_v45 = vld [vmem:[#allocation5 + $0x1190] sm:$0xff] }
 0xa35   : > { %14493 = vmatpush1.bf16.msra.mxu1 %v21393_v52  ;;  %v21414_v52 = vld [vmem:[#allocation8 + $0x1db0] ss:$24 sps:$4 sm:$0xff]   ;;  %v21417_v46 = vld [vmem:[#allocation8 + $0x1d80] ss:$24 sps:$4 sm:$0xff]  }
 0xa36   : > { %14494 = vmatprep.subr.bf16.mxu1 %v21398_v24  ;;  %v19697_v24 = vcombine.low %v14719_v22, %v14721_v61  ;;  %v14628_v22 = vld [vmem:[#allocation5 + $0x1198] sm:$0xff] }
 0xa37   : > { %15796 = vmatpush1.bf16.msra.mxu0 %v19661_v1  ;;  %v19694_v1 = vcombine.high %v14715_v37, %v14717_v60  ;;  %v14630_v61 = vld [vmem:[#allocation5 + $0x11f8] sm:$0xff] }
 0xa38   : > { %15797 = vmatprep.subr.bf16.mxu0 %v19658_v2  ;;  %v14711_v2 = vld [vmem:[#allocation5 + $0x2150] sm:$0xff]  ;;  %v19608_v37 = vcombine.high %v14628_v22, %v14630_v61 }
 0xa39   : > { %14495 = vmatpush1.bf16.msra.mxu1 %v21396_v5  ;;  %v14713_v5 = vld [vmem:[#allocation5 + $0x21b0] sm:$0xff] }
 0xa3a   : > { %14496 = vmatprep.subr.bf16.mxu1 %v21401_v62  ;;  %v19690_v62 = vcombine.high %v14711_v2, %v14713_v5  ;;  %v19689_v12 = vcombine.low %v14711_v2, %v14713_v5  ;;  %v14621_v2 = vld [vmem:[#allocation5 + $0x1070] sm:$0xff]  ;;  %v19607_v5 = vcombine.low %v14628_v22, %v14630_v61 }
 0xa3b   : > { %15798 = vmatpush1.bf16.msra.mxu0 %v19657_v35  ;;  %v21420_v35 = vld [vmem:[#allocation8 + $0x1d50] ss:$24 sps:$4 sm:$0xff]   ;;  %v14603_v61 = vld [vmem:[#allocation5 + $0xd10] sm:$0xff] }
 0xa3c   : > { %15799 = vmatprep.subr.bf16.mxu0 %v19654_v57  ;;  %v14707_v57 = vld [vmem:[#allocation5 + $0x2090] sm:$0xff] }
 0xa3d   : > { %14497 = vmatpush1.bf16.msra.mxu1 %v21399_v17  ;;  %v14709_v17 = vld [vmem:[#allocation5 + $0x20f0] sm:$0xff] }
 0xa3e   : > { %14498 = vmatprep.subr.bf16.mxu1 %v21404_v43  ;;  %v19686_v43 = vcombine.high %v14707_v57, %v14709_v17  ;;  %v19685_v32 = vcombine.low %v14707_v57, %v14709_v17 }
 0xa3f   : > { %15800 = vmatpush1.bf16.msra.mxu0 %v19653_v23  ;;  %v21423_v23 = vld [vmem:[#allocation8 + $0x1d20] ss:$24 sps:$4 sm:$0xff]  }
 0xa40   : > { %15801 = vmatprep.subr.bf16.mxu0 %v19650_v27  ;;  %v14703_v27 = vld [vmem:[#allocation5 + $0x1fd0] sm:$0xff] }
 0xa41   : > { %14499 = vmatpush1.bf16.msra.mxu1 %v21402_v56  ;;  %v14705_v56 = vld [vmem:[#allocation5 + $0x2030] sm:$0xff] }
 0xa42   : > { %14500 = vmatprep.subr.bf16.mxu1 %v21407_v48  ;;  %v19682_v48 = vcombine.high %v14703_v27, %v14705_v56  ;;  %v19681_v39 = vcombine.low %v14703_v27, %v14705_v56  ;;  %v14616_v56 = vld [vmem:[#allocation5 + $0xf58] sm:$0xff] }
 0xa43   : > { %15802 = vmatpush1.bf16.msra.mxu0 %v19649_v36  ;;  %v21426_v36 = vld [vmem:[#allocation8 + $0x1cf0] ss:$24 sps:$4 sm:$0xff]  }
 0xa44   : > { %15803 = vmatprep.subr.bf16.mxu0 %v19646_v3  ;;  %v14699_v3 = vld [vmem:[#allocation5 + $0x1f10] sm:$0xff] }
 0xa45   : > { %14501 = vmatpush1.bf16.msra.mxu1 %v21405_v38  ;;  %v14701_v38 = vld [vmem:[#allocation5 + $0x1f70] sm:$0xff] }
 0xa46   : > { %14502 = vmatprep.subr.bf16.mxu1 %v21410_v25  ;;  %v19678_v25 = vcombine.high %v14699_v3, %v14701_v38 }
 0xa47   : > { %15804 = vmatpush1.bf16.msra.mxu0 %v19645_v49  ;;  %v21429_v49 = vld [vmem:[#allocation8 + $0x1cc0] ss:$24 sps:$4 sm:$0xff]  }
 0xa48   : > { %15805 = vmatprep.subr.bf16.mxu0 %v19642_v55  ;;  %v14695_v55 = vld [vmem:[#allocation5 + $0x1e50] sm:$0xff] }
 0xa49   : > { %14503 = vmatpush1.bf16.msra.mxu1 %v21408_v8  ;;  %v14697_v8 = vld [vmem:[#allocation5 + $0x1eb0] sm:$0xff] }
 0xa4a   : > { %14504 = vmatprep.subr.bf16.mxu1 %v21413_v26  ;;  %v14629_v26 = vld [vmem:[#allocation5 + $0x11f0] sm:$0xff] }
 0xa4b   : > { %15806 = vmatpush1.bf16.msra.mxu0 %v19641_v40  ;;  %v19677_v40 = vcombine.low %v14699_v3, %v14701_v38  ;;  %v19605_v60 = vcombine.low %v14627_v45, %v14629_v26  ;;  %v14613_v3 = vld [vmem:[#allocation5 + $0xef0] sm:$0xff] }
 0xa4c   : > { %15807 = vmatprep.subr.bf16.mxu0 %v19702_v10  ;;  %v19674_v10 = vcombine.high %v14695_v55, %v14697_v8 }
 0xa4d   : > { %14505 = vmatpush2.bf16.msra.mxu1 %v21411_v21  ;;  %v21432_v21 = vld [vmem:[#allocation8 + $0x1c90] ss:$24 sps:$4 sm:$0xff]  }
 0xa4e   : > { %14506 = vmatprep.subr.bf16.mxu1 %v21416_v42  ;;  %v19606_v42 = vcombine.high %v14627_v45, %v14629_v26 }
 0xa4f   : > { %15808 = vmatpush2.bf16.msra.mxu0 %v19701_v50  ;;  %v14623_v50 = vld [vmem:[#allocation5 + $0x10d0] sm:$0xff] }
 0xa50   : > { %15809 = vmatprep.subr.bf16.mxu0 %v19698_v18  ;;  %v14625_v18 = vld [vmem:[#allocation5 + $0x1130] sm:$0xff] }
 0xa51   : > { %14507 = vmatpush2.bf16.msra.mxu1 %v21414_v52  ;;  %v19673_v52 = vcombine.low %v14695_v55, %v14697_v8  ;;  %v14607_v8 = vld [vmem:[#allocation5 + $0xdd0] sm:$0xff] }
 0xa52   : > { %14508 = vmatprep.subr.bf16.mxu1 %v21419_v0  ;;  %v14624_v0 = vld [vmem:[#allocation5 + $0x10d8] sm:$0xff] }
 0xa53   : > { %15810 = vmatpush2.bf16.msra.mxu0 %v19697_v24  ;;  %v14626_v24 = vld [vmem:[#allocation5 + $0x1138] sm:$0xff] }
 0xa54   : > { %15811 = vmatprep.subr.bf16.mxu0 %v19694_v1  ;;  %v19602_v1 = vcombine.high %v14623_v50, %v14625_v18 }
 0xa55   : > { %14509 = vmatpush2.bf16.msra.mxu1 %v21417_v46  ;;  %v14619_v46 = vld [vmem:[#allocation5 + $0x1010] sm:$0xff] }
 0xa56   : > { %14510 = vmatprep.subr.bf16.mxu1 %v21422_v6  ;;  %v19604_v6 = vcombine.high %v14624_v0, %v14626_v24  ;;  %v19598_v17 = vcombine.high %v14619_v46, %v14621_v2  ;;  %v19597_v27 = vcombine.low %v14619_v46, %v14621_v2 }
 0xa57   : > { %15812 = vmatpush2.bf16.msra.mxu0 %v19693_v11  ;;  %v19601_v11 = vcombine.low %v14623_v50, %v14625_v18 }
 0xa58   : > { %15813 = vmatprep.subr.bf16.mxu0 %v19690_v62  ;;  %v14620_v62 = vld [vmem:[#allocation5 + $0x1018] sm:$0xff] }
 0xa59   : > { %14511 = vmatpush2.bf16.msra.mxu1 %v21420_v35  ;;  %v14622_v35 = vld [vmem:[#allocation5 + $0x1078] sm:$0xff] }
 0xa5a   : > { %14512 = vmatprep.subr.bf16.mxu1 %v21425_v51  ;;  %v14615_v51 = vld [vmem:[#allocation5 + $0xf50] sm:$0xff]  ;;  %v19599_v38 = vcombine.low %v14620_v62, %v14622_v35 }
 0xa5b   : > { %15814 = vmatpush2.bf16.msra.mxu0 %v19689_v12  ;;  %v14617_v12 = vld [vmem:[#allocation5 + $0xfb0] sm:$0xff] }
 0xa5c   : > { %15815 = vmatprep.subr.bf16.mxu0 %v19686_v43  ;;  %v19603_v43 = vcombine.low %v14624_v0, %v14626_v24  ;;  %v14599_v24 = vld [vmem:[#allocation5 + $0xc50] sm:$0xff] }
 0xa5d   : > { %14513 = vmatpush2.bf16.msra.mxu1 %v21423_v23  ;;  %v19600_v23 = vcombine.high %v14620_v62, %v14622_v35  ;;  %v14659_v35 = vld [vmem:[#allocation5 + $0x1790] sm:$0xff] }
 0xa5e   : > { %14514 = vmatprep.subr.bf16.mxu1 %v21428_v41  ;;  %v14618_v41 = vld [vmem:[#allocation5 + $0xfb8] sm:$0xff] }
 0xa5f   : > { %15816 = vmatpush2.bf16.msra.mxu0 %v19685_v32  ;;  %v19595_v45 = vcombine.low %v14616_v56, %v14618_v41 }
 0xa60   : > { %15817 = vmatprep.subr.bf16.mxu0 %v19682_v48  ;;  %v19594_v48 = vcombine.high %v14615_v51, %v14617_v12 }
 0xa61   : > { %14515 = vmatpush2.bf16.msra.mxu1 %v21426_v36  ;;  %v14611_v36 = vld [vmem:[#allocation5 + $0xe90] sm:$0xff] }
 0xa62   : > { %14516 = vmatprep.subr.bf16.mxu1 %v21431_v19  ;;  %v19590_v55 = vcombine.high %v14611_v36, %v14613_v3 }
 0xa63   : > { %15818 = vmatpush2.bf16.msra.mxu0 %v19681_v39  ;;  %v19596_v39 = vcombine.high %v14616_v56, %v14618_v41  ;;  %v14655_v41 = vld [vmem:[#allocation5 + $0x16d0] sm:$0xff] }
 0xa64   : > { %15819 = vmatprep.subr.bf16.mxu0 %v19678_v25  ;;  %v14612_v25 = vld [vmem:[#allocation5 + $0xe98] sm:$0xff] }
 0xa65   : > { %14517 = vmatpush2.bf16.msra.mxu1 %v21429_v49  ;;  %v14614_v49 = vld [vmem:[#allocation5 + $0xef8] sm:$0xff] }
 0xa66   : > { %14518 = vmatprep.subr.bf16.mxu1 %v21434_v15  ;;  %v14609_v15 = vld [vmem:[#allocation5 + $0xe30] sm:$0xff]  ;;  %v19592_v26 = vcombine.high %v14612_v25, %v14614_v49  ;;  %v19591_v50 = vcombine.low %v14612_v25, %v14614_v49 }
 0xa67   : > { %15820 = vmatpush2.bf16.msra.mxu0 %v19677_v40  ;;  %v19589_v40 = vcombine.low %v14611_v36, %v14613_v3  ;;  %v19586_v22 = vcombine.high %v14607_v8, %v14609_v15  ;;  %v14653_v25 = vld [vmem:[#allocation5 + $0x1670] sm:$0xff] }
 0xa68   : > { %15821 = vmatprep.subr.bf16.mxu0 %v19674_v10  ;;  %v14608_v10 = vld [vmem:[#allocation5 + $0xdd8] sm:$0xff] }
 0xa69   : > { %14519 = vmatpush2.bf16.msra.mxu1 %v21432_v21  ;;  %v14610_v21 = vld [vmem:[#allocation5 + $0xe38] sm:$0xff] }
 0xa6a   : > { %15750 = vmatprep.subr.bf16.mxu1 %v19606_v42  ;;  %v14605_v42 = vld [vmem:[#allocation5 + $0xd70] sm:$0xff]  ;;  %v19588_v18 = vcombine.high %v14608_v10, %v14610_v21  ;;  %v19587_v46 = vcombine.low %v14608_v10, %v14610_v21 }
 0xa6b   : > { %15822 = vmatpush2.bf16.msra.mxu0 %v19673_v52  ;;  %v19585_v52 = vcombine.low %v14607_v8, %v14609_v15  ;;  %v19582_v0 = vcombine.high %v14603_v61, %v14605_v42  ;;  %v14652_v15 = vld [vmem:[#allocation5 + $0x1618] sm:$0xff]  ;;  %v14649_v10 = vld [vmem:[#allocation5 + $0x15b0] sm:$0xff] }
 0xa6c   : > { %14521 = vmatmul.mubr.bf16.vlgmr.msra.gmra.mxu1 %v22639_v29  ;;  %15873 = vmatprep.subr.bf16.mxu0 %v19608_v37  ;;  %v14604_v37 = vld [vmem:[#allocation5 + $0xd18] sm:$0xff] }
 0xa6d   : > { %15751 = vmatpush1.bf16.msra.mxu1 %v19605_v60  ;;  %15782 = vmatprep.mubr.bf16.mxu1 %v22196_v59  ;;  %v14606_v60 = vld [vmem:[#allocation5 + $0xd78] sm:$0xff] }
 0xa6e   : > { %v22656_v57 = vpop.f32.mrf.mxu0  ;;  %15752 = vmatprep.subr.bf16.mxu1 %v19602_v1  ;;  %15824 = vmatmul.mubr.bf16.vlgmr.msra.gmra.mxu0 %v22214_v33  ;;  %v14601_v1 = vld [vmem:[#allocation5 + $0xcb0] sm:$0xff]  ;;  %v19584_v2 = vcombine.high %v14604_v37, %v14606_v60 }
 0xa6f   : > { %15874 = vmatpush1.bf16.msra.mxu0 %v19607_v5  ;;  %15905 = vmatprep.mubr.bf16.mxu0 %v22196_v59  ;;  %v19593_v59 = vcombine.low %v14615_v51, %v14617_v12  ;;  %v19581_v5 = vcombine.low %v14603_v61, %v14605_v42  ;;  %v19578_v62 = vcombine.high %v14599_v24, %v14601_v1  ;;  %v14648_v42 = vld [vmem:[#allocation5 + $0x1558] sm:$0xff] }
 0xa70   : > { %v22660_v29 = vpop.f32.mrf.mxu0  ;;  %15875 = vmatprep.subr.bf16.mxu0 %v19604_v6  ;;  %v14600_v6 = vld [vmem:[#allocation5 + $0xc58] sm:$0xff]  ;;  %v19583_v51 = vcombine.low %v14604_v37, %v14606_v60  ;;  %v14645_v37 = vld [vmem:[#allocation5 + $0x14f0] sm:$0xff] }
 0xa71   : > { %15753 = vmatpush1.bf16.msra.mxu1 %v19601_v11  ;;  %v14602_v11 = vld [vmem:[#allocation5 + $0xcb8] sm:$0xff] }
 0xa72   : > { %v14403_v32 = vpop.f32.mrf.mxu0  ;;  %15754 = vmatprep.subr.bf16.mxu1 %v19598_v17  ;;  %v14661_v17 = vld [vmem:[#allocation5 + $0x17f0] sm:$0xff]  ;;  %v19580_v12 = vcombine.high %v14600_v6, %v14602_v11 }
 0xa73   : > { %15876 = vmatpush1.bf16.msra.mxu0 %v19603_v43  ;;  %v19577_v43 = vcombine.low %v14599_v24, %v14601_v1  ;;  %v19638_v56 = vcombine.high %v14659_v35, %v14661_v17  ;;  %v14657_v32 = vld [vmem:[#allocation5 + $0x1730] sm:$0xff]  ;;  %v19637_v3 = vcombine.low %v14659_v35, %v14661_v17  ;;  %v14644_v1 = vld [vmem:[#allocation5 + $0x1498] sm:$0xff] }
 0xa74   : > { %v14404_v19 = vpop.f32.mrf.mxu0  ;;  %15877 = vmatprep.subr.bf16.mxu0 %v19600_v23  ;;  %v14660_v23 = vld [vmem:[#allocation5 + $0x1798] sm:$0xff]  ;;  %v19633_v8 = vcombine.low %v14655_v41, %v14657_v32 }
 0xa75   : > { %15755 = vmatpush1.bf16.msra.mxu1 %v19597_v27  ;;  %v14662_v27 = vld [vmem:[#allocation5 + $0x17f8] sm:$0xff] }
 0xa76   : > { %15756 = vmatprep.subr.bf16.mxu1 %v19594_v48  ;;  %v19579_v48 = vcombine.low %v14600_v6, %v14602_v11  ;;  %v19640_v36 = vcombine.high %v14660_v23, %v14662_v27  ;;  %v14658_v19 = vld [vmem:[#allocation5 + $0x1738] sm:$0xff]  ;;  %v19639_v49 = vcombine.low %v14660_v23, %v14662_v27  ;;  %v14641_v6 = vld [vmem:[#allocation5 + $0x1430] sm:$0xff] }
 0xa77   : > { %15878 = vmatpush1.bf16.msra.mxu0 %v19599_v38  ;;  %v14656_v38 = vld [vmem:[#allocation5 + $0x16d8] sm:$0xff]  ;;  %v14637_v23 = vld [vmem:[#allocation5 + $0x1370] sm:$0xff] }
 0xa78   : > { %15879 = vmatprep.subr.bf16.mxu0 %v19596_v39  ;;  %v19634_v39 = vcombine.high %v14655_v41, %v14657_v32  ;;  %v19635_v21 = vcombine.low %v14656_v38, %v14658_v19  ;;  %v14640_v17 = vld [vmem:[#allocation5 + $0x13d8] sm:$0xff] }
 0xa79   : > { %15757 = vmatpush1.bf16.msra.mxu1 %v19593_v59  ;;  %v14651_v59 = vld [vmem:[#allocation5 + $0x1610] sm:$0xff]  ;;  %v14636_v32 = vld [vmem:[#allocation5 + $0x1318] sm:$0xff] }
 0xa7a   : > { %15758 = vmatprep.subr.bf16.mxu1 %v19590_v55  ;;  %v19636_v55 = vcombine.high %v14656_v38, %v14658_v19  ;;  %v19629_v61 = vcombine.low %v14651_v59, %v14653_v25  ;;  %v14633_v38 = vld [vmem:[#allocation5 + $0x12b0] sm:$0xff] }
 0xa7b   : > { %15880 = vmatpush1.bf16.msra.mxu0 %v19595_v45  ;;  %v14654_v45 = vld [vmem:[#allocation5 + $0x1678] sm:$0xff] }
 0xa7c   : > { %15881 = vmatprep.subr.bf16.mxu0 %v19592_v26  ;;  %v19630_v26 = vcombine.high %v14651_v59, %v14653_v25  ;;  %v19631_v60 = vcombine.low %v14652_v15, %v14654_v45  ;;  %v14632_v25 = vld [vmem:[#allocation5 + $0x1258] sm:$0xff] }
 0xa7d   : > { %15759 = vmatpush1.bf16.msra.mxu1 %v19589_v40  ;;  %v14647_v40 = vld [vmem:[#allocation5 + $0x1550] sm:$0xff] }
 0xa7e   : > { %15760 = vmatprep.subr.bf16.mxu1 %v19586_v22  ;;  %v19632_v22 = vcombine.high %v14652_v15, %v14654_v45  ;;  %v19625_v24 = vcombine.low %v14647_v40, %v14649_v10  ;;  %v14566_v15 = vld [vmem:[#allocation5 + $0x5f8] sm:$0xff] }
 0xa7f   : > { %15882 = vmatpush1.bf16.msra.mxu0 %v19591_v50  ;;  %v14650_v50 = vld [vmem:[#allocation5 + $0x15b8] sm:$0xff] }
 0xa80   : > { %15883 = vmatprep.subr.bf16.mxu0 %v19588_v18  ;;  %v19626_v18 = vcombine.high %v14647_v40, %v14649_v10  ;;  %v19627_v11 = vcombine.low %v14648_v42, %v14650_v50 }
 0xa81   : > { %15761 = vmatpush1.bf16.msra.mxu1 %v19585_v52  ;;  %v14643_v52 = vld [vmem:[#allocation5 + $0x1490] sm:$0xff] }
 0xa82   : > { %15762 = vmatprep.subr.bf16.mxu1 %v19582_v0  ;;  %v19628_v0 = vcombine.high %v14648_v42, %v14650_v50  ;;  %v19621_v35 = vcombine.low %v14643_v52, %v14645_v37 }
 0xa83   : > { %15884 = vmatpush1.bf16.msra.mxu0 %v19587_v46  ;;  %v14646_v46 = vld [vmem:[#allocation5 + $0x14f8] sm:$0xff] }
 0xa84   : > { %15885 = vmatprep.subr.bf16.mxu0 %v19584_v2  ;;  %v19622_v2 = vcombine.high %v14643_v52, %v14645_v37  ;;  %v19623_v27 = vcombine.low %v14644_v1, %v14646_v46  ;;  %v14558_v52 = vld [vmem:[#allocation5 + $0x478] sm:$0xff] }
 0xa85   : > { %15763 = vmatpush1.bf16.msra.mxu1 %v19581_v5  ;;  %v14639_v5 = vld [vmem:[#allocation5 + $0x13d0] sm:$0xff] }
 0xa86   : > { %15764 = vmatprep.subr.bf16.mxu1 %v19578_v62  ;;  %v19624_v62 = vcombine.high %v14644_v1, %v14646_v46  ;;  %v19617_v41 = vcombine.low %v14639_v5, %v14641_v6 }
 0xa87   : > { %15886 = vmatpush1.bf16.msra.mxu0 %v19583_v51  ;;  %v14642_v51 = vld [vmem:[#allocation5 + $0x1438] sm:$0xff] }
 0xa88   : > { %15887 = vmatprep.subr.bf16.mxu0 %v19580_v12  ;;  %v19618_v12 = vcombine.high %v14639_v5, %v14641_v6  ;;  %v19619_v19 = vcombine.low %v14640_v17, %v14642_v51  ;;  %v14552_v6 = vld [vmem:[#allocation5 + $0x358] sm:$0xff] }
 0xa89   : > { %15765 = vmatpush1.bf16.msra.mxu1 %v19577_v43  ;;  %v14635_v43 = vld [vmem:[#allocation5 + $0x1310] sm:$0xff] }
 0xa8a   : > { %15766 = vmatprep.subr.bf16.mxu1 %v19638_v56  ;;  %v19620_v56 = vcombine.high %v14640_v17, %v14642_v51  ;;  %v19613_v59 = vcombine.low %v14635_v43, %v14637_v23 }
 0xa8b   : > { %15888 = vmatpush1.bf16.msra.mxu0 %v19579_v48  ;;  %v14638_v48 = vld [vmem:[#allocation5 + $0x1378] sm:$0xff] }
 0xa8c   : > { %15889 = vmatprep.subr.bf16.mxu0 %v19640_v36  ;;  %v19614_v36 = vcombine.high %v14635_v43, %v14637_v23  ;;  %v19615_v45 = vcombine.low %v14636_v32, %v14638_v48  ;;  %v21437_v43 = vld [vmem:[#allocation8 + $0x1f54] ss:$24 sps:$4 sm:$0xff]   ;;  %v14550_v23 = vld [vmem:[#allocation5 + $0x2f8] sm:$0xff] }
 0xa8d   : > { %15767 = vmatpush2.bf16.msra.mxu1 %v19637_v3  ;;  %v14631_v3 = vld [vmem:[#allocation5 + $0x1250] sm:$0xff] }
 0xa8e   : > { %15768 = vmatprep.subr.bf16.mxu1 %v19634_v39  ;;  %v19616_v39 = vcombine.high %v14636_v32, %v14638_v48  ;;  %v19609_v40 = vcombine.low %v14631_v3, %v14633_v38  ;;  %v21443_v32 = vld [vmem:[#allocation8 + $0x1ef4] ss:$24 sps:$4 sm:$0xff]   ;;  %v14544_v48 = vld [vmem:[#allocation5 + $0x1d8] sm:$0xff] }
 0xa8f   : > { %15890 = vmatpush2.bf16.msra.mxu0 %v19639_v49  ;;  %v14634_v49 = vld [vmem:[#allocation5 + $0x12b8] sm:$0xff] }
 0xa90   : > { %15891 = vmatprep.subr.bf16.mxu0 %v19636_v55  ;;  %v19610_v55 = vcombine.high %v14631_v3, %v14633_v38  ;;  %v21441_v38 = vld [vmem:[#allocation8 + $0x1ef0] ss:$24 sps:$4 sm:$0xff]  }
 0xa91   : > { %15769 = vmatpush2.bf16.msra.mxu1 %v19633_v8  ;;  %v14564_v8 = vld [vmem:[#allocation5 + $0x598] sm:$0xff] }
 0xa92   : > { %15770 = vmatprep.subr.bf16.mxu1 %v19630_v26  ;;  %v19612_v26 = vcombine.high %v14632_v25, %v14634_v49  ;;  %v19544_v10 = vcombine.high %v14564_v8, %v14566_v15  ;;  %v19543_v42 = vcombine.low %v14564_v8, %v14566_v15  ;;  %v21449_v15 = vld [vmem:[#allocation8 + $0x1e94] ss:$24 sps:$4 sm:$0xff]  }
 0xa93   : > { %15892 = vmatpush2.bf16.msra.mxu0 %v19635_v21  ;;  %v14560_v21 = vld [vmem:[#allocation5 + $0x4d8] sm:$0xff] }
 0xa94   : > { %15893 = vmatprep.subr.bf16.mxu0 %v19632_v22  ;;  %v14562_v22 = vld [vmem:[#allocation5 + $0x538] sm:$0xff] }
 0xa95   : > { %15771 = vmatpush2.bf16.msra.mxu1 %v19629_v61  ;;  %v19611_v61 = vcombine.low %v14632_v25, %v14634_v49  ;;  %v19540_v50 = vcombine.high %v14560_v21, %v14562_v22  ;;  %v14542_v25 = vld [vmem:[#allocation5 + $0x178] sm:$0xff] }
 0xa96   : > { %15772 = vmatprep.subr.bf16.mxu1 %v19626_v18  ;;  %v14556_v18 = vld [vmem:[#allocation5 + $0x418] sm:$0xff] }
 0xa97   : > { %15894 = vmatpush2.bf16.msra.mxu0 %v19631_v60  ;;  %v19536_v46 = vcombine.high %v14556_v18, %v14558_v52 }
 0xa98   : > { %15895 = vmatprep.subr.bf16.mxu0 %v19628_v0  ;;  %v19539_v0 = vcombine.low %v14560_v21, %v14562_v22  ;;  %v21452_v22 = vld [vmem:[#allocation8 + $0x1e64] ss:$24 sps:$4 sm:$0xff]  }
 0xa99   : > { %15773 = vmatpush2.bf16.msra.mxu1 %v19625_v24 }
 0xa9a   : > { %15774 = vmatprep.subr.bf16.mxu1 %v19622_v2 }
 0xa9b   : > { %15896 = vmatpush2.bf16.msra.mxu0 %v19627_v11  ;;  %v14554_v11 = vld [vmem:[#allocation5 + $0x3b8] sm:$0xff] }
 0xa9c   : > { %15897 = vmatprep.subr.bf16.mxu0 %v19624_v62 }
 0xa9d   : > { %15775 = vmatpush2.bf16.msra.mxu1 %v19621_v35 }
 0xa9e   : > { %15776 = vmatprep.subr.bf16.mxu1 %v19618_v12  ;;  %v19532_v12 = vcombine.high %v14552_v6, %v14554_v11 }
 0xa9f   : > { %15898 = vmatpush2.bf16.msra.mxu0 %v19623_v27  ;;  %v21440_v27 = vld [vmem:[#allocation8 + $0x1f24] ss:$24 sps:$4 sm:$0xff]  }
 0xaa0   : > { %15899 = vmatprep.subr.bf16.mxu0 %v19620_v56  ;;  %v19531_v56 = vcombine.low %v14552_v6, %v14554_v11  ;;  %v21458_v6 = vld [vmem:[#allocation8 + $0x1e04] ss:$24 sps:$4 sm:$0xff]  }
 0xaa1   : > { %15777 = vmatpush2.bf16.msra.mxu1 %v19617_v41  ;;  %v21438_v41 = vld [vmem:[#allocation8 + $0x1f20] ss:$24 sps:$4 sm:$0xff]  }
 0xaa2   : > { %15778 = vmatprep.subr.bf16.mxu1 %v19614_v36  ;;  %v14546_v36 = vld [vmem:[#allocation5 + $0x238] sm:$0xff] }
 0xaa3   : > { %15900 = vmatpush2.bf16.msra.mxu0 %v19619_v19  ;;  %v19524_v19 = vcombine.high %v14544_v48, %v14546_v36  ;;  %v19523_v49 = vcombine.low %v14544_v48, %v14546_v36  ;;  %v14588_v11 = vld [vmem:[#allocation5 + $0xa18] sm:$0xff] }
 0xaa4   : > { %15901 = vmatprep.subr.bf16.mxu0 %v19616_v39  ;;  %v21446_v39 = vld [vmem:[#allocation8 + $0x1ec4] ss:$24 sps:$4 sm:$0xff]  }
 0xaa5   : > { %15779 = vmatpush2.bf16.msra.mxu1 %v19613_v59  ;;  %v14540_v59 = vld [vmem:[#allocation5 + $0x118] sm:$0xff] }
 0xaa6   : > { %15780 = vmatprep.subr.bf16.mxu1 %v19610_v55  ;;  %v21444_v55 = vld [vmem:[#allocation8 + $0x1ec0] ss:$24 sps:$4 sm:$0xff]   ;;  %v19520_v8 = vcombine.high %v14540_v59, %v14542_v25 }
 0xaa7   : > { %15902 = vmatpush2.bf16.msra.mxu0 %v19615_v45  ;;  %v14536_v45 = vld [vmem:[#allocation5 + $0x58] sm:$0xff] }
 0xaa8   : > { %15903 = vmatprep.subr.bf16.mxu0 %v19612_v26  ;;  %v14538_v26 = vld [vmem:[#allocation5 + $0xb8] sm:$0xff] }
 0xaa9   : > { %15781 = vmatpush2.bf16.msra.mxu1 %v19609_v40  ;;  %v19519_v40 = vcombine.low %v14540_v59, %v14542_v25  ;;  %v19516_v21 = vcombine.high %v14536_v45, %v14538_v26  ;;  %v14578_v48 = vld [vmem:[#allocation5 + $0x838] sm:$0xff] }
 0xaaa   : > { %15832 = vmatprep.subr.bf16.mxu1 %v19544_v10  ;;  %v21447_v10 = vld [vmem:[#allocation8 + $0x1e90] ss:$24 sps:$4 sm:$0xff]   ;;  %v14568_v25 = vld [vmem:[#allocation5 + $0x658] sm:$0xff] }
 0xaab   : > { %15904 = vmatpush2.bf16.msra.mxu0 %v19611_v61  ;;  %v14596_v61 = vld [vmem:[#allocation5 + $0xb98] sm:$0xff] }
 0xaac   : > { %15783 = vmatmul.mubr.bf16.vlgmr.msra.gmra.mxu1 %v22205_v20  ;;  %v14358_v37 = vpop.f32.mrf.mxu1  ;;  %17131 = vmatprep.subr.bf16.mxu0 %v21437_v43  ;;  %v14586_v43 = vld [vmem:[#allocation5 + $0x9b8] sm:$0xff] }
 0xaad   : > { %v14359_v60 = vadd.f32 %v14358_v37, %v22648_v30  ;;  %15833 = vmatpush1.bf16.msra.mxu1 %v19543_v42  ;;  %15864 = vmatprep.mubr.bf16.mxu1 %v22194_v58  ;;  %v19535_v58 = vcombine.low %v14556_v18, %v14558_v52  ;;  %v14598_v42 = vld [vmem:[#allocation5 + $0xbf8] sm:$0xff]  ;;  %v21455_v37 = vld [vmem:[#allocation8 + $0x1e34] ss:$24 sps:$4 sm:$0xff]  }
 0xaae   : > { %v22665_v24 = vpop.f32.mrf.mxu0  ;;  %v14360_v1 = vpop.f32.mrf.mxu1  ;;  %15834 = vmatprep.subr.bf16.mxu1 %v19540_v50  ;;  %15906 = vmatmul.mubr.bf16.vlgmr.msra.gmra.mxu0 %v22205_v20  ;;  %v21435_v20 = vld [vmem:[#allocation8 + $0x1f50] ss:$24 sps:$4 sm:$0xff]   ;;  %v19515_v50 = vcombine.low %v14536_v45, %v14538_v26  ;;  %v21450_v18 = vld [vmem:[#allocation8 + $0x1e60] ss:$24 sps:$4 sm:$0xff]   ;;  %v19576_v52 = vcombine.high %v14596_v61, %v14598_v42 }
 0xaaf   : > { %v22669_v2 = vadd.f32 %v14359_v60, %v22573_v13  ;;  %v14361_v5 = vadd.f32 %v14360_v1, %v22652_v47  ;;  %v14548_v13 = vld [vmem:[#allocation5 + $0x298] sm:$0xff]  ;;  %17132 = vmatpush1.bf16.msra.mxu0 %v21435_v20  ;;  %v19575_v1 = vcombine.low %v14596_v61, %v14598_v42 }
 0xab0   : > { %v22672_v62 = vpop.f32.mrf.mxu0  ;;  %v14362_v30 = vpop.f32.mrf.mxu1  ;;  %17133 = vmatprep.subr.bf16.mxu0 %v21440_v27  ;;  %v19527_v3 = vcombine.low %v14548_v13, %v14550_v23  ;;  %v14592_v60 = vld [vmem:[#allocation5 + $0xad8] sm:$0xff] }
 0xab1   : > { %v22675_v35 = vadd.f32 %v14361_v5, %v22579_v9  ;;  %15835 = vmatpush1.bf16.msra.mxu1 %v19539_v0  ;;  %v19528_v9 = vcombine.high %v14548_v13, %v14550_v23  ;;  %v14594_v0 = vld [vmem:[#allocation5 + $0xb38] sm:$0xff]  ;;  %v21459_v23 = vld [vmem:[#allocation8 + $0x20d0] ss:$24 sps:$4 sm:$0xff]  }
 0xab2   : > { %v14485_v17 = vpop.f32.mrf.mxu0  ;;  %v14363_v51 = vpop.f32.mrf.mxu1  ;;  %15836 = vmatprep.subr.bf16.mxu1 %v19536_v46  ;;  %v21453_v46 = vld [vmem:[#allocation8 + $0x1e30] ss:$24 sps:$4 sm:$0xff]   ;;  %v19572_v5 = vcombine.high %v14592_v60, %v14594_v0  ;;  %v14590_v30 = vld [vmem:[#allocation5 + $0xa78] sm:$0xff] }
 0xab3   : > { %17134 = vmatpush1.bf16.msra.mxu0 %v21438_v41  ;;  %v21456_v17 = vld [vmem:[#allocation8 + $0x1e00] ss:$24 sps:$4 sm:$0xff]   ;;  %v19568_v51 = vcombine.high %v14588_v11, %v14590_v30  ;;  %v19567_v13 = vcombine.low %v14588_v11, %v14590_v30 }
 0xab4   : > { %v14486_v47 = vpop.f32.mrf.mxu0  ;;  %17135 = vmatprep.subr.bf16.mxu0 %v21443_v32  ;;  %v14584_v20 = vld [vmem:[#allocation5 + $0x958] sm:$0xff] }
 0xab5   : > { %15837 = vmatpush1.bf16.msra.mxu1 %v19535_v58  ;;  %v19571_v58 = vcombine.low %v14592_v60, %v14594_v0  ;;  %v19564_v27 = vcombine.high %v14584_v20, %v14586_v43  ;;  %v14580_v47 = vld [vmem:[#allocation5 + $0x898] sm:$0xff]  ;;  %v19563_v41 = vcombine.low %v14584_v20, %v14586_v43 }
 0xab6   : > { %15838 = vmatprep.subr.bf16.mxu1 %v19532_v12  ;;  %v21461_v12 = vld [vmem:[#allocation8 + $0x20d4] ss:$24 sps:$4 sm:$0xff]   ;;  %v14576_v32 = vld [vmem:[#allocation5 + $0x7d8] sm:$0xff] }
 0xab7   : > { %17136 = vmatpush1.bf16.msra.mxu0 %v21441_v38  ;;  %v14572_v38 = vld [vmem:[#allocation5 + $0x718] sm:$0xff] }
 0xab8   : > { %17137 = vmatprep.subr.bf16.mxu0 %v21446_v39  ;;  %v19555_v39 = vcombine.low %v14576_v32, %v14578_v48  ;;  %v14694_v45 = vld [vmem:[#allocation5 + $0x1df8] sm:$0xff] }
 0xab9   : > { %15839 = vmatpush1.bf16.msra.mxu1 %v19531_v56  ;;  %v14582_v56 = vld [vmem:[#allocation5 + $0x8f8] sm:$0xff] }
 0xaba   : > { %15840 = vmatprep.subr.bf16.mxu1 %v19528_v9  ;;  %v19560_v9 = vcombine.high %v14580_v47, %v14582_v56  ;;  %v19559_v36 = vcombine.low %v14580_v47, %v14582_v56  ;;  %v14684_v42 = vld [vmem:[#allocation5 + $0x1c18] sm:$0xff] }
 0xabb   : > { %17138 = vmatpush1.bf16.msra.mxu0 %v21444_v55  ;;  %v14680_v30 = vld [vmem:[#allocation5 + $0x1b58] sm:$0xff] }
 0xabc   : > { %17139 = vmatprep.subr.bf16.mxu0 %v21449_v15  ;;  %v14692_v15 = vld [vmem:[#allocation5 + $0x1d98] sm:$0xff] }
 0xabd   : > { %15841 = vmatpush1.bf16.msra.mxu1 %v19527_v3  ;;  %v19556_v3 = vcombine.high %v14576_v32, %v14578_v48  ;;  %v21468_v47 = vld [vmem:[#allocation8 + $0x2040] ss:$24 sps:$4 sm:$0xff]   ;;  %v21473_v32 = vld [vmem:[#allocation8 + $0x2014] ss:$24 sps:$4 sm:$0xff]   ;;  %v21471_v48 = vld [vmem:[#allocation8 + $0x2010] ss:$24 sps:$4 sm:$0xff]  }
 0xabe   : > { %15842 = vmatprep.subr.bf16.mxu1 %v19524_v19  ;;  %v14574_v19 = vld [vmem:[#allocation5 + $0x778] sm:$0xff] }
 0xabf   : > { %17140 = vmatpush1.bf16.msra.mxu0 %v21447_v10  ;;  %v19552_v59 = vcombine.high %v14572_v38, %v14574_v19  ;;  %v19551_v55 = vcombine.low %v14572_v38, %v14574_v19  ;;  %v14688_v10 = vld [vmem:[#allocation5 + $0x1cd8] sm:$0xff] }
 0xac0   : > { %17141 = vmatprep.subr.bf16.mxu0 %v21452_v22  ;;  %v19671_v22 = vcombine.low %v14692_v15, %v14694_v45  ;;  %v14668_v38 = vld [vmem:[#allocation5 + $0x1918] sm:$0xff] }
 0xac1   : > { %15843 = vmatpush1.bf16.msra.mxu1 %v19523_v49  ;;  %v14570_v49 = vld [vmem:[#allocation5 + $0x6b8] sm:$0xff] }
 0xac2   : > { %15844 = vmatprep.subr.bf16.mxu1 %v19520_v8  ;;  %v19548_v8 = vcombine.high %v14568_v25, %v14570_v49  ;;  %v19547_v26 = vcombine.low %v14568_v25, %v14570_v49  ;;  %v14670_v19 = vld [vmem:[#allocation5 + $0x1978] sm:$0xff] }
 0xac3   : > { %17142 = vmatpush1.bf16.msra.mxu0 %v21450_v18  ;;  %v21464_v18 = vld [vmem:[#allocation8 + $0x20a4] ss:$24 sps:$4 sm:$0xff]   ;;  %v19648_v49 = vcombine.high %v14668_v38, %v14670_v19 }
 0xac4   : > { %17143 = vmatprep.subr.bf16.mxu0 %v21455_v37  ;;  %v21462_v37 = vld [vmem:[#allocation8 + $0x20a0] ss:$24 sps:$4 sm:$0xff]  }
 0xac5   : > { %15845 = vmatpush1.bf16.msra.mxu1 %v19519_v40  ;;  %v19672_v40 = vcombine.high %v14692_v15, %v14694_v45  ;;  %v21479_v15 = vld [vmem:[#allocation8 + $0x1fb4] ss:$24 sps:$4 sm:$0xff]   ;;  %v21477_v45 = vld [vmem:[#allocation8 + $0x1fb0] ss:$24 sps:$4 sm:$0xff]  }
 0xac6   : > { %15846 = vmatprep.subr.bf16.mxu1 %v19516_v21  ;;  %v14690_v21 = vld [vmem:[#allocation5 + $0x1d38] sm:$0xff] }
 0xac7   : > { %17144 = vmatpush1.bf16.msra.mxu0 %v21453_v46  ;;  %v19668_v61 = vcombine.high %v14688_v10, %v14690_v21  ;;  %v19667_v0 = vcombine.low %v14688_v10, %v14690_v21  ;;  %v14724_v10 = vld [vmem:[#allocation5 + $0x2398] sm:$0xff] }
 0xac8   : > { %17145 = vmatprep.subr.bf16.mxu0 %v21458_v6  ;;  %v14726_v21 = vld [vmem:[#allocation5 + $0x23f8] sm:$0xff] }
 0xac9   : > { %15847 = vmatpush1.bf16.msra.mxu1 %v19515_v50  ;;  %v14686_v50 = vld [vmem:[#allocation5 + $0x1c78] sm:$0xff] }
 0xaca   : > { %15848 = vmatprep.subr.bf16.mxu1 %v19576_v52  ;;  %v19664_v46 = vcombine.high %v14684_v42, %v14686_v50 }
 0xacb   : > { %17146 = vmatpush1.bf16.msra.mxu0 %v21456_v17 }
 0xacc   : > { %17147 = vmatprep.subr.bf16.mxu0 %v21461_v12  ;;  %v19663_v12 = vcombine.low %v14684_v42, %v14686_v50  ;;  %v19704_v50 = vcombine.high %v14724_v10, %v14726_v21 }
 0xacd   : > { %15849 = vmatpush2.bf16.msra.mxu1 %v19575_v1 }
 0xace   : > { %15850 = vmatprep.subr.bf16.mxu1 %v19572_v5 }
 0xacf   : > { %17148 = vmatpush2.bf16.msra.mxu0 %v21459_v23  ;;  %v21470_v23 = vld [vmem:[#allocation8 + $0x2044] ss:$24 sps:$4 sm:$0xff]  }
 0xad0   : > { %17149 = vmatprep.subr.bf16.mxu0 %v21464_v18  ;;  %v14720_v18 = vld [vmem:[#allocation5 + $0x22d8] sm:$0xff] }
 0xad1   : > { %15851 = vmatpush2.bf16.msra.mxu1 %v19571_v58  ;;  %v21467_v58 = vld [vmem:[#allocation8 + $0x2074] ss:$24 sps:$4 sm:$0xff]  }
 0xad2   : > { %15852 = vmatprep.subr.bf16.mxu1 %v19568_v51  ;;  %v21465_v51 = vld [vmem:[#allocation8 + $0x2070] ss:$24 sps:$4 sm:$0xff]  }
 0xad3   : > { %17150 = vmatpush2.bf16.msra.mxu0 %v21462_v37  ;;  %v21485_v37 = vld [vmem:[#allocation8 + $0x1f5c] ss:$24 sps:$4 sm:$0xff]  }
 0xad4   : > { %17151 = vmatprep.subr.bf16.mxu0 %v21467_v58  ;;  %v14714_v58 = vld [vmem:[#allocation5 + $0x21b8] sm:$0xff] }
 0xad5   : > { %15853 = vmatpush2.bf16.msra.mxu1 %v19567_v13  ;;  %v14676_v13 = vld [vmem:[#allocation5 + $0x1a98] sm:$0xff] }
 0xad6   : > { %15854 = vmatprep.subr.bf16.mxu1 %v19564_v27 }
 0xad7   : > { %17152 = vmatpush2.bf16.msra.mxu0 %v21465_v51 }
 0xad8   : > { %17153 = vmatprep.subr.bf16.mxu0 %v21470_v23 }
 0xad9   : > { %15855 = vmatpush2.bf16.msra.mxu1 %v19563_v41 }
 0xada   : > { %15856 = vmatprep.subr.bf16.mxu1 %v19560_v9  ;;  %v14674_v9 = vld [vmem:[#allocation5 + $0x1a38] sm:$0xff] }
 0xadb   : > { %17154 = vmatpush2.bf16.msra.mxu0 %v21468_v47  ;;  %v14700_v47 = vld [vmem:[#allocation5 + $0x1f18] sm:$0xff] }
 0xadc   : > { %17155 = vmatprep.subr.bf16.mxu0 %v21473_v32  ;;  %v14698_v32 = vld [vmem:[#allocation5 + $0x1eb8] sm:$0xff] }
 0xadd   : > { %15857 = vmatpush2.bf16.msra.mxu1 %v19559_v36 }
 0xade   : > { %15858 = vmatprep.subr.bf16.mxu1 %v19556_v3 }
 0xadf   : > { %17156 = vmatpush2.bf16.msra.mxu0 %v21471_v48 }
 0xae1   : > { %15859 = vmatpush2.bf16.msra.mxu1 %v19555_v39  ;;  %v21476_v39 = vld [vmem:[#allocation8 + $0x1fe4] ss:$24 sps:$4 sm:$0xff]  }
 0xae2   : > { %15860 = vmatprep.subr.bf16.mxu1 %v19552_v59  ;;  %v21474_v59 = vld [vmem:[#allocation8 + $0x1fe0] ss:$24 sps:$4 sm:$0xff]   ;;  %17157 = vmatprep.subr.bf16.mxu0 %v21476_v39 }
 0xae3   : > { %17158 = vmatpush2.bf16.msra.mxu0 %v21474_v59 }
 0xae4   : > { %17159 = vmatprep.subr.bf16.mxu0 %v21479_v15 }
 0xae5   : > { %15861 = vmatpush2.bf16.msra.mxu1 %v19551_v55  ;;  %v14664_v55 = vld [vmem:[#allocation5 + $0x1858] sm:$0xff] }
 0xae6   : > { %15862 = vmatprep.subr.bf16.mxu1 %v19548_v8  ;;  %v14666_v8 = vld [vmem:[#allocation5 + $0x18b8] sm:$0xff] }
 0xae7   : > { %17160 = vmatpush2.bf16.msra.mxu0 %v21477_v45  ;;  %v19643_v42 = vcombine.low %v14664_v55, %v14666_v8 }
 0xae9   : > { %15863 = vmatpush2.bf16.msra.mxu1 %v19547_v26  ;;  %v19647_v26 = vcombine.low %v14668_v38, %v14670_v19 }
 0xaea   : > { %15914 = vmatprep.subr.bf16.mxu1 %v19672_v40  ;;  %v19644_v40 = vcombine.high %v14664_v55, %v14666_v8 }
 0xaec   : > { %v14440_v52 = vpop.f32.mrf.mxu1  ;;  %15865 = vmatmul.mubr.bf16.vlgmr.msra.gmra.mxu1 %v22202_v16  ;;  %v14682_v16 = vld [vmem:[#allocation5 + $0x1bb8] sm:$0xff] }
 0xaed   : > { %v14441_v60 = vadd.f32 %v14440_v52, %v22656_v57  ;;  %15915 = vmatpush1.bf16.msra.mxu1 %v19671_v22  ;;  %15946 = vmatprep.mubr.bf16.mxu1 %v22207_v28  ;;  %v19659_v56 = vcombine.low %v14680_v30, %v14682_v16  ;;  %v21482_v22 = vld [vmem:[#allocation8 + $0x1f84] ss:$24 sps:$4 sm:$0xff]  }
 0xaee   : > { %v14442_v1 = vpop.f32.mrf.mxu1  ;;  %15916 = vmatprep.subr.bf16.mxu1 %v19668_v61  ;;  %v22680_v5 = vpop.f32.mrf.mxu0  ;;  %v21480_v61 = vld [vmem:[#allocation8 + $0x1f80] ss:$24 sps:$4 sm:$0xff]   ;;  %17161 = vmatprep.subr.bf16.mxu0 %v21482_v22  ;;  %v21543_v22 = vld [vmem:[#allocation8 + $0x21f0] ss:$24 sps:$4 sm:$0xff]  }
 0xaef   : > { %v22683_v6 = vadd.f32 %v14441_v60, %v22587_v53  ;;  %v14443_v11 = vadd.f32 %v14442_v1, %v22660_v29  ;;  %v19660_v53 = vcombine.high %v14680_v30, %v14682_v16  ;;  %v14678_v29 = vld [vmem:[#allocation5 + $0x1af8] sm:$0xff]  ;;  %17162 = vmatpush2.bf16.msra.mxu0 %v21480_v61  ;;  %v19703_v60 = vcombine.low %v14724_v10, %v14726_v21  ;;  %v21533_v10 = vld [vmem:[#allocation8 + $0x2254] ss:$24 sps:$4 sm:$0xff]   ;;  %v21531_v21 = vld [vmem:[#allocation8 + $0x2250] ss:$24 sps:$4 sm:$0xff]  }
 0xaf0   : > { %v14444_v57 = vpop.f32.mrf.mxu1  ;;  %v22686_v17 = vpop.f32.mrf.mxu0  ;;  %v19656_v41 = vcombine.high %v14676_v13, %v14678_v29  ;;  %v19655_v36 = vcombine.low %v14676_v13, %v14678_v29  ;;  %v14722_v52 = vld [vmem:[#allocation5 + $0x2338] sm:$0xff]  ;;  %17213 = vmatprep.subr.bf16.mxu0 %v21485_v37  ;;  %v21567_v37 = vld [vmem:[#allocation8 + $0x2130] ss:$24 sps:$4 sm:$0xff]  }
 0xaf1   : > { %v22689_v28 = vadd.f32 %v14443_v11, %v22593_v34  ;;  %15917 = vmatpush1.bf16.msra.mxu1 %v19667_v0  ;;  %v14672_v34 = vld [vmem:[#allocation5 + $0x19d8] sm:$0xff]  ;;  %v19700_v0 = vcombine.high %v14720_v18, %v14722_v52  ;;  %v19699_v11 = vcombine.low %v14720_v18, %v14722_v52  ;;  %v21569_v52 = vld [vmem:[#allocation8 + $0x2134] ss:$24 sps:$4 sm:$0xff]  }
 0xaf2   : > { %v14445_v20 = vpop.f32.mrf.mxu1  ;;  %15918 = vmatprep.subr.bf16.mxu1 %v19664_v46  ;;  %v15747_v43 = vpop.f32.mrf.mxu0  ;;  %v19652_v3 = vcombine.high %v14672_v34, %v14674_v9  ;;  %v19651_v25 = vcombine.low %v14672_v34, %v14674_v9  ;;  %v14716_v1 = vld [vmem:[#allocation5 + $0x2218] sm:$0xff] }
 0xaf3   : > { %v14718_v46 = vld [vmem:[#allocation5 + $0x2278] sm:$0xff] }
 0xaf4   : > { %v15748_v27 = vpop.f32.mrf.mxu0  ;;  %v19696_v30 = vcombine.high %v14716_v1, %v14718_v46  ;;  %v14712_v16 = vld [vmem:[#allocation5 + $0x2158] sm:$0xff]  ;;  %v19695_v57 = vcombine.low %v14716_v1, %v14718_v46 }
 0xaf5   : > { %15919 = vmatpush1.bf16.msra.mxu1 %v19663_v12  ;;  %v19692_v51 = vcombine.high %v14712_v16, %v14714_v58  ;;  %v14708_v12 = vld [vmem:[#allocation5 + $0x2098] sm:$0xff] }
 0xaf6   : > { %15920 = vmatprep.subr.bf16.mxu1 %v19660_v53  ;;  %v14710_v20 = vld [vmem:[#allocation5 + $0x20f8] sm:$0xff]  ;;  %v19691_v53 = vcombine.low %v14712_v16, %v14714_v58  ;;  %v21579_v16 = vld [vmem:[#allocation8 + $0x23d0] ss:$24 sps:$4 sm:$0xff]  }
 0xaf7   : > { %v19688_v43 = vcombine.high %v14708_v12, %v14710_v20  ;;  %v14704_v13 = vld [vmem:[#allocation5 + $0x1fd8] sm:$0xff]  ;;  %v19687_v23 = vcombine.low %v14708_v12, %v14710_v20 }
 0xaf8   : > { %v14706_v29 = vld [vmem:[#allocation5 + $0x2038] sm:$0xff] }
 0xaf9   : > { %15921 = vmatpush1.bf16.msra.mxu1 %v19659_v56  ;;  %v19684_v27 = vcombine.high %v14704_v13, %v14706_v29  ;;  %v14702_v56 = vld [vmem:[#allocation5 + $0x1f78] sm:$0xff] }
 0xafa   : > { %15922 = vmatprep.subr.bf16.mxu1 %v19656_v41  ;;  %v19683_v41 = vcombine.low %v14704_v13, %v14706_v29  ;;  %v19680_v34 = vcombine.high %v14700_v47, %v14702_v56  ;;  %v14696_v9 = vld [vmem:[#allocation5 + $0x1e58] sm:$0xff]  ;;  %v19679_v48 = vcombine.low %v14700_v47, %v14702_v56  ;;  %v21593_v29 = vld [vmem:[#allocation8 + $0x2374] ss:$24 sps:$4 sm:$0xff]   ;;  %v21591_v47 = vld [vmem:[#allocation8 + $0x2370] ss:$24 sps:$4 sm:$0xff]  }
 0xafb   : > { %v21549_v61 = vld [vmem:[#allocation8 + $0x21c0] ss:$24 sps:$4 sm:$0xff]  }
 0xafc   : > { %v21561_v18 = vld [vmem:[#allocation8 + $0x2160] ss:$24 sps:$4 sm:$0xff]  }
 0xafd   : > { %15923 = vmatpush1.bf16.msra.mxu1 %v19655_v36  ;;  %v19676_v36 = vcombine.high %v14696_v9, %v14698_v32  ;;  %v21573_v1 = vld [vmem:[#allocation8 + $0x2100] ss:$24 sps:$4 sm:$0xff]  }
 0xafe   : > { %15924 = vmatprep.subr.bf16.mxu1 %v19652_v3  ;;  %v19675_v3 = vcombine.low %v14696_v9, %v14698_v32  ;;  %v21585_v12 = vld [vmem:[#allocation8 + $0x23a0] ss:$24 sps:$4 sm:$0xff]   ;;  %v21599_v32 = vld [vmem:[#allocation8 + $0x2344] ss:$24 sps:$4 sm:$0xff]  }
 0xb01   : > { %15925 = vmatpush1.bf16.msra.mxu1 %v19651_v25 }
 0xb02   : > { %15926 = vmatprep.subr.bf16.mxu1 %v19648_v49 }
 0xb05   : > { %15927 = vmatpush1.bf16.msra.mxu1 %v19647_v26 }
 0xb06   : > { %15928 = vmatprep.subr.bf16.mxu1 %v19644_v40 }
 0xb09   : > { %15929 = vmatpush1.bf16.msra.mxu1 %v19643_v42  ;;  %v21555_v42 = vld [vmem:[#allocation8 + $0x2190] ss:$24 sps:$4 sm:$0xff]  }
 0xb0a   : > { %15930 = vmatprep.subr.bf16.mxu1 %v19704_v50  ;;  %v21563_v50 = vld [vmem:[#allocation8 + $0x2164] ss:$24 sps:$4 sm:$0xff]  }
 0xb0d   : > { %15931 = vmatpush2.bf16.msra.mxu1 %v19703_v60  ;;  %v22700_v60 = vld [vmem:[#allocation7 + $0x14] sm:$0xf] }
 0xb0e   : > { %15932 = vmatprep.subr.bf16.mxu1 %v19700_v0  ;;  %v21575_v0 = vld [vmem:[#allocation8 + $0x2104] ss:$24 sps:$4 sm:$0xff]   ;;  %v14732_v46 = vrot.slane %v22700_v60, %v22227_v54 }
 0xb10   : > { %v15744_v58 = vadd.f32 %v22680_v5, %v14732_v46  ;;  %v21497_v46 = vld [vmem:[#allocation8 + $0x1e9c] ss:$24 sps:$4 sm:$0xff]  }
 0xb11   : > { %15933 = vmatpush2.bf16.msra.mxu1 %v19699_v11  ;;  %v21581_v11 = vld [vmem:[#allocation8 + $0x23d4] ss:$24 sps:$4 sm:$0xff]  }
 0xb12   : > { %15934 = vmatprep.subr.bf16.mxu1 %v19696_v30  ;;  %v14736_v30 = vrot.slane %v22700_v60, %v22230_v63 }
 0xb15   : > { %15935 = vmatpush2.bf16.msra.mxu1 %v19695_v57  ;;  %v21587_v57 = vld [vmem:[#allocation8 + $0x23a4] ss:$24 sps:$4 sm:$0xff]  }
 0xb16   : > { %15936 = vmatprep.subr.bf16.mxu1 %v19692_v51  ;;  %v15746_v51 = vadd.f32 %v22686_v17, %v14736_v30  ;;  %v21500_v30 = vld [vmem:[#allocation8 + $0x1e6c] ss:$24 sps:$4 sm:$0xff]  }
 0xb19   : > { %15937 = vmatpush2.bf16.msra.mxu1 %v19691_v53 }
 0xb1a   : > { %15938 = vmatprep.subr.bf16.mxu1 %v19688_v43 }
 0xb1d   : > { %15939 = vmatpush2.bf16.msra.mxu1 %v19687_v23 }
 0xb1e   : > { %15940 = vmatprep.subr.bf16.mxu1 %v19684_v27 }
 0xb21   : > { %15941 = vmatpush2.bf16.msra.mxu1 %v19683_v41 }
 0xb22   : > { %15942 = vmatprep.subr.bf16.mxu1 %v19680_v34 }
 0xb25   : > { %15943 = vmatpush2.bf16.msra.mxu1 %v19679_v48 }
 0xb26   : > { %15944 = vmatprep.subr.bf16.mxu1 %v19676_v36  ;;  %v21597_v36 = vld [vmem:[#allocation8 + $0x2340] ss:$24 sps:$4 sm:$0xff]  }
 0xb29   : > { %15945 = vmatpush2.bf16.msra.mxu1 %v19675_v3 }
 0xb2a   : > { %17172 = vmatprep.subr.bf16.mxu1 %v21533_v10  ;;  %v21623_v10 = vld [vmem:[#allocation8 + $0x2284] ss:$24 sps:$4 sm:$0xff]  }
 0xb2c   : > { %v14522_v38 = vpop.f32.mrf.mxu1  ;;  %15947 = vmatmul.mubr.bf16.vlgmr.msra.gmra.mxu1 %v22214_v33  ;;  %v21539_v33 = vld [vmem:[#allocation8 + $0x2224] ss:$24 sps:$4 sm:$0xff]  }
 0xb2d   : > { %v14523_v19 = vadd.f32 %v14522_v38, %v22665_v24  ;;  %17173 = vmatpush1.bf16.msra.mxu1 %v21531_v21  ;;  %v21537_v24 = vld [vmem:[#allocation8 + $0x2220] ss:$24 sps:$4 sm:$0xff]   ;;  %v21605_v38 = vld [vmem:[#allocation8 + $0x2314] ss:$24 sps:$4 sm:$0xff]  }
 0xb2e   : > { %v14524_v39 = vpop.f32.mrf.mxu1  ;;  %v15825_v59 = vpop.f32.mrf.mxu0  ;;  %17174 = vmatprep.subr.bf16.mxu1 %v21539_v33 }
 0xb2f   : > { %v22694_v25 = vadd.f32 %v14523_v19, %v22598_v14  ;;  %v14525_v49 = vadd.f32 %v14524_v39, %v22672_v62  ;;  %v21545_v14 = vld [vmem:[#allocation8 + $0x21f4] ss:$24 sps:$4 sm:$0xff]   ;;  %v21551_v62 = vld [vmem:[#allocation8 + $0x21c4] ss:$24 sps:$4 sm:$0xff]   ;;  %v21603_v19 = vld [vmem:[#allocation8 + $0x2310] ss:$24 sps:$4 sm:$0xff]  }
 0xb30   : > { %v14526_v55 = vpop.f32.mrf.mxu1  ;;  %v15827_v8 = vpop.f32.mrf.mxu0  ;;  %v21611_v39 = vld [vmem:[#allocation8 + $0x22e4] ss:$24 sps:$4 sm:$0xff]  }
 0xb31   : > { %v22698_v15 = vadd.f32 %v14525_v49, %v22602_v31  ;;  %17175 = vmatpush1.bf16.msra.mxu1 %v21537_v24  ;;  %v21557_v31 = vld [vmem:[#allocation8 + $0x2194] ss:$24 sps:$4 sm:$0xff]   ;;  %v21615_v55 = vld [vmem:[#allocation8 + $0x22b0] ss:$24 sps:$4 sm:$0xff]   ;;  %v21621_v24 = vld [vmem:[#allocation8 + $0x2280] ss:$24 sps:$4 sm:$0xff]  }
 0xb32   : > { %v14527_v45 = vpop.f32.mrf.mxu1  ;;  %v15829_v26 = vpop.f32.mrf.mxu0  ;;  %17176 = vmatprep.subr.bf16.mxu1 %v21545_v14  ;;  %v21617_v49 = vld [vmem:[#allocation8 + $0x22b4] ss:$24 sps:$4 sm:$0xff]  }
 0xb34   : > { %v15830_v40 = vpop.f32.mrf.mxu0 }
 0xb35   : > { %17177 = vmatpush1.bf16.msra.mxu1 %v21543_v22 }
 0xb36   : > { %17178 = vmatprep.subr.bf16.mxu1 %v21551_v62  ;;  %v21629_v62 = vld [vmem:[#allocation8 + $0x225c] ss:$24 sps:$4 sm:$0xff]  }
 0xb39   : > { %17179 = vmatpush1.bf16.msra.mxu1 %v21549_v61 }
 0xb3a   : > { %17180 = vmatprep.subr.bf16.mxu1 %v21557_v31  ;;  %v21483_v31 = vld [vmem:[#allocation8 + $0x1f58] ss:$24 sps:$4 sm:$0xff]  }
 0xb3d   : > { %17181 = vmatpush1.bf16.msra.mxu1 %v21555_v42 }
 0xb3e   : > { %17182 = vmatprep.subr.bf16.mxu1 %v21563_v50  ;;  %v21488_v50 = vld [vmem:[#allocation8 + $0x1f2c] ss:$24 sps:$4 sm:$0xff]  }
 0xb41   : > { %17183 = vmatpush1.bf16.msra.mxu1 %v21561_v18  ;;  %v21486_v18 = vld [vmem:[#allocation8 + $0x1f28] ss:$24 sps:$4 sm:$0xff]  }
 0xb42   : > { %17184 = vmatprep.subr.bf16.mxu1 %v21569_v52  ;;  %v21491_v52 = vld [vmem:[#allocation8 + $0x1efc] ss:$24 sps:$4 sm:$0xff]  }
 0xb45   : > { %17185 = vmatpush1.bf16.msra.mxu1 %v21567_v37  ;;  %v21489_v37 = vld [vmem:[#allocation8 + $0x1ef8] ss:$24 sps:$4 sm:$0xff]  }
 0xb46   : > { %17186 = vmatprep.subr.bf16.mxu1 %v21575_v0  ;;  %v21494_v0 = vld [vmem:[#allocation8 + $0x1ecc] ss:$24 sps:$4 sm:$0xff]  }
 0xb49   : > { %17187 = vmatpush1.bf16.msra.mxu1 %v21573_v1  ;;  %v21492_v1 = vld [vmem:[#allocation8 + $0x1ec8] ss:$24 sps:$4 sm:$0xff]  }
 0xb4a   : > { %17188 = vmatprep.subr.bf16.mxu1 %v21581_v11  ;;  %v21495_v11 = vld [vmem:[#allocation8 + $0x1e98] ss:$24 sps:$4 sm:$0xff]  }
 0xb4d   : > { %17189 = vmatpush2.bf16.msra.mxu1 %v21579_v16  ;;  %v21498_v16 = vld [vmem:[#allocation8 + $0x1e68] ss:$24 sps:$4 sm:$0xff]  }
 0xb4e   : > { %17190 = vmatprep.subr.bf16.mxu1 %v21587_v57  ;;  %v21501_v57 = vld [vmem:[#allocation8 + $0x1e38] ss:$24 sps:$4 sm:$0xff]  }
 0xb51   : > { %17191 = vmatpush2.bf16.msra.mxu1 %v21585_v12  ;;  %v21504_v12 = vld [vmem:[#allocation8 + $0x1e08] ss:$24 sps:$4 sm:$0xff]  }
 0xb52   : > { %17192 = vmatprep.subr.bf16.mxu1 %v21593_v29  ;;  %v21510_v29 = vld [vmem:[#allocation8 + $0x20a8] ss:$24 sps:$4 sm:$0xff]  }
 0xb55   : > { %17193 = vmatpush2.bf16.msra.mxu1 %v21591_v47 }
 0xb56   : > { %17194 = vmatprep.subr.bf16.mxu1 %v21599_v32  ;;  %v21521_v32 = vld [vmem:[#allocation8 + $0x201c] ss:$24 sps:$4 sm:$0xff]  }
 0xb59   : > { %17195 = vmatpush2.bf16.msra.mxu1 %v21597_v36  ;;  %v21524_v36 = vld [vmem:[#allocation8 + $0x1fec] ss:$24 sps:$4 sm:$0xff]  }
 0xb5a   : > { %17196 = vmatprep.subr.bf16.mxu1 %v21605_v38  ;;  %v21527_v38 = vld [vmem:[#allocation8 + $0x1fbc] ss:$24 sps:$4 sm:$0xff]  }
 0xb5d   : > { %17197 = vmatpush2.bf16.msra.mxu1 %v21603_v19  ;;  %v21525_v19 = vld [vmem:[#allocation8 + $0x1fb8] ss:$24 sps:$4 sm:$0xff]  }
 0xb5e   : > { %17198 = vmatprep.subr.bf16.mxu1 %v21611_v39  ;;  %v21530_v39 = vld [vmem:[#allocation8 + $0x1f8c] ss:$24 sps:$4 sm:$0xff]  }
 0xb6c   : > { %v15784_v20 = vpop.f32.mrf.mxu1 }
 0xb6d   : > { %v15785_v53 = vadd.f32 %v15784_v20, %v15744_v58  ;;  %v21503_v58 = vld [vmem:[#allocation8 + $0x1e3c] ss:$24 sps:$4 sm:$0xff]  }
 0xb6e   : > { %v15786_v43 = vpop.f32.mrf.mxu1  ;;  %v22708_v13 = vpop.f32.mrf.mxu0  ;;  %v21509_v20 = vld [vmem:[#allocation8 + $0x20dc] ss:$24 sps:$4 sm:$0xff]  }
 0xb6f   : > { %v15787_v23 = vadd.f32 %v15786_v43, %v15746_v51  ;;  %v15826_v27 = vadd.f32 %v15825_v59, %v15785_v53  ;;  %v21609_v59 = vld [vmem:[#allocation8 + $0x22e0] ss:$24 sps:$4 sm:$0xff]   ;;  %v21506_v51 = vld [vmem:[#allocation8 + $0x1e0c] ss:$24 sps:$4 sm:$0xff]  }
 0xb70   : > { %v15788_v56 = vpop.f32.mrf.mxu1  ;;  %v22710_v41 = vpop.f32.mrf.mxu0  ;;  %17199 = vmatpush2.bf16.msra.mxu1 %v21609_v59  ;;  %v21507_v53 = vld [vmem:[#allocation8 + $0x20d8] ss:$24 sps:$4 sm:$0xff]   ;;  %v21512_v43 = vld [vmem:[#allocation8 + $0x20ac] ss:$24 sps:$4 sm:$0xff]   ;;  %v21528_v59 = vld [vmem:[#allocation8 + $0x1f88] ss:$24 sps:$4 sm:$0xff]  }
 0xb71   : > { %v15959_v5 = vmul.f32 0.70710677, %v15826_v27  ;;  %v15828_v34 = vadd.f32 %v15827_v8, %v15787_v23  ;;  %17200 = vmatprep.subr.bf16.mxu1 %v21617_v49  ;;  %v15955_v40 = vmul.f32 0.5, %v15826_v27  ;;  %v21515_v27 = vld [vmem:[#allocation8 + $0x207c] ss:$24 sps:$4 sm:$0xff]  }
 0xb72   : > { %v15789_v17 = vpop.f32.mrf.mxu1  ;;  %v15911_v9 = vpop.f32.mrf.mxu0  ;;  %v21513_v56 = vld [vmem:[#allocation8 + $0x2078] ss:$24 sps:$4 sm:$0xff]   ;;  %v21536_v49 = vld [vmem:[#allocation8 + $0x1f64] ss:$24 sps:$4 sm:$0xff]  }
 0xb73   : > { %21763 = verf.f32 %v15959_v5  ;;  %v15960_v48 = vmul.f32 0.70710677, %v15828_v34  ;;  %v15956_v21 = vmul.f32 0.5, %v15828_v34  ;;  %v21518_v34 = vld [vmem:[#allocation8 + $0x204c] ss:$24 sps:$4 sm:$0xff]  }
 0xb74   : > { %v15912_v3 = vpop.f32.mrf.mxu0  ;;  %17201 = vmatpush2.bf16.msra.mxu1 %v21615_v55  ;;  %v21516_v9 = vld [vmem:[#allocation8 + $0x2048] ss:$24 sps:$4 sm:$0xff]  }
 0xb75   : > { %21765 = verf.f32 %v15960_v48  ;;  %17202 = vmatprep.subr.bf16.mxu1 %v21623_v10  ;;  %v21519_v48 = vld [vmem:[#allocation8 + $0x2018] ss:$24 sps:$4 sm:$0xff]   ;;  %v21522_v3 = vld [vmem:[#allocation8 + $0x1fe8] ss:$24 sps:$4 sm:$0xff]   ;;  %v21554_v10 = vld [vmem:[#allocation8 + $0x1ed4] ss:$24 sps:$4 sm:$0xff]  }
 0xb76   : > { %v21534_v55 = vld [vmem:[#allocation8 + $0x1f60] ss:$24 sps:$4 sm:$0xff]  }
 0xb78   : > { %17203 = vmatpush2.bf16.msra.mxu1 %v21621_v24  ;;  %v21558_v24 = vld [vmem:[#allocation8 + $0x1ea0] ss:$24 sps:$4 sm:$0xff]  }
 0xb79   : > { %17254 = vmatprep.subr.bf16.mxu1 %v21629_v62  ;;  %v21572_v62 = vld [vmem:[#allocation8 + $0x1e44] ss:$24 sps:$4 sm:$0xff]  }
 0xb80   : > { %v21764_v8 = vpop.eup %21763 }
 0xb81   : > { %v15967_v45 = vadd.f32 1.0, %v21764_v8  ;;  %v21542_v8 = vld [vmem:[#allocation8 + $0x1f34] ss:$24 sps:$4 sm:$0xff]  }
 0xb82   : > { %v21766_v26 = vpop.eup %21765 }
 0xb83   : > { %v15968_v33 = vadd.f32 1.0, %v21766_v26  ;;  %v15971_v14 = vmul.f32 %v15967_v45, %v15955_v40  ;;  %v21540_v45 = vld [vmem:[#allocation8 + $0x1f30] ss:$24 sps:$4 sm:$0xff]   ;;  %v21548_v26 = vld [vmem:[#allocation8 + $0x1f04] ss:$24 sps:$4 sm:$0xff]  }
 0xb84   : > { %v21546_v40 = vld [vmem:[#allocation8 + $0x1f00] ss:$24 sps:$4 sm:$0xff]  }
 0xb85   : > { %v15972_v22 = vmul.f32 %v15968_v33, %v15956_v21  ;;  %v22714_v42 = vpack.c.bf16 %v15971_v14, %v15971_v14  ;;  %v21552_v21 = vld [vmem:[#allocation8 + $0x1ed0] ss:$24 sps:$4 sm:$0xff]   ;;  %v21560_v33 = vld [vmem:[#allocation8 + $0x1ea4] ss:$24 sps:$4 sm:$0xff]   ;;  %v21566_v14 = vld [vmem:[#allocation8 + $0x1e74] ss:$24 sps:$4 sm:$0xff]  }
 0xb87   : > { %v22712_v61 = vpack.c.bf16 %v15972_v22, %v15972_v22  ;;  %v21564_v22 = vld [vmem:[#allocation8 + $0x1e70] ss:$24 sps:$4 sm:$0xff]  }
 0xb89   : > { %17163 = vmatprep.mubr.bf16.mxu0 %v22712_v61 }
 0xb8a   : > { %17164 = vmatmul.mubr.bf16.vlgmr.msra.gmra.mxu0 %v22714_v42 }
 0xb8b   : > { %17214 = vmatpush1.bf16.msra.mxu0 %v21483_v31  ;;  %17245 = vmatprep.mubr.bf16.mxu0 %v22712_v61  ;;  %v21578_v31 = vld [vmem:[#allocation8 + $0x1e14] ss:$24 sps:$4 sm:$0xff]  }
 0xb8c   : > { %17215 = vmatprep.subr.bf16.mxu0 %v21488_v50  ;;  %v14740_v50 = vrot.slane %v22700_v60, %v22257_v4 }
 0xb8f   : > { %17216 = vmatpush1.bf16.msra.mxu0 %v21486_v18  ;;  %v21576_v18 = vld [vmem:[#allocation8 + $0x1e10] ss:$24 sps:$4 sm:$0xff]  }
 0xb90   : > { %17217 = vmatprep.subr.bf16.mxu0 %v21491_v52  ;;  %v21584_v52 = vld [vmem:[#allocation8 + $0x20e4] ss:$24 sps:$4 sm:$0xff]  }
 0xb93   : > { %17218 = vmatpush1.bf16.msra.mxu0 %v21489_v37  ;;  %v14744_v37 = vrot.slane %v22700_v60, %v22260_v7 }
 0xb94   : > { %17219 = vmatprep.subr.bf16.mxu0 %v21494_v0 }
 0xb97   : > { %17220 = vmatpush1.bf16.msra.mxu0 %v21492_v1  ;;  %v21582_v1 = vld [vmem:[#allocation8 + $0x20e0] ss:$24 sps:$4 sm:$0xff]  }
 0xb98   : > { %17221 = vmatprep.subr.bf16.mxu0 %v21497_v46  ;;  %v21590_v46 = vld [vmem:[#allocation8 + $0x20b4] ss:$24 sps:$4 sm:$0xff]  }
 0xb9b   : > { %17222 = vmatpush1.bf16.msra.mxu0 %v21495_v11 }
 0xb9c   : > { %17223 = vmatprep.subr.bf16.mxu0 %v21500_v30 }
 0xb9f   : > { %17224 = vmatpush1.bf16.msra.mxu0 %v21498_v16  ;;  %v21588_v16 = vld [vmem:[#allocation8 + $0x20b0] ss:$24 sps:$4 sm:$0xff]  }
 0xba0   : > { %17225 = vmatprep.subr.bf16.mxu0 %v21503_v58 }
 0xba3   : > { %17226 = vmatpush1.bf16.msra.mxu0 %v21501_v57  ;;  %v21596_v57 = vld [vmem:[#allocation8 + $0x2084] ss:$24 sps:$4 sm:$0xff]  }
 0xba4   : > { %17227 = vmatprep.subr.bf16.mxu0 %v21506_v51 }
 0xba7   : > { %17228 = vmatpush1.bf16.msra.mxu0 %v21504_v12 }
 0xba8   : > { %17229 = vmatprep.subr.bf16.mxu0 %v21509_v20 }
 0xbab   : > { %17230 = vmatpush2.bf16.msra.mxu0 %v21507_v53 }
 0xbac   : > { %v22719_v23 = vpop.f32.mrf.mxu1  ;;  %17231 = vmatprep.subr.bf16.mxu0 %v21512_v43  ;;  %v21594_v43 = vld [vmem:[#allocation8 + $0x2080] ss:$24 sps:$4 sm:$0xff]  }
 0xbad   : > { %v15867_v0 = vadd.f32 %v22719_v23, %v14740_v50  ;;  %v21602_v23 = vld [vmem:[#allocation8 + $0x2054] ss:$24 sps:$4 sm:$0xff]  }
 0xbae   : > { %v22721_v47 = vpop.f32.mrf.mxu1  ;;  %v21647_v50 = vld [vmem:[#allocation8 + $0x213c] ss:$24 sps:$4 sm:$0xff]  }
 0xbaf   : > { %17232 = vmatpush2.bf16.msra.mxu0 %v21510_v29  ;;  %v15869_v11 = vadd.f32 %v22721_v47, %v14744_v37  ;;  %v15908_v30 = vadd.f32 %v22708_v13, %v15867_v0  ;;  %v21600_v13 = vld [vmem:[#allocation8 + $0x2050] ss:$24 sps:$4 sm:$0xff]   ;;  %v21653_v37 = vld [vmem:[#allocation8 + $0x23dc] ss:$24 sps:$4 sm:$0xff]  }
 0xbb0   : > { %v15870_v5 = vpop.f32.mrf.mxu1  ;;  %17233 = vmatprep.subr.bf16.mxu0 %v21515_v27  ;;  %v21651_v0 = vld [vmem:[#allocation8 + $0x23d8] ss:$24 sps:$4 sm:$0xff]  }
 0xbb1   : > { %v15910_v51 = vadd.f32 %v22710_v41, %v15869_v11  ;;  %v21606_v5 = vld [vmem:[#allocation8 + $0x2020] ss:$24 sps:$4 sm:$0xff]   ;;  %v21614_v41 = vld [vmem:[#allocation8 + $0x1ff4] ss:$24 sps:$4 sm:$0xff]  }
 0xbb2   : > { %v15871_v17 = vpop.f32.mrf.mxu1  ;;  %v21659_v11 = vld [vmem:[#allocation8 + $0x237c] ss:$24 sps:$4 sm:$0xff]  }
 0xbb3   : > { %17234 = vmatpush2.bf16.msra.mxu0 %v21513_v56  ;;  %v21608_v56 = vld [vmem:[#allocation8 + $0x2024] ss:$24 sps:$4 sm:$0xff]  }
 0xbb4   : > { %17235 = vmatprep.subr.bf16.mxu0 %v21518_v34  ;;  %v21612_v34 = vld [vmem:[#allocation8 + $0x1ff0] ss:$24 sps:$4 sm:$0xff]   ;;  %v21620_v17 = vld [vmem:[#allocation8 + $0x1fc4] ss:$24 sps:$4 sm:$0xff]  }
 0xbb7   : > { %17236 = vmatpush2.bf16.msra.mxu0 %v21516_v9 }
 0xbb8   : > { %17237 = vmatprep.subr.bf16.mxu0 %v21521_v32 }
 0xbbb   : > { %17238 = vmatpush2.bf16.msra.mxu0 %v21519_v48  ;;  %v21618_v48 = vld [vmem:[#allocation8 + $0x1fc0] ss:$24 sps:$4 sm:$0xff]  }
 0xbbc   : > { %17239 = vmatprep.subr.bf16.mxu0 %v21524_v36 }
 0xbbf   : > { %17240 = vmatpush2.bf16.msra.mxu0 %v21522_v3 }
 0xbc0   : > { %17241 = vmatprep.subr.bf16.mxu0 %v21527_v38  ;;  %v21626_v38 = vld [vmem:[#allocation8 + $0x1f94] ss:$24 sps:$4 sm:$0xff]  }
 0xbc3   : > { %17242 = vmatpush2.bf16.msra.mxu0 %v21525_v19 }
 0xbc4   : > { %17243 = vmatprep.subr.bf16.mxu0 %v21530_v39 }
 0xbc7   : > { %17244 = vmatpush2.bf16.msra.mxu0 %v21528_v59 }
 0xbc8   : > { %17295 = vmatprep.subr.bf16.mxu0 %v21536_v49  ;;  %v21624_v49 = vld [vmem:[#allocation8 + $0x1f90] ss:$24 sps:$4 sm:$0xff]  }
 0xbca   : > { %17246 = vmatmul.mubr.bf16.vlgmr.msra.gmra.mxu0 %v22714_v42 }
 0xbcb   : > { %17296 = vmatpush1.bf16.msra.mxu0 %v21534_v55  ;;  %17327 = vmatprep.mubr.bf16.mxu0 %v22712_v61  ;;  %v21570_v61 = vld [vmem:[#allocation8 + $0x1e40] ss:$24 sps:$4 sm:$0xff]  }
 0xbcc   : > { %17297 = vmatprep.subr.bf16.mxu0 %v21542_v8 }
 0xbcf   : > { %17298 = vmatpush1.bf16.msra.mxu0 %v21540_v45  ;;  %v21627_v45 = vld [vmem:[#allocation8 + $0x2258] ss:$24 sps:$4 sm:$0xff]  }
 0xbd0   : > { %17299 = vmatprep.subr.bf16.mxu0 %v21548_v26 }
 0xbd3   : > { %17300 = vmatpush1.bf16.msra.mxu0 %v21546_v40  ;;  %v21632_v40 = vld [vmem:[#allocation8 + $0x222c] ss:$24 sps:$4 sm:$0xff]  }
 0xbd4   : > { %17301 = vmatprep.subr.bf16.mxu0 %v21554_v10  ;;  %v21630_v10 = vld [vmem:[#allocation8 + $0x2228] ss:$24 sps:$4 sm:$0xff]  }
 0xbd7   : > { %17302 = vmatpush1.bf16.msra.mxu0 %v21552_v21  ;;  %v21635_v21 = vld [vmem:[#allocation8 + $0x21fc] ss:$24 sps:$4 sm:$0xff]  }
 0xbd8   : > { %17303 = vmatprep.subr.bf16.mxu0 %v21560_v33  ;;  %v21633_v33 = vld [vmem:[#allocation8 + $0x21f8] ss:$24 sps:$4 sm:$0xff]  }
 0xbdb   : > { %17304 = vmatpush1.bf16.msra.mxu0 %v21558_v24  ;;  %v21638_v24 = vld [vmem:[#allocation8 + $0x21cc] ss:$24 sps:$4 sm:$0xff]  }
 0xbdc   : > { %17305 = vmatprep.subr.bf16.mxu0 %v21566_v14  ;;  %v21636_v14 = vld [vmem:[#allocation8 + $0x21c8] ss:$24 sps:$4 sm:$0xff]  }
 0xbdf   : > { %17306 = vmatpush1.bf16.msra.mxu0 %v21564_v22  ;;  %v21641_v22 = vld [vmem:[#allocation8 + $0x219c] ss:$24 sps:$4 sm:$0xff]  }
 0xbe0   : > { %17307 = vmatprep.subr.bf16.mxu0 %v21572_v62  ;;  %v21639_v62 = vld [vmem:[#allocation8 + $0x2198] ss:$24 sps:$4 sm:$0xff]  }
 0xbe3   : > { %17308 = vmatpush1.bf16.msra.mxu0 %v21570_v61  ;;  %v21644_v61 = vld [vmem:[#allocation8 + $0x216c] ss:$24 sps:$4 sm:$0xff]  }
 0xbe4   : > { %17309 = vmatprep.subr.bf16.mxu0 %v21578_v31  ;;  %v21642_v31 = vld [vmem:[#allocation8 + $0x2168] ss:$24 sps:$4 sm:$0xff]  }
 0xbe7   : > { %17310 = vmatpush1.bf16.msra.mxu0 %v21576_v18  ;;  %v21650_v18 = vld [vmem:[#allocation8 + $0x210c] ss:$24 sps:$4 sm:$0xff]  }
 0xbe8   : > { %17311 = vmatprep.subr.bf16.mxu0 %v21584_v52  ;;  %v21648_v52 = vld [vmem:[#allocation8 + $0x2108] ss:$24 sps:$4 sm:$0xff]  }
 0xbeb   : > { %17312 = vmatpush2.bf16.msra.mxu0 %v21582_v1  ;;  %v21656_v1 = vld [vmem:[#allocation8 + $0x23ac] ss:$24 sps:$4 sm:$0xff]  }
 0xbec   : > { %v15948_v58 = vpop.f32.mrf.mxu1  ;;  %17313 = vmatprep.subr.bf16.mxu0 %v21590_v46  ;;  %v21654_v46 = vld [vmem:[#allocation8 + $0x23a8] ss:$24 sps:$4 sm:$0xff]  }
 0xbed   : > { %v15949_v12 = vadd.f32 %v15948_v58, %v15908_v30  ;;  %v21657_v30 = vld [vmem:[#allocation8 + $0x2378] ss:$24 sps:$4 sm:$0xff]   ;;  %v21660_v58 = vld [vmem:[#allocation8 + $0x2348] ss:$24 sps:$4 sm:$0xff]  }
 0xbee   : > { %v15950_v20 = vpop.f32.mrf.mxu1 }
 0xbef   : > { %v15961_v60 = vmul.f32 0.70710677, %v15949_v12  ;;  %v15951_v53 = vadd.f32 %v15950_v20, %v15910_v51  ;;  %17314 = vmatpush2.bf16.msra.mxu0 %v21588_v16  ;;  %v15957_v3 = vmul.f32 0.5, %v15949_v12  ;;  %v21662_v16 = vld [vmem:[#allocation8 + $0x234c] ss:$24 sps:$4 sm:$0xff]  }
 0xbf0   : > { %v15952_v29 = vpop.f32.mrf.mxu1  ;;  %17315 = vmatprep.subr.bf16.mxu0 %v21596_v57  ;;  %v21665_v57 = vld [vmem:[#allocation8 + $0x231c] ss:$24 sps:$4 sm:$0xff]   ;;  %v21663_v51 = vld [vmem:[#allocation8 + $0x2318] ss:$24 sps:$4 sm:$0xff]   ;;  %v21668_v12 = vld [vmem:[#allocation8 + $0x22ec] ss:$24 sps:$4 sm:$0xff]  }
 0xbf1   : > { %21767 = verf.f32 %v15961_v60  ;;  %v15962_v27 = vmul.f32 0.70710677, %v15951_v53  ;;  %v15958_v19 = vmul.f32 0.5, %v15951_v53  ;;  %v21666_v20 = vld [vmem:[#allocation8 + $0x22e8] ss:$24 sps:$4 sm:$0xff]  }
 0xbf2   : > { %v15953_v47 = vpop.f32.mrf.mxu1  ;;  %v21671_v60 = vld [vmem:[#allocation8 + $0x22bc] ss:$24 sps:$4 sm:$0xff]   ;;  %v21669_v53 = vld [vmem:[#allocation8 + $0x22b8] ss:$24 sps:$4 sm:$0xff]   ;;  %v21672_v29 = vld [vmem:[#allocation8 + $0x2288] ss:$24 sps:$4 sm:$0xff]  }
 0xbf3   : > { %21769 = verf.f32 %v15962_v27  ;;  %17316 = vmatpush2.bf16.msra.mxu0 %v21594_v43  ;;  %v21674_v43 = vld [vmem:[#allocation8 + $0x228c] ss:$24 sps:$4 sm:$0xff]   ;;  %v21675_v27 = vld [vmem:[#allocation8 + $0x2260] ss:$24 sps:$4 sm:$0xff]  }
 0xbf4   : > { %17317 = vmatprep.subr.bf16.mxu0 %v21602_v23  ;;  %v21677_v23 = vld [vmem:[#allocation8 + $0x2264] ss:$24 sps:$4 sm:$0xff]   ;;  %v21680_v47 = vld [vmem:[#allocation8 + $0x2234] ss:$24 sps:$4 sm:$0xff]  }
 0xbf7   : > { %17318 = vmatpush2.bf16.msra.mxu0 %v21600_v13  ;;  %v21678_v13 = vld [vmem:[#allocation8 + $0x2230] ss:$24 sps:$4 sm:$0xff]  }
 0xbf8   : > { %17319 = vmatprep.subr.bf16.mxu0 %v21608_v56 }
 0xbfb   : > { %17320 = vmatpush2.bf16.msra.mxu0 %v21606_v5  ;;  %v21683_v5 = vld [vmem:[#allocation8 + $0x2204] ss:$24 sps:$4 sm:$0xff]  }
 0xbfc   : > { %17321 = vmatprep.subr.bf16.mxu0 %v21614_v41 }
 0xbfe   : > { %v21768_v9 = vpop.eup %21767 }
 0xbff   : > { %v15969_v32 = vadd.f32 1.0, %v21768_v9  ;;  %17322 = vmatpush2.bf16.msra.mxu0 %v21612_v34  ;;  %v21681_v34 = vld [vmem:[#allocation8 + $0x2200] ss:$24 sps:$4 sm:$0xff]   ;;  %v21686_v9 = vld [vmem:[#allocation8 + $0x21d4] ss:$24 sps:$4 sm:$0xff]  }
 0xc00   : > { %v21770_v36 = vpop.eup %21769  ;;  %17323 = vmatprep.subr.bf16.mxu0 %v21620_v17 }
 0xc01   : > { %v15970_v39 = vadd.f32 1.0, %v21770_v36  ;;  %v15973_v59 = vmul.f32 %v15969_v32, %v15957_v3  ;;  %v21689_v36 = vld [vmem:[#allocation8 + $0x21a4] ss:$24 sps:$4 sm:$0xff]   ;;  %v21687_v3 = vld [vmem:[#allocation8 + $0x21a0] ss:$24 sps:$4 sm:$0xff]  }
 0xc03   : > { %17324 = vmatpush2.bf16.msra.mxu0 %v21618_v48  ;;  %v15974_v55 = vmul.f32 %v15970_v39, %v15958_v19  ;;  %v22735_v26 = vpack.c.bf16 %v15973_v59, %v15973_v59  ;;  %v21684_v48 = vld [vmem:[#allocation8 + $0x21d0] ss:$24 sps:$4 sm:$0xff]   ;;  %v21695_v39 = vld [vmem:[#allocation8 + $0x2144] ss:$24 sps:$4 sm:$0xff]   ;;  %v21693_v59 = vld [vmem:[#allocation8 + $0x2140] ss:$24 sps:$4 sm:$0xff]  }
 0xc04   : > { %17325 = vmatprep.subr.bf16.mxu0 %v21626_v38  ;;  %v21692_v38 = vld [vmem:[#allocation8 + $0x2174] ss:$24 sps:$4 sm:$0xff]   ;;  %v21690_v19 = vld [vmem:[#allocation8 + $0x2170] ss:$24 sps:$4 sm:$0xff]  }
 0xc05   : > { %v22733_v8 = vpack.c.bf16 %v15974_v55, %v15974_v55  ;;  %v21696_v55 = vld [vmem:[#allocation8 + $0x2110] ss:$24 sps:$4 sm:$0xff]  }
 0xc07   : > { %17326 = vmatpush2.bf16.msra.mxu0 %v21624_v49  ;;  %17204 = vmatprep.mubr.bf16.mxu1 %v22733_v8  ;;  %v21698_v49 = vld [vmem:[#allocation8 + $0x2114] ss:$24 sps:$4 sm:$0xff]  }
 0xc08   : > { %17205 = vmatmul.mubr.bf16.vlgmr.msra.gmra.mxu1 %v22735_v26 }
 0xc09   : > { %17255 = vmatpush1.bf16.msra.mxu1 %v21627_v45  ;;  %17286 = vmatprep.mubr.bf16.mxu1 %v22733_v8  ;;  %v21699_v45 = vld [vmem:[#allocation8 + $0x23e0] ss:$24 sps:$4 sm:$0xff]  }
 0xc0a   : > { %17328 = vmatmul.mubr.bf16.vlgmr.msra.gmra.mxu0 %v22714_v42  ;;  %17256 = vmatprep.subr.bf16.mxu1 %v21632_v40  ;;  %v21645_v42 = vld [vmem:[#allocation8 + $0x2138] ss:$24 sps:$4 sm:$0xff]   ;;  %v21704_v40 = vld [vmem:[#allocation8 + $0x23b4] ss:$24 sps:$4 sm:$0xff]  }
 0xc0d   : > { %17257 = vmatpush1.bf16.msra.mxu1 %v21630_v10  ;;  %v21702_v10 = vld [vmem:[#allocation8 + $0x23b0] ss:$24 sps:$4 sm:$0xff]  }
 0xc0e   : > { %17258 = vmatprep.subr.bf16.mxu1 %v21635_v21  ;;  %v21707_v21 = vld [vmem:[#allocation8 + $0x2384] ss:$24 sps:$4 sm:$0xff]  }
 0xc11   : > { %17259 = vmatpush1.bf16.msra.mxu1 %v21633_v33  ;;  %v21705_v33 = vld [vmem:[#allocation8 + $0x2380] ss:$24 sps:$4 sm:$0xff]  }
 0xc12   : > { %17260 = vmatprep.subr.bf16.mxu1 %v21638_v24  ;;  %v21710_v24 = vld [vmem:[#allocation8 + $0x2354] ss:$24 sps:$4 sm:$0xff]  }
 0xc15   : > { %17261 = vmatpush1.bf16.msra.mxu1 %v21636_v14  ;;  %v21708_v14 = vld [vmem:[#allocation8 + $0x2350] ss:$24 sps:$4 sm:$0xff]  }
 0xc16   : > { %17262 = vmatprep.subr.bf16.mxu1 %v21641_v22  ;;  %v21713_v22 = vld [vmem:[#allocation8 + $0x2324] ss:$24 sps:$4 sm:$0xff]  }
 0xc19   : > { %17263 = vmatpush1.bf16.msra.mxu1 %v21639_v62  ;;  %v21711_v62 = vld [vmem:[#allocation8 + $0x2320] ss:$24 sps:$4 sm:$0xff]  }
 0xc1a   : > { %17264 = vmatprep.subr.bf16.mxu1 %v21644_v61  ;;  %v21716_v61 = vld [vmem:[#allocation8 + $0x22f4] ss:$24 sps:$4 sm:$0xff]  }
 0xc1d   : > { %17265 = vmatpush1.bf16.msra.mxu1 %v21642_v31  ;;  %v21714_v31 = vld [vmem:[#allocation8 + $0x22f0] ss:$24 sps:$4 sm:$0xff]  }
 0xc1e   : > { %17266 = vmatprep.subr.bf16.mxu1 %v21647_v50  ;;  %v21719_v50 = vld [vmem:[#allocation8 + $0x22c4] ss:$24 sps:$4 sm:$0xff]  }
 0xc21   : > { %17267 = vmatpush1.bf16.msra.mxu1 %v21645_v42  ;;  %v21717_v42 = vld [vmem:[#allocation8 + $0x22c0] ss:$24 sps:$4 sm:$0xff]  }
 0xc22   : > { %17268 = vmatprep.subr.bf16.mxu1 %v21650_v18  ;;  %v21722_v18 = vld [vmem:[#allocation8 + $0x2294] ss:$24 sps:$4 sm:$0xff]  }
 0xc25   : > { %17269 = vmatpush1.bf16.msra.mxu1 %v21648_v52  ;;  %v21720_v52 = vld [vmem:[#allocation8 + $0x2290] ss:$24 sps:$4 sm:$0xff]  }
 0xc26   : > { %17270 = vmatprep.subr.bf16.mxu1 %v21653_v37 }
 0xc29   : > { %17271 = vmatpush2.bf16.msra.mxu1 %v21651_v0 }
 0xc2a   : > { %17272 = vmatprep.subr.bf16.mxu1 %v21656_v1 }
 0xc2d   : > { %17273 = vmatpush2.bf16.msra.mxu1 %v21654_v46 }
 0xc2e   : > { %17274 = vmatprep.subr.bf16.mxu1 %v21659_v11  ;;  %v22748_v11 = vld [vmem:[#allocation10] sm:$0x3f] }
 0xc31   : > { %17275 = vmatpush2.bf16.msra.mxu1 %v21657_v30 }
 0xc32   : > { %17276 = vmatprep.subr.bf16.mxu1 %v21662_v16 }
 0xc35   : > { %17277 = vmatpush2.bf16.msra.mxu1 %v21660_v58  ;;  %v17388_v58 = vrot.slane %v22748_v11, %v22227_v54 }
 0xc36   : > { %17278 = vmatprep.subr.bf16.mxu1 %v21665_v57 }
 0xc39   : > { %17279 = vmatpush2.bf16.msra.mxu1 %v21663_v51 }
 0xc3a   : > { %17280 = vmatprep.subr.bf16.mxu1 %v21668_v12 }
 0xc3d   : > { %17281 = vmatpush2.bf16.msra.mxu1 %v21666_v20 }
 0xc3e   : > { %17282 = vmatprep.subr.bf16.mxu1 %v21671_v60 }
 0xc41   : > { %17283 = vmatpush2.bf16.msra.mxu1 %v21669_v53 }
 0xc42   : > { %17284 = vmatprep.subr.bf16.mxu1 %v21674_v43 }
 0xc45   : > { %17285 = vmatpush2.bf16.msra.mxu1 %v21672_v29 }
 0xc46   : > { %17336 = vmatprep.subr.bf16.mxu1 %v21677_v23 }
 0xc48   : > { %17287 = vmatmul.mubr.bf16.vlgmr.msra.gmra.mxu1 %v22735_v26 }
 0xc49   : > { %17337 = vmatpush1.bf16.msra.mxu1 %v21675_v27  ;;  %17368 = vmatprep.mubr.bf16.mxu1 %v22733_v8  ;;  %v21701_v8 = vld [vmem:[#allocation8 + $0x23e4] ss:$24 sps:$4 sm:$0xff]  }
 0xc4a   : > { %v22743_v56 = vpop.f32.mrf.mxu0  ;;  %17338 = vmatprep.subr.bf16.mxu1 %v21680_v47 }
 0xc4c   : > { %v22745_v41 = vpop.f32.mrf.mxu0 }
 0xc4d   : > { %17339 = vmatpush1.bf16.msra.mxu1 %v21678_v13 }
 0xc4e   : > { %v17169_v17 = vpop.f32.mrf.mxu0  ;;  %17340 = vmatprep.subr.bf16.mxu1 %v21683_v5 }
 0xc50   : > { %v17170_v32 = vpop.f32.mrf.mxu0 }
 0xc51   : > { %17341 = vmatpush1.bf16.msra.mxu1 %v21681_v34 }
 0xc52   : > { %17342 = vmatprep.subr.bf16.mxu1 %v21686_v9 }
 0xc55   : > { %17343 = vmatpush1.bf16.msra.mxu1 %v21684_v48 }
 0xc56   : > { %17344 = vmatprep.subr.bf16.mxu1 %v21689_v36  ;;  %v17396_v36 = vrot.slane %v22748_v11, %v22257_v4 }
 0xc59   : > { %17345 = vmatpush1.bf16.msra.mxu1 %v21687_v3 }
 0xc5a   : > { %17346 = vmatprep.subr.bf16.mxu1 %v21692_v38 }
 0xc5d   : > { %17347 = vmatpush1.bf16.msra.mxu1 %v21690_v19 }
 0xc5e   : > { %17348 = vmatprep.subr.bf16.mxu1 %v21695_v39  ;;  %v17400_v39 = vrot.slane %v22748_v11, %v22260_v7 }
 0xc61   : > { %17349 = vmatpush1.bf16.msra.mxu1 %v21693_v59 }
 0xc62   : > { %17350 = vmatprep.subr.bf16.mxu1 %v21698_v49 }
 0xc65   : > { %17351 = vmatpush1.bf16.msra.mxu1 %v21696_v55 }
 0xc66   : > { %17352 = vmatprep.subr.bf16.mxu1 %v21701_v8 }
 0xc69   : > { %17353 = vmatpush2.bf16.msra.mxu1 %v21699_v45 }
 0xc6a   : > { %17354 = vmatprep.subr.bf16.mxu1 %v21704_v40 }
 0xc6d   : > { %17355 = vmatpush2.bf16.msra.mxu1 %v21702_v10 }
 0xc6e   : > { %17356 = vmatprep.subr.bf16.mxu1 %v21707_v21 }
 0xc71   : > { %17357 = vmatpush2.bf16.msra.mxu1 %v21705_v33 }
 0xc72   : > { %17358 = vmatprep.subr.bf16.mxu1 %v21710_v24 }
 0xc75   : > { %17359 = vmatpush2.bf16.msra.mxu1 %v21708_v14 }
 0xc76   : > { %17360 = vmatprep.subr.bf16.mxu1 %v21713_v22 }
 0xc79   : > { %17361 = vmatpush2.bf16.msra.mxu1 %v21711_v62  ;;  %v17403_v62 = vsub.s32 4, %v22224_v44 }
 0xc7a   : > { %17362 = vmatprep.subr.bf16.mxu1 %v21716_v61 }
 0xc7d   : > { %17363 = vmatpush2.bf16.msra.mxu1 %v21714_v31 }
 0xc7e   : > { %17364 = vmatprep.subr.bf16.mxu1 %v21719_v50  ;;  %v17404_v50 = vrot.slane %v22748_v11, %v17403_v62 }
 0xc81   : > { %17365 = vmatpush2.bf16.msra.mxu1 %v21717_v42 }
 0xc82   : > { %17366 = vmatprep.subr.bf16.mxu1 %v21722_v18 }
 0xc85   : > { %17367 = vmatpush2.bf16.msra.mxu1 %v21720_v52 }
 0xc88   : > { %17369 = vmatmul.mubr.bf16.vlgmr.msra.gmra.mxu1 %v22735_v26  ;;  %v17392_v26 = vrot.slane %v22748_v11, %v22230_v63 }
 0xc8a   : > { %v17247_v37 = vpop.f32.mrf.mxu0 }
 0xc8c   : > { %v17249_v0 = vpop.f32.mrf.mxu0 }
 0xc8e   : > { %v17251_v1 = vpop.f32.mrf.mxu0 }
 0xc90   : > { %v17252_v46 = vpop.f32.mrf.mxu0 }
 0xcc8   : > { %v17206_v30 = vpop.f32.mrf.mxu1 }
 0xcc9   : > { %v17207_v16 = vadd.f32 %v17206_v30, %v22743_v56 }
 0xcca   : > { %v17329_v57 = vpop.f32.mrf.mxu0  ;;  %v17208_v51 = vpop.f32.mrf.mxu1 }
 0xccb   : > { %v17377_v12 = vadd.f32 %v17207_v16, %v22669_v2  ;;  %v17209_v20 = vadd.f32 %v17208_v51, %v22745_v41 }
 0xccc   : > { %v17331_v60 = vpop.f32.mrf.mxu0  ;;  %v17210_v53 = vpop.f32.mrf.mxu1 }
 0xccd   : > { %v17415_v43 = vadd.f32 %v17388_v58, %v17377_v12  ;;  %v17378_v29 = vadd.f32 %v17209_v20, %v22675_v35 }
 0xcce   : > { %v17333_v23 = vpop.f32.mrf.mxu0  ;;  %v17211_v27 = vpop.f32.mrf.mxu1 }
 0xccf   : > { %v17427_v47 = vmul.f32 0.70710677, %v17415_v43  ;;  %v17416_v13 = vadd.f32 %v17392_v26, %v17378_v29  ;;  %v17421_v5 = vmul.f32 0.5, %v17415_v43 }
 0xcd0   : > { %v17334_v54 = vpop.f32.mrf.mxu0 }
 0xcd1   : > { %21771 = verf.f32 %v17427_v47  ;;  %v17428_v56 = vmul.f32 0.70710677, %v17416_v13  ;;  %v17422_v63 = vmul.f32 0.5, %v17416_v13 }
 0xcd3   : > { %21773 = verf.f32 %v17428_v56 }
 0xcde   : > { %v21772_v2 = vpop.eup %21771 }
 0xcdf   : > { %v17439_v41 = vadd.f32 1.0, %v21772_v2 }
 0xce0   : > { %v21774_v34 = vpop.eup %21773 }
 0xce1   : > { %v17445_v17 = vmul.f32 %v17439_v41, %v17421_v5  ;;  %v17440_v9 = vadd.f32 1.0, %v21774_v34 }
 0xce3   : > { %17451 = vst [vmem:[%s22760_s25] sm:$0xff] %v17445_v17  ;;  %v17446_v35 = vmul.f32 %v17440_v9, %v17422_v63 }
 0xce5   : > { %17452 = vst [vmem:[%s22760_s25 + $0x8] sm:$0xff] %v17446_v35 }
 0xd08   : > { %v17288_v32 = vpop.f32.mrf.mxu1 }
 0xd09   : > { %v17289_v48 = vadd.f32 %v17288_v32, %v17247_v37 }
 0xd0a   : > { %v17290_v3 = vpop.f32.mrf.mxu1 }
 0xd0b   : > { %v17379_v38 = vadd.f32 %v17289_v48, %v22683_v6  ;;  %v17291_v19 = vadd.f32 %v17290_v3, %v17249_v0 }
 0xd0c   : > { %v17292_v59 = vpop.f32.mrf.mxu1 }
 0xd0d   : > { %v17417_v49 = vadd.f32 %v17396_v36, %v17379_v38  ;;  %v17380_v55 = vadd.f32 %v17291_v19, %v22689_v28  ;;  %v17407_v28 = vsub.s32 5, %v22224_v44 }
 0xd0e   : > { %v17293_v8 = vpop.f32.mrf.mxu1 }
 0xd0f   : > { %v17429_v45 = vmul.f32 0.70710677, %v17417_v49  ;;  %v17418_v40 = vadd.f32 %v17400_v39, %v17380_v55  ;;  %v17423_v21 = vmul.f32 0.5, %v17417_v49  ;;  %v17408_v37 = vrot.slane %v22748_v11, %v17407_v28 }
 0xd11   : > { %21775 = verf.f32 %v17429_v45  ;;  %v17430_v10 = vmul.f32 0.70710677, %v17418_v40  ;;  %v17424_v14 = vmul.f32 0.5, %v17418_v40 }
 0xd13   : > { %21777 = verf.f32 %v17430_v10 }
 0xd1e   : > { %v21776_v4 = vpop.eup %21775 }
 0xd1f   : > { %v17441_v33 = vadd.f32 1.0, %v21776_v4 }
 0xd20   : > { %v21778_v6 = vpop.eup %21777 }
 0xd21   : > { %v17447_v24 = vmul.f32 %v17441_v33, %v17423_v21  ;;  %v17442_v22 = vadd.f32 1.0, %v21778_v6 }
 0xd23   : > { %17453 = vst [vmem:[%s22760_s25 + $0x10] sm:$0xff] %v17447_v24  ;;  %v17448_v7 = vmul.f32 %v17442_v22, %v17424_v14 }
 0xd25   : > { %17454 = vst [vmem:[%s22760_s25 + $0x18] sm:$0xff] %v17448_v7 }
 0xd48   : > { %v17370_v61 = vpop.f32.mrf.mxu1 }
 0xd49   : > { %v17371_v31 = vadd.f32 %v17370_v61, %v17329_v57 }
 0xd4a   : > { %v17372_v42 = vpop.f32.mrf.mxu1 }
 0xd4b   : > { %v17381_v18 = vadd.f32 %v17371_v31, %v22694_v25  ;;  %v17373_v52 = vadd.f32 %v17372_v42, %v17331_v60 }
 0xd4c   : > { %v17374_v0 = vpop.f32.mrf.mxu1 }
 0xd4d   : > { %v17419_v1 = vadd.f32 %v17404_v50, %v17381_v18  ;;  %v17382_v46 = vadd.f32 %v17373_v52, %v22698_v15 }
 0xd4e   : > { %v17375_v30 = vpop.f32.mrf.mxu1 }
 0xd4f   : > { %v17431_v16 = vmul.f32 0.70710677, %v17419_v1  ;;  %v17420_v44 = vadd.f32 %v17408_v37, %v17382_v46  ;;  %v17425_v51 = vmul.f32 0.5, %v17419_v1 }
 0xd51   : > { %21779 = verf.f32 %v17431_v16  ;;  %v17432_v58 = vmul.f32 0.70710677, %v17420_v44  ;;  %v17426_v20 = vmul.f32 0.5, %v17420_v44 }
 0xd53   : > { %21781 = verf.f32 %v17432_v58 }
 0xd5e   : > { %v21780_v57 = vpop.eup %21779 }
 0xd5f   : > { %v17443_v25 = vadd.f32 1.0, %v21780_v57 }
 0xd60   : > { %v21782_v12 = vpop.eup %21781 }
 0xd61   : > { %v17449_v11 = vmul.f32 %v17443_v25, %v17425_v51  ;;  %v17444_v26 = vadd.f32 1.0, %v21782_v12 }
 0xd63   : > { %17455 = vst [vmem:[%s22760_s25 + $0x20] sm:$0xff] %v17449_v11  ;;  %v17450_v15 = vmul.f32 %v17444_v26, %v17426_v20 }
 0xd65   : > { %17456 = vst [vmem:[%s22760_s25 + $0x28] sm:$0xff] %v17450_v15 }
 0xd66   : > { %21929 = shalt.err (!%p21926_p11)
}
 0xd67   : > { %s21930_s22 = scalar_lea.hbm %s17470_s29, 768  ;;  %s21934_s30 = scalar_lea.hbm %s22821_s5, 1536 }
 0xd68   : > { %p21931_p12 = scmp.ne.s32.totalorder %s17470_s29, %s21930_s22  ;;  %p21935_p4 = scmp.lt.s32.totalorder %s17470_s29, %s22821_s5 }
 0xd69   : > { %p21936_p13 = scmp.lt.s32.totalorder %s21934_s30, %s21930_s22 }
 0xd6a   : > { %p21932_p1 = pnand %p21931_p12, %p22838_p7 }
 0xd6b   : > { %p21937_p2 = por %p21936_p13, %p21935_p4 }
 0xd6c   : > { %p21933_p3 = pneg %p21932_p1 }
 0xd6e   : > { %p21938_p8 = pnand %p21937_p2, %p21933_p3 }
 0xd70   : > { %21941 = shalt.err (!%p21938_p8)
}
 0xd71   : > { %19922 = dma.vmem_to_hbm [thread:$0]  (%p22838_p7), %s17473_s16, 768, %s17470_s29, %s17458_s17  }
 0xd72 PF: > { %s17484_s25 = sand.u32 1, %s21976_s18   ;;  %p22839_p10 = scmp.ne.s32.totalorder %s22830_s13, 0 }
 0xd73   : > { %p22840_p6 = scmp.ge.s32.totalorder %s21988_s21, 2  ;;  %s17485_s10 = scalar_lea.sflag [#allocation4], %s17484_s25 }
 0xd75   : > { %p19942_p0 = pnand %p22840_p6, %p22839_p10 }
 0xd77   : > { %p19943_p5 = pneg %p19942_p0 }
 0xd79   : > { %21971 = dma.done.wait (%p19943_p5), %s17485_s10, 768  }
 0xd7a   : > { %21973 = vsyncadd (%p19943_p5), %s17485_s10, 4294966528  ;;  %p20_p9 = scmp.ge.s32.totalorder %s22115_s28, 4   ;;  %s22841_s18 = smov %s21980_s19 }
 0xd7b   : > { %s22842_s19 = smov %s21984_s20  ;;  %s22843_s20 = smov %s22126_s9 }
 0xd7c   : > { %s22844_s21 = smov %s22115_s28  ;;  %22 = sbr.rel (!%p20_p9) target bundleno = 7 (0x7), region = 101 }
 0xd81   :  { %17490 = vsyncpa [#allocation3], 1 }
 0xd82   :  { %17492 = vsyncpa [#allocation3 + $0x1], 1 }
 0xd83   :  { %17493 = vsyncpa [#allocation6], 1 }
 0xd84   :  { %17494 = vsyncpa [#allocation9], 1 }
 0xd85   :  { %17495 = vsyncpa [#allocation4], 1 }
 0xd86   :  { %17497 = vsyncpa [#allocation4 + $0x1], 1 }

</bundles_post_ra>
